<compile_context>
chip_gen: v6e
topology: v6e:2x2x1
jax: 0.10.0
libtpu: 0.0.40
codegen_flags: <defaults>
</compile_context>

<pallas_src>
import jax
import jax.numpy as jnp
from jax import lax
from jax.experimental import pallas as pl
from jax.experimental.pallas import tpu as pltpu

LANE = 128


def _bidir_lstm_kernel(emb_ref, wih_ref, wrec_ref, b_ref,   # inputs
                       out_ref,                              # output (T, 2*Hp)
                       xg_ref, h_ref, c_ref):                # scratch
    T = emb_ref.shape[0]
    Hp = h_ref.shape[1] // 2          # padded hidden dim (multiple of 128)
    G4 = 4 * Hp

    # Fused input projection for BOTH directions and ALL timesteps: one MXU GEMM.
    xg_ref[...] = (jnp.dot(emb_ref[...], wih_ref[...],
                           preferred_element_type=jnp.float32) + b_ref[...])

    # Zero initial hidden / cell states (PyTorch default h0 = c0 = 0).
    h_ref[...] = jnp.zeros_like(h_ref)
    c_ref[...] = jnp.zeros_like(c_ref)

    def step(t, carry):
        tb = T - 1 - t

        # Single fused recurrent matmul for both directions: (1,2Hp) @ (2Hp,8Hp) -> (1,8Hp).
        rec = jnp.dot(h_ref[...], wrec_ref[...], preferred_element_type=jnp.float32)

        gf = xg_ref[pl.ds(t, 1), 0:G4] + rec[:, 0:G4]          # forward gates, time t
        gb = xg_ref[pl.ds(tb, 1), G4:2 * G4] + rec[:, G4:2 * G4]  # backward gates, time T-1-t
        c = c_ref[...]

        # ---- forward direction (lane-dense Hp-wide slices) ----
        i_f = jax.nn.sigmoid(gf[:, 0:Hp])
        f_f = jax.nn.sigmoid(gf[:, Hp:2 * Hp])
        g_f = jnp.tanh(gf[:, 2 * Hp:3 * Hp])
        o_f = jax.nn.sigmoid(gf[:, 3 * Hp:4 * Hp])
        c_f = f_f * c[:, 0:Hp] + i_f * g_f
        h_f = o_f * jnp.tanh(c_f)

        # ---- backward direction ----
        i_b = jax.nn.sigmoid(gb[:, 0:Hp])
        f_b = jax.nn.sigmoid(gb[:, Hp:2 * Hp])
        g_b = jnp.tanh(gb[:, 2 * Hp:3 * Hp])
        o_b = jax.nn.sigmoid(gb[:, 3 * Hp:4 * Hp])
        c_b = f_b * c[:, Hp:2 * Hp] + i_b * g_b
        h_b = o_b * jnp.tanh(c_b)

        # Update fused state (lane-aligned 128-wide stores at offsets 0 / Hp).
        h_ref[:, 0:Hp] = h_f
        h_ref[:, Hp:2 * Hp] = h_b
        c_ref[:, 0:Hp] = c_f
        c_ref[:, Hp:2 * Hp] = c_b

        # Lane-dense output rows (full 128-lane width per direction).
        out_ref[pl.ds(t, 1), 0:Hp] = h_f
        out_ref[pl.ds(tb, 1), Hp:2 * Hp] = h_b
        return carry

    # T is static and small: fully unroll so the LLO scheduler can interleave
    # fwd/bwd EUP (sigmoid/tanh) work with the next step's MXU push.
    lax.fori_loop(0, T, step, 0, unroll=True)


def encoder_rnn_forward(sentence, params):
    """Equivalent of EncoderRNN.forward: returns (T, 1, 2*hidden_dim) float32."""
    embeds = params["embedding"][sentence].astype(jnp.float32)   # (T, E) gather glue
    T, E = embeds.shape
    H = params["w_hh_f"].shape[1]                                # w_hh: (4H, H)
    Hp = ((H + LANE - 1) // LANE) * LANE                         # pad hidden to lane width

    def pad_gate_cols(w_t):      # (X, 4H) -> (X, 4Hp): each H gate chunk -> start of Hp chunk
        X = w_t.shape[0]
        w = w_t.reshape(X, 4, H)
        w = jnp.pad(w, ((0, 0), (0, 0), (0, Hp - H)))
        return w.reshape(X, 4 * Hp)

    def pad_gate_bias(b):        # (4H,) -> (4Hp,)
        b = b.reshape(4, H)
        b = jnp.pad(b, ((0, 0), (0, Hp - H)))
        return b.reshape(4 * Hp)

    f32 = jnp.float32
    # Fused input-projection weights / bias: [forward 4Hp | backward 4Hp].
    wihf = pad_gate_cols(params["w_ih_f"].T.astype(f32))         # (E, 4Hp)
    wihb = pad_gate_cols(params["w_ih_b"].T.astype(f32))
    wih_cat = jnp.concatenate([wihf, wihb], axis=1)              # (E, 8Hp)
    bf = pad_gate_bias((params["b_ih_f"] + params["b_hh_f"]).astype(f32))
    bb = pad_gate_bias((params["b_ih_b"] + params["b_hh_b"]).astype(f32))
    b_cat = jnp.concatenate([bf, bb])[None, :]                   # (1, 8Hp)

    # Block-diagonal recurrent weight: rows 0:Hp drive forward gates, rows Hp:2Hp drive backward.
    whhf = pad_gate_cols(params["w_hh_f"].T.astype(f32))         # (H, 4Hp)
    whhb = pad_gate_cols(params["w_hh_b"].T.astype(f32))
    wrec = jnp.zeros((2 * Hp, 8 * Hp), f32)
    wrec = wrec.at[0:H, 0:4 * Hp].set(whhf)
    wrec = wrec.at[Hp:Hp + H, 4 * Hp:8 * Hp].set(whhb)

    out = pl.pallas_call(
        _bidir_lstm_kernel,
        out_shape=jax.ShapeDtypeStruct((T, 2 * Hp), jnp.float32),
        grid=(1,),
        in_specs=[
            pl.BlockSpec((T, E), lambda i: (0, 0)),
            pl.BlockSpec((E, 8 * Hp), lambda i: (0, 0)),
            pl.BlockSpec((2 * Hp, 8 * Hp), lambda i: (0, 0)),
            pl.BlockSpec((1, 8 * Hp), lambda i: (0, 0)),
        ],
        out_specs=pl.BlockSpec((T, 2 * Hp), lambda i: (0, 0)),
        scratch_shapes=[
            pltpu.VMEM((T, 8 * Hp), jnp.float32),   # fused input gates, both directions
            pltpu.VMEM((1, 2 * Hp), jnp.float32),   # h = [h_f | h_b]
            pltpu.VMEM((1, 2 * Hp), jnp.float32),   # c = [c_f | c_b]
        ],
        compiler_params=pltpu.CompilerParams(dimension_semantics=("arbitrary",)),
    )(embeds, wih_cat, wrec, b_cat)

    # Strip lane padding: forward half at cols [0:H], backward half at cols [Hp:Hp+H].
    lstm_out = jnp.concatenate([out[:, 0:H], out[:, Hp:Hp + H]], axis=1)
    return lstm_out.reshape(T, 1, 2 * H)


def _reference_forward(sentence, params):
    """Pure-JAX reference (mirrors torch.nn.LSTM bidirectional, batch=1)."""
    emb = params["embedding"][sentence].astype(jnp.float32)      # (T, E)
    H = params["w_hh_f"].shape[1]

    def run_dir(xs, w_ih, w_hh, b_ih, b_hh):
        def cell(carry, x):
            h, c = carry
            g = x @ w_ih.T + b_ih + h @ w_hh.T + b_hh
            i = jax.nn.sigmoid(g[0:H])
            f = jax.nn.sigmoid(g[H:2 * H])
            gg = jnp.tanh(g[2 * H:3 * H])
            o = jax.nn.sigmoid(g[3 * H:4 * H])
            c = f * c + i * gg
            h = o * jnp.tanh(c)
            return (h, c), h
        (_, _), hs = lax.scan(cell, (jnp.zeros(H), jnp.zeros(H)), xs)
        return hs

    h_fwd = run_dir(emb, params["w_ih_f"], params["w_hh_f"],
                    params["b_ih_f"], params["b_hh_f"])
    h_bwd = run_dir(emb[::-1], params["w_ih_b"], params["w_hh_b"],
                    params["b_ih_b"], params["b_hh_b"])[::-1]
    return jnp.concatenate([h_fwd, h_bwd], axis=-1)[:, None, :]


def init_params(key, vocab_size, embedding_dim, hidden_dim):
    H, E, V = hidden_dim, embedding_dim, vocab_size
    k = 1.0 / jnp.sqrt(jnp.float32(H))
    keys = jax.random.split(key, 9)
    u = lambda kk, shape: jax.random.uniform(kk, shape, jnp.float32, -k, k)
    return {
        "embedding": jax.random.normal(keys[0], (V, E), jnp.float32),
        "w_ih_f": u(keys[1], (4 * H, E)),
        "w_hh_f": u(keys[2], (4 * H, H)),
        "b_ih_f": u(keys[3], (4 * H,)),
        "b_hh_f": u(keys[4], (4 * H,)),
        "w_ih_b": u(keys[5], (4 * H, E)),
        "w_hh_b": u(keys[6], (4 * H, H)),
        "b_ih_b": u(keys[7], (4 * H,)),
        "b_hh_b": u(keys[8], (4 * H,)),
    }


if __name__ == "__main__":
    VOCAB, EMB, HID, SEQ = 20, 16, 32, 8

    key = jax.random.PRNGKey(0)
    k_params, k_sent = jax.random.split(key)
    params = init_params(k_params, VOCAB, EMB, HID)
    sentence = jax.random.randint(k_sent, (SEQ,), 0, VOCAB, dtype=jnp.int32)

    lstm_out = encoder_rnn_forward(sentence, params)
    lstm_out = jax.block_until_ready(lstm_out)

    assert lstm_out.shape == (SEQ, 1, 2 * HID), lstm_out.shape

    ref = _reference_forward(sentence, params)
    assert jnp.allclose(lstm_out, ref, atol=2e-3, rtol=2e-3), "mismatch vs reference"

    print("KERNEL_OK")
</pallas_src>

<mosaic_0001>
module attributes {stable_mosaic.version = 11 : i64} {
  func.func @_bidir_lstm_kernel(%arg0: i32, %arg1: memref<8x16xf32, #tpu.memory_space<vmem>>, %arg2: memref<16x1024xf32, #tpu.memory_space<vmem>>, %arg3: memref<256x1024xf32, #tpu.memory_space<vmem>>, %arg4: memref<1x1024xf32, #tpu.memory_space<vmem>>, %arg5: memref<8x256xf32, #tpu.memory_space<vmem>>, %arg6: memref<8x1024xf32, #tpu.memory_space<vmem>>, %arg7: memref<1x256xf32, #tpu.memory_space<vmem>>, %arg8: memref<1x256xf32, #tpu.memory_space<vmem>>) attributes {dimension_semantics = [#tpu.dimension_semantics<arbitrary>], iteration_bounds = array<i64: 1>, scalar_prefetch = 0 : i64, scratch_operands = 3 : i64, tpu.core_type = #tpu.core_type<tc>, window_params = [{pipeline_mode = #tpu.pipeline_mode<synchronous>, transform_indices = @transform_0, window_bounds = array<i64: 8, 16>}, {pipeline_mode = #tpu.pipeline_mode<synchronous>, transform_indices = @transform_1, window_bounds = array<i64: 16, 1024>}, {pipeline_mode = #tpu.pipeline_mode<synchronous>, transform_indices = @transform_2, window_bounds = array<i64: 256, 1024>}, {pipeline_mode = #tpu.pipeline_mode<synchronous>, transform_indices = @transform_3, window_bounds = array<i64: 1, 1024>}, {pipeline_mode = #tpu.pipeline_mode<synchronous>, transform_indices = @transform_4, window_bounds = array<i64: 8, 256>}]} {
    %c0 = arith.constant 0 : index
    %c0_0 = arith.constant 0 : index
    %0 = vector.load %arg1[%c0, %c0_0] : memref<8x16xf32, #tpu.memory_space<vmem>>, vector<8x16xf32>
    %c0_1 = arith.constant 0 : index
    %c0_2 = arith.constant 0 : index
    %1 = vector.load %arg2[%c0_1, %c0_2] : memref<16x1024xf32, #tpu.memory_space<vmem>>, vector<16x1024xf32>
    %cst = arith.constant dense<0.000000e+00> : vector<8x1024xf32>
    %2 = tpu.matmul %0, %1, %cst {dimension_numbers = #tpu.dot_dimension_numbers<[1], [0], [0], [1], [0, 0, 1, 1], [], []>} : vector<8x16xf32>, vector<16x1024xf32>, vector<8x1024xf32> -> vector<8x1024xf32>
    %c0_3 = arith.constant 0 : index
    %c0_4 = arith.constant 0 : index
    %3 = vector.load %arg4[%c0_3, %c0_4] : memref<1x1024xf32, #tpu.memory_space<vmem>>, vector<1x1024xf32>
    %4 = vector.broadcast %3 : vector<1x1024xf32> to vector<8x1024xf32>
    %5 = arith.addf %2, %4 : vector<8x1024xf32>
    %c0_5 = arith.constant 0 : index
    %c0_6 = arith.constant 0 : index
    %6 = vector.load %arg6[%c0_5, %c0_6] : memref<8x1024xf32, #tpu.memory_space<vmem>>, vector<8x1024xf32>
    tpu.vector_store %arg6[%c0_5, %c0_6], %5 {strides = array<i32>} : memref<8x1024xf32, #tpu.memory_space<vmem>>, vector<8x1024xf32>,
    %cst_7 = arith.constant 0.000000e+00 : f32
    %7 = vector.broadcast %cst_7 : f32 to vector<1x256xf32>
    %c0_8 = arith.constant 0 : index
    %c0_9 = arith.constant 0 : index
    %8 = vector.load %arg7[%c0_8, %c0_9] : memref<1x256xf32, #tpu.memory_space<vmem>>, vector<1x256xf32>
    tpu.vector_store %arg7[%c0_8, %c0_9], %7 {strides = array<i32>} : memref<1x256xf32, #tpu.memory_space<vmem>>, vector<1x256xf32>,
    %cst_10 = arith.constant 0.000000e+00 : f32
    %9 = vector.broadcast %cst_10 : f32 to vector<1x256xf32>
    %c0_11 = arith.constant 0 : index
    %c0_12 = arith.constant 0 : index
    %10 = vector.load %arg8[%c0_11, %c0_12] : memref<1x256xf32, #tpu.memory_space<vmem>>, vector<1x256xf32>
    tpu.vector_store %arg8[%c0_11, %c0_12], %9 {strides = array<i32>} : memref<1x256xf32, #tpu.memory_space<vmem>>, vector<1x256xf32>,
    %c0_i32 = arith.constant 0 : i32
    %c7_i32 = arith.constant 7 : i32
    %11 = arith.subi %c7_i32, %c0_i32 : i32
    %c0_13 = arith.constant 0 : index
    %c0_14 = arith.constant 0 : index
    %12 = vector.load %arg7[%c0_13, %c0_14] : memref<1x256xf32, #tpu.memory_space<vmem>>, vector<1x256xf32>
    %c0_15 = arith.constant 0 : index
    %c0_16 = arith.constant 0 : index
    %13 = vector.load %arg3[%c0_15, %c0_16] : memref<256x1024xf32, #tpu.memory_space<vmem>>, vector<256x1024xf32>
    %cst_17 = arith.constant dense<0.000000e+00> : vector<1x1024xf32>
    %14 = tpu.matmul %12, %13, %cst_17 {dimension_numbers = #tpu.dot_dimension_numbers<[1], [0], [0], [1], [0, 0, 1, 1], [], []>} : vector<1x256xf32>, vector<256x1024xf32>, vector<1x1024xf32> -> vector<1x1024xf32>
    %15 = arith.index_cast %c0_i32 : i32 to index
    %c0_18 = arith.constant 0 : index
    %16 = vector.load %arg6[%15, %c0_18] : memref<8x1024xf32, #tpu.memory_space<vmem>>, vector<1x512xf32>
    %17 = vector.extract_strided_slice %14 {offsets = [0, 0], sizes = [1, 512], strides = [1, 1]} : vector<1x1024xf32> to vector<1x512xf32>
    %18 = arith.addf %16, %17 : vector<1x512xf32>
    %19 = arith.index_cast %11 : i32 to index
    %c512 = arith.constant 512 : index
    %20 = vector.load %arg6[%19, %c512] : memref<8x1024xf32, #tpu.memory_space<vmem>>, vector<1x512xf32>
    %21 = vector.extract_strided_slice %14 {offsets = [0, 512], sizes = [1, 512], strides = [1, 1]} : vector<1x1024xf32> to vector<1x512xf32>
    %22 = arith.addf %20, %21 : vector<1x512xf32>
    %c0_19 = arith.constant 0 : index
    %c0_20 = arith.constant 0 : index
    %23 = vector.load %arg8[%c0_19, %c0_20] : memref<1x256xf32, #tpu.memory_space<vmem>>, vector<1x256xf32>
    %24 = vector.extract_strided_slice %18 {offsets = [0, 0], sizes = [1, 128], strides = [1, 1]} : vector<1x512xf32> to vector<1x128xf32>
    %25 = arith.negf %24 : vector<1x128xf32>
    %26 = math.exp %25 : vector<1x128xf32>
    %cst_21 = arith.constant 1.000000e+00 : f32
    %27 = vector.broadcast %cst_21 : f32 to vector<1x128xf32>
    %28 = arith.addf %27, %26 : vector<1x128xf32>
    %29 = arith.divf %27, %28 : vector<1x128xf32>
    %30 = vector.extract_strided_slice %18 {offsets = [0, 128], sizes = [1, 128], strides = [1, 1]} : vector<1x512xf32> to vector<1x128xf32>
    %31 = arith.negf %30 : vector<1x128xf32>
    %32 = math.exp %31 : vector<1x128xf32>
    %cst_22 = arith.constant 1.000000e+00 : f32
    %33 = vector.broadcast %cst_22 : f32 to vector<1x128xf32>
    %34 = arith.addf %33, %32 : vector<1x128xf32>
    %35 = arith.divf %33, %34 : vector<1x128xf32>
    %36 = vector.extract_strided_slice %18 {offsets = [0, 256], sizes = [1, 128], strides = [1, 1]} : vector<1x512xf32> to vector<1x128xf32>
    %37 = math.tanh %36 : vector<1x128xf32>
    %38 = vector.extract_strided_slice %18 {offsets = [0, 384], sizes = [1, 128], strides = [1, 1]} : vector<1x512xf32> to vector<1x128xf32>
    %39 = arith.negf %38 : vector<1x128xf32>
    %40 = math.exp %39 : vector<1x128xf32>
    %cst_23 = arith.constant 1.000000e+00 : f32
    %41 = vector.broadcast %cst_23 : f32 to vector<1x128xf32>
    %42 = arith.addf %41, %40 : vector<1x128xf32>
    %43 = arith.divf %41, %42 : vector<1x128xf32>
    %44 = vector.extract_strided_slice %23 {offsets = [0, 0], sizes = [1, 128], strides = [1, 1]} : vector<1x256xf32> to vector<1x128xf32>
    %45 = arith.mulf %35, %44 : vector<1x128xf32>
    %46 = arith.mulf %29, %37 : vector<1x128xf32>
    %47 = arith.addf %45, %46 : vector<1x128xf32>
    %48 = math.tanh %47 : vector<1x128xf32>
    %49 = arith.mulf %43, %48 : vector<1x128xf32>
    %50 = vector.extract_strided_slice %22 {offsets = [0, 0], sizes = [1, 128], strides = [1, 1]} : vector<1x512xf32> to vector<1x128xf32>
    %51 = arith.negf %50 : vector<1x128xf32>
    %52 = math.exp %51 : vector<1x128xf32>
    %cst_24 = arith.constant 1.000000e+00 : f32
    %53 = vector.broadcast %cst_24 : f32 to vector<1x128xf32>
    %54 = arith.addf %53, %52 : vector<1x128xf32>
    %55 = arith.divf %53, %54 : vector<1x128xf32>
    %56 = vector.extract_strided_slice %22 {offsets = [0, 128], sizes = [1, 128], strides = [1, 1]} : vector<1x512xf32> to vector<1x128xf32>
    %57 = arith.negf %56 : vector<1x128xf32>
    %58 = math.exp %57 : vector<1x128xf32>
    %cst_25 = arith.constant 1.000000e+00 : f32
    %59 = vector.broadcast %cst_25 : f32 to vector<1x128xf32>
    %60 = arith.addf %59, %58 : vector<1x128xf32>
    %61 = arith.divf %59, %60 : vector<1x128xf32>
    %62 = vector.extract_strided_slice %22 {offsets = [0, 256], sizes = [1, 128], strides = [1, 1]} : vector<1x512xf32> to vector<1x128xf32>
    %63 = math.tanh %62 : vector<1x128xf32>
    %64 = vector.extract_strided_slice %22 {offsets = [0, 384], sizes = [1, 128], strides = [1, 1]} : vector<1x512xf32> to vector<1x128xf32>
    %65 = arith.negf %64 : vector<1x128xf32>
    %66 = math.exp %65 : vector<1x128xf32>
    %cst_26 = arith.constant 1.000000e+00 : f32
    %67 = vector.broadcast %cst_26 : f32 to vector<1x128xf32>
    %68 = arith.addf %67, %66 : vector<1x128xf32>
    %69 = arith.divf %67, %68 : vector<1x128xf32>
    %70 = vector.extract_strided_slice %23 {offsets = [0, 128], sizes = [1, 128], strides = [1, 1]} : vector<1x256xf32> to vector<1x128xf32>
    %71 = arith.mulf %61, %70 : vector<1x128xf32>
    %72 = arith.mulf %55, %63 : vector<1x128xf32>
    %73 = arith.addf %71, %72 : vector<1x128xf32>
    %74 = math.tanh %73 : vector<1x128xf32>
    %75 = arith.mulf %69, %74 : vector<1x128xf32>
    %c0_27 = arith.constant 0 : index
    %c0_28 = arith.constant 0 : index
    %76 = vector.load %arg7[%c0_27, %c0_28] : memref<1x256xf32, #tpu.memory_space<vmem>>, vector<1x128xf32>
    tpu.vector_store %arg7[%c0_27, %c0_28], %49 {strides = array<i32>} : memref<1x256xf32, #tpu.memory_space<vmem>>, vector<1x128xf32>,
    %c0_29 = arith.constant 0 : index
    %c128 = arith.constant 128 : index
    %77 = vector.load %arg7[%c0_29, %c128] : memref<1x256xf32, #tpu.memory_space<vmem>>, vector<1x128xf32>
    tpu.vector_store %arg7[%c0_29, %c128], %75 {strides = array<i32>} : memref<1x256xf32, #tpu.memory_space<vmem>>, vector<1x128xf32>,
    %c0_30 = arith.constant 0 : index
    %c0_31 = arith.constant 0 : index
    %78 = vector.load %arg8[%c0_30, %c0_31] : memref<1x256xf32, #tpu.memory_space<vmem>>, vector<1x128xf32>
    tpu.vector_store %arg8[%c0_30, %c0_31], %47 {strides = array<i32>} : memref<1x256xf32, #tpu.memory_space<vmem>>, vector<1x128xf32>,
    %c0_32 = arith.constant 0 : index
    %c128_33 = arith.constant 128 : index
    %79 = vector.load %arg8[%c0_32, %c128_33] : memref<1x256xf32, #tpu.memory_space<vmem>>, vector<1x128xf32>
    tpu.vector_store %arg8[%c0_32, %c128_33], %73 {strides = array<i32>} : memref<1x256xf32, #tpu.memory_space<vmem>>, vector<1x128xf32>,
    %80 = arith.index_cast %c0_i32 : i32 to index
    %c0_34 = arith.constant 0 : index
    %81 = vector.load %arg5[%80, %c0_34] : memref<8x256xf32, #tpu.memory_space<vmem>>, vector<1x128xf32>
    tpu.vector_store %arg5[%80, %c0_34], %49 {strides = array<i32>} : memref<8x256xf32, #tpu.memory_space<vmem>>, vector<1x128xf32>,
    %82 = arith.index_cast %11 : i32 to index
    %c128_35 = arith.constant 128 : index
    %83 = vector.load %arg5[%82, %c128_35] : memref<8x256xf32, #tpu.memory_space<vmem>>, vector<1x128xf32>
    tpu.vector_store %arg5[%82, %c128_35], %75 {strides = array<i32>} : memref<8x256xf32, #tpu.memory_space<vmem>>, vector<1x128xf32>,
    %c1_i32 = arith.constant 1 : i32
    %c7_i32_36 = arith.constant 7 : i32
    %84 = arith.subi %c7_i32_36, %c1_i32 : i32
    %c0_37 = arith.constant 0 : index
    %c0_38 = arith.constant 0 : index
    %85 = vector.load %arg7[%c0_37, %c0_38] : memref<1x256xf32, #tpu.memory_space<vmem>>, vector<1x256xf32>
    %c0_39 = arith.constant 0 : index
    %c0_40 = arith.constant 0 : index
    %86 = vector.load %arg3[%c0_39, %c0_40] : memref<256x1024xf32, #tpu.memory_space<vmem>>, vector<256x1024xf32>
    %cst_41 = arith.constant dense<0.000000e+00> : vector<1x1024xf32>
    %87 = tpu.matmul %85, %86, %cst_41 {dimension_numbers = #tpu.dot_dimension_numbers<[1], [0], [0], [1], [0, 0, 1, 1], [], []>} : vector<1x256xf32>, vector<256x1024xf32>, vector<1x1024xf32> -> vector<1x1024xf32>
    %88 = arith.index_cast %c1_i32 : i32 to index
    %c0_42 = arith.constant 0 : index
    %89 = vector.load %arg6[%88, %c0_42] : memref<8x1024xf32, #tpu.memory_space<vmem>>, vector<1x512xf32>
    %90 = vector.extract_strided_slice %87 {offsets = [0, 0], sizes = [1, 512], strides = [1, 1]} : vector<1x1024xf32> to vector<1x512xf32>
    %91 = arith.addf %89, %90 : vector<1x512xf32>
    %92 = arith.index_cast %84 : i32 to index
    %c512_43 = arith.constant 512 : index
    %93 = vector.load %arg6[%92, %c512_43] : memref<8x1024xf32, #tpu.memory_space<vmem>>, vector<1x512xf32>
    %94 = vector.extract_strided_slice %87 {offsets = [0, 512], sizes = [1, 512], strides = [1, 1]} : vector<1x1024xf32> to vector<1x512xf32>
    %95 = arith.addf %93, %94 : vector<1x512xf32>
    %c0_44 = arith.constant 0 : index
    %c0_45 = arith.constant 0 : index
    %96 = vector.load %arg8[%c0_44, %c0_45] : memref<1x256xf32, #tpu.memory_space<vmem>>, vector<1x256xf32>
    %97 = vector.extract_strided_slice %91 {offsets = [0, 0], sizes = [1, 128], strides = [1, 1]} : vector<1x512xf32> to vector<1x128xf32>
    %98 = arith.negf %97 : vector<1x128xf32>
    %99 = math.exp %98 : vector<1x128xf32>
    %cst_46 = arith.constant 1.000000e+00 : f32
    %100 = vector.broadcast %cst_46 : f32 to vector<1x128xf32>
    %101 = arith.addf %100, %99 : vector<1x128xf32>
    %102 = arith.divf %100, %101 : vector<1x128xf32>
    %103 = vector.extract_strided_slice %91 {offsets = [0, 128], sizes = [1, 128], strides = [1, 1]} : vector<1x512xf32> to vector<1x128xf32>
    %104 = arith.negf %103 : vector<1x128xf32>
    %105 = math.exp %104 : vector<1x128xf32>
    %cst_47 = arith.constant 1.000000e+00 : f32
    %106 = vector.broadcast %cst_47 : f32 to vector<1x128xf32>
    %107 = arith.addf %106, %105 : vector<1x128xf32>
    %108 = arith.divf %106, %107 : vector<1x128xf32>
    %109 = vector.extract_strided_slice %91 {offsets = [0, 256], sizes = [1, 128], strides = [1, 1]} : vector<1x512xf32> to vector<1x128xf32>
    %110 = math.tanh %109 : vector<1x128xf32>
    %111 = vector.extract_strided_slice %91 {offsets = [0, 384], sizes = [1, 128], strides = [1, 1]} : vector<1x512xf32> to vector<1x128xf32>
    %112 = arith.negf %111 : vector<1x128xf32>
    %113 = math.exp %112 : vector<1x128xf32>
    %cst_48 = arith.constant 1.000000e+00 : f32
    %114 = vector.broadcast %cst_48 : f32 to vector<1x128xf32>
    %115 = arith.addf %114, %113 : vector<1x128xf32>
    %116 = arith.divf %114, %115 : vector<1x128xf32>
    %117 = vector.extract_strided_slice %96 {offsets = [0, 0], sizes = [1, 128], strides = [1, 1]} : vector<1x256xf32> to vector<1x128xf32>
    %118 = arith.mulf %108, %117 : vector<1x128xf32>
    %119 = arith.mulf %102, %110 : vector<1x128xf32>
    %120 = arith.addf %118, %119 : vector<1x128xf32>
    %121 = math.tanh %120 : vector<1x128xf32>
    %122 = arith.mulf %116, %121 : vector<1x128xf32>
    %123 = vector.extract_strided_slice %95 {offsets = [0, 0], sizes = [1, 128], strides = [1, 1]} : vector<1x512xf32> to vector<1x128xf32>
    %124 = arith.negf %123 : vector<1x128xf32>
    %125 = math.exp %124 : vector<1x128xf32>
    %cst_49 = arith.constant 1.000000e+00 : f32
    %126 = vector.broadcast %cst_49 : f32 to vector<1x128xf32>
    %127 = arith.addf %126, %125 : vector<1x128xf32>
    %128 = arith.divf %126, %127 : vector<1x128xf32>
    %129 = vector.extract_strided_slice %95 {offsets = [0, 128], sizes = [1, 128], strides = [1, 1]} : vector<1x512xf32> to vector<1x128xf32>
    %130 = arith.negf %129 : vector<1x128xf32>
    %131 = math.exp %130 : vector<1x128xf32>
    %cst_50 = arith.constant 1.000000e+00 : f32
    %132 = vector.broadcast %cst_50 : f32 to vector<1x128xf32>
    %133 = arith.addf %132, %131 : vector<1x128xf32>
    %134 = arith.divf %132, %133 : vector<1x128xf32>
    %135 = vector.extract_strided_slice %95 {offsets = [0, 256], sizes = [1, 128], strides = [1, 1]} : vector<1x512xf32> to vector<1x128xf32>
    %136 = math.tanh %135 : vector<1x128xf32>
    %137 = vector.extract_strided_slice %95 {offsets = [0, 384], sizes = [1, 128], strides = [1, 1]} : vector<1x512xf32> to vector<1x128xf32>
    %138 = arith.negf %137 : vector<1x128xf32>
    %139 = math.exp %138 : vector<1x128xf32>
    %cst_51 = arith.constant 1.000000e+00 : f32
    %140 = vector.broadcast %cst_51 : f32 to vector<1x128xf32>
    %141 = arith.addf %140, %139 : vector<1x128xf32>
    %142 = arith.divf %140, %141 : vector<1x128xf32>
    %143 = vector.extract_strided_slice %96 {offsets = [0, 128], sizes = [1, 128], strides = [1, 1]} : vector<1x256xf32> to vector<1x128xf32>
    %144 = arith.mulf %134, %143 : vector<1x128xf32>
    %145 = arith.mulf %128, %136 : vector<1x128xf32>
    %146 = arith.addf %144, %145 : vector<1x128xf32>
    %147 = math.tanh %146 : vector<1x128xf32>
    %148 = arith.mulf %142, %147 : vector<1x128xf32>
    %c0_52 = arith.constant 0 : index
    %c0_53 = arith.constant 0 : index
    %149 = vector.load %arg7[%c0_52, %c0_53] : memref<1x256xf32, #tpu.memory_space<vmem>>, vector<1x128xf32>
    tpu.vector_store %arg7[%c0_52, %c0_53], %122 {strides = array<i32>} : memref<1x256xf32, #tpu.memory_space<vmem>>, vector<1x128xf32>,
    %c0_54 = arith.constant 0 : index
    %c128_55 = arith.constant 128 : index
    %150 = vector.load %arg7[%c0_54, %c128_55] : memref<1x256xf32, #tpu.memory_space<vmem>>, vector<1x128xf32>
    tpu.vector_store %arg7[%c0_54, %c128_55], %148 {strides = array<i32>} : memref<1x256xf32, #tpu.memory_space<vmem>>, vector<1x128xf32>,
    %c0_56 = arith.constant 0 : index
    %c0_57 = arith.constant 0 : index
    %151 = vector.load %arg8[%c0_56, %c0_57] : memref<1x256xf32, #tpu.memory_space<vmem>>, vector<1x128xf32>
    tpu.vector_store %arg8[%c0_56, %c0_57], %120 {strides = array<i32>} : memref<1x256xf32, #tpu.memory_space<vmem>>, vector<1x128xf32>,
    %c0_58 = arith.constant 0 : index
    %c128_59 = arith.constant 128 : index
    %152 = vector.load %arg8[%c0_58, %c128_59] : memref<1x256xf32, #tpu.memory_space<vmem>>, vector<1x128xf32>
    tpu.vector_store %arg8[%c0_58, %c128_59], %146 {strides = array<i32>} : memref<1x256xf32, #tpu.memory_space<vmem>>, vector<1x128xf32>,
    %153 = arith.index_cast %c1_i32 : i32 to index
    %c0_60 = arith.constant 0 : index
    %154 = vector.load %arg5[%153, %c0_60] : memref<8x256xf32, #tpu.memory_space<vmem>>, vector<1x128xf32>
    tpu.vector_store %arg5[%153, %c0_60], %122 {strides = array<i32>} : memref<8x256xf32, #tpu.memory_space<vmem>>, vector<1x128xf32>,
    %155 = arith.index_cast %84 : i32 to index
    %c128_61 = arith.constant 128 : index
    %156 = vector.load %arg5[%155, %c128_61] : memref<8x256xf32, #tpu.memory_space<vmem>>, vector<1x128xf32>
    tpu.vector_store %arg5[%155, %c128_61], %148 {strides = array<i32>} : memref<8x256xf32, #tpu.memory_space<vmem>>, vector<1x128xf32>,
    %c2_i32 = arith.constant 2 : i32
    %c7_i32_62 = arith.constant 7 : i32
    %157 = arith.subi %c7_i32_62, %c2_i32 : i32
    %c0_63 = arith.constant 0 : index
    %c0_64 = arith.constant 0 : index
    %158 = vector.load %arg7[%c0_63, %c0_64] : memref<1x256xf32, #tpu.memory_space<vmem>>, vector<1x256xf32>
    %c0_65 = arith.constant 0 : index
    %c0_66 = arith.constant 0 : index
    %159 = vector.load %arg3[%c0_65, %c0_66] : memref<256x1024xf32, #tpu.memory_space<vmem>>, vector<256x1024xf32>
    %cst_67 = arith.constant dense<0.000000e+00> : vector<1x1024xf32>
    %160 = tpu.matmul %158, %159, %cst_67 {dimension_numbers = #tpu.dot_dimension_numbers<[1], [0], [0], [1], [0, 0, 1, 1], [], []>} : vector<1x256xf32>, vector<256x1024xf32>, vector<1x1024xf32> -> vector<1x1024xf32>
    %161 = arith.index_cast %c2_i32 : i32 to index
    %c0_68 = arith.constant 0 : index
    %162 = vector.load %arg6[%161, %c0_68] : memref<8x1024xf32, #tpu.memory_space<vmem>>, vector<1x512xf32>
    %163 = vector.extract_strided_slice %160 {offsets = [0, 0], sizes = [1, 512], strides = [1, 1]} : vector<1x1024xf32> to vector<1x512xf32>
    %164 = arith.addf %162, %163 : vector<1x512xf32>
    %165 = arith.index_cast %157 : i32 to index
    %c512_69 = arith.constant 512 : index
    %166 = vector.load %arg6[%165, %c512_69] : memref<8x1024xf32, #tpu.memory_space<vmem>>, vector<1x512xf32>
    %167 = vector.extract_strided_slice %160 {offsets = [0, 512], sizes = [1, 512], strides = [1, 1]} : vector<1x1024xf32> to vector<1x512xf32>
    %168 = arith.addf %166, %167 : vector<1x512xf32>
    %c0_70 = arith.constant 0 : index
    %c0_71 = arith.constant 0 : index
    %169 = vector.load %arg8[%c0_70, %c0_71] : memref<1x256xf32, #tpu.memory_space<vmem>>, vector<1x256xf32>
    %170 = vector.extract_strided_slice %164 {offsets = [0, 0], sizes = [1, 128], strides = [1, 1]} : vector<1x512xf32> to vector<1x128xf32>
    %171 = arith.negf %170 : vector<1x128xf32>
    %172 = math.exp %171 : vector<1x128xf32>
    %cst_72 = arith.constant 1.000000e+00 : f32
    %173 = vector.broadcast %cst_72 : f32 to vector<1x128xf32>
    %174 = arith.addf %173, %172 : vector<1x128xf32>
    %175 = arith.divf %173, %174 : vector<1x128xf32>
    %176 = vector.extract_strided_slice %164 {offsets = [0, 128], sizes = [1, 128], strides = [1, 1]} : vector<1x512xf32> to vector<1x128xf32>
    %177 = arith.negf %176 : vector<1x128xf32>
    %178 = math.exp %177 : vector<1x128xf32>
    %cst_73 = arith.constant 1.000000e+00 : f32
    %179 = vector.broadcast %cst_73 : f32 to vector<1x128xf32>
    %180 = arith.addf %179, %178 : vector<1x128xf32>
    %181 = arith.divf %179, %180 : vector<1x128xf32>
    %182 = vector.extract_strided_slice %164 {offsets = [0, 256], sizes = [1, 128], strides = [1, 1]} : vector<1x512xf32> to vector<1x128xf32>
    %183 = math.tanh %182 : vector<1x128xf32>
    %184 = vector.extract_strided_slice %164 {offsets = [0, 384], sizes = [1, 128], strides = [1, 1]} : vector<1x512xf32> to vector<1x128xf32>
    %185 = arith.negf %184 : vector<1x128xf32>
    %186 = math.exp %185 : vector<1x128xf32>
    %cst_74 = arith.constant 1.000000e+00 : f32
    %187 = vector.broadcast %cst_74 : f32 to vector<1x128xf32>
    %188 = arith.addf %187, %186 : vector<1x128xf32>
    %189 = arith.divf %187, %188 : vector<1x128xf32>
    %190 = vector.extract_strided_slice %169 {offsets = [0, 0], sizes = [1, 128], strides = [1, 1]} : vector<1x256xf32> to vector<1x128xf32>
    %191 = arith.mulf %181, %190 : vector<1x128xf32>
    %192 = arith.mulf %175, %183 : vector<1x128xf32>
    %193 = arith.addf %191, %192 : vector<1x128xf32>
    %194 = math.tanh %193 : vector<1x128xf32>
    %195 = arith.mulf %189, %194 : vector<1x128xf32>
    %196 = vector.extract_strided_slice %168 {offsets = [0, 0], sizes = [1, 128], strides = [1, 1]} : vector<1x512xf32> to vector<1x128xf32>
    %197 = arith.negf %196 : vector<1x128xf32>
    %198 = math.exp %197 : vector<1x128xf32>
    %cst_75 = arith.constant 1.000000e+00 : f32
    %199 = vector.broadcast %cst_75 : f32 to vector<1x128xf32>
    %200 = arith.addf %199, %198 : vector<1x128xf32>
    %201 = arith.divf %199, %200 : vector<1x128xf32>
    %202 = vector.extract_strided_slice %168 {offsets = [0, 128], sizes = [1, 128], strides = [1, 1]} : vector<1x512xf32> to vector<1x128xf32>
    %203 = arith.negf %202 : vector<1x128xf32>
    %204 = math.exp %203 : vector<1x128xf32>
    %cst_76 = arith.constant 1.000000e+00 : f32
    %205 = vector.broadcast %cst_76 : f32 to vector<1x128xf32>
    %206 = arith.addf %205, %204 : vector<1x128xf32>
    %207 = arith.divf %205, %206 : vector<1x128xf32>
    %208 = vector.extract_strided_slice %168 {offsets = [0, 256], sizes = [1, 128], strides = [1, 1]} : vector<1x512xf32> to vector<1x128xf32>
    %209 = math.tanh %208 : vector<1x128xf32>
    %210 = vector.extract_strided_slice %168 {offsets = [0, 384], sizes = [1, 128], strides = [1, 1]} : vector<1x512xf32> to vector<1x128xf32>
    %211 = arith.negf %210 : vector<1x128xf32>
    %212 = math.exp %211 : vector<1x128xf32>
    %cst_77 = arith.constant 1.000000e+00 : f32
    %213 = vector.broadcast %cst_77 : f32 to vector<1x128xf32>
    %214 = arith.addf %213, %212 : vector<1x128xf32>
    %215 = arith.divf %213, %214 : vector<1x128xf32>
    %216 = vector.extract_strided_slice %169 {offsets = [0, 128], sizes = [1, 128], strides = [1, 1]} : vector<1x256xf32> to vector<1x128xf32>
    %217 = arith.mulf %207, %216 : vector<1x128xf32>
    %218 = arith.mulf %201, %209 : vector<1x128xf32>
    %219 = arith.addf %217, %218 : vector<1x128xf32>
    %220 = math.tanh %219 : vector<1x128xf32>
    %221 = arith.mulf %215, %220 : vector<1x128xf32>
    %c0_78 = arith.constant 0 : index
    %c0_79 = arith.constant 0 : index
    %222 = vector.load %arg7[%c0_78, %c0_79] : memref<1x256xf32, #tpu.memory_space<vmem>>, vector<1x128xf32>
    tpu.vector_store %arg7[%c0_78, %c0_79], %195 {strides = array<i32>} : memref<1x256xf32, #tpu.memory_space<vmem>>, vector<1x128xf32>,
    %c0_80 = arith.constant 0 : index
    %c128_81 = arith.constant 128 : index
    %223 = vector.load %arg7[%c0_80, %c128_81] : memref<1x256xf32, #tpu.memory_space<vmem>>, vector<1x128xf32>
    tpu.vector_store %arg7[%c0_80, %c128_81], %221 {strides = array<i32>} : memref<1x256xf32, #tpu.memory_space<vmem>>, vector<1x128xf32>,
    %c0_82 = arith.constant 0 : index
    %c0_83 = arith.constant 0 : index
    %224 = vector.load %arg8[%c0_82, %c0_83] : memref<1x256xf32, #tpu.memory_space<vmem>>, vector<1x128xf32>
    tpu.vector_store %arg8[%c0_82, %c0_83], %193 {strides = array<i32>} : memref<1x256xf32, #tpu.memory_space<vmem>>, vector<1x128xf32>,
    %c0_84 = arith.constant 0 : index
    %c128_85 = arith.constant 128 : index
    %225 = vector.load %arg8[%c0_84, %c128_85] : memref<1x256xf32, #tpu.memory_space<vmem>>, vector<1x128xf32>
    tpu.vector_store %arg8[%c0_84, %c128_85], %219 {strides = array<i32>} : memref<1x256xf32, #tpu.memory_space<vmem>>, vector<1x128xf32>,
    %226 = arith.index_cast %c2_i32 : i32 to index
    %c0_86 = arith.constant 0 : index
    %227 = vector.load %arg5[%226, %c0_86] : memref<8x256xf32, #tpu.memory_space<vmem>>, vector<1x128xf32>
    tpu.vector_store %arg5[%226, %c0_86], %195 {strides = array<i32>} : memref<8x256xf32, #tpu.memory_space<vmem>>, vector<1x128xf32>,
    %228 = arith.index_cast %157 : i32 to index
    %c128_87 = arith.constant 128 : index
    %229 = vector.load %arg5[%228, %c128_87] : memref<8x256xf32, #tpu.memory_space<vmem>>, vector<1x128xf32>
    tpu.vector_store %arg5[%228, %c128_87], %221 {strides = array<i32>} : memref<8x256xf32, #tpu.memory_space<vmem>>, vector<1x128xf32>,
    %c3_i32 = arith.constant 3 : i32
    %c7_i32_88 = arith.constant 7 : i32
    %230 = arith.subi %c7_i32_88, %c3_i32 : i32
    %c0_89 = arith.constant 0 : index
    %c0_90 = arith.constant 0 : index
    %231 = vector.load %arg7[%c0_89, %c0_90] : memref<1x256xf32, #tpu.memory_space<vmem>>, vector<1x256xf32>
    %c0_91 = arith.constant 0 : index
    %c0_92 = arith.constant 0 : index
    %232 = vector.load %arg3[%c0_91, %c0_92] : memref<256x1024xf32, #tpu.memory_space<vmem>>, vector<256x1024xf32>
    %cst_93 = arith.constant dense<0.000000e+00> : vector<1x1024xf32>
    %233 = tpu.matmul %231, %232, %cst_93 {dimension_numbers = #tpu.dot_dimension_numbers<[1], [0], [0], [1], [0, 0, 1, 1], [], []>} : vector<1x256xf32>, vector<256x1024xf32>, vector<1x1024xf32> -> vector<1x1024xf32>
    %234 = arith.index_cast %c3_i32 : i32 to index
    %c0_94 = arith.constant 0 : index
    %235 = vector.load %arg6[%234, %c0_94] : memref<8x1024xf32, #tpu.memory_space<vmem>>, vector<1x512xf32>
    %236 = vector.extract_strided_slice %233 {offsets = [0, 0], sizes = [1, 512], strides = [1, 1]} : vector<1x1024xf32> to vector<1x512xf32>
    %237 = arith.addf %235, %236 : vector<1x512xf32>
    %238 = arith.index_cast %230 : i32 to index
    %c512_95 = arith.constant 512 : index
    %239 = vector.load %arg6[%238, %c512_95] : memref<8x1024xf32, #tpu.memory_space<vmem>>, vector<1x512xf32>
    %240 = vector.extract_strided_slice %233 {offsets = [0, 512], sizes = [1, 512], strides = [1, 1]} : vector<1x1024xf32> to vector<1x512xf32>
    %241 = arith.addf %239, %240 : vector<1x512xf32>
    %c0_96 = arith.constant 0 : index
    %c0_97 = arith.constant 0 : index
    %242 = vector.load %arg8[%c0_96, %c0_97] : memref<1x256xf32, #tpu.memory_space<vmem>>, vector<1x256xf32>
    %243 = vector.extract_strided_slice %237 {offsets = [0, 0], sizes = [1, 128], strides = [1, 1]} : vector<1x512xf32> to vector<1x128xf32>
    %244 = arith.negf %243 : vector<1x128xf32>
    %245 = math.exp %244 : vector<1x128xf32>
    %cst_98 = arith.constant 1.000000e+00 : f32
    %246 = vector.broadcast %cst_98 : f32 to vector<1x128xf32>
    %247 = arith.addf %246, %245 : vector<1x128xf32>
    %248 = arith.divf %246, %247 : vector<1x128xf32>
    %249 = vector.extract_strided_slice %237 {offsets = [0, 128], sizes = [1, 128], strides = [1, 1]} : vector<1x512xf32> to vector<1x128xf32>
    %250 = arith.negf %249 : vector<1x128xf32>
    %251 = math.exp %250 : vector<1x128xf32>
    %cst_99 = arith.constant 1.000000e+00 : f32
    %252 = vector.broadcast %cst_99 : f32 to vector<1x128xf32>
    %253 = arith.addf %252, %251 : vector<1x128xf32>
    %254 = arith.divf %252, %253 : vector<1x128xf32>
    %255 = vector.extract_strided_slice %237 {offsets = [0, 256], sizes = [1, 128], strides = [1, 1]} : vector<1x512xf32> to vector<1x128xf32>
    %256 = math.tanh %255 : vector<1x128xf32>
    %257 = vector.extract_strided_slice %237 {offsets = [0, 384], sizes = [1, 128], strides = [1, 1]} : vector<1x512xf32> to vector<1x128xf32>
    %258 = arith.negf %257 : vector<1x128xf32>
    %259 = math.exp %258 : vector<1x128xf32>
    %cst_100 = arith.constant 1.000000e+00 : f32
    %260 = vector.broadcast %cst_100 : f32 to vector<1x128xf32>
    %261 = arith.addf %260, %259 : vector<1x128xf32>
    %262 = arith.divf %260, %261 : vector<1x128xf32>
    %263 = vector.extract_strided_slice %242 {offsets = [0, 0], sizes = [1, 128], strides = [1, 1]} : vector<1x256xf32> to vector<1x128xf32>
    %264 = arith.mulf %254, %263 : vector<1x128xf32>
    %265 = arith.mulf %248, %256 : vector<1x128xf32>
    %266 = arith.addf %264, %265 : vector<1x128xf32>
    %267 = math.tanh %266 : vector<1x128xf32>
    %268 = arith.mulf %262, %267 : vector<1x128xf32>
    %269 = vector.extract_strided_slice %241 {offsets = [0, 0], sizes = [1, 128], strides = [1, 1]} : vector<1x512xf32> to vector<1x128xf32>
    %270 = arith.negf %269 : vector<1x128xf32>
    %271 = math.exp %270 : vector<1x128xf32>
    %cst_101 = arith.constant 1.000000e+00 : f32
    %272 = vector.broadcast %cst_101 : f32 to vector<1x128xf32>
    %273 = arith.addf %272, %271 : vector<1x128xf32>
    %274 = arith.divf %272, %273 : vector<1x128xf32>
    %275 = vector.extract_strided_slice %241 {offsets = [0, 128], sizes = [1, 128], strides = [1, 1]} : vector<1x512xf32> to vector<1x128xf32>
    %276 = arith.negf %275 : vector<1x128xf32>
    %277 = math.exp %276 : vector<1x128xf32>
    %cst_102 = arith.constant 1.000000e+00 : f32
    %278 = vector.broadcast %cst_102 : f32 to vector<1x128xf32>
    %279 = arith.addf %278, %277 : vector<1x128xf32>
    %280 = arith.divf %278, %279 : vector<1x128xf32>
    %281 = vector.extract_strided_slice %241 {offsets = [0, 256], sizes = [1, 128], strides = [1, 1]} : vector<1x512xf32> to vector<1x128xf32>
    %282 = math.tanh %281 : vector<1x128xf32>
    %283 = vector.extract_strided_slice %241 {offsets = [0, 384], sizes = [1, 128], strides = [1, 1]} : vector<1x512xf32> to vector<1x128xf32>
    %284 = arith.negf %283 : vector<1x128xf32>
    %285 = math.exp %284 : vector<1x128xf32>
    %cst_103 = arith.constant 1.000000e+00 : f32
    %286 = vector.broadcast %cst_103 : f32 to vector<1x128xf32>
    %287 = arith.addf %286, %285 : vector<1x128xf32>
    %288 = arith.divf %286, %287 : vector<1x128xf32>
    %289 = vector.extract_strided_slice %242 {offsets = [0, 128], sizes = [1, 128], strides = [1, 1]} : vector<1x256xf32> to vector<1x128xf32>
    %290 = arith.mulf %280, %289 : vector<1x128xf32>
    %291 = arith.mulf %274, %282 : vector<1x128xf32>
    %292 = arith.addf %290, %291 : vector<1x128xf32>
    %293 = math.tanh %292 : vector<1x128xf32>
    %294 = arith.mulf %288, %293 : vector<1x128xf32>
    %c0_104 = arith.constant 0 : index
    %c0_105 = arith.constant 0 : index
    %295 = vector.load %arg7[%c0_104, %c0_105] : memref<1x256xf32, #tpu.memory_space<vmem>>, vector<1x128xf32>
    tpu.vector_store %arg7[%c0_104, %c0_105], %268 {strides = array<i32>} : memref<1x256xf32, #tpu.memory_space<vmem>>, vector<1x128xf32>,
    %c0_106 = arith.constant 0 : index
    %c128_107 = arith.constant 128 : index
    %296 = vector.load %arg7[%c0_106, %c128_107] : memref<1x256xf32, #tpu.memory_space<vmem>>, vector<1x128xf32>
    tpu.vector_store %arg7[%c0_106, %c128_107], %294 {strides = array<i32>} : memref<1x256xf32, #tpu.memory_space<vmem>>, vector<1x128xf32>,
    %c0_108 = arith.constant 0 : index
    %c0_109 = arith.constant 0 : index
    %297 = vector.load %arg8[%c0_108, %c0_109] : memref<1x256xf32, #tpu.memory_space<vmem>>, vector<1x128xf32>
    tpu.vector_store %arg8[%c0_108, %c0_109], %266 {strides = array<i32>} : memref<1x256xf32, #tpu.memory_space<vmem>>, vector<1x128xf32>,
    %c0_110 = arith.constant 0 : index
    %c128_111 = arith.constant 128 : index
    %298 = vector.load %arg8[%c0_110, %c128_111] : memref<1x256xf32, #tpu.memory_space<vmem>>, vector<1x128xf32>
    tpu.vector_store %arg8[%c0_110, %c128_111], %292 {strides = array<i32>} : memref<1x256xf32, #tpu.memory_space<vmem>>, vector<1x128xf32>,
    %299 = arith.index_cast %c3_i32 : i32 to index
    %c0_112 = arith.constant 0 : index
    %300 = vector.load %arg5[%299, %c0_112] : memref<8x256xf32, #tpu.memory_space<vmem>>, vector<1x128xf32>
    tpu.vector_store %arg5[%299, %c0_112], %268 {strides = array<i32>} : memref<8x256xf32, #tpu.memory_space<vmem>>, vector<1x128xf32>,
    %301 = arith.index_cast %230 : i32 to index
    %c128_113 = arith.constant 128 : index
    %302 = vector.load %arg5[%301, %c128_113] : memref<8x256xf32, #tpu.memory_space<vmem>>, vector<1x128xf32>
    tpu.vector_store %arg5[%301, %c128_113], %294 {strides = array<i32>} : memref<8x256xf32, #tpu.memory_space<vmem>>, vector<1x128xf32>,
    %c4_i32 = arith.constant 4 : i32
    %c7_i32_114 = arith.constant 7 : i32
    %303 = arith.subi %c7_i32_114, %c4_i32 : i32
    %c0_115 = arith.constant 0 : index
    %c0_116 = arith.constant 0 : index
    %304 = vector.load %arg7[%c0_115, %c0_116] : memref<1x256xf32, #tpu.memory_space<vmem>>, vector<1x256xf32>
    %c0_117 = arith.constant 0 : index
    %c0_118 = arith.constant 0 : index
    %305 = vector.load %arg3[%c0_117, %c0_118] : memref<256x1024xf32, #tpu.memory_space<vmem>>, vector<256x1024xf32>
    %cst_119 = arith.constant dense<0.000000e+00> : vector<1x1024xf32>
    %306 = tpu.matmul %304, %305, %cst_119 {dimension_numbers = #tpu.dot_dimension_numbers<[1], [0], [0], [1], [0, 0, 1, 1], [], []>} : vector<1x256xf32>, vector<256x1024xf32>, vector<1x1024xf32> -> vector<1x1024xf32>
    %307 = arith.index_cast %c4_i32 : i32 to index
    %c0_120 = arith.constant 0 : index
    %308 = vector.load %arg6[%307, %c0_120] : memref<8x1024xf32, #tpu.memory_space<vmem>>, vector<1x512xf32>
    %309 = vector.extract_strided_slice %306 {offsets = [0, 0], sizes = [1, 512], strides = [1, 1]} : vector<1x1024xf32> to vector<1x512xf32>
    %310 = arith.addf %308, %309 : vector<1x512xf32>
    %311 = arith.index_cast %303 : i32 to index
    %c512_121 = arith.constant 512 : index
    %312 = vector.load %arg6[%311, %c512_121] : memref<8x1024xf32, #tpu.memory_space<vmem>>, vector<1x512xf32>
    %313 = vector.extract_strided_slice %306 {offsets = [0, 512], sizes = [1, 512], strides = [1, 1]} : vector<1x1024xf32> to vector<1x512xf32>
    %314 = arith.addf %312, %313 : vector<1x512xf32>
    %c0_122 = arith.constant 0 : index
    %c0_123 = arith.constant 0 : index
    %315 = vector.load %arg8[%c0_122, %c0_123] : memref<1x256xf32, #tpu.memory_space<vmem>>, vector<1x256xf32>
    %316 = vector.extract_strided_slice %310 {offsets = [0, 0], sizes = [1, 128], strides = [1, 1]} : vector<1x512xf32> to vector<1x128xf32>
    %317 = arith.negf %316 : vector<1x128xf32>
    %318 = math.exp %317 : vector<1x128xf32>
    %cst_124 = arith.constant 1.000000e+00 : f32
    %319 = vector.broadcast %cst_124 : f32 to vector<1x128xf32>
    %320 = arith.addf %319, %318 : vector<1x128xf32>
    %321 = arith.divf %319, %320 : vector<1x128xf32>
    %322 = vector.extract_strided_slice %310 {offsets = [0, 128], sizes = [1, 128], strides = [1, 1]} : vector<1x512xf32> to vector<1x128xf32>
    %323 = arith.negf %322 : vector<1x128xf32>
    %324 = math.exp %323 : vector<1x128xf32>
    %cst_125 = arith.constant 1.000000e+00 : f32
    %325 = vector.broadcast %cst_125 : f32 to vector<1x128xf32>
    %326 = arith.addf %325, %324 : vector<1x128xf32>
    %327 = arith.divf %325, %326 : vector<1x128xf32>
    %328 = vector.extract_strided_slice %310 {offsets = [0, 256], sizes = [1, 128], strides = [1, 1]} : vector<1x512xf32> to vector<1x128xf32>
    %329 = math.tanh %328 : vector<1x128xf32>
    %330 = vector.extract_strided_slice %310 {offsets = [0, 384], sizes = [1, 128], strides = [1, 1]} : vector<1x512xf32> to vector<1x128xf32>
    %331 = arith.negf %330 : vector<1x128xf32>
    %332 = math.exp %331 : vector<1x128xf32>
    %cst_126 = arith.constant 1.000000e+00 : f32
    %333 = vector.broadcast %cst_126 : f32 to vector<1x128xf32>
    %334 = arith.addf %333, %332 : vector<1x128xf32>
    %335 = arith.divf %333, %334 : vector<1x128xf32>
    %336 = vector.extract_strided_slice %315 {offsets = [0, 0], sizes = [1, 128], strides = [1, 1]} : vector<1x256xf32> to vector<1x128xf32>
    %337 = arith.mulf %327, %336 : vector<1x128xf32>
    %338 = arith.mulf %321, %329 : vector<1x128xf32>
    %339 = arith.addf %337, %338 : vector<1x128xf32>
    %340 = math.tanh %339 : vector<1x128xf32>
    %341 = arith.mulf %335, %340 : vector<1x128xf32>
    %342 = vector.extract_strided_slice %314 {offsets = [0, 0], sizes = [1, 128], strides = [1, 1]} : vector<1x512xf32> to vector<1x128xf32>
    %343 = arith.negf %342 : vector<1x128xf32>
    %344 = math.exp %343 : vector<1x128xf32>
    %cst_127 = arith.constant 1.000000e+00 : f32
    %345 = vector.broadcast %cst_127 : f32 to vector<1x128xf32>
    %346 = arith.addf %345, %344 : vector<1x128xf32>
    %347 = arith.divf %345, %346 : vector<1x128xf32>
    %348 = vector.extract_strided_slice %314 {offsets = [0, 128], sizes = [1, 128], strides = [1, 1]} : vector<1x512xf32> to vector<1x128xf32>
    %349 = arith.negf %348 : vector<1x128xf32>
    %350 = math.exp %349 : vector<1x128xf32>
    %cst_128 = arith.constant 1.000000e+00 : f32
    %351 = vector.broadcast %cst_128 : f32 to vector<1x128xf32>
    %352 = arith.addf %351, %350 : vector<1x128xf32>
    %353 = arith.divf %351, %352 : vector<1x128xf32>
    %354 = vector.extract_strided_slice %314 {offsets = [0, 256], sizes = [1, 128], strides = [1, 1]} : vector<1x512xf32> to vector<1x128xf32>
    %355 = math.tanh %354 : vector<1x128xf32>
    %356 = vector.extract_strided_slice %314 {offsets = [0, 384], sizes = [1, 128], strides = [1, 1]} : vector<1x512xf32> to vector<1x128xf32>
    %357 = arith.negf %356 : vector<1x128xf32>
    %358 = math.exp %357 : vector<1x128xf32>
    %cst_129 = arith.constant 1.000000e+00 : f32
    %359 = vector.broadcast %cst_129 : f32 to vector<1x128xf32>
    %360 = arith.addf %359, %358 : vector<1x128xf32>
    %361 = arith.divf %359, %360 : vector<1x128xf32>
    %362 = vector.extract_strided_slice %315 {offsets = [0, 128], sizes = [1, 128], strides = [1, 1]} : vector<1x256xf32> to vector<1x128xf32>
    %363 = arith.mulf %353, %362 : vector<1x128xf32>
    %364 = arith.mulf %347, %355 : vector<1x128xf32>
    %365 = arith.addf %363, %364 : vector<1x128xf32>
    %366 = math.tanh %365 : vector<1x128xf32>
    %367 = arith.mulf %361, %366 : vector<1x128xf32>
    %c0_130 = arith.constant 0 : index
    %c0_131 = arith.constant 0 : index
    %368 = vector.load %arg7[%c0_130, %c0_131] : memref<1x256xf32, #tpu.memory_space<vmem>>, vector<1x128xf32>
    tpu.vector_store %arg7[%c0_130, %c0_131], %341 {strides = array<i32>} : memref<1x256xf32, #tpu.memory_space<vmem>>, vector<1x128xf32>,
    %c0_132 = arith.constant 0 : index
    %c128_133 = arith.constant 128 : index
    %369 = vector.load %arg7[%c0_132, %c128_133] : memref<1x256xf32, #tpu.memory_space<vmem>>, vector<1x128xf32>
    tpu.vector_store %arg7[%c0_132, %c128_133], %367 {strides = array<i32>} : memref<1x256xf32, #tpu.memory_space<vmem>>, vector<1x128xf32>,
    %c0_134 = arith.constant 0 : index
    %c0_135 = arith.constant 0 : index
    %370 = vector.load %arg8[%c0_134, %c0_135] : memref<1x256xf32, #tpu.memory_space<vmem>>, vector<1x128xf32>
    tpu.vector_store %arg8[%c0_134, %c0_135], %339 {strides = array<i32>} : memref<1x256xf32, #tpu.memory_space<vmem>>, vector<1x128xf32>,
    %c0_136 = arith.constant 0 : index
    %c128_137 = arith.constant 128 : index
    %371 = vector.load %arg8[%c0_136, %c128_137] : memref<1x256xf32, #tpu.memory_space<vmem>>, vector<1x128xf32>
    tpu.vector_store %arg8[%c0_136, %c128_137], %365 {strides = array<i32>} : memref<1x256xf32, #tpu.memory_space<vmem>>, vector<1x128xf32>,
    %372 = arith.index_cast %c4_i32 : i32 to index
    %c0_138 = arith.constant 0 : index
    %373 = vector.load %arg5[%372, %c0_138] : memref<8x256xf32, #tpu.memory_space<vmem>>, vector<1x128xf32>
    tpu.vector_store %arg5[%372, %c0_138], %341 {strides = array<i32>} : memref<8x256xf32, #tpu.memory_space<vmem>>, vector<1x128xf32>,
    %374 = arith.index_cast %303 : i32 to index
    %c128_139 = arith.constant 128 : index
    %375 = vector.load %arg5[%374, %c128_139] : memref<8x256xf32, #tpu.memory_space<vmem>>, vector<1x128xf32>
    tpu.vector_store %arg5[%374, %c128_139], %367 {strides = array<i32>} : memref<8x256xf32, #tpu.memory_space<vmem>>, vector<1x128xf32>,
    %c5_i32 = arith.constant 5 : i32
    %c7_i32_140 = arith.constant 7 : i32
    %376 = arith.subi %c7_i32_140, %c5_i32 : i32
    %c0_141 = arith.constant 0 : index
    %c0_142 = arith.constant 0 : index
    %377 = vector.load %arg7[%c0_141, %c0_142] : memref<1x256xf32, #tpu.memory_space<vmem>>, vector<1x256xf32>
    %c0_143 = arith.constant 0 : index
    %c0_144 = arith.constant 0 : index
    %378 = vector.load %arg3[%c0_143, %c0_144] : memref<256x1024xf32, #tpu.memory_space<vmem>>, vector<256x1024xf32>
    %cst_145 = arith.constant dense<0.000000e+00> : vector<1x1024xf32>
    %379 = tpu.matmul %377, %378, %cst_145 {dimension_numbers = #tpu.dot_dimension_numbers<[1], [0], [0], [1], [0, 0, 1, 1], [], []>} : vector<1x256xf32>, vector<256x1024xf32>, vector<1x1024xf32> -> vector<1x1024xf32>
    %380 = arith.index_cast %c5_i32 : i32 to index
    %c0_146 = arith.constant 0 : index
    %381 = vector.load %arg6[%380, %c0_146] : memref<8x1024xf32, #tpu.memory_space<vmem>>, vector<1x512xf32>
    %382 = vector.extract_strided_slice %379 {offsets = [0, 0], sizes = [1, 512], strides = [1, 1]} : vector<1x1024xf32> to vector<1x512xf32>
    %383 = arith.addf %381, %382 : vector<1x512xf32>
    %384 = arith.index_cast %376 : i32 to index
    %c512_147 = arith.constant 512 : index
    %385 = vector.load %arg6[%384, %c512_147] : memref<8x1024xf32, #tpu.memory_space<vmem>>, vector<1x512xf32>
    %386 = vector.extract_strided_slice %379 {offsets = [0, 512], sizes = [1, 512], strides = [1, 1]} : vector<1x1024xf32> to vector<1x512xf32>
    %387 = arith.addf %385, %386 : vector<1x512xf32>
    %c0_148 = arith.constant 0 : index
    %c0_149 = arith.constant 0 : index
    %388 = vector.load %arg8[%c0_148, %c0_149] : memref<1x256xf32, #tpu.memory_space<vmem>>, vector<1x256xf32>
    %389 = vector.extract_strided_slice %383 {offsets = [0, 0], sizes = [1, 128], strides = [1, 1]} : vector<1x512xf32> to vector<1x128xf32>
    %390 = arith.negf %389 : vector<1x128xf32>
    %391 = math.exp %390 : vector<1x128xf32>
    %cst_150 = arith.constant 1.000000e+00 : f32
    %392 = vector.broadcast %cst_150 : f32 to vector<1x128xf32>
    %393 = arith.addf %392, %391 : vector<1x128xf32>
    %394 = arith.divf %392, %393 : vector<1x128xf32>
    %395 = vector.extract_strided_slice %383 {offsets = [0, 128], sizes = [1, 128], strides = [1, 1]} : vector<1x512xf32> to vector<1x128xf32>
    %396 = arith.negf %395 : vector<1x128xf32>
    %397 = math.exp %396 : vector<1x128xf32>
    %cst_151 = arith.constant 1.000000e+00 : f32
    %398 = vector.broadcast %cst_151 : f32 to vector<1x128xf32>
    %399 = arith.addf %398, %397 : vector<1x128xf32>
    %400 = arith.divf %398, %399 : vector<1x128xf32>
    %401 = vector.extract_strided_slice %383 {offsets = [0, 256], sizes = [1, 128], strides = [1, 1]} : vector<1x512xf32> to vector<1x128xf32>
    %402 = math.tanh %401 : vector<1x128xf32>
    %403 = vector.extract_strided_slice %383 {offsets = [0, 384], sizes = [1, 128], strides = [1, 1]} : vector<1x512xf32> to vector<1x128xf32>
    %404 = arith.negf %403 : vector<1x128xf32>
    %405 = math.exp %404 : vector<1x128xf32>
    %cst_152 = arith.constant 1.000000e+00 : f32
    %406 = vector.broadcast %cst_152 : f32 to vector<1x128xf32>
    %407 = arith.addf %406, %405 : vector<1x128xf32>
    %408 = arith.divf %406, %407 : vector<1x128xf32>
    %409 = vector.extract_strided_slice %388 {offsets = [0, 0], sizes = [1, 128], strides = [1, 1]} : vector<1x256xf32> to vector<1x128xf32>
    %410 = arith.mulf %400, %409 : vector<1x128xf32>
    %411 = arith.mulf %394, %402 : vector<1x128xf32>
    %412 = arith.addf %410, %411 : vector<1x128xf32>
    %413 = math.tanh %412 : vector<1x128xf32>
    %414 = arith.mulf %408, %413 : vector<1x128xf32>
    %415 = vector.extract_strided_slice %387 {offsets = [0, 0], sizes = [1, 128], strides = [1, 1]} : vector<1x512xf32> to vector<1x128xf32>
    %416 = arith.negf %415 : vector<1x128xf32>
    %417 = math.exp %416 : vector<1x128xf32>
    %cst_153 = arith.constant 1.000000e+00 : f32
    %418 = vector.broadcast %cst_153 : f32 to vector<1x128xf32>
    %419 = arith.addf %418, %417 : vector<1x128xf32>
    %420 = arith.divf %418, %419 : vector<1x128xf32>
    %421 = vector.extract_strided_slice %387 {offsets = [0, 128], sizes = [1, 128], strides = [1, 1]} : vector<1x512xf32> to vector<1x128xf32>
    %422 = arith.negf %421 : vector<1x128xf32>
    %423 = math.exp %422 : vector<1x128xf32>
    %cst_154 = arith.constant 1.000000e+00 : f32
    %424 = vector.broadcast %cst_154 : f32 to vector<1x128xf32>
    %425 = arith.addf %424, %423 : vector<1x128xf32>
    %426 = arith.divf %424, %425 : vector<1x128xf32>
    %427 = vector.extract_strided_slice %387 {offsets = [0, 256], sizes = [1, 128], strides = [1, 1]} : vector<1x512xf32> to vector<1x128xf32>
    %428 = math.tanh %427 : vector<1x128xf32>
    %429 = vector.extract_strided_slice %387 {offsets = [0, 384], sizes = [1, 128], strides = [1, 1]} : vector<1x512xf32> to vector<1x128xf32>
    %430 = arith.negf %429 : vector<1x128xf32>
    %431 = math.exp %430 : vector<1x128xf32>
    %cst_155 = arith.constant 1.000000e+00 : f32
    %432 = vector.broadcast %cst_155 : f32 to vector<1x128xf32>
    %433 = arith.addf %432, %431 : vector<1x128xf32>
    %434 = arith.divf %432, %433 : vector<1x128xf32>
    %435 = vector.extract_strided_slice %388 {offsets = [0, 128], sizes = [1, 128], strides = [1, 1]} : vector<1x256xf32> to vector<1x128xf32>
    %436 = arith.mulf %426, %435 : vector<1x128xf32>
    %437 = arith.mulf %420, %428 : vector<1x128xf32>
    %438 = arith.addf %436, %437 : vector<1x128xf32>
    %439 = math.tanh %438 : vector<1x128xf32>
    %440 = arith.mulf %434, %439 : vector<1x128xf32>
    %c0_156 = arith.constant 0 : index
    %c0_157 = arith.constant 0 : index
    %441 = vector.load %arg7[%c0_156, %c0_157] : memref<1x256xf32, #tpu.memory_space<vmem>>, vector<1x128xf32>
    tpu.vector_store %arg7[%c0_156, %c0_157], %414 {strides = array<i32>} : memref<1x256xf32, #tpu.memory_space<vmem>>, vector<1x128xf32>,
    %c0_158 = arith.constant 0 : index
    %c128_159 = arith.constant 128 : index
    %442 = vector.load %arg7[%c0_158, %c128_159] : memref<1x256xf32, #tpu.memory_space<vmem>>, vector<1x128xf32>
    tpu.vector_store %arg7[%c0_158, %c128_159], %440 {strides = array<i32>} : memref<1x256xf32, #tpu.memory_space<vmem>>, vector<1x128xf32>,
    %c0_160 = arith.constant 0 : index
    %c0_161 = arith.constant 0 : index
    %443 = vector.load %arg8[%c0_160, %c0_161] : memref<1x256xf32, #tpu.memory_space<vmem>>, vector<1x128xf32>
    tpu.vector_store %arg8[%c0_160, %c0_161], %412 {strides = array<i32>} : memref<1x256xf32, #tpu.memory_space<vmem>>, vector<1x128xf32>,
    %c0_162 = arith.constant 0 : index
    %c128_163 = arith.constant 128 : index
    %444 = vector.load %arg8[%c0_162, %c128_163] : memref<1x256xf32, #tpu.memory_space<vmem>>, vector<1x128xf32>
    tpu.vector_store %arg8[%c0_162, %c128_163], %438 {strides = array<i32>} : memref<1x256xf32, #tpu.memory_space<vmem>>, vector<1x128xf32>,
    %445 = arith.index_cast %c5_i32 : i32 to index
    %c0_164 = arith.constant 0 : index
    %446 = vector.load %arg5[%445, %c0_164] : memref<8x256xf32, #tpu.memory_space<vmem>>, vector<1x128xf32>
    tpu.vector_store %arg5[%445, %c0_164], %414 {strides = array<i32>} : memref<8x256xf32, #tpu.memory_space<vmem>>, vector<1x128xf32>,
    %447 = arith.index_cast %376 : i32 to index
    %c128_165 = arith.constant 128 : index
    %448 = vector.load %arg5[%447, %c128_165] : memref<8x256xf32, #tpu.memory_space<vmem>>, vector<1x128xf32>
    tpu.vector_store %arg5[%447, %c128_165], %440 {strides = array<i32>} : memref<8x256xf32, #tpu.memory_space<vmem>>, vector<1x128xf32>,
    %c6_i32 = arith.constant 6 : i32
    %c7_i32_166 = arith.constant 7 : i32
    %449 = arith.subi %c7_i32_166, %c6_i32 : i32
    %c0_167 = arith.constant 0 : index
    %c0_168 = arith.constant 0 : index
    %450 = vector.load %arg7[%c0_167, %c0_168] : memref<1x256xf32, #tpu.memory_space<vmem>>, vector<1x256xf32>
    %c0_169 = arith.constant 0 : index
    %c0_170 = arith.constant 0 : index
    %451 = vector.load %arg3[%c0_169, %c0_170] : memref<256x1024xf32, #tpu.memory_space<vmem>>, vector<256x1024xf32>
    %cst_171 = arith.constant dense<0.000000e+00> : vector<1x1024xf32>
    %452 = tpu.matmul %450, %451, %cst_171 {dimension_numbers = #tpu.dot_dimension_numbers<[1], [0], [0], [1], [0, 0, 1, 1], [], []>} : vector<1x256xf32>, vector<256x1024xf32>, vector<1x1024xf32> -> vector<1x1024xf32>
    %453 = arith.index_cast %c6_i32 : i32 to index
    %c0_172 = arith.constant 0 : index
    %454 = vector.load %arg6[%453, %c0_172] : memref<8x1024xf32, #tpu.memory_space<vmem>>, vector<1x512xf32>
    %455 = vector.extract_strided_slice %452 {offsets = [0, 0], sizes = [1, 512], strides = [1, 1]} : vector<1x1024xf32> to vector<1x512xf32>
    %456 = arith.addf %454, %455 : vector<1x512xf32>
    %457 = arith.index_cast %449 : i32 to index
    %c512_173 = arith.constant 512 : index
    %458 = vector.load %arg6[%457, %c512_173] : memref<8x1024xf32, #tpu.memory_space<vmem>>, vector<1x512xf32>
    %459 = vector.extract_strided_slice %452 {offsets = [0, 512], sizes = [1, 512], strides = [1, 1]} : vector<1x1024xf32> to vector<1x512xf32>
    %460 = arith.addf %458, %459 : vector<1x512xf32>
    %c0_174 = arith.constant 0 : index
    %c0_175 = arith.constant 0 : index
    %461 = vector.load %arg8[%c0_174, %c0_175] : memref<1x256xf32, #tpu.memory_space<vmem>>, vector<1x256xf32>
    %462 = vector.extract_strided_slice %456 {offsets = [0, 0], sizes = [1, 128], strides = [1, 1]} : vector<1x512xf32> to vector<1x128xf32>
    %463 = arith.negf %462 : vector<1x128xf32>
    %464 = math.exp %463 : vector<1x128xf32>
    %cst_176 = arith.constant 1.000000e+00 : f32
    %465 = vector.broadcast %cst_176 : f32 to vector<1x128xf32>
    %466 = arith.addf %465, %464 : vector<1x128xf32>
    %467 = arith.divf %465, %466 : vector<1x128xf32>
    %468 = vector.extract_strided_slice %456 {offsets = [0, 128], sizes = [1, 128], strides = [1, 1]} : vector<1x512xf32> to vector<1x128xf32>
    %469 = arith.negf %468 : vector<1x128xf32>
    %470 = math.exp %469 : vector<1x128xf32>
    %cst_177 = arith.constant 1.000000e+00 : f32
    %471 = vector.broadcast %cst_177 : f32 to vector<1x128xf32>
    %472 = arith.addf %471, %470 : vector<1x128xf32>
    %473 = arith.divf %471, %472 : vector<1x128xf32>
    %474 = vector.extract_strided_slice %456 {offsets = [0, 256], sizes = [1, 128], strides = [1, 1]} : vector<1x512xf32> to vector<1x128xf32>
    %475 = math.tanh %474 : vector<1x128xf32>
    %476 = vector.extract_strided_slice %456 {offsets = [0, 384], sizes = [1, 128], strides = [1, 1]} : vector<1x512xf32> to vector<1x128xf32>
    %477 = arith.negf %476 : vector<1x128xf32>
    %478 = math.exp %477 : vector<1x128xf32>
    %cst_178 = arith.constant 1.000000e+00 : f32
    %479 = vector.broadcast %cst_178 : f32 to vector<1x128xf32>
    %480 = arith.addf %479, %478 : vector<1x128xf32>
    %481 = arith.divf %479, %480 : vector<1x128xf32>
    %482 = vector.extract_strided_slice %461 {offsets = [0, 0], sizes = [1, 128], strides = [1, 1]} : vector<1x256xf32> to vector<1x128xf32>
    %483 = arith.mulf %473, %482 : vector<1x128xf32>
    %484 = arith.mulf %467, %475 : vector<1x128xf32>
    %485 = arith.addf %483, %484 : vector<1x128xf32>
    %486 = math.tanh %485 : vector<1x128xf32>
    %487 = arith.mulf %481, %486 : vector<1x128xf32>
    %488 = vector.extract_strided_slice %460 {offsets = [0, 0], sizes = [1, 128], strides = [1, 1]} : vector<1x512xf32> to vector<1x128xf32>
    %489 = arith.negf %488 : vector<1x128xf32>
    %490 = math.exp %489 : vector<1x128xf32>
    %cst_179 = arith.constant 1.000000e+00 : f32
    %491 = vector.broadcast %cst_179 : f32 to vector<1x128xf32>
    %492 = arith.addf %491, %490 : vector<1x128xf32>
    %493 = arith.divf %491, %492 : vector<1x128xf32>
    %494 = vector.extract_strided_slice %460 {offsets = [0, 128], sizes = [1, 128], strides = [1, 1]} : vector<1x512xf32> to vector<1x128xf32>
    %495 = arith.negf %494 : vector<1x128xf32>
    %496 = math.exp %495 : vector<1x128xf32>
    %cst_180 = arith.constant 1.000000e+00 : f32
    %497 = vector.broadcast %cst_180 : f32 to vector<1x128xf32>
    %498 = arith.addf %497, %496 : vector<1x128xf32>
    %499 = arith.divf %497, %498 : vector<1x128xf32>
    %500 = vector.extract_strided_slice %460 {offsets = [0, 256], sizes = [1, 128], strides = [1, 1]} : vector<1x512xf32> to vector<1x128xf32>
    %501 = math.tanh %500 : vector<1x128xf32>
    %502 = vector.extract_strided_slice %460 {offsets = [0, 384], sizes = [1, 128], strides = [1, 1]} : vector<1x512xf32> to vector<1x128xf32>
    %503 = arith.negf %502 : vector<1x128xf32>
    %504 = math.exp %503 : vector<1x128xf32>
    %cst_181 = arith.constant 1.000000e+00 : f32
    %505 = vector.broadcast %cst_181 : f32 to vector<1x128xf32>
    %506 = arith.addf %505, %504 : vector<1x128xf32>
    %507 = arith.divf %505, %506 : vector<1x128xf32>
    %508 = vector.extract_strided_slice %461 {offsets = [0, 128], sizes = [1, 128], strides = [1, 1]} : vector<1x256xf32> to vector<1x128xf32>
    %509 = arith.mulf %499, %508 : vector<1x128xf32>
    %510 = arith.mulf %493, %501 : vector<1x128xf32>
    %511 = arith.addf %509, %510 : vector<1x128xf32>
    %512 = math.tanh %511 : vector<1x128xf32>
    %513 = arith.mulf %507, %512 : vector<1x128xf32>
    %c0_182 = arith.constant 0 : index
    %c0_183 = arith.constant 0 : index
    %514 = vector.load %arg7[%c0_182, %c0_183] : memref<1x256xf32, #tpu.memory_space<vmem>>, vector<1x128xf32>
    tpu.vector_store %arg7[%c0_182, %c0_183], %487 {strides = array<i32>} : memref<1x256xf32, #tpu.memory_space<vmem>>, vector<1x128xf32>,
    %c0_184 = arith.constant 0 : index
    %c128_185 = arith.constant 128 : index
    %515 = vector.load %arg7[%c0_184, %c128_185] : memref<1x256xf32, #tpu.memory_space<vmem>>, vector<1x128xf32>
    tpu.vector_store %arg7[%c0_184, %c128_185], %513 {strides = array<i32>} : memref<1x256xf32, #tpu.memory_space<vmem>>, vector<1x128xf32>,
    %c0_186 = arith.constant 0 : index
    %c0_187 = arith.constant 0 : index
    %516 = vector.load %arg8[%c0_186, %c0_187] : memref<1x256xf32, #tpu.memory_space<vmem>>, vector<1x128xf32>
    tpu.vector_store %arg8[%c0_186, %c0_187], %485 {strides = array<i32>} : memref<1x256xf32, #tpu.memory_space<vmem>>, vector<1x128xf32>,
    %c0_188 = arith.constant 0 : index
    %c128_189 = arith.constant 128 : index
    %517 = vector.load %arg8[%c0_188, %c128_189] : memref<1x256xf32, #tpu.memory_space<vmem>>, vector<1x128xf32>
    tpu.vector_store %arg8[%c0_188, %c128_189], %511 {strides = array<i32>} : memref<1x256xf32, #tpu.memory_space<vmem>>, vector<1x128xf32>,
    %518 = arith.index_cast %c6_i32 : i32 to index
    %c0_190 = arith.constant 0 : index
    %519 = vector.load %arg5[%518, %c0_190] : memref<8x256xf32, #tpu.memory_space<vmem>>, vector<1x128xf32>
    tpu.vector_store %arg5[%518, %c0_190], %487 {strides = array<i32>} : memref<8x256xf32, #tpu.memory_space<vmem>>, vector<1x128xf32>,
    %520 = arith.index_cast %449 : i32 to index
    %c128_191 = arith.constant 128 : index
    %521 = vector.load %arg5[%520, %c128_191] : memref<8x256xf32, #tpu.memory_space<vmem>>, vector<1x128xf32>
    tpu.vector_store %arg5[%520, %c128_191], %513 {strides = array<i32>} : memref<8x256xf32, #tpu.memory_space<vmem>>, vector<1x128xf32>,
    %c7_i32_192 = arith.constant 7 : i32
    %c7_i32_193 = arith.constant 7 : i32
    %522 = arith.subi %c7_i32_193, %c7_i32_192 : i32
    %c0_194 = arith.constant 0 : index
    %c0_195 = arith.constant 0 : index
    %523 = vector.load %arg7[%c0_194, %c0_195] : memref<1x256xf32, #tpu.memory_space<vmem>>, vector<1x256xf32>
    %c0_196 = arith.constant 0 : index
    %c0_197 = arith.constant 0 : index
    %524 = vector.load %arg3[%c0_196, %c0_197] : memref<256x1024xf32, #tpu.memory_space<vmem>>, vector<256x1024xf32>
    %cst_198 = arith.constant dense<0.000000e+00> : vector<1x1024xf32>
    %525 = tpu.matmul %523, %524, %cst_198 {dimension_numbers = #tpu.dot_dimension_numbers<[1], [0], [0], [1], [0, 0, 1, 1], [], []>} : vector<1x256xf32>, vector<256x1024xf32>, vector<1x1024xf32> -> vector<1x1024xf32>
    %526 = arith.index_cast %c7_i32_192 : i32 to index
    %c0_199 = arith.constant 0 : index
    %527 = vector.load %arg6[%526, %c0_199] : memref<8x1024xf32, #tpu.memory_space<vmem>>, vector<1x512xf32>
    %528 = vector.extract_strided_slice %525 {offsets = [0, 0], sizes = [1, 512], strides = [1, 1]} : vector<1x1024xf32> to vector<1x512xf32>
    %529 = arith.addf %527, %528 : vector<1x512xf32>
    %530 = arith.index_cast %522 : i32 to index
    %c512_200 = arith.constant 512 : index
    %531 = vector.load %arg6[%530, %c512_200] : memref<8x1024xf32, #tpu.memory_space<vmem>>, vector<1x512xf32>
    %532 = vector.extract_strided_slice %525 {offsets = [0, 512], sizes = [1, 512], strides = [1, 1]} : vector<1x1024xf32> to vector<1x512xf32>
    %533 = arith.addf %531, %532 : vector<1x512xf32>
    %c0_201 = arith.constant 0 : index
    %c0_202 = arith.constant 0 : index
    %534 = vector.load %arg8[%c0_201, %c0_202] : memref<1x256xf32, #tpu.memory_space<vmem>>, vector<1x256xf32>
    %535 = vector.extract_strided_slice %529 {offsets = [0, 0], sizes = [1, 128], strides = [1, 1]} : vector<1x512xf32> to vector<1x128xf32>
    %536 = arith.negf %535 : vector<1x128xf32>
    %537 = math.exp %536 : vector<1x128xf32>
    %cst_203 = arith.constant 1.000000e+00 : f32
    %538 = vector.broadcast %cst_203 : f32 to vector<1x128xf32>
    %539 = arith.addf %538, %537 : vector<1x128xf32>
    %540 = arith.divf %538, %539 : vector<1x128xf32>
    %541 = vector.extract_strided_slice %529 {offsets = [0, 128], sizes = [1, 128], strides = [1, 1]} : vector<1x512xf32> to vector<1x128xf32>
    %542 = arith.negf %541 : vector<1x128xf32>
    %543 = math.exp %542 : vector<1x128xf32>
    %cst_204 = arith.constant 1.000000e+00 : f32
    %544 = vector.broadcast %cst_204 : f32 to vector<1x128xf32>
    %545 = arith.addf %544, %543 : vector<1x128xf32>
    %546 = arith.divf %544, %545 : vector<1x128xf32>
    %547 = vector.extract_strided_slice %529 {offsets = [0, 256], sizes = [1, 128], strides = [1, 1]} : vector<1x512xf32> to vector<1x128xf32>
    %548 = math.tanh %547 : vector<1x128xf32>
    %549 = vector.extract_strided_slice %529 {offsets = [0, 384], sizes = [1, 128], strides = [1, 1]} : vector<1x512xf32> to vector<1x128xf32>
    %550 = arith.negf %549 : vector<1x128xf32>
    %551 = math.exp %550 : vector<1x128xf32>
    %cst_205 = arith.constant 1.000000e+00 : f32
    %552 = vector.broadcast %cst_205 : f32 to vector<1x128xf32>
    %553 = arith.addf %552, %551 : vector<1x128xf32>
    %554 = arith.divf %552, %553 : vector<1x128xf32>
    %555 = vector.extract_strided_slice %534 {offsets = [0, 0], sizes = [1, 128], strides = [1, 1]} : vector<1x256xf32> to vector<1x128xf32>
    %556 = arith.mulf %546, %555 : vector<1x128xf32>
    %557 = arith.mulf %540, %548 : vector<1x128xf32>
    %558 = arith.addf %556, %557 : vector<1x128xf32>
    %559 = math.tanh %558 : vector<1x128xf32>
    %560 = arith.mulf %554, %559 : vector<1x128xf32>
    %561 = vector.extract_strided_slice %533 {offsets = [0, 0], sizes = [1, 128], strides = [1, 1]} : vector<1x512xf32> to vector<1x128xf32>
    %562 = arith.negf %561 : vector<1x128xf32>
    %563 = math.exp %562 : vector<1x128xf32>
    %cst_206 = arith.constant 1.000000e+00 : f32
    %564 = vector.broadcast %cst_206 : f32 to vector<1x128xf32>
    %565 = arith.addf %564, %563 : vector<1x128xf32>
    %566 = arith.divf %564, %565 : vector<1x128xf32>
    %567 = vector.extract_strided_slice %533 {offsets = [0, 128], sizes = [1, 128], strides = [1, 1]} : vector<1x512xf32> to vector<1x128xf32>
    %568 = arith.negf %567 : vector<1x128xf32>
    %569 = math.exp %568 : vector<1x128xf32>
    %cst_207 = arith.constant 1.000000e+00 : f32
    %570 = vector.broadcast %cst_207 : f32 to vector<1x128xf32>
    %571 = arith.addf %570, %569 : vector<1x128xf32>
    %572 = arith.divf %570, %571 : vector<1x128xf32>
    %573 = vector.extract_strided_slice %533 {offsets = [0, 256], sizes = [1, 128], strides = [1, 1]} : vector<1x512xf32> to vector<1x128xf32>
    %574 = math.tanh %573 : vector<1x128xf32>
    %575 = vector.extract_strided_slice %533 {offsets = [0, 384], sizes = [1, 128], strides = [1, 1]} : vector<1x512xf32> to vector<1x128xf32>
    %576 = arith.negf %575 : vector<1x128xf32>
    %577 = math.exp %576 : vector<1x128xf32>
    %cst_208 = arith.constant 1.000000e+00 : f32
    %578 = vector.broadcast %cst_208 : f32 to vector<1x128xf32>
    %579 = arith.addf %578, %577 : vector<1x128xf32>
    %580 = arith.divf %578, %579 : vector<1x128xf32>
    %581 = vector.extract_strided_slice %534 {offsets = [0, 128], sizes = [1, 128], strides = [1, 1]} : vector<1x256xf32> to vector<1x128xf32>
    %582 = arith.mulf %572, %581 : vector<1x128xf32>
    %583 = arith.mulf %566, %574 : vector<1x128xf32>
    %584 = arith.addf %582, %583 : vector<1x128xf32>
    %585 = math.tanh %584 : vector<1x128xf32>
    %586 = arith.mulf %580, %585 : vector<1x128xf32>
    %c0_209 = arith.constant 0 : index
    %c0_210 = arith.constant 0 : index
    %587 = vector.load %arg7[%c0_209, %c0_210] : memref<1x256xf32, #tpu.memory_space<vmem>>, vector<1x128xf32>
    tpu.vector_store %arg7[%c0_209, %c0_210], %560 {strides = array<i32>} : memref<1x256xf32, #tpu.memory_space<vmem>>, vector<1x128xf32>,
    %c0_211 = arith.constant 0 : index
    %c128_212 = arith.constant 128 : index
    %588 = vector.load %arg7[%c0_211, %c128_212] : memref<1x256xf32, #tpu.memory_space<vmem>>, vector<1x128xf32>
    tpu.vector_store %arg7[%c0_211, %c128_212], %586 {strides = array<i32>} : memref<1x256xf32, #tpu.memory_space<vmem>>, vector<1x128xf32>,
    %c0_213 = arith.constant 0 : index
    %c0_214 = arith.constant 0 : index
    %589 = vector.load %arg8[%c0_213, %c0_214] : memref<1x256xf32, #tpu.memory_space<vmem>>, vector<1x128xf32>
    tpu.vector_store %arg8[%c0_213, %c0_214], %558 {strides = array<i32>} : memref<1x256xf32, #tpu.memory_space<vmem>>, vector<1x128xf32>,
    %c0_215 = arith.constant 0 : index
    %c128_216 = arith.constant 128 : index
    %590 = vector.load %arg8[%c0_215, %c128_216] : memref<1x256xf32, #tpu.memory_space<vmem>>, vector<1x128xf32>
    tpu.vector_store %arg8[%c0_215, %c128_216], %584 {strides = array<i32>} : memref<1x256xf32, #tpu.memory_space<vmem>>, vector<1x128xf32>,
    %591 = arith.index_cast %c7_i32_192 : i32 to index
    %c0_217 = arith.constant 0 : index
    %592 = vector.load %arg5[%591, %c0_217] : memref<8x256xf32, #tpu.memory_space<vmem>>, vector<1x128xf32>
    tpu.vector_store %arg5[%591, %c0_217], %560 {strides = array<i32>} : memref<8x256xf32, #tpu.memory_space<vmem>>, vector<1x128xf32>,
    %593 = arith.index_cast %522 : i32 to index
    %c128_218 = arith.constant 128 : index
    %594 = vector.load %arg5[%593, %c128_218] : memref<8x256xf32, #tpu.memory_space<vmem>>, vector<1x128xf32>
    tpu.vector_store %arg5[%593, %c128_218], %586 {strides = array<i32>} : memref<8x256xf32, #tpu.memory_space<vmem>>, vector<1x128xf32>,
    %c8_i32 = arith.constant 8 : i32
    return
  }
  func.func @transform_0(%arg0: i32) -> (i32, i32) {
    %c0_i32 = arith.constant 0 : i32
    %c0_i32_0 = arith.constant 0 : i32
    %c0_i32_1 = arith.constant 0 : i32
    return %c0_i32, %c0_i32_0 : i32, i32
  }
  func.func @transform_1(%arg0: i32) -> (i32, i32) {
    %c0_i32 = arith.constant 0 : i32
    %c0_i32_0 = arith.constant 0 : i32
    %c0_i32_1 = arith.constant 0 : i32
    return %c0_i32, %c0_i32_0 : i32, i32
  }
  func.func @transform_2(%arg0: i32) -> (i32, i32) {
    %c0_i32 = arith.constant 0 : i32
    %c0_i32_0 = arith.constant 0 : i32
    %c0_i32_1 = arith.constant 0 : i32
    return %c0_i32, %c0_i32_0 : i32, i32
  }
  func.func @transform_3(%arg0: i32) -> (i32, i32) {
    %c0_i32 = arith.constant 0 : i32
    %c0_i32_0 = arith.constant 0 : i32
    %c0_i32_1 = arith.constant 0 : i32
    return %c0_i32, %c0_i32_0 : i32, i32
  }
  func.func @transform_4(%arg0: i32) -> (i32, i32) {
    %c0_i32 = arith.constant 0 : i32
    %c0_i32_0 = arith.constant 0 : i32
    %c0_i32_1 = arith.constant 0 : i32
    return %c0_i32, %c0_i32_0 : i32, i32
  }
}

</mosaic_0001>

<bundles_post_ra>
// kernel: tpu_custom_call.1
= control target key start
LH: loop header
LB: loop body
LE: loop exit
PB: predicated region body
PF: predicated region fallthrough
CT: control target
= control target key end

     0   :  { %9 = vsyncpa [#allocation6], 0  ;;  %s6638_s0 = inlined_call_operand.hbm [shape: f32[8,16], index: 0, kind: input, shape index: {}]   ;;  %s6639_s1 = inlined_call_operand.hbm [shape: f32[16,1024], index: 1, kind: input, shape index: {}]   ;;  %s6640_s2 = inlined_call_operand.hbm [shape: f32[256,1024], index: 2, kind: input, shape index: {}]   ;;  %s6641_s3 = inlined_call_operand.hbm [shape: f32[1,1024], index: 3, kind: input, shape index: {}]   ;;  %s6642_s4 = inlined_call_operand.hbm [shape: f32[8,256], index: 4, kind: output, shape index: {}]  }
   0x1   :  { %10 = vsyncpa [#allocation9], 0 }
   0x2   :  { %11 = vsyncpa [#allocation12], 0 }
   0x3   :  { %12 = vsyncpa [#allocation7], 0  ;;  %s6377_s15 = smov [#allocation8]  }
   0x4   :  { %s28_s16 = sshll.u32 %s6377_s15, 4  ;;  %s29_s16 = int_to_ptr.vmem [resolvable:$true] %s28_s16 }
   0x5   :  { %s6277_s17 = scalar_lea.vmem %s29_s16, 2048  ;;  %p6282_p1 = scmp.lt.s32.totalorder %s29_s16, %s29_s16 }
   0x6   :  { %p6278_p0 = scmp.ne.s32.totalorder %s29_s16, %s6277_s17  ;;  %p6283_p2 = scmp.lt.s32.totalorder %s6277_s17, %s6277_s17 }
   0x8   :  { %p6284_p3 = por %p6283_p2, %p6282_p1 }
   0xa   :  { %p6285_p4 = pnand %p6284_p3, %p6278_p0 }
   0xc   :  { %6288 = shalt.err (!%p6285_p4)
}
   0xd   :  { %s6378_s18 = smov 1024   ;;  %s6379_s19 = smov 64  }
   0xe   :  { %34 = dma.hbm_to_vmem [thread:$0]  %s6639_s1, 2048, %s29_s16, [#allocation9], %s6378_s18, %s6378_s18, %s6379_s19  }
   0xf   :  { %s6380_s22 = smov [#allocation5]   ;;  %s6381_s24 = smov [#allocation10]  }
  0x10   :  { %s19_s23 = sshll.u32 %s6380_s22, 4  ;;  %s40_s25 = sshll.u32 %s6381_s24, 4  ;;  %s20_s23 = int_to_ptr.vmem [resolvable:$true] %s19_s23  ;;  %s41_s25 = int_to_ptr.vmem [resolvable:$true] %s40_s25 }
  0x11   :  { %s6297_s26 = scalar_lea.vmem %s20_s23, 128  ;;  %p6302_p6 = scmp.lt.s32.totalorder %s20_s23, %s20_s23 }
  0x12   :  { %p6298_p5 = scmp.ne.s32.totalorder %s20_s23, %s6297_s26  ;;  %p6303_p7 = scmp.lt.s32.totalorder %s6297_s26, %s6297_s26 }
  0x14   :  { %p6304_p8 = por %p6303_p7, %p6302_p6 }
  0x16   :  { %p6305_p9 = pnand %p6304_p8, %p6298_p5 }
  0x18   :  { %6308 = shalt.err (!%p6305_p9)
}
  0x19   :  { %22 = dma.hbm_to_vmem [thread:$0]  %s6638_s0, 128, %s20_s23, [#allocation6]  }
  0x1a   :  { %s6317_s29 = scalar_lea.vmem %s41_s25, 32768  ;;  %p6322_p11 = scmp.lt.s32.totalorder %s41_s25, %s41_s25 }
  0x1b   :  { %p6318_p10 = scmp.ne.s32.totalorder %s41_s25, %s6317_s29  ;;  %p6323_p12 = scmp.lt.s32.totalorder %s6317_s29, %s6317_s29 }
  0x1d   :  { %p6324_p13 = por %p6323_p12, %p6322_p11 }
  0x1f   :  { %p6325_p0 = pnand %p6324_p13, %p6318_p10 }
  0x21   :  { %6328 = shalt.err (!%p6325_p0)
}
  0x22   :  { %46 = dma.hbm_to_vmem [thread:$0]  %s6640_s2, 32768, %s41_s25, [#allocation9], %s6378_s18, %s6378_s18, %s6379_s19  }
  0x23   :  { %s6382_s5 = smov [#allocation11]  }
  0x24   :  { %s53_s6 = sshll.u32 %s6382_s5, 4  ;;  %s54_s6 = int_to_ptr.vmem [resolvable:$true] %s53_s6 }
  0x25   :  { %s6337_s7 = scalar_lea.vmem %s54_s6, 128  ;;  %p6342_p2 = scmp.lt.s32.totalorder %s54_s6, %s54_s6 }
  0x26   :  { %p6338_p1 = scmp.ne.s32.totalorder %s54_s6, %s6337_s7  ;;  %p6343_p3 = scmp.lt.s32.totalorder %s6337_s7, %s6337_s7 }
  0x28   :  { %p6344_p4 = por %p6343_p3, %p6342_p2 }
  0x2a   :  { %p6345_p5 = pnand %p6344_p4, %p6338_p1 }
  0x2c   :  { %6348 = shalt.err (!%p6345_p5)
}
  0x2d   :  { %56 = dma.hbm_to_vmem [thread:$0]  %s6641_s3, 128, %s54_s6, [#allocation12]  }
  0x2e   :  { %6369 = dma.done.wait [#allocation6], 128  }
  0x2f   :  { %6370 = vsyncadd [#allocation6], 4294967168 }
  0x30   :  { %6371 = dma.done.wait [#allocation9], 34816  }
  0x31   :  { %6372 = vsyncadd [#allocation9], 4294932480 }
  0x32   :  { %6373 = dma.done.wait [#allocation12], 128  }
  0x33   :  { %6374 = vsyncadd [#allocation12], 4294967168  ;;  %v88_v0 = vlaneseq  ;;  %v6383_v1 = vmov 0.0   ;;  %v79_v2 = vld [vmem:[#allocation8 + $0x48] sm:$0xff]  ;;  %v81_v3 = vld [vmem:[#allocation8 + $0x58] sm:$0xff]  ;;  %vm128_vm1 = vcmask 130048  }
  0x34   :  { %196 = vmatprep.mubr.f32.mxu0 %v6383_v1  ;;  %267 = vmatprep.mubr.f32.mxu1 %v6383_v1  ;;  %v78_v4 = vld [vmem:[#allocation8 + $0x40] sm:$0xff]  ;;  %v80_v5 = vld [vmem:[#allocation8 + $0x50] sm:$0xff]  ;;  %v71_v6 = vld [vmem:[#allocation8 + $0x8] sm:$0xff]  ;;  %s6385_s2 = smov [#allocation13]  }
  0x35   :  { %vm426_vm0 = vcmp.lt.s32.totalorder %v88_v0, 256  ;;  %160 = vmatprep.subr.mxu0 %v79_v2  ;;  %231 = vmatprep.subr.mxu1 %v81_v3  ;;  %v73_v7 = vld [vmem:[#allocation8 + $0x18] sm:$0xff]  ;;  %v70_v8 = vld [vmem:[#allocation8] sm:$0xff]  ;;  %v72_v9 = vld [vmem:[#allocation8 + $0x10] sm:$0xff]  ;;  %vm6466_vm2 = vcmp.lt.s32.totalorder %v88_v0, 128  ;;  %s5941_s3 = sshll.u32 %s6385_s2, 4  ;;  %s5942_s3 = int_to_ptr.vmem [resolvable:$true] %s5941_s3 }
  0x36   :  { %428 = vst.msk [vmem:[#allocation3] sm:$0x3] %vm426_vm0, %v6383_v1  ;;  %429 = vst.msk [vmem:[#allocation4] sm:$0x3] %vm426_vm0, %v6383_v1  ;;  %161 = vmatpush1.msra.mxu0 %v78_v4  ;;  %232 = vmatpush1.msra.mxu1 %v80_v5  ;;  %v69_v10 = vld [vmem:[#allocation5] sm:$0xff]  ;;  %v83_v11 = vld [vmem:[#allocation8 + $0x68] sm:$0xff]  ;;  %p6354_p7 = scmp.lt.s32.totalorder %s5942_s3, %s5942_s3 }
  0x37   :  { %162 = vmatprep.subr.mxu0 %v71_v6  ;;  %233 = vmatprep.subr.mxu1 %v73_v7  ;;  %v85_v12 = vld [vmem:[#allocation8 + $0x78] sm:$0xff]  ;;  %v82_v13 = vld [vmem:[#allocation8 + $0x60] sm:$0xff]  ;;  %v84_v14 = vld [vmem:[#allocation8 + $0x70] sm:$0xff]  ;;  %s6349_s9 = scalar_lea.vmem %s5942_s3, 256 }
  0x38   :  { %163 = vmatpush1.msra.mxu0 %v70_v8  ;;  %234 = vmatpush1.msra.mxu1 %v72_v9  ;;  %v75_v15 = vld [vmem:[#allocation8 + $0x28] sm:$0xff]  ;;  %v77_v16 = vld [vmem:[#allocation8 + $0x38] sm:$0xff]  ;;  %v74_v17 = vld [vmem:[#allocation8 + $0x20] sm:$0xff]  ;;  %p6350_p6 = scmp.ne.s32.totalorder %s5942_s3, %s6349_s9  ;;  %p6355_p8 = scmp.lt.s32.totalorder %s6349_s9, %s6349_s9 }
  0x39   :  { %5952 = vmatmul.mubr.msk.f32.vlgmr.msra.gmra.mxu0 %vm128_vm1, %v69_v10  ;;  %5953 = vmatmul.mubr.msk.f32.vlgmr.msra.gmra.mxu1 %vm128_vm1, %v69_v10  ;;  %v76_v18 = vld [vmem:[#allocation8 + $0x30] sm:$0xff]  ;;  %v552_v19 = vld [vmem:[#allocation10 + $0x3c8] sm:$0xff]  ;;  %v554_v20 = vld [vmem:[#allocation10 + $0x3d8] sm:$0xff] }
  0x3a   :  { %302 = vmatprep.subr.mxu0 %v83_v11  ;;  %373 = vmatprep.subr.mxu1 %v85_v12  ;;  %v551_v21 = vld [vmem:[#allocation10 + $0x3c0] sm:$0xff]  ;;  %v553_v22 = vld [vmem:[#allocation10 + $0x3d0] sm:$0xff]  ;;  %v544_v23 = vld [vmem:[#allocation10 + $0x388] sm:$0xff]  ;;  %p6356_p9 = por %p6355_p8, %p6354_p7 }
  0x3b   :  { %303 = vmatpush1.msra.mxu0 %v82_v13  ;;  %374 = vmatpush1.msra.mxu1 %v84_v14  ;;  %v546_v24 = vld [vmem:[#allocation10 + $0x398] sm:$0xff]  ;;  %v543_v25 = vld [vmem:[#allocation10 + $0x380] sm:$0xff]  ;;  %v545_v26 = vld [vmem:[#allocation10 + $0x390] sm:$0xff] }
  0x3c   :  { %304 = vmatprep.subr.mxu0 %v75_v15  ;;  %375 = vmatprep.subr.mxu1 %v77_v16  ;;  %v536_v27 = vld [vmem:[#allocation10 + $0x348] sm:$0xff]  ;;  %v538_v28 = vld [vmem:[#allocation10 + $0x358] sm:$0xff]  ;;  %v535_v29 = vld [vmem:[#allocation10 + $0x340] sm:$0xff]  ;;  %p6357_p10 = pnand %p6356_p9, %p6350_p6 }
  0x3d   :  { %305 = vmatpush1.msra.mxu0 %v74_v17  ;;  %338 = vmatprep.mubr.f32.mxu0 %v6383_v1  ;;  %v537_v30 = vld [vmem:[#allocation10 + $0x350] sm:$0xff]  ;;  %v528_v31 = vld [vmem:[#allocation10 + $0x308] sm:$0xff]  ;;  %v530_v32 = vld [vmem:[#allocation10 + $0x318] sm:$0xff] }
  0x3e   :  { %376 = vmatpush1.msra.mxu1 %v76_v18  ;;  %409 = vmatprep.mubr.f32.mxu1 %v6383_v1  ;;  %v527_v33 = vld [vmem:[#allocation10 + $0x300] sm:$0xff]  ;;  %v529_v34 = vld [vmem:[#allocation10 + $0x310] sm:$0xff]  ;;  %v520_v35 = vld [vmem:[#allocation10 + $0x2c8] sm:$0xff] }
  0x3f   :  { %5954 = vmatmul.mubr.msk.f32.vlgmr.msra.gmra.mxu0 %vm128_vm1, %v69_v10  ;;  %5955 = vmatmul.mubr.msk.f32.vlgmr.msra.gmra.mxu1 %vm128_vm1, %v69_v10  ;;  %v522_v36 = vld [vmem:[#allocation10 + $0x2d8] sm:$0xff]  ;;  %v519_v37 = vld [vmem:[#allocation10 + $0x2c0] sm:$0xff]  ;;  %v521_v38 = vld [vmem:[#allocation10 + $0x2d0] sm:$0xff] }
  0x40   :  { %698 = vmatprep.subr.mxu0 %v552_v19  ;;  %769 = vmatprep.subr.mxu1 %v554_v20  ;;  %v512_v39 = vld [vmem:[#allocation10 + $0x288] sm:$0xff]  ;;  %v514_v40 = vld [vmem:[#allocation10 + $0x298] sm:$0xff]  ;;  %v511_v41 = vld [vmem:[#allocation10 + $0x280] sm:$0xff] }
  0x41   :  { %699 = vmatpush1.msra.mxu0 %v551_v21  ;;  %770 = vmatpush1.msra.mxu1 %v553_v22  ;;  %v513_v42 = vld [vmem:[#allocation10 + $0x290] sm:$0xff]  ;;  %v504_v43 = vld [vmem:[#allocation10 + $0x248] sm:$0xff]  ;;  %v506_v44 = vld [vmem:[#allocation10 + $0x258] sm:$0xff] }
  0x42   :  { %700 = vmatprep.subr.mxu0 %v544_v23  ;;  %771 = vmatprep.subr.mxu1 %v546_v24  ;;  %v503_v45 = vld [vmem:[#allocation10 + $0x240] sm:$0xff]  ;;  %v505_v46 = vld [vmem:[#allocation10 + $0x250] sm:$0xff]  ;;  %v496_v47 = vld [vmem:[#allocation10 + $0x208] sm:$0xff] }
  0x43   :  { %701 = vmatpush1.msra.mxu0 %v543_v25  ;;  %772 = vmatpush1.msra.mxu1 %v545_v26  ;;  %v498_v48 = vld [vmem:[#allocation10 + $0x218] sm:$0xff]  ;;  %v495_v49 = vld [vmem:[#allocation10 + $0x200] sm:$0xff]  ;;  %v497_v50 = vld [vmem:[#allocation10 + $0x210] sm:$0xff] }
  0x44   :  { %702 = vmatprep.subr.mxu0 %v536_v27  ;;  %773 = vmatprep.subr.mxu1 %v538_v28  ;;  %v488_v51 = vld [vmem:[#allocation10 + $0x1c8] sm:$0xff]  ;;  %v490_v52 = vld [vmem:[#allocation10 + $0x1d8] sm:$0xff]  ;;  %v487_v53 = vld [vmem:[#allocation10 + $0x1c0] sm:$0xff] }
  0x45   :  { %703 = vmatpush1.msra.mxu0 %v535_v29  ;;  %774 = vmatpush1.msra.mxu1 %v537_v30  ;;  %v489_v54 = vld [vmem:[#allocation10 + $0x1d0] sm:$0xff]  ;;  %v480_v55 = vld [vmem:[#allocation10 + $0x188] sm:$0xff]  ;;  %v482_v56 = vld [vmem:[#allocation10 + $0x198] sm:$0xff] }
  0x46   :  { %704 = vmatprep.subr.mxu0 %v528_v31  ;;  %775 = vmatprep.subr.mxu1 %v530_v32  ;;  %v479_v57 = vld [vmem:[#allocation10 + $0x180] sm:$0xff]  ;;  %v481_v58 = vld [vmem:[#allocation10 + $0x190] sm:$0xff]  ;;  %v472_v59 = vld [vmem:[#allocation10 + $0x148] sm:$0xff] }
  0x47   :  { %705 = vmatpush1.msra.mxu0 %v527_v33  ;;  %776 = vmatpush1.msra.mxu1 %v529_v34  ;;  %v474_v60 = vld [vmem:[#allocation10 + $0x158] sm:$0xff]  ;;  %v471_v61 = vld [vmem:[#allocation10 + $0x140] sm:$0xff]  ;;  %v473_v62 = vld [vmem:[#allocation10 + $0x150] sm:$0xff] }
  0x48   :  { %706 = vmatprep.subr.mxu0 %v520_v35  ;;  %777 = vmatprep.subr.mxu1 %v522_v36  ;;  %v464_v63 = vld [vmem:[#allocation10 + $0x108] sm:$0xff]  ;;  %v466_v1 = vld [vmem:[#allocation10 + $0x118] sm:$0xff]  ;;  %v463_v2 = vld [vmem:[#allocation10 + $0x100] sm:$0xff] }
  0x49   :  { %707 = vmatpush1.msra.mxu0 %v519_v37  ;;  %778 = vmatpush1.msra.mxu1 %v521_v38  ;;  %v465_v3 = vld [vmem:[#allocation10 + $0x110] sm:$0xff]  ;;  %v456_v4 = vld [vmem:[#allocation10 + $0xc8] sm:$0xff]  ;;  %v458_v5 = vld [vmem:[#allocation10 + $0xd8] sm:$0xff] }
  0x4a   :  { %708 = vmatprep.subr.mxu0 %v512_v39  ;;  %779 = vmatprep.subr.mxu1 %v514_v40  ;;  %v455_v6 = vld [vmem:[#allocation10 + $0xc0] sm:$0xff]  ;;  %v457_v7 = vld [vmem:[#allocation10 + $0xd0] sm:$0xff]  ;;  %v448_v8 = vld [vmem:[#allocation10 + $0x88] sm:$0xff] }
  0x4b   :  { %709 = vmatpush1.msra.mxu0 %v511_v41  ;;  %780 = vmatpush1.msra.mxu1 %v513_v42  ;;  %v450_v9 = vld [vmem:[#allocation10 + $0x98] sm:$0xff]  ;;  %v447_v10 = vld [vmem:[#allocation10 + $0x80] sm:$0xff]  ;;  %v449_v11 = vld [vmem:[#allocation10 + $0x90] sm:$0xff] }
  0x4c   :  { %710 = vmatprep.subr.mxu0 %v504_v43  ;;  %781 = vmatprep.subr.mxu1 %v506_v44  ;;  %v440_v12 = vld [vmem:[#allocation10 + $0x48] sm:$0xff]  ;;  %v442_v13 = vld [vmem:[#allocation10 + $0x58] sm:$0xff]  ;;  %v439_v14 = vld [vmem:[#allocation10 + $0x40] sm:$0xff] }
  0x4d   :  { %711 = vmatpush1.msra.mxu0 %v503_v45  ;;  %782 = vmatpush1.msra.mxu1 %v505_v46  ;;  %v441_v15 = vld [vmem:[#allocation10 + $0x50] sm:$0xff]  ;;  %v432_v16 = vld [vmem:[#allocation10 + $0x8] sm:$0xff]  ;;  %v434_v17 = vld [vmem:[#allocation10 + $0x18] sm:$0xff] }
  0x4e   :  { %712 = vmatprep.subr.mxu0 %v496_v47  ;;  %783 = vmatprep.subr.mxu1 %v498_v48  ;;  %v431_v18 = vld [vmem:[#allocation10] sm:$0xff]  ;;  %v433_v19 = vld [vmem:[#allocation10 + $0x10] sm:$0xff]  ;;  %v680_v20 = vld [vmem:[#allocation10 + $0x7c8] sm:$0xff] }
  0x4f   :  { %713 = vmatpush1.msra.mxu0 %v495_v49  ;;  %784 = vmatpush1.msra.mxu1 %v497_v50  ;;  %v682_v21 = vld [vmem:[#allocation10 + $0x7d8] sm:$0xff]  ;;  %v679_v22 = vld [vmem:[#allocation10 + $0x7c0] sm:$0xff]  ;;  %v681_v23 = vld [vmem:[#allocation10 + $0x7d0] sm:$0xff] }
  0x50   :  { %714 = vmatprep.subr.mxu0 %v488_v51  ;;  %785 = vmatprep.subr.mxu1 %v490_v52  ;;  %v672_v24 = vld [vmem:[#allocation10 + $0x788] sm:$0xff]  ;;  %v674_v25 = vld [vmem:[#allocation10 + $0x798] sm:$0xff]  ;;  %v671_v26 = vld [vmem:[#allocation10 + $0x780] sm:$0xff] }
  0x51   :  { %715 = vmatpush1.msra.mxu0 %v487_v53  ;;  %786 = vmatpush1.msra.mxu1 %v489_v54  ;;  %v673_v27 = vld [vmem:[#allocation10 + $0x790] sm:$0xff]  ;;  %v664_v28 = vld [vmem:[#allocation10 + $0x748] sm:$0xff]  ;;  %v666_v29 = vld [vmem:[#allocation10 + $0x758] sm:$0xff] }
  0x52   :  { %716 = vmatprep.subr.mxu0 %v480_v55  ;;  %787 = vmatprep.subr.mxu1 %v482_v56  ;;  %v663_v30 = vld [vmem:[#allocation10 + $0x740] sm:$0xff]  ;;  %v665_v31 = vld [vmem:[#allocation10 + $0x750] sm:$0xff]  ;;  %v656_v32 = vld [vmem:[#allocation10 + $0x708] sm:$0xff] }
  0x53   :  { %717 = vmatpush1.msra.mxu0 %v479_v57  ;;  %788 = vmatpush1.msra.mxu1 %v481_v58  ;;  %v658_v33 = vld [vmem:[#allocation10 + $0x718] sm:$0xff]  ;;  %v655_v34 = vld [vmem:[#allocation10 + $0x700] sm:$0xff]  ;;  %v657_v35 = vld [vmem:[#allocation10 + $0x710] sm:$0xff] }
  0x54   :  { %718 = vmatprep.subr.mxu0 %v472_v59  ;;  %789 = vmatprep.subr.mxu1 %v474_v60  ;;  %v648_v36 = vld [vmem:[#allocation10 + $0x6c8] sm:$0xff]  ;;  %v650_v37 = vld [vmem:[#allocation10 + $0x6d8] sm:$0xff]  ;;  %v647_v38 = vld [vmem:[#allocation10 + $0x6c0] sm:$0xff] }
  0x55   :  { %719 = vmatpush1.msra.mxu0 %v471_v61  ;;  %790 = vmatpush1.msra.mxu1 %v473_v62  ;;  %v649_v39 = vld [vmem:[#allocation10 + $0x6d0] sm:$0xff]  ;;  %v640_v40 = vld [vmem:[#allocation10 + $0x688] sm:$0xff]  ;;  %v642_v41 = vld [vmem:[#allocation10 + $0x698] sm:$0xff] }
  0x56   :  { %720 = vmatprep.subr.mxu0 %v464_v63  ;;  %791 = vmatprep.subr.mxu1 %v466_v1  ;;  %v639_v42 = vld [vmem:[#allocation10 + $0x680] sm:$0xff]  ;;  %v641_v43 = vld [vmem:[#allocation10 + $0x690] sm:$0xff]  ;;  %v632_v44 = vld [vmem:[#allocation10 + $0x648] sm:$0xff]  ;;  %v6429_v1 = vshrl.u32 %v88_v0, 7 }
  0x57   :  { %721 = vmatpush1.msra.mxu0 %v463_v2  ;;  %792 = vmatpush1.msra.mxu1 %v465_v3  ;;  %v634_v45 = vld [vmem:[#allocation10 + $0x658] sm:$0xff]  ;;  %v631_v46 = vld [vmem:[#allocation10 + $0x640] sm:$0xff]  ;;  %v633_v47 = vld [vmem:[#allocation10 + $0x650] sm:$0xff] }
  0x58   :  { %722 = vmatprep.subr.mxu0 %v456_v4  ;;  %793 = vmatprep.subr.mxu1 %v458_v5  ;;  %v624_v48 = vld [vmem:[#allocation10 + $0x608] sm:$0xff]  ;;  %v626_v49 = vld [vmem:[#allocation10 + $0x618] sm:$0xff]  ;;  %v623_v50 = vld [vmem:[#allocation10 + $0x600] sm:$0xff] }
  0x59   :  { %723 = vmatpush1.msra.mxu0 %v455_v6  ;;  %794 = vmatpush1.msra.mxu1 %v457_v7  ;;  %v625_v51 = vld [vmem:[#allocation10 + $0x610] sm:$0xff]  ;;  %v616_v52 = vld [vmem:[#allocation10 + $0x5c8] sm:$0xff]  ;;  %v618_v53 = vld [vmem:[#allocation10 + $0x5d8] sm:$0xff] }
  0x5a   :  { %724 = vmatprep.subr.mxu0 %v448_v8  ;;  %795 = vmatprep.subr.mxu1 %v450_v9  ;;  %v615_v54 = vld [vmem:[#allocation10 + $0x5c0] sm:$0xff]  ;;  %v617_v55 = vld [vmem:[#allocation10 + $0x5d0] sm:$0xff]  ;;  %v608_v56 = vld [vmem:[#allocation10 + $0x588] sm:$0xff] }
  0x5b   :  { %725 = vmatpush1.msra.mxu0 %v447_v10  ;;  %796 = vmatpush1.msra.mxu1 %v449_v11  ;;  %v610_v57 = vld [vmem:[#allocation10 + $0x598] sm:$0xff]  ;;  %v607_v58 = vld [vmem:[#allocation10 + $0x580] sm:$0xff]  ;;  %v609_v59 = vld [vmem:[#allocation10 + $0x590] sm:$0xff] }
  0x5c   :  { %726 = vmatprep.subr.mxu0 %v440_v12  ;;  %797 = vmatprep.subr.mxu1 %v442_v13  ;;  %v600_v60 = vld [vmem:[#allocation10 + $0x548] sm:$0xff]  ;;  %v602_v61 = vld [vmem:[#allocation10 + $0x558] sm:$0xff]  ;;  %v599_v62 = vld [vmem:[#allocation10 + $0x540] sm:$0xff]  ;;  %v6432_v12 = vsub.s32 1, %v6429_v1 }
  0x5d   :  { %727 = vmatpush1.msra.mxu0 %v439_v14  ;;  %798 = vmatpush1.msra.mxu1 %v441_v15  ;;  %v601_v63 = vld [vmem:[#allocation10 + $0x550] sm:$0xff]  ;;  %v592_v2 = vld [vmem:[#allocation10 + $0x508] sm:$0xff]  ;;  %v594_v3 = vld [vmem:[#allocation10 + $0x518] sm:$0xff] }
  0x5e   :  { %728 = vmatprep.subr.mxu0 %v432_v16  ;;  %799 = vmatprep.subr.mxu1 %v434_v17  ;;  %v591_v4 = vld [vmem:[#allocation10 + $0x500] sm:$0xff]  ;;  %v593_v5 = vld [vmem:[#allocation10 + $0x510] sm:$0xff]  ;;  %v584_v6 = vld [vmem:[#allocation10 + $0x4c8] sm:$0xff] }
  0x5f   :  { %729 = vmatpush1.msra.mxu0 %v431_v18  ;;  %800 = vmatpush1.msra.mxu1 %v433_v19  ;;  %v586_v7 = vld [vmem:[#allocation10 + $0x4d8] sm:$0xff]  ;;  %v583_v8 = vld [vmem:[#allocation10 + $0x4c0] sm:$0xff]  ;;  %v585_v9 = vld [vmem:[#allocation10 + $0x4d0] sm:$0xff]  ;;  %v6435_v18 = vsub.s32 0, %v6429_v1 }
  0x60   :  { %730 = vmatprep.subr.mxu0 %v680_v20  ;;  %801 = vmatprep.subr.mxu1 %v682_v21  ;;  %v576_v10 = vld [vmem:[#allocation10 + $0x488] sm:$0xff]  ;;  %v578_v11 = vld [vmem:[#allocation10 + $0x498] sm:$0xff]  ;;  %v430_v13 = vld [vmem:[#allocation3] sm:$0x3] }
  0x61   :  { %731 = vmatpush2.msra.mxu0 %v679_v22  ;;  %802 = vmatpush2.msra.mxu1 %v681_v23  ;;  %v575_v14 = vld [vmem:[#allocation10 + $0x480] sm:$0xff]  ;;  %v577_v15 = vld [vmem:[#allocation10 + $0x490] sm:$0xff]  ;;  %v568_v16 = vld [vmem:[#allocation10 + $0x448] sm:$0xff]  ;;  %v6438_v23 = vrot.slane %v430_v13, %v6432_v12 }
  0x62   :  { %732 = vmatprep.subr.mxu0 %v672_v24  ;;  %803 = vmatprep.subr.mxu1 %v674_v25  ;;  %v570_v17 = vld [vmem:[#allocation10 + $0x458] sm:$0xff]  ;;  %v567_v19 = vld [vmem:[#allocation10 + $0x440] sm:$0xff]  ;;  %v569_v20 = vld [vmem:[#allocation10 + $0x450] sm:$0xff] }
  0x63   :  { %733 = vmatpush2.msra.mxu0 %v671_v26  ;;  %804 = vmatpush2.msra.mxu1 %v673_v27  ;;  %v560_v21 = vld [vmem:[#allocation10 + $0x408] sm:$0xff]  ;;  %v562_v22 = vld [vmem:[#allocation10 + $0x418] sm:$0xff]  ;;  %v559_v24 = vld [vmem:[#allocation10 + $0x400] sm:$0xff]  ;;  %v6441_v26 = vrot.slane %v430_v13, %v6435_v18 }
  0x64   :  { %734 = vmatprep.subr.mxu0 %v664_v28  ;;  %805 = vmatprep.subr.mxu1 %v666_v29  ;;  %v561_v25 = vld [vmem:[#allocation10 + $0x410] sm:$0xff]  ;;  %v556_v27 = vld [vmem:[#allocation10 + $0x3e8] sm:$0xff]  ;;  %v558_v28 = vld [vmem:[#allocation10 + $0x3f8] sm:$0xff] }
  0x65   :  { %735 = vmatpush2.msra.mxu0 %v663_v30  ;;  %806 = vmatpush2.msra.mxu1 %v665_v31  ;;  %v555_v29 = vld [vmem:[#allocation10 + $0x3e0] sm:$0xff]  ;;  %v557_v30 = vld [vmem:[#allocation10 + $0x3f0] sm:$0xff]  ;;  %v548_v31 = vld [vmem:[#allocation10 + $0x3a8] sm:$0xff] }
  0x66   :  { %736 = vmatprep.subr.mxu0 %v656_v32  ;;  %807 = vmatprep.subr.mxu1 %v658_v33  ;;  %v550_v32 = vld [vmem:[#allocation10 + $0x3b8] sm:$0xff]  ;;  %v547_v33 = vld [vmem:[#allocation10 + $0x3a0] sm:$0xff]  ;;  %v469_v13 = vld [vmem:[#allocation10 + $0x130] sm:$0xff] }
  0x67   :  { %737 = vmatpush2.msra.mxu0 %v655_v34  ;;  %808 = vmatpush2.msra.mxu1 %v657_v35  ;;  %v549_v34 = vld [vmem:[#allocation10 + $0x3b0] sm:$0xff]  ;;  %v540_v35 = vld [vmem:[#allocation10 + $0x368] sm:$0xff] }
  0x68   :  { %738 = vmatprep.subr.mxu0 %v648_v36  ;;  %809 = vmatprep.subr.mxu1 %v650_v37  ;;  %v542_v36 = vld [vmem:[#allocation10 + $0x378] sm:$0xff]  ;;  %v539_v37 = vld [vmem:[#allocation10 + $0x360] sm:$0xff] }
  0x69   :  { %739 = vmatpush2.msra.mxu0 %v647_v38  ;;  %810 = vmatpush2.msra.mxu1 %v649_v39  ;;  %v541_v38 = vld [vmem:[#allocation10 + $0x370] sm:$0xff]  ;;  %v532_v39 = vld [vmem:[#allocation10 + $0x328] sm:$0xff] }
  0x6a   :  { %740 = vmatprep.subr.mxu0 %v640_v40  ;;  %811 = vmatprep.subr.mxu1 %v642_v41  ;;  %v534_v40 = vld [vmem:[#allocation10 + $0x338] sm:$0xff]  ;;  %v531_v41 = vld [vmem:[#allocation10 + $0x320] sm:$0xff] }
  0x6b   :  { %741 = vmatpush2.msra.mxu0 %v639_v42  ;;  %812 = vmatpush2.msra.mxu1 %v641_v43  ;;  %v533_v42 = vld [vmem:[#allocation10 + $0x330] sm:$0xff]  ;;  %v524_v43 = vld [vmem:[#allocation10 + $0x2e8] sm:$0xff] }
  0x6c   :  { %742 = vmatprep.subr.mxu0 %v632_v44  ;;  %813 = vmatprep.subr.mxu1 %v634_v45  ;;  %v526_v44 = vld [vmem:[#allocation10 + $0x2f8] sm:$0xff]  ;;  %v523_v45 = vld [vmem:[#allocation10 + $0x2e0] sm:$0xff] }
  0x6d   :  { %743 = vmatpush2.msra.mxu0 %v631_v46  ;;  %814 = vmatpush2.msra.mxu1 %v633_v47  ;;  %v525_v46 = vld [vmem:[#allocation10 + $0x2f0] sm:$0xff]  ;;  %v516_v47 = vld [vmem:[#allocation10 + $0x2a8] sm:$0xff] }
  0x6e   :  { %744 = vmatprep.subr.mxu0 %v624_v48  ;;  %815 = vmatprep.subr.mxu1 %v626_v49  ;;  %v518_v48 = vld [vmem:[#allocation10 + $0x2b8] sm:$0xff]  ;;  %v515_v49 = vld [vmem:[#allocation10 + $0x2a0] sm:$0xff] }
  0x6f   :  { %745 = vmatpush2.msra.mxu0 %v623_v50  ;;  %816 = vmatpush2.msra.mxu1 %v625_v51  ;;  %v517_v50 = vld [vmem:[#allocation10 + $0x2b0] sm:$0xff]  ;;  %v508_v51 = vld [vmem:[#allocation10 + $0x268] sm:$0xff] }
  0x70   :  { %746 = vmatprep.subr.mxu0 %v616_v52  ;;  %817 = vmatprep.subr.mxu1 %v618_v53  ;;  %v510_v52 = vld [vmem:[#allocation10 + $0x278] sm:$0xff]  ;;  %v507_v53 = vld [vmem:[#allocation10 + $0x260] sm:$0xff] }
  0x71   :  { %747 = vmatpush2.msra.mxu0 %v615_v54  ;;  %818 = vmatpush2.msra.mxu1 %v617_v55  ;;  %v509_v54 = vld [vmem:[#allocation10 + $0x270] sm:$0xff]  ;;  %v500_v55 = vld [vmem:[#allocation10 + $0x228] sm:$0xff] }
  0x72   :  { %748 = vmatprep.subr.mxu0 %v608_v56  ;;  %819 = vmatprep.subr.mxu1 %v610_v57  ;;  %v502_v56 = vld [vmem:[#allocation10 + $0x238] sm:$0xff]  ;;  %v499_v57 = vld [vmem:[#allocation10 + $0x220] sm:$0xff] }
  0x73   :  { %749 = vmatpush2.msra.mxu0 %v607_v58  ;;  %820 = vmatpush2.msra.mxu1 %v609_v59  ;;  %v501_v58 = vld [vmem:[#allocation10 + $0x230] sm:$0xff]  ;;  %v492_v59 = vld [vmem:[#allocation10 + $0x1e8] sm:$0xff] }
  0x74   :  { %750 = vmatprep.subr.mxu0 %v600_v60  ;;  %821 = vmatprep.subr.mxu1 %v602_v61  ;;  %v494_v60 = vld [vmem:[#allocation10 + $0x1f8] sm:$0xff]  ;;  %v491_v61 = vld [vmem:[#allocation10 + $0x1e0] sm:$0xff] }
  0x75   :  { %751 = vmatpush2.msra.mxu0 %v599_v62  ;;  %822 = vmatpush2.msra.mxu1 %v601_v63  ;;  %v493_v62 = vld [vmem:[#allocation10 + $0x1f0] sm:$0xff]  ;;  %v484_v63 = vld [vmem:[#allocation10 + $0x1a8] sm:$0xff] }
  0x76   :  { %752 = vmatprep.subr.mxu0 %v592_v2  ;;  %823 = vmatprep.subr.mxu1 %v594_v3  ;;  %v486_v2 = vld [vmem:[#allocation10 + $0x1b8] sm:$0xff]  ;;  %v483_v3 = vld [vmem:[#allocation10 + $0x1a0] sm:$0xff] }
  0x77   :  { %753 = vmatpush2.msra.mxu0 %v591_v4  ;;  %824 = vmatpush2.msra.mxu1 %v593_v5  ;;  %v485_v4 = vld [vmem:[#allocation10 + $0x1b0] sm:$0xff]  ;;  %v476_v5 = vld [vmem:[#allocation10 + $0x168] sm:$0xff] }
  0x78   :  { %754 = vmatprep.subr.mxu0 %v584_v6  ;;  %825 = vmatprep.subr.mxu1 %v586_v7  ;;  %v478_v6 = vld [vmem:[#allocation10 + $0x178] sm:$0xff]  ;;  %v475_v7 = vld [vmem:[#allocation10 + $0x160] sm:$0xff] }
  0x79   :  { %755 = vmatpush2.msra.mxu0 %v583_v8  ;;  %826 = vmatpush2.msra.mxu1 %v585_v9  ;;  %v477_v8 = vld [vmem:[#allocation10 + $0x170] sm:$0xff]  ;;  %v468_v9 = vld [vmem:[#allocation10 + $0x128] sm:$0xff] }
  0x7a   :  { %756 = vmatprep.subr.mxu0 %v576_v10  ;;  %827 = vmatprep.subr.mxu1 %v578_v11  ;;  %v470_v10 = vld [vmem:[#allocation10 + $0x138] sm:$0xff]  ;;  %v467_v11 = vld [vmem:[#allocation10 + $0x120] sm:$0xff] }
  0x7b   :  { %757 = vmatpush2.msra.mxu0 %v575_v14  ;;  %828 = vmatpush2.msra.mxu1 %v577_v15  ;;  %v460_v14 = vld [vmem:[#allocation10 + $0xe8] sm:$0xff]  ;;  %v462_v15 = vld [vmem:[#allocation10 + $0xf8] sm:$0xff] }
  0x7c   :  { %758 = vmatprep.subr.mxu0 %v568_v16  ;;  %829 = vmatprep.subr.mxu1 %v570_v17  ;;  %v459_v16 = vld [vmem:[#allocation10 + $0xe0] sm:$0xff]  ;;  %v461_v17 = vld [vmem:[#allocation10 + $0xf0] sm:$0xff] }
  0x7d   :  { %759 = vmatpush2.msra.mxu0 %v567_v19  ;;  %830 = vmatpush2.msra.mxu1 %v569_v20  ;;  %v452_v19 = vld [vmem:[#allocation10 + $0xa8] sm:$0xff]  ;;  %v454_v20 = vld [vmem:[#allocation10 + $0xb8] sm:$0xff] }
  0x7e   :  { %760 = vmatprep.subr.mxu0 %v560_v21  ;;  %831 = vmatprep.subr.mxu1 %v562_v22  ;;  %v451_v21 = vld [vmem:[#allocation10 + $0xa0] sm:$0xff]  ;;  %v453_v22 = vld [vmem:[#allocation10 + $0xb0] sm:$0xff] }
  0x7f   :  { %761 = vmatpush2.msra.mxu0 %v559_v24  ;;  %762 = vmatprep.mubr.f32.mxu0 %v6438_v23  ;;  %v444_v24 = vld [vmem:[#allocation10 + $0x68] sm:$0xff] }
  0x80   :  { %832 = vmatpush2.msra.mxu1 %v561_v25  ;;  %833 = vmatprep.mubr.f32.mxu1 %v6438_v23  ;;  %v446_v25 = vld [vmem:[#allocation10 + $0x78] sm:$0xff] }
  0x81   :  { %763 = vmatmul.mubr.f32.vlgmr.msra.gmra.mxu0 %v6441_v26  ;;  %834 = vmatmul.mubr.f32.vlgmr.msra.gmra.mxu1 %v6441_v26 }
  0x82   :  { %840 = vmatprep.subr.mxu0 %v556_v27  ;;  %911 = vmatprep.subr.mxu1 %v558_v28  ;;  %v443_v27 = vld [vmem:[#allocation10 + $0x60] sm:$0xff]  ;;  %v445_v28 = vld [vmem:[#allocation10 + $0x70] sm:$0xff] }
  0x83   :  { %841 = vmatpush1.msra.mxu0 %v555_v29  ;;  %912 = vmatpush1.msra.mxu1 %v557_v30  ;;  %v436_v29 = vld [vmem:[#allocation10 + $0x28] sm:$0xff]  ;;  %v438_v30 = vld [vmem:[#allocation10 + $0x38] sm:$0xff] }
  0x84   :  { %842 = vmatprep.subr.mxu0 %v548_v31  ;;  %913 = vmatprep.subr.mxu1 %v550_v32  ;;  %v435_v31 = vld [vmem:[#allocation10 + $0x20] sm:$0xff]  ;;  %v437_v32 = vld [vmem:[#allocation10 + $0x30] sm:$0xff] }
  0x85   :  { %843 = vmatpush1.msra.mxu0 %v547_v33  ;;  %914 = vmatpush1.msra.mxu1 %v549_v34  ;;  %v684_v33 = vld [vmem:[#allocation10 + $0x7e8] sm:$0xff]  ;;  %v686_v34 = vld [vmem:[#allocation10 + $0x7f8] sm:$0xff] }
  0x86   :  { %844 = vmatprep.subr.mxu0 %v540_v35  ;;  %915 = vmatprep.subr.mxu1 %v542_v36  ;;  %v683_v35 = vld [vmem:[#allocation10 + $0x7e0] sm:$0xff]  ;;  %v685_v36 = vld [vmem:[#allocation10 + $0x7f0] sm:$0xff] }
  0x87   :  { %845 = vmatpush1.msra.mxu0 %v539_v37  ;;  %916 = vmatpush1.msra.mxu1 %v541_v38  ;;  %v676_v37 = vld [vmem:[#allocation10 + $0x7a8] sm:$0xff]  ;;  %v678_v38 = vld [vmem:[#allocation10 + $0x7b8] sm:$0xff] }
  0x88   :  { %846 = vmatprep.subr.mxu0 %v532_v39  ;;  %917 = vmatprep.subr.mxu1 %v534_v40  ;;  %v675_v39 = vld [vmem:[#allocation10 + $0x7a0] sm:$0xff]  ;;  %v677_v40 = vld [vmem:[#allocation10 + $0x7b0] sm:$0xff] }
  0x89   :  { %847 = vmatpush1.msra.mxu0 %v531_v41  ;;  %918 = vmatpush1.msra.mxu1 %v533_v42  ;;  %v668_v41 = vld [vmem:[#allocation10 + $0x768] sm:$0xff]  ;;  %v670_v42 = vld [vmem:[#allocation10 + $0x778] sm:$0xff] }
  0x8a   :  { %848 = vmatprep.subr.mxu0 %v524_v43  ;;  %919 = vmatprep.subr.mxu1 %v526_v44  ;;  %v667_v43 = vld [vmem:[#allocation10 + $0x760] sm:$0xff]  ;;  %v669_v44 = vld [vmem:[#allocation10 + $0x770] sm:$0xff] }
  0x8b   :  { %849 = vmatpush1.msra.mxu0 %v523_v45  ;;  %920 = vmatpush1.msra.mxu1 %v525_v46  ;;  %v660_v45 = vld [vmem:[#allocation10 + $0x728] sm:$0xff]  ;;  %v662_v46 = vld [vmem:[#allocation10 + $0x738] sm:$0xff] }
  0x8c   :  { %850 = vmatprep.subr.mxu0 %v516_v47  ;;  %921 = vmatprep.subr.mxu1 %v518_v48  ;;  %v659_v47 = vld [vmem:[#allocation10 + $0x720] sm:$0xff]  ;;  %v661_v48 = vld [vmem:[#allocation10 + $0x730] sm:$0xff] }
  0x8d   :  { %851 = vmatpush1.msra.mxu0 %v515_v49  ;;  %922 = vmatpush1.msra.mxu1 %v517_v50  ;;  %v652_v49 = vld [vmem:[#allocation10 + $0x6e8] sm:$0xff]  ;;  %v654_v50 = vld [vmem:[#allocation10 + $0x6f8] sm:$0xff] }
  0x8e   :  { %852 = vmatprep.subr.mxu0 %v508_v51  ;;  %923 = vmatprep.subr.mxu1 %v510_v52  ;;  %v651_v51 = vld [vmem:[#allocation10 + $0x6e0] sm:$0xff]  ;;  %v653_v52 = vld [vmem:[#allocation10 + $0x6f0] sm:$0xff] }
  0x8f   :  { %853 = vmatpush1.msra.mxu0 %v507_v53  ;;  %924 = vmatpush1.msra.mxu1 %v509_v54  ;;  %v644_v53 = vld [vmem:[#allocation10 + $0x6a8] sm:$0xff]  ;;  %v646_v54 = vld [vmem:[#allocation10 + $0x6b8] sm:$0xff] }
  0x90   :  { %854 = vmatprep.subr.mxu0 %v500_v55  ;;  %925 = vmatprep.subr.mxu1 %v502_v56  ;;  %v643_v55 = vld [vmem:[#allocation10 + $0x6a0] sm:$0xff]  ;;  %v645_v56 = vld [vmem:[#allocation10 + $0x6b0] sm:$0xff] }
  0x91   :  { %855 = vmatpush1.msra.mxu0 %v499_v57  ;;  %926 = vmatpush1.msra.mxu1 %v501_v58  ;;  %v636_v57 = vld [vmem:[#allocation10 + $0x668] sm:$0xff]  ;;  %v638_v58 = vld [vmem:[#allocation10 + $0x678] sm:$0xff] }
  0x92   :  { %856 = vmatprep.subr.mxu0 %v492_v59  ;;  %927 = vmatprep.subr.mxu1 %v494_v60  ;;  %v635_v59 = vld [vmem:[#allocation10 + $0x660] sm:$0xff]  ;;  %v637_v60 = vld [vmem:[#allocation10 + $0x670] sm:$0xff] }
  0x93   :  { %857 = vmatpush1.msra.mxu0 %v491_v61  ;;  %928 = vmatpush1.msra.mxu1 %v493_v62  ;;  %v628_v61 = vld [vmem:[#allocation10 + $0x628] sm:$0xff]  ;;  %v630_v62 = vld [vmem:[#allocation10 + $0x638] sm:$0xff] }
  0x94   :  { %858 = vmatprep.subr.mxu0 %v484_v63  ;;  %929 = vmatprep.subr.mxu1 %v486_v2  ;;  %v627_v63 = vld [vmem:[#allocation10 + $0x620] sm:$0xff]  ;;  %v629_v2 = vld [vmem:[#allocation10 + $0x630] sm:$0xff] }
  0x95   :  { %859 = vmatpush1.msra.mxu0 %v483_v3  ;;  %930 = vmatpush1.msra.mxu1 %v485_v4  ;;  %v620_v3 = vld [vmem:[#allocation10 + $0x5e8] sm:$0xff]  ;;  %v622_v4 = vld [vmem:[#allocation10 + $0x5f8] sm:$0xff] }
  0x96   :  { %860 = vmatprep.subr.mxu0 %v476_v5  ;;  %931 = vmatprep.subr.mxu1 %v478_v6  ;;  %v619_v5 = vld [vmem:[#allocation10 + $0x5e0] sm:$0xff]  ;;  %v621_v6 = vld [vmem:[#allocation10 + $0x5f0] sm:$0xff] }
  0x97   :  { %861 = vmatpush1.msra.mxu0 %v475_v7  ;;  %932 = vmatpush1.msra.mxu1 %v477_v8  ;;  %v612_v7 = vld [vmem:[#allocation10 + $0x5a8] sm:$0xff]  ;;  %v614_v8 = vld [vmem:[#allocation10 + $0x5b8] sm:$0xff] }
  0x98   :  { %862 = vmatprep.subr.mxu0 %v468_v9  ;;  %933 = vmatprep.subr.mxu1 %v470_v10  ;;  %v611_v9 = vld [vmem:[#allocation10 + $0x5a0] sm:$0xff]  ;;  %v613_v10 = vld [vmem:[#allocation10 + $0x5b0] sm:$0xff] }
  0x99   :  { %863 = vmatpush1.msra.mxu0 %v467_v11  ;;  %934 = vmatpush1.msra.mxu1 %v469_v13  ;;  %v604_v11 = vld [vmem:[#allocation10 + $0x568] sm:$0xff]  ;;  %v606_v13 = vld [vmem:[#allocation10 + $0x578] sm:$0xff] }
  0x9a   :  { %864 = vmatprep.subr.mxu0 %v460_v14  ;;  %935 = vmatprep.subr.mxu1 %v462_v15  ;;  %v603_v14 = vld [vmem:[#allocation10 + $0x560] sm:$0xff]  ;;  %v605_v15 = vld [vmem:[#allocation10 + $0x570] sm:$0xff] }
  0x9b   :  { %865 = vmatpush1.msra.mxu0 %v459_v16  ;;  %936 = vmatpush1.msra.mxu1 %v461_v17  ;;  %v596_v16 = vld [vmem:[#allocation10 + $0x528] sm:$0xff]  ;;  %v598_v17 = vld [vmem:[#allocation10 + $0x538] sm:$0xff] }
  0x9c   :  { %866 = vmatprep.subr.mxu0 %v452_v19  ;;  %937 = vmatprep.subr.mxu1 %v454_v20  ;;  %v595_v19 = vld [vmem:[#allocation10 + $0x520] sm:$0xff]  ;;  %v597_v20 = vld [vmem:[#allocation10 + $0x530] sm:$0xff] }
  0x9d   :  { %867 = vmatpush1.msra.mxu0 %v451_v21  ;;  %938 = vmatpush1.msra.mxu1 %v453_v22  ;;  %v588_v21 = vld [vmem:[#allocation10 + $0x4e8] sm:$0xff]  ;;  %v590_v22 = vld [vmem:[#allocation10 + $0x4f8] sm:$0xff] }
  0x9e   :  { %868 = vmatprep.subr.mxu0 %v444_v24  ;;  %939 = vmatprep.subr.mxu1 %v446_v25  ;;  %v587_v24 = vld [vmem:[#allocation10 + $0x4e0] sm:$0xff]  ;;  %v589_v25 = vld [vmem:[#allocation10 + $0x4f0] sm:$0xff] }
  0x9f   :  { %869 = vmatpush1.msra.mxu0 %v443_v27  ;;  %940 = vmatpush1.msra.mxu1 %v445_v28  ;;  %v580_v27 = vld [vmem:[#allocation10 + $0x4a8] sm:$0xff]  ;;  %v582_v28 = vld [vmem:[#allocation10 + $0x4b8] sm:$0xff] }
  0xa0   :  { %870 = vmatprep.subr.mxu0 %v436_v29  ;;  %941 = vmatprep.subr.mxu1 %v438_v30  ;;  %v579_v29 = vld [vmem:[#allocation10 + $0x4a0] sm:$0xff]  ;;  %v581_v30 = vld [vmem:[#allocation10 + $0x4b0] sm:$0xff] }
  0xa1   :  { %871 = vmatpush1.msra.mxu0 %v435_v31  ;;  %942 = vmatpush1.msra.mxu1 %v437_v32  ;;  %v572_v31 = vld [vmem:[#allocation10 + $0x468] sm:$0xff]  ;;  %v574_v32 = vld [vmem:[#allocation10 + $0x478] sm:$0xff] }
  0xa2   :  { %872 = vmatprep.subr.mxu0 %v684_v33  ;;  %943 = vmatprep.subr.mxu1 %v686_v34  ;;  %v571_v33 = vld [vmem:[#allocation10 + $0x460] sm:$0xff]  ;;  %v573_v34 = vld [vmem:[#allocation10 + $0x470] sm:$0xff] }
  0xa3   :  { %873 = vmatpush2.msra.mxu0 %v683_v35  ;;  %944 = vmatpush2.msra.mxu1 %v685_v36  ;;  %v564_v35 = vld [vmem:[#allocation10 + $0x428] sm:$0xff]  ;;  %v566_v36 = vld [vmem:[#allocation10 + $0x438] sm:$0xff] }
  0xa4   :  { %874 = vmatprep.subr.mxu0 %v676_v37  ;;  %945 = vmatprep.subr.mxu1 %v678_v38  ;;  %v563_v37 = vld [vmem:[#allocation10 + $0x420] sm:$0xff]  ;;  %v565_v38 = vld [vmem:[#allocation10 + $0x430] sm:$0xff] }
  0xa5   :  { %875 = vmatpush2.msra.mxu0 %v675_v39  ;;  %946 = vmatpush2.msra.mxu1 %v677_v40  ;;  %v98_v39 = vsub.s32 2, %v6429_v1  ;;  %v86_v40 = vld [vmem:[#allocation11] sm:$0xff] }
  0xa6   :  { %876 = vmatprep.subr.mxu0 %v668_v41  ;;  %947 = vmatprep.subr.mxu1 %v670_v42  ;;  %v102_v41 = vsub.s32 3, %v6429_v1  ;;  %v91_v42 = vrot.slane %v86_v40, %v6435_v18 }
  0xa7   :  { %877 = vmatpush2.msra.mxu0 %v667_v43  ;;  %948 = vmatpush2.msra.mxu1 %v669_v44  ;;  %v99_v43 = vrot.slane %v86_v40, %v98_v39  ;;  %v95_v44 = vrot.slane %v86_v40, %v6432_v12  ;;  %v1187_v39 = vld [vmem:[#allocation10 + $0x218] sm:$0xff] }
  0xa8   :  { %878 = vmatprep.subr.mxu0 %v660_v45  ;;  %949 = vmatprep.subr.mxu1 %v662_v46  ;;  %v103_v45 = vrot.slane %v86_v40, %v102_v41  ;;  %v106_v46 = vsub.s32 4, %v6429_v1  ;;  %v1186_v41 = vld [vmem:[#allocation10 + $0x210] sm:$0xff] }
  0xa9   :  { %879 = vmatpush2.msra.mxu0 %v659_v47  ;;  %950 = vmatpush2.msra.mxu1 %v661_v48  ;;  %v114_v47 = vsub.s32 6, %v6429_v1 }
  0xaa   :  { %880 = vmatprep.subr.mxu0 %v652_v49  ;;  %951 = vmatprep.subr.mxu1 %v654_v50 }
  0xab   :  { %881 = vmatpush2.msra.mxu0 %v651_v51  ;;  %952 = vmatpush2.msra.mxu1 %v653_v52  ;;  %v118_v51 = vsub.s32 7, %v6429_v1 }
  0xac   :  { %882 = vmatprep.subr.mxu0 %v644_v53  ;;  %953 = vmatprep.subr.mxu1 %v646_v54 }
  0xad   :  { %883 = vmatpush2.msra.mxu0 %v643_v55  ;;  %954 = vmatpush2.msra.mxu1 %v645_v56  ;;  %v107_v56 = vrot.slane %v86_v40, %v106_v46  ;;  %v1169_v46 = vld [vmem:[#allocation10 + $0x188] sm:$0xff] }
  0xae   :  { %884 = vmatprep.subr.mxu0 %v636_v57  ;;  %955 = vmatprep.subr.mxu1 %v638_v58  ;;  %v115_v57 = vrot.slane %v86_v40, %v114_v47  ;;  %v1171_v47 = vld [vmem:[#allocation10 + $0x198] sm:$0xff] }
  0xaf   :  { %885 = vmatpush2.msra.mxu0 %v635_v59  ;;  %956 = vmatpush2.msra.mxu1 %v637_v60  ;;  %v119_v59 = vrot.slane %v86_v40, %v118_v51  ;;  %v1162_v51 = vld [vmem:[#allocation10 + $0x150] sm:$0xff] }
  0xb0   :  { %886 = vmatprep.subr.mxu0 %v628_v61  ;;  %957 = vmatprep.subr.mxu1 %v630_v62 }
  0xb1   :  { %887 = vmatpush2.msra.mxu0 %v627_v63  ;;  %958 = vmatpush2.msra.mxu1 %v629_v2 }
  0xb2   :  { %888 = vmatprep.subr.mxu0 %v620_v3  ;;  %959 = vmatprep.subr.mxu1 %v622_v4 }
  0xb3   :  { %889 = vmatpush2.msra.mxu0 %v619_v5  ;;  %960 = vmatpush2.msra.mxu1 %v621_v6  ;;  %v1241_v6 = vld [vmem:[#allocation10 + $0x3c8] sm:$0xff] }
  0xb4   :  { %890 = vmatprep.subr.mxu0 %v612_v7  ;;  %961 = vmatprep.subr.mxu1 %v614_v8  ;;  %v1243_v7 = vld [vmem:[#allocation10 + $0x3d8] sm:$0xff]  ;;  %v1240_v8 = vld [vmem:[#allocation10 + $0x3c0] sm:$0xff] }
  0xb5   :  { %891 = vmatpush2.msra.mxu0 %v611_v9  ;;  %962 = vmatpush2.msra.mxu1 %v613_v10  ;;  %v1242_v9 = vld [vmem:[#allocation10 + $0x3d0] sm:$0xff]  ;;  %v1233_v10 = vld [vmem:[#allocation10 + $0x388] sm:$0xff] }
  0xb6   :  { %892 = vmatprep.subr.mxu0 %v604_v11  ;;  %963 = vmatprep.subr.mxu1 %v606_v13  ;;  %v1235_v11 = vld [vmem:[#allocation10 + $0x398] sm:$0xff]  ;;  %v1232_v13 = vld [vmem:[#allocation10 + $0x380] sm:$0xff] }
  0xb7   :  { %893 = vmatpush2.msra.mxu0 %v603_v14  ;;  %964 = vmatpush2.msra.mxu1 %v605_v15  ;;  %v1234_v14 = vld [vmem:[#allocation10 + $0x390] sm:$0xff]  ;;  %v1225_v15 = vld [vmem:[#allocation10 + $0x348] sm:$0xff] }
  0xb8   :  { %894 = vmatprep.subr.mxu0 %v596_v16  ;;  %965 = vmatprep.subr.mxu1 %v598_v17  ;;  %v1227_v16 = vld [vmem:[#allocation10 + $0x358] sm:$0xff]  ;;  %v1224_v17 = vld [vmem:[#allocation10 + $0x340] sm:$0xff] }
  0xb9   :  { %895 = vmatpush2.msra.mxu0 %v595_v19  ;;  %966 = vmatpush2.msra.mxu1 %v597_v20  ;;  %v1226_v19 = vld [vmem:[#allocation10 + $0x350] sm:$0xff]  ;;  %v1217_v20 = vld [vmem:[#allocation10 + $0x308] sm:$0xff] }
  0xba   :  { %896 = vmatprep.subr.mxu0 %v588_v21  ;;  %967 = vmatprep.subr.mxu1 %v590_v22  ;;  %v1219_v21 = vld [vmem:[#allocation10 + $0x318] sm:$0xff]  ;;  %v1216_v22 = vld [vmem:[#allocation10 + $0x300] sm:$0xff] }
  0xbb   :  { %897 = vmatpush2.msra.mxu0 %v587_v24  ;;  %968 = vmatpush2.msra.mxu1 %v589_v25  ;;  %v1218_v24 = vld [vmem:[#allocation10 + $0x310] sm:$0xff]  ;;  %v1209_v25 = vld [vmem:[#allocation10 + $0x2c8] sm:$0xff] }
  0xbc   :  { %898 = vmatprep.subr.mxu0 %v580_v27  ;;  %969 = vmatprep.subr.mxu1 %v582_v28  ;;  %v1211_v27 = vld [vmem:[#allocation10 + $0x2d8] sm:$0xff]  ;;  %v1208_v28 = vld [vmem:[#allocation10 + $0x2c0] sm:$0xff] }
  0xbd   :  { %899 = vmatpush2.msra.mxu0 %v579_v29  ;;  %970 = vmatpush2.msra.mxu1 %v581_v30  ;;  %v1210_v29 = vld [vmem:[#allocation10 + $0x2d0] sm:$0xff]  ;;  %v1201_v30 = vld [vmem:[#allocation10 + $0x288] sm:$0xff] }
  0xbe   :  { %900 = vmatprep.subr.mxu0 %v572_v31  ;;  %971 = vmatprep.subr.mxu1 %v574_v32  ;;  %v1203_v31 = vld [vmem:[#allocation10 + $0x298] sm:$0xff]  ;;  %v1200_v32 = vld [vmem:[#allocation10 + $0x280] sm:$0xff] }
  0xbf   :  { %901 = vmatpush2.msra.mxu0 %v571_v33  ;;  %972 = vmatpush2.msra.mxu1 %v573_v34  ;;  %v1202_v33 = vld [vmem:[#allocation10 + $0x290] sm:$0xff]  ;;  %v1193_v34 = vld [vmem:[#allocation10 + $0x248] sm:$0xff] }
  0xc0   :  { %902 = vmatprep.subr.mxu0 %v564_v35  ;;  %973 = vmatprep.subr.mxu1 %v566_v36  ;;  %v1195_v35 = vld [vmem:[#allocation10 + $0x258] sm:$0xff]  ;;  %v1192_v36 = vld [vmem:[#allocation10 + $0x240] sm:$0xff] }
  0xc1   :  { %903 = vmatpush2.msra.mxu0 %v563_v37  ;;  %904 = vmatprep.mubr.f32.mxu0 %v6438_v23  ;;  %v1194_v37 = vld [vmem:[#allocation10 + $0x250] sm:$0xff] }
  0xc2   :  { %974 = vmatpush2.msra.mxu1 %v565_v38  ;;  %975 = vmatprep.mubr.f32.mxu1 %v6438_v23  ;;  %v1185_v38 = vld [vmem:[#allocation10 + $0x208] sm:$0xff] }
  0xc3   :  { %905 = vmatmul.mubr.f32.vlgmr.msra.gmra.mxu0 %v6441_v26  ;;  %976 = vmatmul.mubr.f32.vlgmr.msra.gmra.mxu1 %v6441_v26  ;;  %v110_v26 = vsub.s32 5, %v6429_v1 }
  0xc4   :  { %1387 = vmatprep.subr.mxu0 %v1241_v6  ;;  %1458 = vmatprep.subr.mxu1 %v1243_v7  ;;  %v1121_v6 = vld [vmem:[#allocation10 + $0x8] sm:$0xff]  ;;  %v1123_v7 = vld [vmem:[#allocation10 + $0x18] sm:$0xff] }
  0xc5   :  { %v111_v58 = vrot.slane %v86_v40, %v110_v26  ;;  %1388 = vmatpush1.msra.mxu0 %v1240_v8  ;;  %1459 = vmatpush1.msra.mxu1 %v1242_v9  ;;  %v1184_v40 = vld [vmem:[#allocation10 + $0x200] sm:$0xff]  ;;  %v1122_v9 = vld [vmem:[#allocation10 + $0x10] sm:$0xff] }
  0xc6   :  { %1389 = vmatprep.subr.mxu0 %v1233_v10  ;;  %1460 = vmatprep.subr.mxu1 %v1235_v11  ;;  %v1160_v26 = vld [vmem:[#allocation10 + $0x140] sm:$0xff]  ;;  %v1369_v10 = vld [vmem:[#allocation10 + $0x7c8] sm:$0xff]  ;;  %v1371_v11 = vld [vmem:[#allocation10 + $0x7d8] sm:$0xff] }
  0xc7   :  { %1390 = vmatpush1.msra.mxu0 %v1232_v13  ;;  %1461 = vmatpush1.msra.mxu1 %v1234_v14  ;;  %v1120_v8 = vld [vmem:[#allocation10] sm:$0xff]  ;;  %v1370_v14 = vld [vmem:[#allocation10 + $0x7d0] sm:$0xff] }
  0xc8   :  { %1391 = vmatprep.subr.mxu0 %v1225_v15  ;;  %1462 = vmatprep.subr.mxu1 %v1227_v16  ;;  %v1368_v13 = vld [vmem:[#allocation10 + $0x7c0] sm:$0xff]  ;;  %v1361_v15 = vld [vmem:[#allocation10 + $0x788] sm:$0xff]  ;;  %v1363_v16 = vld [vmem:[#allocation10 + $0x798] sm:$0xff] }
  0xc9   :  { %1392 = vmatpush1.msra.mxu0 %v1224_v17  ;;  %1463 = vmatpush1.msra.mxu1 %v1226_v19  ;;  %v1360_v17 = vld [vmem:[#allocation10 + $0x780] sm:$0xff]  ;;  %v1362_v19 = vld [vmem:[#allocation10 + $0x790] sm:$0xff] }
  0xca   :  { %1393 = vmatprep.subr.mxu0 %v1217_v20  ;;  %1464 = vmatprep.subr.mxu1 %v1219_v21  ;;  %v1353_v20 = vld [vmem:[#allocation10 + $0x748] sm:$0xff]  ;;  %v1355_v21 = vld [vmem:[#allocation10 + $0x758] sm:$0xff] }
  0xcb   :  { %1394 = vmatpush1.msra.mxu0 %v1216_v22  ;;  %1465 = vmatpush1.msra.mxu1 %v1218_v24  ;;  %v1352_v22 = vld [vmem:[#allocation10 + $0x740] sm:$0xff]  ;;  %v1354_v24 = vld [vmem:[#allocation10 + $0x750] sm:$0xff] }
  0xcc   :  { %1395 = vmatprep.subr.mxu0 %v1209_v25  ;;  %1466 = vmatprep.subr.mxu1 %v1211_v27  ;;  %v1345_v25 = vld [vmem:[#allocation10 + $0x708] sm:$0xff]  ;;  %v1347_v27 = vld [vmem:[#allocation10 + $0x718] sm:$0xff] }
  0xcd   :  { %1396 = vmatpush1.msra.mxu0 %v1208_v28  ;;  %1467 = vmatpush1.msra.mxu1 %v1210_v29  ;;  %v1344_v28 = vld [vmem:[#allocation10 + $0x700] sm:$0xff]  ;;  %v1346_v29 = vld [vmem:[#allocation10 + $0x710] sm:$0xff] }
  0xce   :  { %1397 = vmatprep.subr.mxu0 %v1201_v30  ;;  %1468 = vmatprep.subr.mxu1 %v1203_v31  ;;  %v1337_v30 = vld [vmem:[#allocation10 + $0x6c8] sm:$0xff]  ;;  %v1339_v31 = vld [vmem:[#allocation10 + $0x6d8] sm:$0xff] }
  0xcf   :  { %1398 = vmatpush1.msra.mxu0 %v1200_v32  ;;  %1469 = vmatpush1.msra.mxu1 %v1202_v33  ;;  %v1336_v32 = vld [vmem:[#allocation10 + $0x6c0] sm:$0xff]  ;;  %v1338_v33 = vld [vmem:[#allocation10 + $0x6d0] sm:$0xff] }
  0xd0   :  { %1399 = vmatprep.subr.mxu0 %v1193_v34  ;;  %1470 = vmatprep.subr.mxu1 %v1195_v35  ;;  %v6384_v34 = vmov 1966171168  }
  0xd1   :  { %1400 = vmatpush1.msra.mxu0 %v1192_v36  ;;  %1471 = vmatpush1.msra.mxu1 %v1194_v37  ;;  %v990_v35 = vunpack.c.l.s4 %v6384_v34  ;;  %v1329_v36 = vld [vmem:[#allocation10 + $0x688] sm:$0xff]  ;;  %v1331_v37 = vld [vmem:[#allocation10 + $0x698] sm:$0xff] }
  0xd2   :  { %1401 = vmatprep.subr.mxu0 %v1185_v38  ;;  %1472 = vmatprep.subr.mxu1 %v1187_v39  ;;  %v1328_v38 = vld [vmem:[#allocation10 + $0x680] sm:$0xff]  ;;  %v1330_v39 = vld [vmem:[#allocation10 + $0x690] sm:$0xff] }
  0xd3   :  { %1402 = vmatpush1.msra.mxu0 %v1184_v40  ;;  %1473 = vmatpush1.msra.mxu1 %v1186_v41  ;;  %v1321_v40 = vld [vmem:[#allocation10 + $0x648] sm:$0xff]  ;;  %v1323_v41 = vld [vmem:[#allocation10 + $0x658] sm:$0xff] }
  0xf9   :  { %v198_v23 = vpop.f32.mrf.mxu0  ;;  %v269_v48 = vpop.f32.mrf.mxu1 }
  0xfa   :  { %v199_v49 = vadd.f32 %v198_v23, %v91_v42  ;;  %v270_v50 = vadd.f32 %v269_v48, %v99_v43  ;;  %v1177_v42 = vld [vmem:[#allocation10 + $0x1c8] sm:$0xff]  ;;  %v1179_v43 = vld [vmem:[#allocation10 + $0x1d8] sm:$0xff]  ;;  %v1168_v23 = vld [vmem:[#allocation10 + $0x180] sm:$0xff] }
  0xfb   :  { %v200_v52 = vpop.f32.mrf.mxu0  ;;  %v271_v53 = vpop.f32.mrf.mxu1  ;;  %1403 = vmatprep.subr.mxu0 %v1177_v42  ;;  %1474 = vmatprep.subr.mxu1 %v1179_v43  ;;  %v1170_v48 = vld [vmem:[#allocation10 + $0x190] sm:$0xff]  ;;  %v1320_v42 = vld [vmem:[#allocation10 + $0x640] sm:$0xff] }
  0xfc   :  { %416 = vst [vmem:[#allocation2] sm:$0xff] %v199_v49  ;;  %418 = vst [vmem:[#allocation2 + $0x10] sm:$0xff] %v270_v50  ;;  %v201_v54 = vadd.f32 %v200_v52, %v95_v44  ;;  %v272_v55 = vadd.f32 %v271_v53, %v103_v45  ;;  %v1176_v44 = vld [vmem:[#allocation10 + $0x1c0] sm:$0xff]  ;;  %v1178_v45 = vld [vmem:[#allocation10 + $0x1d0] sm:$0xff] }
  0xfd   :  { %1404 = vmatpush1.msra.mxu0 %v1176_v44  ;;  %1475 = vmatpush1.msra.mxu1 %v1178_v45  ;;  %v1161_v49 = vld [vmem:[#allocation10 + $0x148] sm:$0xff]  ;;  %v1163_v50 = vld [vmem:[#allocation10 + $0x158] sm:$0xff]  ;;  %v1322_v43 = vld [vmem:[#allocation10 + $0x650] sm:$0xff]  ;;  %v991_v44 = vunpack.c.0.s8 %v990_v35 }
  0xfe   :  { %417 = vst [vmem:[#allocation2 + $0x8] sm:$0xff] %v201_v54  ;;  %419 = vst [vmem:[#allocation2 + $0x18] sm:$0xff] %v272_v55  ;;  %1405 = vmatprep.subr.mxu0 %v1169_v46  ;;  %1476 = vmatprep.subr.mxu1 %v1171_v47  ;;  %v1153_v52 = vld [vmem:[#allocation10 + $0x108] sm:$0xff]  ;;  %v1155_v53 = vld [vmem:[#allocation10 + $0x118] sm:$0xff] }
  0xff   :  { %v340_v60 = vpop.f32.mrf.mxu0  ;;  %v411_v61 = vpop.f32.mrf.mxu1  ;;  %1406 = vmatpush1.msra.mxu0 %v1168_v23  ;;  %1477 = vmatpush1.msra.mxu1 %v1170_v48  ;;  %v1152_v54 = vld [vmem:[#allocation10 + $0x100] sm:$0xff]  ;;  %v1154_v55 = vld [vmem:[#allocation10 + $0x110] sm:$0xff]  ;;  %v1313_v45 = vld [vmem:[#allocation10 + $0x608] sm:$0xff] }
 0x100   :  { %v341_v62 = vadd.f32 %v340_v60, %v107_v56  ;;  %v412_v63 = vadd.f32 %v411_v61, %v115_v57  ;;  %1407 = vmatprep.subr.mxu0 %v1161_v49  ;;  %1478 = vmatprep.subr.mxu1 %v1163_v50  ;;  %v1145_v56 = vld [vmem:[#allocation10 + $0xc8] sm:$0xff]  ;;  %v1147_v57 = vld [vmem:[#allocation10 + $0xd8] sm:$0xff]  ;;  %v1312_v47 = vld [vmem:[#allocation10 + $0x600] sm:$0xff] }
 0x101   :  { %v342_v2 = vpop.f32.mrf.mxu0  ;;  %v413_v3 = vpop.f32.mrf.mxu1  ;;  %1408 = vmatpush1.msra.mxu0 %v1160_v26  ;;  %1479 = vmatpush1.msra.mxu1 %v1162_v51  ;;  %v1137_v60 = vld [vmem:[#allocation10 + $0x88] sm:$0xff]  ;;  %v1139_v61 = vld [vmem:[#allocation10 + $0x98] sm:$0xff]  ;;  %v1314_v23 = vld [vmem:[#allocation10 + $0x610] sm:$0xff] }
 0x102   :  { %420 = vst [vmem:[#allocation2 + $0x20] sm:$0xff] %v341_v62  ;;  %422 = vst [vmem:[#allocation2 + $0x30] sm:$0xff] %v412_v63  ;;  %v343_v4 = vadd.f32 %v342_v2, %v111_v58  ;;  %v414_v5 = vadd.f32 %v413_v3, %v119_v59  ;;  %1409 = vmatprep.subr.mxu0 %v1153_v52  ;;  %1480 = vmatprep.subr.mxu1 %v1155_v53  ;;  %v1144_v58 = vld [vmem:[#allocation10 + $0xc0] sm:$0xff]  ;;  %v1146_v59 = vld [vmem:[#allocation10 + $0xd0] sm:$0xff] }
 0x103   :  { %1410 = vmatpush1.msra.mxu0 %v1152_v54  ;;  %1481 = vmatpush1.msra.mxu1 %v1154_v55  ;;  %v1136_v62 = vld [vmem:[#allocation10 + $0x80] sm:$0xff]  ;;  %v1138_v63 = vld [vmem:[#allocation10 + $0x90] sm:$0xff]  ;;  %v1129_v2 = vld [vmem:[#allocation10 + $0x48] sm:$0xff]  ;;  %v6460_v53 = vsub.s32 %v991_v44, %v6429_v1 }
 0x104   :  { %421 = vst [vmem:[#allocation2 + $0x28] sm:$0xff] %v343_v4  ;;  %423 = vst [vmem:[#allocation2 + $0x38] sm:$0xff] %v414_v5  ;;  %1411 = vmatprep.subr.mxu0 %v1145_v56  ;;  %1482 = vmatprep.subr.mxu1 %v1147_v57  ;;  %v1131_v3 = vld [vmem:[#allocation10 + $0x58] sm:$0xff]  ;;  %v1128_v4 = vld [vmem:[#allocation10 + $0x40] sm:$0xff] }
 0x105   :  { %1412 = vmatpush1.msra.mxu0 %v1144_v58  ;;  %1483 = vmatpush1.msra.mxu1 %v1146_v59  ;;  %v1130_v5 = vld [vmem:[#allocation10 + $0x50] sm:$0xff]  ;;  %v1315_v46 = vld [vmem:[#allocation10 + $0x618] sm:$0xff]  ;;  %v1305_v48 = vld [vmem:[#allocation10 + $0x5c8] sm:$0xff] }
 0x106   :  { %1413 = vmatprep.subr.mxu0 %v1137_v60  ;;  %1484 = vmatprep.subr.mxu1 %v1139_v61  ;;  %v1307_v49 = vld [vmem:[#allocation10 + $0x5d8] sm:$0xff]  ;;  %v1304_v51 = vld [vmem:[#allocation10 + $0x5c0] sm:$0xff]  ;;  %v1306_v52 = vld [vmem:[#allocation10 + $0x5d0] sm:$0xff] }
 0x107   :  { %1414 = vmatpush1.msra.mxu0 %v1136_v62  ;;  %1485 = vmatpush1.msra.mxu1 %v1138_v63  ;;  %v1297_v54 = vld [vmem:[#allocation10 + $0x588] sm:$0xff]  ;;  %v1299_v55 = vld [vmem:[#allocation10 + $0x598] sm:$0xff]  ;;  %v1296_v58 = vld [vmem:[#allocation10 + $0x580] sm:$0xff] }
 0x108   :  { %1415 = vmatprep.subr.mxu0 %v1129_v2  ;;  %1486 = vmatprep.subr.mxu1 %v1131_v3  ;;  %v1298_v59 = vld [vmem:[#allocation10 + $0x590] sm:$0xff]  ;;  %v1289_v62 = vld [vmem:[#allocation10 + $0x548] sm:$0xff]  ;;  %v1291_v63 = vld [vmem:[#allocation10 + $0x558] sm:$0xff] }
 0x109   :  { %1416 = vmatpush1.msra.mxu0 %v1128_v4  ;;  %1487 = vmatpush1.msra.mxu1 %v1130_v5  ;;  %v1288_v1 = vld [vmem:[#allocation10 + $0x540] sm:$0xff]  ;;  %v1290_v2 = vld [vmem:[#allocation10 + $0x550] sm:$0xff]  ;;  %v1281_v5 = vld [vmem:[#allocation10 + $0x508] sm:$0xff] }
 0x10a   :  { %1417 = vmatprep.subr.mxu0 %v1121_v6  ;;  %1488 = vmatprep.subr.mxu1 %v1123_v7  ;;  %v1283_v6 = vld [vmem:[#allocation10 + $0x518] sm:$0xff]  ;;  %v1280_v7 = vld [vmem:[#allocation10 + $0x500] sm:$0xff] }
 0x10b   :  { %1418 = vmatpush1.msra.mxu0 %v1120_v8  ;;  %1489 = vmatpush1.msra.mxu1 %v1122_v9  ;;  %v1282_v8 = vld [vmem:[#allocation10 + $0x510] sm:$0xff]  ;;  %v1273_v9 = vld [vmem:[#allocation10 + $0x4c8] sm:$0xff] }
 0x10c   :  { %1419 = vmatprep.subr.mxu0 %v1369_v10  ;;  %1490 = vmatprep.subr.mxu1 %v1371_v11  ;;  %v1275_v10 = vld [vmem:[#allocation10 + $0x4d8] sm:$0xff] }
 0x10d   :  { %1420 = vmatpush2.msra.mxu0 %v1368_v13  ;;  %1491 = vmatpush2.msra.mxu1 %v1370_v14  ;;  %v1272_v13 = vld [vmem:[#allocation10 + $0x4c0] sm:$0xff]  ;;  %v1274_v14 = vld [vmem:[#allocation10 + $0x4d0] sm:$0xff] }
 0x10e   :  { %1421 = vmatprep.subr.mxu0 %v1361_v15  ;;  %1492 = vmatprep.subr.mxu1 %v1363_v16  ;;  %v1265_v15 = vld [vmem:[#allocation10 + $0x488] sm:$0xff]  ;;  %v1267_v16 = vld [vmem:[#allocation10 + $0x498] sm:$0xff] }
 0x10f   :  { %1422 = vmatpush2.msra.mxu0 %v1360_v17  ;;  %1493 = vmatpush2.msra.mxu1 %v1362_v19  ;;  %v1264_v17 = vld [vmem:[#allocation10 + $0x480] sm:$0xff]  ;;  %v1266_v19 = vld [vmem:[#allocation10 + $0x490] sm:$0xff] }
 0x110   :  { %1423 = vmatprep.subr.mxu0 %v1353_v20  ;;  %1494 = vmatprep.subr.mxu1 %v1355_v21  ;;  %v1257_v21 = vld [vmem:[#allocation10 + $0x448] sm:$0xff] }
 0x111   :  { %1424 = vmatpush2.msra.mxu0 %v1352_v22  ;;  %1495 = vmatpush2.msra.mxu1 %v1354_v24  ;;  %v1259_v22 = vld [vmem:[#allocation10 + $0x458] sm:$0xff] }
 0x112   :  { %1425 = vmatprep.subr.mxu0 %v1345_v25  ;;  %1496 = vmatprep.subr.mxu1 %v1347_v27  ;;  %v982_v24 = vld [vmem:[#allocation2] ss:$8 sm:$0xf] }
 0x113   :  { %1426 = vmatpush2.msra.mxu0 %v1344_v28  ;;  %1497 = vmatpush2.msra.mxu1 %v1346_v29  ;;  %v1256_v25 = vld [vmem:[#allocation10 + $0x440] sm:$0xff]  ;;  %v1258_v27 = vld [vmem:[#allocation10 + $0x450] sm:$0xff]  ;;  %v1249_v29 = vld [vmem:[#allocation10 + $0x408] sm:$0xff] }
 0x114   :  { %1427 = vmatprep.subr.mxu0 %v1337_v30  ;;  %1498 = vmatprep.subr.mxu1 %v1339_v31  ;;  %v1251_v30 = vld [vmem:[#allocation10 + $0x418] sm:$0xff]  ;;  %v1248_v31 = vld [vmem:[#allocation10 + $0x400] sm:$0xff] }
 0x115   :  { %1428 = vmatpush2.msra.mxu0 %v1336_v32  ;;  %1499 = vmatpush2.msra.mxu1 %v1338_v33  ;;  %v1250_v32 = vld [vmem:[#allocation10 + $0x410] sm:$0xff] }
 0x116   :  { %1429 = vmatprep.subr.mxu0 %v1329_v36  ;;  %1500 = vmatprep.subr.mxu1 %v1331_v37  ;;  %v1245_v36 = vld [vmem:[#allocation10 + $0x3e8] sm:$0xff]  ;;  %v1247_v37 = vld [vmem:[#allocation10 + $0x3f8] sm:$0xff] }
 0x117   :  { %1430 = vmatpush2.msra.mxu0 %v1328_v38  ;;  %1501 = vmatpush2.msra.mxu1 %v1330_v39 }
 0x118   :  { %1431 = vmatprep.subr.mxu0 %v1321_v40  ;;  %1502 = vmatprep.subr.mxu1 %v1323_v41 }
 0x119   :  { %1432 = vmatpush2.msra.mxu0 %v1320_v42  ;;  %1503 = vmatpush2.msra.mxu1 %v1322_v43 }
 0x11a   :  { %1433 = vmatprep.subr.mxu0 %v1313_v45  ;;  %1504 = vmatprep.subr.mxu1 %v1315_v46 }
 0x11b   :  { %1434 = vmatpush2.msra.mxu0 %v1312_v47  ;;  %1505 = vmatpush2.msra.mxu1 %v1314_v23  ;;  %v1045_v47 = vld [vmem:[#allocation4] sm:$0x3] }
 0x11c   :  { %1435 = vmatprep.subr.mxu0 %v1305_v48  ;;  %1506 = vmatprep.subr.mxu1 %v1307_v49 }
 0x11d   :  { %1436 = vmatpush2.msra.mxu0 %v1304_v51  ;;  %1507 = vmatpush2.msra.mxu1 %v1306_v52 }
 0x11e   :  { %1437 = vmatprep.subr.mxu0 %v1297_v54  ;;  %1508 = vmatprep.subr.mxu1 %v1299_v55 }
 0x11f   :  { %1438 = vmatpush2.msra.mxu0 %v1296_v58  ;;  %1509 = vmatpush2.msra.mxu1 %v1298_v59 }
 0x120   :  { %1439 = vmatprep.subr.mxu0 %v1289_v62  ;;  %1510 = vmatprep.subr.mxu1 %v1291_v63 }
 0x121   :  { %1440 = vmatpush2.msra.mxu0 %v1288_v1  ;;  %1511 = vmatpush2.msra.mxu1 %v1290_v2 }
 0x122   :  { %1441 = vmatprep.subr.mxu0 %v1281_v5  ;;  %1512 = vmatprep.subr.mxu1 %v1283_v6 }
 0x123   :  { %1442 = vmatpush2.msra.mxu0 %v1280_v7  ;;  %1513 = vmatpush2.msra.mxu1 %v1282_v8 }
 0x124   :  { %1443 = vmatprep.subr.mxu0 %v1273_v9  ;;  %1514 = vmatprep.subr.mxu1 %v1275_v10 }
 0x125   :  { %1444 = vmatpush2.msra.mxu0 %v1272_v13  ;;  %1515 = vmatpush2.msra.mxu1 %v1274_v14 }
 0x126   :  { %1445 = vmatprep.subr.mxu0 %v1265_v15  ;;  %1516 = vmatprep.subr.mxu1 %v1267_v16 }
 0x127   :  { %1446 = vmatpush2.msra.mxu0 %v1264_v17  ;;  %1517 = vmatpush2.msra.mxu1 %v1266_v19  ;;  %v1104_v17 = vrot.slane %v1045_v47, 1 }
 0x128   :  { %1447 = vmatprep.subr.mxu0 %v1257_v21  ;;  %1518 = vmatprep.subr.mxu1 %v1259_v22 }
 0x129   :  { %1448 = vmatpush2.msra.mxu0 %v1256_v25  ;;  %1519 = vmatpush2.msra.mxu1 %v1258_v27 }
 0x12a   :  { %1449 = vmatprep.subr.mxu0 %v1249_v29  ;;  %1520 = vmatprep.subr.mxu1 %v1251_v30 }
 0x12b   :  { %1450 = vmatpush2.msra.mxu0 %v1248_v31  ;;  %1521 = vmatpush2.msra.mxu1 %v1250_v32 }
 0x12c   :  { %1529 = vmatprep.subr.mxu0 %v1245_v36  ;;  %1600 = vmatprep.subr.mxu1 %v1247_v37  ;;  %v1237_v36 = vld [vmem:[#allocation10 + $0x3a8] sm:$0xff]  ;;  %v1239_v37 = vld [vmem:[#allocation10 + $0x3b8] sm:$0xff] }
 0x141   :  { %v764_v50 = vpop.f32.mrf.mxu0  ;;  %v835_v26 = vpop.f32.mrf.mxu1 }
 0x143   :  { %v766_v56 = vpop.f32.mrf.mxu0  ;;  %v837_v57 = vpop.f32.mrf.mxu1 }
 0x144   :  { %v987_v60 = vcombine.low %v764_v50, %v766_v56  ;;  %v988_v61 = vcombine.low %v835_v26, %v837_v57 }
 0x146   :  { %v995_v3 = vrot.slane %v987_v60, %v6460_v53  ;;  %v1002_v4 = vrot.slane %v988_v61, %v6460_v53 }
 0x148   :  { %v1003_v11 = vcombine.low %v995_v3, %v1002_v4  ;;  %v1014_v3 = vld [vmem:[#allocation2 + $0x27] ss:$8 sm:$0xf] }
 0x14a   :  { %v1010_v20 = vrot.slane %v1003_v11, %v6460_v53 }
 0x14c   :  { %v1012_v28 = vadd.f32 %v1010_v20, %v982_v24 }
 0x14e   :  { %v5956_v33 = vmul.f32 -1.442695, %v1012_v28  ;;  %v1053_v34 = vrot.slane %v1012_v28, 1  ;;  %v1064_v38 = vrot.slane %v1012_v28, 3  ;;  %v1061_v41 = vrot.slane %v1012_v28, 2 }
 0x150   :  { %6013 = vpow2.f32 %v5956_v33  ;;  %v5957_v35 = vmul.f32 -1.442695, %v1053_v34  ;;  %v5958_v39 = vmul.f32 -1.442695, %v1064_v38  ;;  %v1244_v34 = vld [vmem:[#allocation10 + $0x3e0] sm:$0xff] }
 0x151   :  { %v1236_v38 = vld [vmem:[#allocation10 + $0x3a0] sm:$0xff] }
 0x152   :  { %6015 = vpow2.f32 %v5957_v35  ;;  %v1246_v35 = vld [vmem:[#allocation10 + $0x3f0] sm:$0xff] }
 0x153   :  { %6017 = vpow2.f32 %v5958_v39  ;;  %v1238_v39 = vld [vmem:[#allocation10 + $0x3b0] sm:$0xff] }
 0x15d   :  { %v6014_v40 = vpop.eup %6013 }
 0x15e   :  { %v1049_v42 = vadd.f32 1.0, %v6014_v40  ;;  %v1229_v40 = vld [vmem:[#allocation10 + $0x368] sm:$0xff] }
 0x15f   :  { %v6016_v43 = vpop.eup %6015 }
 0x160   :  { %6019 = vrcp.f32 %v1049_v42  ;;  %v1058_v44 = vadd.f32 1.0, %v6016_v43  ;;  %v6018_v45 = vpop.eup %6017  ;;  %v1228_v42 = vld [vmem:[#allocation10 + $0x360] sm:$0xff]  ;;  %v1230_v43 = vld [vmem:[#allocation10 + $0x370] sm:$0xff] }
 0x161   :  { %6021 = vtanh.f32 %v1061_v41  ;;  %v1069_v49 = vadd.f32 1.0, %v6018_v45  ;;  %v1231_v41 = vld [vmem:[#allocation10 + $0x378] sm:$0xff] }
 0x162   :  { %6023 = vrcp.f32 %v1058_v44  ;;  %v1221_v44 = vld [vmem:[#allocation10 + $0x328] sm:$0xff]  ;;  %v1223_v45 = vld [vmem:[#allocation10 + $0x338] sm:$0xff] }
 0x163   :  { %6025 = vrcp.f32 %v1069_v49  ;;  %v1212_v49 = vld [vmem:[#allocation10 + $0x2e0] sm:$0xff] }
 0x16d   :  { %v6020_v46 = vpop.eup %6019 }
 0x16e   :  { %v6022_v23 = vpop.eup %6021 }
 0x16f   :  { %v6024_v48 = vpop.eup %6023  ;;  %v1073_v26 = vmul.f32 %v6022_v23, %v6020_v46  ;;  %v1220_v46 = vld [vmem:[#allocation10 + $0x320] sm:$0xff]  ;;  %v1213_v23 = vld [vmem:[#allocation10 + $0x2e8] sm:$0xff] }
 0x170   :  { %v1072_v50 = vmul.f32 %v6024_v48, %v1045_v47  ;;  %v6026_v54 = vpop.eup %6025  ;;  %v1222_v47 = vld [vmem:[#allocation10 + $0x330] sm:$0xff]  ;;  %v1215_v48 = vld [vmem:[#allocation10 + $0x2f8] sm:$0xff] }
 0x172   :  { %v1074_v52 = vadd.f32 %v1073_v26, %v1072_v50  ;;  %v1214_v50 = vld [vmem:[#allocation10 + $0x2f0] sm:$0xff]  ;;  %v1205_v26 = vld [vmem:[#allocation10 + $0x2a8] sm:$0xff] }
 0x174   :  { %6027 = vtanh.f32 %v1074_v52  ;;  %1115 = vst.msk [vmem:[#allocation4] sm:$0x1] %vm6466_vm2, %v1074_v52  ;;  %v1207_v52 = vld [vmem:[#allocation10 + $0x2b8] sm:$0xff] }
 0x181   :  { %v6028_v55 = vpop.eup %6027 }
 0x182   :  { %v1076_v56 = vmul.f32 %v6028_v55, %v6026_v54  ;;  %v1204_v54 = vld [vmem:[#allocation10 + $0x2a0] sm:$0xff]  ;;  %v1206_v55 = vld [vmem:[#allocation10 + $0x2b0] sm:$0xff] }
 0x183   :  { %v906_v57 = vpop.f32.mrf.mxu0  ;;  %v977_v58 = vpop.f32.mrf.mxu1 }
 0x184   :  { %1113 = vst.msk [vmem:[#allocation3] sm:$0x1] %vm6466_vm2, %v1076_v56  ;;  %1117 = vst [vmem:[#allocation13] sm:$0x1] %v1076_v56  ;;  %v1197_v56 = vld [vmem:[#allocation10 + $0x268] sm:$0xff] }
 0x185   :  { %v908_v59 = vpop.f32.mrf.mxu0  ;;  %v979_v0 = vpop.f32.mrf.mxu1 }
 0x186   :  { %v1019_v60 = vcombine.low %v906_v57, %v908_v59  ;;  %v1020_v61 = vcombine.low %v977_v58, %v979_v0  ;;  %v1199_v57 = vld [vmem:[#allocation10 + $0x278] sm:$0xff]  ;;  %v1196_v58 = vld [vmem:[#allocation10 + $0x260] sm:$0xff]  ;;  %v1198_v59 = vld [vmem:[#allocation10 + $0x270] sm:$0xff] }
 0x187   :  { %v1189_v0 = vld [vmem:[#allocation10 + $0x228] sm:$0xff] }
 0x188   :  { %v1027_v62 = vrot.slane %v1019_v60, %v6460_v53  ;;  %v1034_v63 = vrot.slane %v1020_v61, %v6460_v53  ;;  %v1191_v60 = vld [vmem:[#allocation10 + $0x238] sm:$0xff]  ;;  %v1188_v61 = vld [vmem:[#allocation10 + $0x220] sm:$0xff] }
 0x18a   :  { %v1035_v1 = vcombine.low %v1027_v62, %v1034_v63  ;;  %v1190_v62 = vld [vmem:[#allocation10 + $0x230] sm:$0xff]  ;;  %v1181_v63 = vld [vmem:[#allocation10 + $0x1e8] sm:$0xff] }
 0x18c   :  { %v1042_v2 = vrot.slane %v1035_v1, %v6460_v53  ;;  %v1183_v1 = vld [vmem:[#allocation10 + $0x1f8] sm:$0xff] }
 0x18e   :  { %v1044_v4 = vadd.f32 %v1042_v2, %v1014_v3  ;;  %v1180_v2 = vld [vmem:[#allocation10 + $0x1e0] sm:$0xff]  ;;  %v1182_v3 = vld [vmem:[#allocation10 + $0x1f0] sm:$0xff] }
 0x190   :  { %v5959_v5 = vmul.f32 -1.442695, %v1044_v4  ;;  %v1084_v6 = vrot.slane %v1044_v4, 1  ;;  %v1095_v8 = vrot.slane %v1044_v4, 3  ;;  %v1092_v11 = vrot.slane %v1044_v4, 2  ;;  %v1173_v4 = vld [vmem:[#allocation10 + $0x1a8] sm:$0xff] }
 0x192   :  { %6029 = vpow2.f32 %v5959_v5  ;;  %v5960_v7 = vmul.f32 -1.442695, %v1084_v6  ;;  %v5961_v9 = vmul.f32 -1.442695, %v1095_v8  ;;  %v1175_v5 = vld [vmem:[#allocation10 + $0x1b8] sm:$0xff]  ;;  %v1172_v6 = vld [vmem:[#allocation10 + $0x1a0] sm:$0xff] }
 0x193   :  { %v1165_v8 = vld [vmem:[#allocation10 + $0x168] sm:$0xff] }
 0x194   :  { %6031 = vpow2.f32 %v5960_v7  ;;  %v1174_v7 = vld [vmem:[#allocation10 + $0x1b0] sm:$0xff] }
 0x195   :  { %6033 = vpow2.f32 %v5961_v9  ;;  %v1167_v9 = vld [vmem:[#allocation10 + $0x178] sm:$0xff] }
 0x19f   :  { %v6030_v10 = vpop.eup %6029 }
 0x1a0   :  { %v1080_v13 = vadd.f32 1.0, %v6030_v10  ;;  %v1164_v10 = vld [vmem:[#allocation10 + $0x160] sm:$0xff] }
 0x1a1   :  { %v6032_v14 = vpop.eup %6031 }
 0x1a2   :  { %6035 = vrcp.f32 %v1080_v13  ;;  %v1089_v15 = vadd.f32 1.0, %v6032_v14  ;;  %v6034_v16 = vpop.eup %6033  ;;  %v1157_v13 = vld [vmem:[#allocation10 + $0x128] sm:$0xff]  ;;  %v1159_v14 = vld [vmem:[#allocation10 + $0x138] sm:$0xff] }
 0x1a3   :  { %6037 = vtanh.f32 %v1092_v11  ;;  %v1100_v22 = vadd.f32 1.0, %v6034_v16  ;;  %v1166_v11 = vld [vmem:[#allocation10 + $0x170] sm:$0xff] }
 0x1a4   :  { %6039 = vrcp.f32 %v1089_v15  ;;  %v1156_v15 = vld [vmem:[#allocation10 + $0x120] sm:$0xff]  ;;  %v1158_v16 = vld [vmem:[#allocation10 + $0x130] sm:$0xff] }
 0x1a5   :  { %6041 = vrcp.f32 %v1100_v22  ;;  %v1141_v22 = vld [vmem:[#allocation10 + $0xa8] sm:$0xff] }
 0x1af   :  { %v6036_v19 = vpop.eup %6035 }
 0x1b0   :  { %v6038_v20 = vpop.eup %6037 }
 0x1b1   :  { %v6040_v21 = vpop.eup %6039  ;;  %v1107_v25 = vmul.f32 %v6038_v20, %v6036_v19  ;;  %v1151_v19 = vld [vmem:[#allocation10 + $0xf8] sm:$0xff]  ;;  %v1148_v20 = vld [vmem:[#allocation10 + $0xe0] sm:$0xff] }
 0x1b2   :  { %v1106_v24 = vmul.f32 %v6040_v21, %v1104_v17  ;;  %v6042_v28 = vpop.eup %6041  ;;  %v1149_v17 = vld [vmem:[#allocation10 + $0xe8] sm:$0xff]  ;;  %v1150_v21 = vld [vmem:[#allocation10 + $0xf0] sm:$0xff] }
 0x1b4   :  { %v1108_v27 = vadd.f32 %v1107_v25, %v1106_v24  ;;  %v1143_v24 = vld [vmem:[#allocation10 + $0xb8] sm:$0xff]  ;;  %v1140_v25 = vld [vmem:[#allocation10 + $0xa0] sm:$0xff] }
 0x1b6   :  { %6043 = vtanh.f32 %v1108_v27  ;;  %1116 = vst.msk [vmem:[#allocation4 + $0x1] sm:$0x1] %vm6466_vm2, %v1108_v27  ;;  %v1142_v27 = vld [vmem:[#allocation10 + $0xb0] sm:$0xff] }
 0x1c3   :  { %v6044_v29 = vpop.eup %6043 }
 0x1c4   :  { %v1110_v30 = vmul.f32 %v6044_v29, %v6042_v28  ;;  %v1133_v28 = vld [vmem:[#allocation10 + $0x68] sm:$0xff]  ;;  %v1135_v29 = vld [vmem:[#allocation10 + $0x78] sm:$0xff] }
 0x1c6   :  { %1114 = vst.msk [vmem:[#allocation3 + $0x1] sm:$0x1] %vm6466_vm2, %v1110_v30  ;;  %1118 = vst [vmem:[#allocation13 + $0xf] sm:$0x1] %v1110_v30  ;;  %v1132_v30 = vld [vmem:[#allocation10 + $0x60] sm:$0xff] }
 0x1cd   :  { %v1119_v31 = vld [vmem:[#allocation3] sm:$0x3] }
 0x1ce   :  { %v1384_v32 = vrot.slane %v1119_v31, %v6432_v12  ;;  %v6483_v33 = vrot.slane %v1119_v31, %v6435_v18  ;;  %v1134_v31 = vld [vmem:[#allocation10 + $0x70] sm:$0xff] }
 0x1d0   :  { %1451 = vmatprep.mubr.f32.mxu0 %v1384_v32  ;;  %1522 = vmatprep.mubr.f32.mxu1 %v1384_v32 }
 0x1d1   :  { %1452 = vmatmul.mubr.f32.vlgmr.msra.gmra.mxu0 %v6483_v33  ;;  %1523 = vmatmul.mubr.f32.vlgmr.msra.gmra.mxu1 %v6483_v33 }
 0x1d2   :  { %1530 = vmatpush1.msra.mxu0 %v1244_v34  ;;  %1601 = vmatpush1.msra.mxu1 %v1246_v35  ;;  %v1127_v34 = vld [vmem:[#allocation10 + $0x38] sm:$0xff]  ;;  %v1124_v35 = vld [vmem:[#allocation10 + $0x20] sm:$0xff] }
 0x1d3   :  { %1531 = vmatprep.subr.mxu0 %v1237_v36  ;;  %1593 = vmatprep.mubr.f32.mxu0 %v1384_v32  ;;  %v1126_v36 = vld [vmem:[#allocation10 + $0x30] sm:$0xff] }
 0x1d4   :  { %1602 = vmatprep.subr.mxu1 %v1239_v37  ;;  %1664 = vmatprep.mubr.f32.mxu1 %v1384_v32  ;;  %v1125_v32 = vld [vmem:[#allocation10 + $0x28] sm:$0xff] }
 0x1d5   :  { %1532 = vmatpush1.msra.mxu0 %v1236_v38  ;;  %1603 = vmatpush1.msra.mxu1 %v1238_v39  ;;  %v1373_v37 = vld [vmem:[#allocation10 + $0x7e8] sm:$0xff]  ;;  %v1375_v38 = vld [vmem:[#allocation10 + $0x7f8] sm:$0xff]  ;;  %v1372_v39 = vld [vmem:[#allocation10 + $0x7e0] sm:$0xff] }
 0x1d6   :  { %1533 = vmatprep.subr.mxu0 %v1229_v40  ;;  %1604 = vmatprep.subr.mxu1 %v1231_v41  ;;  %v1374_v40 = vld [vmem:[#allocation10 + $0x7f0] sm:$0xff]  ;;  %v1365_v41 = vld [vmem:[#allocation10 + $0x7a8] sm:$0xff] }
 0x1d7   :  { %1534 = vmatpush1.msra.mxu0 %v1228_v42  ;;  %1605 = vmatpush1.msra.mxu1 %v1230_v43  ;;  %v1367_v42 = vld [vmem:[#allocation10 + $0x7b8] sm:$0xff]  ;;  %v1364_v43 = vld [vmem:[#allocation10 + $0x7a0] sm:$0xff] }
 0x1d8   :  { %1535 = vmatprep.subr.mxu0 %v1221_v44  ;;  %1606 = vmatprep.subr.mxu1 %v1223_v45  ;;  %v1366_v44 = vld [vmem:[#allocation10 + $0x7b0] sm:$0xff]  ;;  %v1357_v45 = vld [vmem:[#allocation10 + $0x768] sm:$0xff] }
 0x1d9   :  { %1536 = vmatpush1.msra.mxu0 %v1220_v46  ;;  %1607 = vmatpush1.msra.mxu1 %v1222_v47  ;;  %v1359_v46 = vld [vmem:[#allocation10 + $0x778] sm:$0xff]  ;;  %v1356_v47 = vld [vmem:[#allocation10 + $0x760] sm:$0xff] }
 0x1da   :  { %1537 = vmatprep.subr.mxu0 %v1213_v23  ;;  %1608 = vmatprep.subr.mxu1 %v1215_v48  ;;  %v1358_v23 = vld [vmem:[#allocation10 + $0x770] sm:$0xff]  ;;  %v1349_v48 = vld [vmem:[#allocation10 + $0x728] sm:$0xff] }
 0x1db   :  { %1538 = vmatpush1.msra.mxu0 %v1212_v49  ;;  %1609 = vmatpush1.msra.mxu1 %v1214_v50  ;;  %v1351_v49 = vld [vmem:[#allocation10 + $0x738] sm:$0xff]  ;;  %v1348_v50 = vld [vmem:[#allocation10 + $0x720] sm:$0xff] }
 0x1dc   :  { %1539 = vmatprep.subr.mxu0 %v1205_v26  ;;  %1610 = vmatprep.subr.mxu1 %v1207_v52  ;;  %v1350_v26 = vld [vmem:[#allocation10 + $0x730] sm:$0xff]  ;;  %v1341_v52 = vld [vmem:[#allocation10 + $0x6e8] sm:$0xff] }
 0x1dd   :  { %1540 = vmatpush1.msra.mxu0 %v1204_v54  ;;  %1611 = vmatpush1.msra.mxu1 %v1206_v55  ;;  %v1343_v54 = vld [vmem:[#allocation10 + $0x6f8] sm:$0xff]  ;;  %v1340_v55 = vld [vmem:[#allocation10 + $0x6e0] sm:$0xff] }
 0x1de   :  { %1541 = vmatprep.subr.mxu0 %v1197_v56  ;;  %1612 = vmatprep.subr.mxu1 %v1199_v57  ;;  %v1342_v56 = vld [vmem:[#allocation10 + $0x6f0] sm:$0xff]  ;;  %v1333_v57 = vld [vmem:[#allocation10 + $0x6a8] sm:$0xff] }
 0x1df   :  { %1542 = vmatpush1.msra.mxu0 %v1196_v58  ;;  %1613 = vmatpush1.msra.mxu1 %v1198_v59  ;;  %v1335_v58 = vld [vmem:[#allocation10 + $0x6b8] sm:$0xff]  ;;  %v1332_v59 = vld [vmem:[#allocation10 + $0x6a0] sm:$0xff] }
 0x1e0   :  { %1543 = vmatprep.subr.mxu0 %v1189_v0  ;;  %1614 = vmatprep.subr.mxu1 %v1191_v60  ;;  %v1334_v0 = vld [vmem:[#allocation10 + $0x6b0] sm:$0xff]  ;;  %v1325_v60 = vld [vmem:[#allocation10 + $0x668] sm:$0xff] }
 0x1e1   :  { %1544 = vmatpush1.msra.mxu0 %v1188_v61  ;;  %1615 = vmatpush1.msra.mxu1 %v1190_v62  ;;  %v1327_v61 = vld [vmem:[#allocation10 + $0x678] sm:$0xff]  ;;  %v1324_v62 = vld [vmem:[#allocation10 + $0x660] sm:$0xff] }
 0x1e2   :  { %1545 = vmatprep.subr.mxu0 %v1181_v63  ;;  %1616 = vmatprep.subr.mxu1 %v1183_v1  ;;  %v1326_v63 = vld [vmem:[#allocation10 + $0x670] sm:$0xff]  ;;  %v1317_v1 = vld [vmem:[#allocation10 + $0x628] sm:$0xff] }
 0x1e3   :  { %1546 = vmatpush1.msra.mxu0 %v1180_v2  ;;  %1617 = vmatpush1.msra.mxu1 %v1182_v3  ;;  %v1319_v2 = vld [vmem:[#allocation10 + $0x638] sm:$0xff]  ;;  %v1316_v3 = vld [vmem:[#allocation10 + $0x620] sm:$0xff] }
 0x1e4   :  { %1547 = vmatprep.subr.mxu0 %v1173_v4  ;;  %1618 = vmatprep.subr.mxu1 %v1175_v5  ;;  %v1318_v4 = vld [vmem:[#allocation10 + $0x630] sm:$0xff]  ;;  %v1309_v5 = vld [vmem:[#allocation10 + $0x5e8] sm:$0xff] }
 0x1e5   :  { %1548 = vmatpush1.msra.mxu0 %v1172_v6  ;;  %1619 = vmatpush1.msra.mxu1 %v1174_v7  ;;  %v1311_v6 = vld [vmem:[#allocation10 + $0x5f8] sm:$0xff]  ;;  %v1308_v7 = vld [vmem:[#allocation10 + $0x5e0] sm:$0xff] }
 0x1e6   :  { %1549 = vmatprep.subr.mxu0 %v1165_v8  ;;  %1620 = vmatprep.subr.mxu1 %v1167_v9  ;;  %v1310_v8 = vld [vmem:[#allocation10 + $0x5f0] sm:$0xff]  ;;  %v1301_v9 = vld [vmem:[#allocation10 + $0x5a8] sm:$0xff] }
 0x1e7   :  { %1550 = vmatpush1.msra.mxu0 %v1164_v10  ;;  %1621 = vmatpush1.msra.mxu1 %v1166_v11  ;;  %v1303_v10 = vld [vmem:[#allocation10 + $0x5b8] sm:$0xff]  ;;  %v1300_v11 = vld [vmem:[#allocation10 + $0x5a0] sm:$0xff] }
 0x1e8   :  { %1551 = vmatprep.subr.mxu0 %v1157_v13  ;;  %1622 = vmatprep.subr.mxu1 %v1159_v14  ;;  %v1302_v13 = vld [vmem:[#allocation10 + $0x5b0] sm:$0xff]  ;;  %v1293_v14 = vld [vmem:[#allocation10 + $0x568] sm:$0xff] }
 0x1e9   :  { %1552 = vmatpush1.msra.mxu0 %v1156_v15  ;;  %1623 = vmatpush1.msra.mxu1 %v1158_v16  ;;  %v1295_v15 = vld [vmem:[#allocation10 + $0x578] sm:$0xff]  ;;  %v1292_v16 = vld [vmem:[#allocation10 + $0x560] sm:$0xff] }
 0x1ea   :  { %1553 = vmatprep.subr.mxu0 %v1149_v17  ;;  %1624 = vmatprep.subr.mxu1 %v1151_v19  ;;  %v1294_v17 = vld [vmem:[#allocation10 + $0x570] sm:$0xff]  ;;  %v1285_v19 = vld [vmem:[#allocation10 + $0x528] sm:$0xff] }
 0x1eb   :  { %1554 = vmatpush1.msra.mxu0 %v1148_v20  ;;  %1625 = vmatpush1.msra.mxu1 %v1150_v21  ;;  %v1287_v20 = vld [vmem:[#allocation10 + $0x538] sm:$0xff]  ;;  %v1284_v21 = vld [vmem:[#allocation10 + $0x520] sm:$0xff] }
 0x1ec   :  { %1555 = vmatprep.subr.mxu0 %v1141_v22  ;;  %1626 = vmatprep.subr.mxu1 %v1143_v24  ;;  %v1286_v22 = vld [vmem:[#allocation10 + $0x530] sm:$0xff]  ;;  %v1277_v24 = vld [vmem:[#allocation10 + $0x4e8] sm:$0xff] }
 0x1ed   :  { %1556 = vmatpush1.msra.mxu0 %v1140_v25  ;;  %1627 = vmatpush1.msra.mxu1 %v1142_v27  ;;  %v1279_v25 = vld [vmem:[#allocation10 + $0x4f8] sm:$0xff]  ;;  %v1276_v27 = vld [vmem:[#allocation10 + $0x4e0] sm:$0xff] }
 0x1ee   :  { %1557 = vmatprep.subr.mxu0 %v1133_v28  ;;  %1628 = vmatprep.subr.mxu1 %v1135_v29  ;;  %v1278_v28 = vld [vmem:[#allocation10 + $0x4f0] sm:$0xff]  ;;  %v1269_v29 = vld [vmem:[#allocation10 + $0x4a8] sm:$0xff] }
 0x1ef   :  { %1558 = vmatpush1.msra.mxu0 %v1132_v30  ;;  %1629 = vmatpush1.msra.mxu1 %v1134_v31  ;;  %v1271_v30 = vld [vmem:[#allocation10 + $0x4b8] sm:$0xff]  ;;  %v1268_v31 = vld [vmem:[#allocation10 + $0x4a0] sm:$0xff] }
 0x1f0   :  { %1559 = vmatprep.subr.mxu0 %v1125_v32  ;;  %1630 = vmatprep.subr.mxu1 %v1127_v34  ;;  %v1270_v32 = vld [vmem:[#allocation10 + $0x4b0] sm:$0xff]  ;;  %v1261_v34 = vld [vmem:[#allocation10 + $0x468] sm:$0xff] }
 0x1f1   :  { %1560 = vmatpush1.msra.mxu0 %v1124_v35  ;;  %1631 = vmatpush1.msra.mxu1 %v1126_v36  ;;  %v1263_v35 = vld [vmem:[#allocation10 + $0x478] sm:$0xff]  ;;  %v1260_v36 = vld [vmem:[#allocation10 + $0x460] sm:$0xff] }
 0x1f2   :  { %1561 = vmatprep.subr.mxu0 %v1373_v37  ;;  %1632 = vmatprep.subr.mxu1 %v1375_v38  ;;  %v1262_v37 = vld [vmem:[#allocation10 + $0x470] sm:$0xff]  ;;  %v1253_v38 = vld [vmem:[#allocation10 + $0x428] sm:$0xff] }
 0x1f3   :  { %1562 = vmatpush2.msra.mxu0 %v1372_v39  ;;  %1633 = vmatpush2.msra.mxu1 %v1374_v40  ;;  %v1255_v39 = vld [vmem:[#allocation10 + $0x438] sm:$0xff]  ;;  %v1252_v40 = vld [vmem:[#allocation10 + $0x420] sm:$0xff] }
 0x1f4   :  { %1563 = vmatprep.subr.mxu0 %v1365_v41  ;;  %1634 = vmatprep.subr.mxu1 %v1367_v42  ;;  %v1254_v41 = vld [vmem:[#allocation10 + $0x430] sm:$0xff]  ;;  %v1929_v42 = vld [vmem:[#allocation10 + $0x3c8] sm:$0xff] }
 0x1f5   :  { %1564 = vmatpush2.msra.mxu0 %v1364_v43  ;;  %1635 = vmatpush2.msra.mxu1 %v1366_v44  ;;  %v1931_v43 = vld [vmem:[#allocation10 + $0x3d8] sm:$0xff]  ;;  %v1928_v44 = vld [vmem:[#allocation10 + $0x3c0] sm:$0xff] }
 0x1f6   :  { %1565 = vmatprep.subr.mxu0 %v1357_v45  ;;  %1636 = vmatprep.subr.mxu1 %v1359_v46  ;;  %v1930_v45 = vld [vmem:[#allocation10 + $0x3d0] sm:$0xff]  ;;  %v1921_v46 = vld [vmem:[#allocation10 + $0x388] sm:$0xff] }
 0x1f7   :  { %1566 = vmatpush2.msra.mxu0 %v1356_v47  ;;  %1637 = vmatpush2.msra.mxu1 %v1358_v23  ;;  %v1923_v47 = vld [vmem:[#allocation10 + $0x398] sm:$0xff]  ;;  %v1920_v23 = vld [vmem:[#allocation10 + $0x380] sm:$0xff] }
 0x1f8   :  { %1567 = vmatprep.subr.mxu0 %v1349_v48  ;;  %1638 = vmatprep.subr.mxu1 %v1351_v49  ;;  %v1922_v48 = vld [vmem:[#allocation10 + $0x390] sm:$0xff]  ;;  %v1913_v49 = vld [vmem:[#allocation10 + $0x348] sm:$0xff] }
 0x1f9   :  { %1568 = vmatpush2.msra.mxu0 %v1348_v50  ;;  %1639 = vmatpush2.msra.mxu1 %v1350_v26  ;;  %v1915_v50 = vld [vmem:[#allocation10 + $0x358] sm:$0xff]  ;;  %v1914_v26 = vld [vmem:[#allocation10 + $0x350] sm:$0xff] }
 0x1fa   :  { %1569 = vmatprep.subr.mxu0 %v1341_v52  ;;  %1640 = vmatprep.subr.mxu1 %v1343_v54  ;;  %v1905_v52 = vld [vmem:[#allocation10 + $0x308] sm:$0xff]  ;;  %v1907_v54 = vld [vmem:[#allocation10 + $0x318] sm:$0xff] }
 0x1fb   :  { %1570 = vmatpush2.msra.mxu0 %v1340_v55  ;;  %1641 = vmatpush2.msra.mxu1 %v1342_v56  ;;  %v1904_v55 = vld [vmem:[#allocation10 + $0x300] sm:$0xff]  ;;  %v1906_v56 = vld [vmem:[#allocation10 + $0x310] sm:$0xff] }
 0x1fc   :  { %1571 = vmatprep.subr.mxu0 %v1333_v57  ;;  %1642 = vmatprep.subr.mxu1 %v1335_v58  ;;  %v1897_v57 = vld [vmem:[#allocation10 + $0x2c8] sm:$0xff]  ;;  %v1899_v58 = vld [vmem:[#allocation10 + $0x2d8] sm:$0xff] }
 0x1fd   :  { %1572 = vmatpush2.msra.mxu0 %v1332_v59  ;;  %1643 = vmatpush2.msra.mxu1 %v1334_v0  ;;  %v1896_v59 = vld [vmem:[#allocation10 + $0x2c0] sm:$0xff]  ;;  %v1898_v0 = vld [vmem:[#allocation10 + $0x2d0] sm:$0xff] }
 0x1fe   :  { %1573 = vmatprep.subr.mxu0 %v1325_v60  ;;  %1644 = vmatprep.subr.mxu1 %v1327_v61  ;;  %v1889_v60 = vld [vmem:[#allocation10 + $0x288] sm:$0xff]  ;;  %v1891_v61 = vld [vmem:[#allocation10 + $0x298] sm:$0xff] }
 0x1ff   :  { %1574 = vmatpush2.msra.mxu0 %v1324_v62  ;;  %1645 = vmatpush2.msra.mxu1 %v1326_v63  ;;  %v1888_v62 = vld [vmem:[#allocation10 + $0x280] sm:$0xff]  ;;  %v1890_v63 = vld [vmem:[#allocation10 + $0x290] sm:$0xff] }
 0x200   :  { %1575 = vmatprep.subr.mxu0 %v1317_v1  ;;  %1646 = vmatprep.subr.mxu1 %v1319_v2  ;;  %v1881_v1 = vld [vmem:[#allocation10 + $0x248] sm:$0xff]  ;;  %v1883_v2 = vld [vmem:[#allocation10 + $0x258] sm:$0xff] }
 0x201   :  { %1576 = vmatpush2.msra.mxu0 %v1316_v3  ;;  %1647 = vmatpush2.msra.mxu1 %v1318_v4  ;;  %v1880_v3 = vld [vmem:[#allocation10 + $0x240] sm:$0xff]  ;;  %v1882_v4 = vld [vmem:[#allocation10 + $0x250] sm:$0xff] }
 0x202   :  { %1577 = vmatprep.subr.mxu0 %v1309_v5  ;;  %1648 = vmatprep.subr.mxu1 %v1311_v6  ;;  %v1873_v5 = vld [vmem:[#allocation10 + $0x208] sm:$0xff]  ;;  %v1875_v6 = vld [vmem:[#allocation10 + $0x218] sm:$0xff] }
 0x203   :  { %1578 = vmatpush2.msra.mxu0 %v1308_v7  ;;  %1649 = vmatpush2.msra.mxu1 %v1310_v8  ;;  %v1872_v7 = vld [vmem:[#allocation10 + $0x200] sm:$0xff]  ;;  %v1874_v8 = vld [vmem:[#allocation10 + $0x210] sm:$0xff] }
 0x204   :  { %1579 = vmatprep.subr.mxu0 %v1301_v9  ;;  %1650 = vmatprep.subr.mxu1 %v1303_v10  ;;  %v1865_v9 = vld [vmem:[#allocation10 + $0x1c8] sm:$0xff]  ;;  %v1867_v10 = vld [vmem:[#allocation10 + $0x1d8] sm:$0xff] }
 0x205   :  { %1580 = vmatpush2.msra.mxu0 %v1300_v11  ;;  %1651 = vmatpush2.msra.mxu1 %v1302_v13  ;;  %v1864_v11 = vld [vmem:[#allocation10 + $0x1c0] sm:$0xff]  ;;  %v1866_v13 = vld [vmem:[#allocation10 + $0x1d0] sm:$0xff] }
 0x206   :  { %1581 = vmatprep.subr.mxu0 %v1293_v14  ;;  %1652 = vmatprep.subr.mxu1 %v1295_v15  ;;  %v1857_v14 = vld [vmem:[#allocation10 + $0x188] sm:$0xff]  ;;  %v1859_v15 = vld [vmem:[#allocation10 + $0x198] sm:$0xff] }
 0x207   :  { %1582 = vmatpush2.msra.mxu0 %v1292_v16  ;;  %1653 = vmatpush2.msra.mxu1 %v1294_v17  ;;  %v1856_v16 = vld [vmem:[#allocation10 + $0x180] sm:$0xff]  ;;  %v1858_v17 = vld [vmem:[#allocation10 + $0x190] sm:$0xff] }
 0x208   :  { %1583 = vmatprep.subr.mxu0 %v1285_v19  ;;  %1654 = vmatprep.subr.mxu1 %v1287_v20  ;;  %v1849_v19 = vld [vmem:[#allocation10 + $0x148] sm:$0xff]  ;;  %v1851_v20 = vld [vmem:[#allocation10 + $0x158] sm:$0xff] }
 0x209   :  { %1584 = vmatpush2.msra.mxu0 %v1284_v21  ;;  %1655 = vmatpush2.msra.mxu1 %v1286_v22  ;;  %v1848_v21 = vld [vmem:[#allocation10 + $0x140] sm:$0xff]  ;;  %v1850_v22 = vld [vmem:[#allocation10 + $0x150] sm:$0xff] }
 0x20a   :  { %1585 = vmatprep.subr.mxu0 %v1277_v24  ;;  %1656 = vmatprep.subr.mxu1 %v1279_v25  ;;  %v1841_v24 = vld [vmem:[#allocation10 + $0x108] sm:$0xff]  ;;  %v1843_v25 = vld [vmem:[#allocation10 + $0x118] sm:$0xff] }
 0x20b   :  { %1586 = vmatpush2.msra.mxu0 %v1276_v27  ;;  %1657 = vmatpush2.msra.mxu1 %v1278_v28  ;;  %v1840_v27 = vld [vmem:[#allocation10 + $0x100] sm:$0xff]  ;;  %v1842_v28 = vld [vmem:[#allocation10 + $0x110] sm:$0xff] }
 0x20c   :  { %1587 = vmatprep.subr.mxu0 %v1269_v29  ;;  %1658 = vmatprep.subr.mxu1 %v1271_v30  ;;  %v1833_v29 = vld [vmem:[#allocation10 + $0xc8] sm:$0xff]  ;;  %v1835_v30 = vld [vmem:[#allocation10 + $0xd8] sm:$0xff] }
 0x20d   :  { %1588 = vmatpush2.msra.mxu0 %v1268_v31  ;;  %1659 = vmatpush2.msra.mxu1 %v1270_v32  ;;  %v1832_v31 = vld [vmem:[#allocation10 + $0xc0] sm:$0xff]  ;;  %v1834_v32 = vld [vmem:[#allocation10 + $0xd0] sm:$0xff] }
 0x20e   :  { %1589 = vmatprep.subr.mxu0 %v1261_v34  ;;  %1660 = vmatprep.subr.mxu1 %v1263_v35  ;;  %v1825_v34 = vld [vmem:[#allocation10 + $0x88] sm:$0xff]  ;;  %v1827_v35 = vld [vmem:[#allocation10 + $0x98] sm:$0xff] }
 0x20f   :  { %1590 = vmatpush2.msra.mxu0 %v1260_v36  ;;  %1661 = vmatpush2.msra.mxu1 %v1262_v37  ;;  %v1824_v36 = vld [vmem:[#allocation10 + $0x80] sm:$0xff]  ;;  %v1826_v37 = vld [vmem:[#allocation10 + $0x90] sm:$0xff] }
 0x210   :  { %1591 = vmatprep.subr.mxu0 %v1253_v38  ;;  %1662 = vmatprep.subr.mxu1 %v1255_v39  ;;  %v1817_v38 = vld [vmem:[#allocation10 + $0x48] sm:$0xff]  ;;  %v1819_v39 = vld [vmem:[#allocation10 + $0x58] sm:$0xff] }
 0x211   :  { %1592 = vmatpush2.msra.mxu0 %v1252_v40  ;;  %1663 = vmatpush2.msra.mxu1 %v1254_v41  ;;  %v1816_v40 = vld [vmem:[#allocation10 + $0x40] sm:$0xff]  ;;  %v1818_v41 = vld [vmem:[#allocation10 + $0x50] sm:$0xff] }
 0x212   :  { %1594 = vmatmul.mubr.f32.vlgmr.msra.gmra.mxu0 %v6483_v33  ;;  %1665 = vmatmul.mubr.f32.vlgmr.msra.gmra.mxu1 %v6483_v33  ;;  %v1912_v33 = vld [vmem:[#allocation10 + $0x340] sm:$0xff] }
 0x213   :  { %2075 = vmatprep.subr.mxu0 %v1929_v42  ;;  %2146 = vmatprep.subr.mxu1 %v1931_v43  ;;  %v1809_v42 = vld [vmem:[#allocation10 + $0x8] sm:$0xff]  ;;  %v1811_v43 = vld [vmem:[#allocation10 + $0x18] sm:$0xff] }
 0x214   :  { %2076 = vmatpush1.msra.mxu0 %v1928_v44  ;;  %2147 = vmatpush1.msra.mxu1 %v1930_v45  ;;  %v1808_v44 = vld [vmem:[#allocation10] sm:$0xff]  ;;  %v1810_v45 = vld [vmem:[#allocation10 + $0x10] sm:$0xff] }
 0x215   :  { %2077 = vmatprep.subr.mxu0 %v1921_v46  ;;  %2148 = vmatprep.subr.mxu1 %v1923_v47  ;;  %v2057_v46 = vld [vmem:[#allocation10 + $0x7c8] sm:$0xff]  ;;  %v2059_v47 = vld [vmem:[#allocation10 + $0x7d8] sm:$0xff] }
 0x216   :  { %2078 = vmatpush1.msra.mxu0 %v1920_v23  ;;  %2149 = vmatpush1.msra.mxu1 %v1922_v48  ;;  %v2056_v23 = vld [vmem:[#allocation10 + $0x7c0] sm:$0xff]  ;;  %v2058_v48 = vld [vmem:[#allocation10 + $0x7d0] sm:$0xff] }
 0x217   :  { %2079 = vmatprep.subr.mxu0 %v1913_v49  ;;  %2150 = vmatprep.subr.mxu1 %v1915_v50  ;;  %v2049_v49 = vld [vmem:[#allocation10 + $0x788] sm:$0xff]  ;;  %v2051_v50 = vld [vmem:[#allocation10 + $0x798] sm:$0xff] }
 0x218   :  { %2080 = vmatpush1.msra.mxu0 %v1912_v33  ;;  %2151 = vmatpush1.msra.mxu1 %v1914_v26  ;;  %v2048_v33 = vld [vmem:[#allocation10 + $0x780] sm:$0xff]  ;;  %v2050_v26 = vld [vmem:[#allocation10 + $0x790] sm:$0xff] }
 0x219   :  { %2081 = vmatprep.subr.mxu0 %v1905_v52  ;;  %2152 = vmatprep.subr.mxu1 %v1907_v54  ;;  %v2041_v52 = vld [vmem:[#allocation10 + $0x748] sm:$0xff]  ;;  %v2043_v54 = vld [vmem:[#allocation10 + $0x758] sm:$0xff] }
 0x21a   :  { %2082 = vmatpush1.msra.mxu0 %v1904_v55  ;;  %2153 = vmatpush1.msra.mxu1 %v1906_v56  ;;  %v2040_v55 = vld [vmem:[#allocation10 + $0x740] sm:$0xff]  ;;  %v2042_v56 = vld [vmem:[#allocation10 + $0x750] sm:$0xff] }
 0x21b   :  { %2083 = vmatprep.subr.mxu0 %v1897_v57  ;;  %2154 = vmatprep.subr.mxu1 %v1899_v58  ;;  %v2033_v57 = vld [vmem:[#allocation10 + $0x708] sm:$0xff]  ;;  %v2035_v58 = vld [vmem:[#allocation10 + $0x718] sm:$0xff] }
 0x21c   :  { %2084 = vmatpush1.msra.mxu0 %v1896_v59  ;;  %2155 = vmatpush1.msra.mxu1 %v1898_v0  ;;  %v2032_v59 = vld [vmem:[#allocation10 + $0x700] sm:$0xff]  ;;  %v2034_v0 = vld [vmem:[#allocation10 + $0x710] sm:$0xff] }
 0x21d   :  { %2085 = vmatprep.subr.mxu0 %v1889_v60  ;;  %2156 = vmatprep.subr.mxu1 %v1891_v61  ;;  %v2025_v60 = vld [vmem:[#allocation10 + $0x6c8] sm:$0xff]  ;;  %v2027_v61 = vld [vmem:[#allocation10 + $0x6d8] sm:$0xff] }
 0x21e   :  { %2086 = vmatpush1.msra.mxu0 %v1888_v62  ;;  %2157 = vmatpush1.msra.mxu1 %v1890_v63  ;;  %v2024_v62 = vld [vmem:[#allocation10 + $0x6c0] sm:$0xff]  ;;  %v2026_v63 = vld [vmem:[#allocation10 + $0x6d0] sm:$0xff] }
 0x21f   :  { %2087 = vmatprep.subr.mxu0 %v1881_v1  ;;  %2158 = vmatprep.subr.mxu1 %v1883_v2  ;;  %v2017_v1 = vld [vmem:[#allocation10 + $0x688] sm:$0xff]  ;;  %v2019_v2 = vld [vmem:[#allocation10 + $0x698] sm:$0xff] }
 0x220   :  { %2088 = vmatpush1.msra.mxu0 %v1880_v3  ;;  %2159 = vmatpush1.msra.mxu1 %v1882_v4  ;;  %v2016_v3 = vld [vmem:[#allocation10 + $0x680] sm:$0xff]  ;;  %v2018_v4 = vld [vmem:[#allocation10 + $0x690] sm:$0xff] }
 0x221   :  { %2089 = vmatprep.subr.mxu0 %v1873_v5  ;;  %2160 = vmatprep.subr.mxu1 %v1875_v6  ;;  %v2009_v5 = vld [vmem:[#allocation10 + $0x648] sm:$0xff]  ;;  %v2011_v6 = vld [vmem:[#allocation10 + $0x658] sm:$0xff] }
 0x222   :  { %2090 = vmatpush1.msra.mxu0 %v1872_v7  ;;  %2161 = vmatpush1.msra.mxu1 %v1874_v8  ;;  %v2008_v7 = vld [vmem:[#allocation10 + $0x640] sm:$0xff]  ;;  %v2010_v8 = vld [vmem:[#allocation10 + $0x650] sm:$0xff] }
 0x223   :  { %2091 = vmatprep.subr.mxu0 %v1865_v9  ;;  %2162 = vmatprep.subr.mxu1 %v1867_v10  ;;  %v2001_v9 = vld [vmem:[#allocation10 + $0x608] sm:$0xff]  ;;  %v2003_v10 = vld [vmem:[#allocation10 + $0x618] sm:$0xff] }
 0x224   :  { %2092 = vmatpush1.msra.mxu0 %v1864_v11  ;;  %2163 = vmatpush1.msra.mxu1 %v1866_v13  ;;  %v2000_v11 = vld [vmem:[#allocation10 + $0x600] sm:$0xff]  ;;  %v2002_v13 = vld [vmem:[#allocation10 + $0x610] sm:$0xff] }
 0x225   :  { %2093 = vmatprep.subr.mxu0 %v1857_v14  ;;  %2164 = vmatprep.subr.mxu1 %v1859_v15  ;;  %v1993_v14 = vld [vmem:[#allocation10 + $0x5c8] sm:$0xff]  ;;  %v1995_v15 = vld [vmem:[#allocation10 + $0x5d8] sm:$0xff] }
 0x226   :  { %2094 = vmatpush1.msra.mxu0 %v1856_v16  ;;  %2165 = vmatpush1.msra.mxu1 %v1858_v17  ;;  %v1992_v16 = vld [vmem:[#allocation10 + $0x5c0] sm:$0xff]  ;;  %v1994_v17 = vld [vmem:[#allocation10 + $0x5d0] sm:$0xff] }
 0x227   :  { %2095 = vmatprep.subr.mxu0 %v1849_v19  ;;  %2166 = vmatprep.subr.mxu1 %v1851_v20 }
 0x228   :  { %2096 = vmatpush1.msra.mxu0 %v1848_v21  ;;  %2167 = vmatpush1.msra.mxu1 %v1850_v22  ;;  %v1985_v21 = vld [vmem:[#allocation10 + $0x588] sm:$0xff]  ;;  %v1987_v22 = vld [vmem:[#allocation10 + $0x598] sm:$0xff] }
 0x229   :  { %2097 = vmatprep.subr.mxu0 %v1841_v24  ;;  %2168 = vmatprep.subr.mxu1 %v1843_v25  ;;  %v1984_v24 = vld [vmem:[#allocation10 + $0x580] sm:$0xff]  ;;  %v1986_v25 = vld [vmem:[#allocation10 + $0x590] sm:$0xff] }
 0x22a   :  { %2098 = vmatpush1.msra.mxu0 %v1840_v27  ;;  %2169 = vmatpush1.msra.mxu1 %v1842_v28 }
 0x22b   :  { %2099 = vmatprep.subr.mxu0 %v1833_v29  ;;  %2170 = vmatprep.subr.mxu1 %v1835_v30  ;;  %v1977_v29 = vld [vmem:[#allocation10 + $0x548] sm:$0xff]  ;;  %v1979_v30 = vld [vmem:[#allocation10 + $0x558] sm:$0xff] }
 0x22c   :  { %2100 = vmatpush1.msra.mxu0 %v1832_v31  ;;  %2171 = vmatpush1.msra.mxu1 %v1834_v32 }
 0x22d   :  { %2101 = vmatprep.subr.mxu0 %v1825_v34  ;;  %2172 = vmatprep.subr.mxu1 %v1827_v35  ;;  %v1976_v34 = vld [vmem:[#allocation10 + $0x540] sm:$0xff]  ;;  %v1978_v35 = vld [vmem:[#allocation10 + $0x550] sm:$0xff] }
 0x22e   :  { %2102 = vmatpush1.msra.mxu0 %v1824_v36  ;;  %2173 = vmatpush1.msra.mxu1 %v1826_v37  ;;  %v1969_v36 = vld [vmem:[#allocation10 + $0x508] sm:$0xff]  ;;  %v1971_v37 = vld [vmem:[#allocation10 + $0x518] sm:$0xff] }
 0x22f   :  { %2103 = vmatprep.subr.mxu0 %v1817_v38  ;;  %2174 = vmatprep.subr.mxu1 %v1819_v39  ;;  %v1968_v38 = vld [vmem:[#allocation10 + $0x500] sm:$0xff] }
 0x230   :  { %2104 = vmatpush1.msra.mxu0 %v1816_v40  ;;  %2175 = vmatpush1.msra.mxu1 %v1818_v41  ;;  %v1970_v41 = vld [vmem:[#allocation10 + $0x510] sm:$0xff] }
 0x231   :  { %2105 = vmatprep.subr.mxu0 %v1809_v42  ;;  %2176 = vmatprep.subr.mxu1 %v1811_v43  ;;  %v1961_v42 = vld [vmem:[#allocation10 + $0x4c8] sm:$0xff]  ;;  %v1963_v43 = vld [vmem:[#allocation10 + $0x4d8] sm:$0xff] }
 0x232   :  { %2106 = vmatpush1.msra.mxu0 %v1808_v44  ;;  %2177 = vmatpush1.msra.mxu1 %v1810_v45  ;;  %v1960_v44 = vld [vmem:[#allocation10 + $0x4c0] sm:$0xff]  ;;  %v1962_v45 = vld [vmem:[#allocation10 + $0x4d0] sm:$0xff] }
 0x233   :  { %2107 = vmatprep.subr.mxu0 %v2057_v46  ;;  %2178 = vmatprep.subr.mxu1 %v2059_v47  ;;  %v1953_v46 = vld [vmem:[#allocation10 + $0x488] sm:$0xff] }
 0x234   :  { %2108 = vmatpush2.msra.mxu0 %v2056_v23  ;;  %2179 = vmatpush2.msra.mxu1 %v2058_v48  ;;  %v1955_v23 = vld [vmem:[#allocation10 + $0x498] sm:$0xff]  ;;  %v1952_v48 = vld [vmem:[#allocation10 + $0x480] sm:$0xff] }
 0x235   :  { %2109 = vmatprep.subr.mxu0 %v2049_v49  ;;  %2180 = vmatprep.subr.mxu1 %v2051_v50  ;;  %v1954_v49 = vld [vmem:[#allocation10 + $0x490] sm:$0xff]  ;;  %v1945_v50 = vld [vmem:[#allocation10 + $0x448] sm:$0xff] }
 0x236   :  { %2110 = vmatpush2.msra.mxu0 %v2048_v33  ;;  %2181 = vmatpush2.msra.mxu1 %v2050_v26  ;;  %v1947_v33 = vld [vmem:[#allocation10 + $0x458] sm:$0xff] }
 0x237   :  { %2111 = vmatprep.subr.mxu0 %v2041_v52  ;;  %2182 = vmatprep.subr.mxu1 %v2043_v54  ;;  %v1944_v52 = vld [vmem:[#allocation10 + $0x440] sm:$0xff]  ;;  %v1946_v54 = vld [vmem:[#allocation10 + $0x450] sm:$0xff] }
 0x238   :  { %2112 = vmatpush2.msra.mxu0 %v2040_v55  ;;  %2183 = vmatpush2.msra.mxu1 %v2042_v56  ;;  %v1672_v55 = vld [vmem:[#allocation2 + $0x1] ss:$8 sm:$0xf] }
 0x239   :  { %2113 = vmatprep.subr.mxu0 %v2033_v57  ;;  %2184 = vmatprep.subr.mxu1 %v2035_v58  ;;  %v1937_v56 = vld [vmem:[#allocation10 + $0x408] sm:$0xff]  ;;  %v1939_v57 = vld [vmem:[#allocation10 + $0x418] sm:$0xff] }
 0x23a   :  { %2114 = vmatpush2.msra.mxu0 %v2032_v59  ;;  %2185 = vmatpush2.msra.mxu1 %v2034_v0  ;;  %v1936_v59 = vld [vmem:[#allocation10 + $0x400] sm:$0xff]  ;;  %v1938_v0 = vld [vmem:[#allocation10 + $0x410] sm:$0xff] }
 0x23b   :  { %2115 = vmatprep.subr.mxu0 %v2025_v60  ;;  %2186 = vmatprep.subr.mxu1 %v2027_v61 }
 0x23c   :  { %2116 = vmatpush2.msra.mxu0 %v2024_v62  ;;  %2187 = vmatpush2.msra.mxu1 %v2026_v63  ;;  %v1933_v62 = vld [vmem:[#allocation10 + $0x3e8] sm:$0xff]  ;;  %v1935_v63 = vld [vmem:[#allocation10 + $0x3f8] sm:$0xff] }
 0x23d   :  { %2117 = vmatprep.subr.mxu0 %v2017_v1  ;;  %2188 = vmatprep.subr.mxu1 %v2019_v2 }
 0x23e   :  { %2118 = vmatpush2.msra.mxu0 %v2016_v3  ;;  %2189 = vmatpush2.msra.mxu1 %v2018_v4 }
 0x23f   :  { %2119 = vmatprep.subr.mxu0 %v2009_v5  ;;  %2190 = vmatprep.subr.mxu1 %v2011_v6 }
 0x240   :  { %2120 = vmatpush2.msra.mxu0 %v2008_v7  ;;  %2191 = vmatpush2.msra.mxu1 %v2010_v8 }
 0x241   :  { %2121 = vmatprep.subr.mxu0 %v2001_v9  ;;  %2192 = vmatprep.subr.mxu1 %v2003_v10 }
 0x242   :  { %2122 = vmatpush2.msra.mxu0 %v2000_v11  ;;  %2193 = vmatpush2.msra.mxu1 %v2002_v13 }
 0x243   :  { %2123 = vmatprep.subr.mxu0 %v1993_v14  ;;  %2194 = vmatprep.subr.mxu1 %v1995_v15  ;;  %v1735_v14 = vld [vmem:[#allocation4] sm:$0x3] }
 0x244   :  { %2124 = vmatpush2.msra.mxu0 %v1992_v16  ;;  %2195 = vmatpush2.msra.mxu1 %v1994_v17 }
 0x245   :  { %2125 = vmatprep.subr.mxu0 %v1985_v21  ;;  %2196 = vmatprep.subr.mxu1 %v1987_v22 }
 0x246   :  { %2126 = vmatpush2.msra.mxu0 %v1984_v24  ;;  %2197 = vmatpush2.msra.mxu1 %v1986_v25 }
 0x247   :  { %2127 = vmatprep.subr.mxu0 %v1977_v29  ;;  %2198 = vmatprep.subr.mxu1 %v1979_v30 }
 0x248   :  { %2128 = vmatpush2.msra.mxu0 %v1976_v34  ;;  %2199 = vmatpush2.msra.mxu1 %v1978_v35 }
 0x249   :  { %2129 = vmatprep.subr.mxu0 %v1969_v36  ;;  %2200 = vmatprep.subr.mxu1 %v1971_v37  ;;  %v1704_v36 = vld [vmem:[#allocation2 + $0x26] ss:$8 sm:$0xf] }
 0x24a   :  { %2130 = vmatpush2.msra.mxu0 %v1968_v38  ;;  %2201 = vmatpush2.msra.mxu1 %v1970_v41 }
 0x24b   :  { %2131 = vmatprep.subr.mxu0 %v1961_v42  ;;  %2202 = vmatprep.subr.mxu1 %v1963_v43 }
 0x24c   :  { %2132 = vmatpush2.msra.mxu0 %v1960_v44  ;;  %2203 = vmatpush2.msra.mxu1 %v1962_v45 }
 0x24d   :  { %2133 = vmatprep.subr.mxu0 %v1953_v46  ;;  %2204 = vmatprep.subr.mxu1 %v1955_v23 }
 0x24e   :  { %2134 = vmatpush2.msra.mxu0 %v1952_v48  ;;  %2205 = vmatpush2.msra.mxu1 %v1954_v49 }
 0x24f   :  { %2135 = vmatprep.subr.mxu0 %v1945_v50  ;;  %2206 = vmatprep.subr.mxu1 %v1947_v33  ;;  %v1794_v50 = vrot.slane %v1735_v14, 1 }
 0x250   :  { %2136 = vmatpush2.msra.mxu0 %v1944_v52  ;;  %2207 = vmatpush2.msra.mxu1 %v1946_v54 }
 0x251   :  { %2137 = vmatprep.subr.mxu0 %v1937_v56  ;;  %2208 = vmatprep.subr.mxu1 %v1939_v57 }
 0x252   :  { %2138 = vmatpush2.msra.mxu0 %v1936_v59  ;;  %2209 = vmatpush2.msra.mxu1 %v1938_v0 }
 0x253   :  { %2217 = vmatprep.subr.mxu0 %v1933_v62  ;;  %2288 = vmatprep.subr.mxu1 %v1935_v63  ;;  %v1934_v62 = vld [vmem:[#allocation10 + $0x3f0] sm:$0xff]  ;;  %v1925_v63 = vld [vmem:[#allocation10 + $0x3a8] sm:$0xff] }
 0x291   :  { %v1453_v19 = vpop.f32.mrf.mxu0  ;;  %v1524_v20 = vpop.f32.mrf.mxu1 }
 0x293   :  { %v1455_v27 = vpop.f32.mrf.mxu0  ;;  %v1526_v28 = vpop.f32.mrf.mxu1 }
 0x294   :  { %v1677_v31 = vcombine.low %v1453_v19, %v1455_v27  ;;  %v1678_v32 = vcombine.low %v1524_v20, %v1526_v28 }
 0x296   :  { %v1685_v39 = vrot.slane %v1677_v31, %v6460_v53  ;;  %v1692_v40 = vrot.slane %v1678_v32, %v6460_v53 }
 0x298   :  { %v1693_v47 = vcombine.low %v1685_v39, %v1692_v40 }
 0x29a   :  { %v1700_v26 = vrot.slane %v1693_v47, %v6460_v53 }
 0x29c   :  { %v1702_v58 = vadd.f32 %v1700_v26, %v1672_v55 }
 0x29e   :  { %v5962_v60 = vmul.f32 -1.442695, %v1702_v58  ;;  %v1743_v61 = vrot.slane %v1702_v58, 1  ;;  %v1754_v2 = vrot.slane %v1702_v58, 3  ;;  %v1751_v5 = vrot.slane %v1702_v58, 2 }
 0x2a0   :  { %6045 = vpow2.f32 %v5962_v60  ;;  %v5963_v1 = vmul.f32 -1.442695, %v1743_v61  ;;  %v5964_v3 = vmul.f32 -1.442695, %v1754_v2  ;;  %v1932_v61 = vld [vmem:[#allocation10 + $0x3e0] sm:$0xff] }
 0x2a1   :  { %v1924_v2 = vld [vmem:[#allocation10 + $0x3a0] sm:$0xff] }
 0x2a2   :  { %6047 = vpow2.f32 %v5963_v1  ;;  %v1927_v1 = vld [vmem:[#allocation10 + $0x3b8] sm:$0xff] }
 0x2a3   :  { %6049 = vpow2.f32 %v5964_v3  ;;  %v1926_v3 = vld [vmem:[#allocation10 + $0x3b0] sm:$0xff] }
 0x2ad   :  { %v6046_v4 = vpop.eup %6045 }
 0x2ae   :  { %v1739_v6 = vadd.f32 1.0, %v6046_v4  ;;  %v1917_v4 = vld [vmem:[#allocation10 + $0x368] sm:$0xff] }
 0x2af   :  { %v6048_v7 = vpop.eup %6047 }
 0x2b0   :  { %6051 = vrcp.f32 %v1739_v6  ;;  %v1748_v8 = vadd.f32 1.0, %v6048_v7  ;;  %v6050_v9 = vpop.eup %6049  ;;  %v1916_v6 = vld [vmem:[#allocation10 + $0x360] sm:$0xff]  ;;  %v1918_v7 = vld [vmem:[#allocation10 + $0x370] sm:$0xff] }
 0x2b1   :  { %6053 = vtanh.f32 %v1751_v5  ;;  %v1759_v15 = vadd.f32 1.0, %v6050_v9  ;;  %v1919_v5 = vld [vmem:[#allocation10 + $0x378] sm:$0xff] }
 0x2b2   :  { %6055 = vrcp.f32 %v1748_v8  ;;  %v1909_v8 = vld [vmem:[#allocation10 + $0x328] sm:$0xff]  ;;  %v1911_v9 = vld [vmem:[#allocation10 + $0x338] sm:$0xff] }
 0x2b3   :  { %6057 = vrcp.f32 %v1759_v15  ;;  %v1900_v15 = vld [vmem:[#allocation10 + $0x2e0] sm:$0xff] }
 0x2bd   :  { %v6052_v10 = vpop.eup %6051 }
 0x2be   :  { %v6054_v11 = vpop.eup %6053 }
 0x2bf   :  { %v6056_v13 = vpop.eup %6055  ;;  %v1763_v17 = vmul.f32 %v6054_v11, %v6052_v10  ;;  %v1908_v10 = vld [vmem:[#allocation10 + $0x320] sm:$0xff]  ;;  %v1910_v11 = vld [vmem:[#allocation10 + $0x330] sm:$0xff] }
 0x2c0   :  { %v1762_v16 = vmul.f32 %v6056_v13, %v1735_v14  ;;  %v6058_v20 = vpop.eup %6057  ;;  %v1901_v13 = vld [vmem:[#allocation10 + $0x2e8] sm:$0xff]  ;;  %v1903_v14 = vld [vmem:[#allocation10 + $0x2f8] sm:$0xff] }
 0x2c2   :  { %v1764_v19 = vadd.f32 %v1763_v17, %v1762_v16  ;;  %v1902_v16 = vld [vmem:[#allocation10 + $0x2f0] sm:$0xff]  ;;  %v1893_v17 = vld [vmem:[#allocation10 + $0x2a8] sm:$0xff] }
 0x2c4   :  { %6059 = vtanh.f32 %v1764_v19  ;;  %1803 = vst.msk [vmem:[#allocation4] sm:$0x1] %vm6466_vm2, %v1764_v19  ;;  %v1895_v19 = vld [vmem:[#allocation10 + $0x2b8] sm:$0xff] }
 0x2d1   :  { %v6060_v21 = vpop.eup %6059 }
 0x2d2   :  { %v1766_v22 = vmul.f32 %v6060_v21, %v6058_v20  ;;  %v1595_v24 = vpop.f32.mrf.mxu0  ;;  %v1666_v25 = vpop.f32.mrf.mxu1  ;;  %v1892_v20 = vld [vmem:[#allocation10 + $0x2a0] sm:$0xff]  ;;  %v1894_v21 = vld [vmem:[#allocation10 + $0x2b0] sm:$0xff] }
 0x2d4   :  { %1801 = vst.msk [vmem:[#allocation3] sm:$0x1] %vm6466_vm2, %v1766_v22  ;;  %1805 = vst [vmem:[#allocation13 + $0x1] sm:$0x1] %v1766_v22  ;;  %v1597_v27 = vpop.f32.mrf.mxu0  ;;  %v1668_v28 = vpop.f32.mrf.mxu1  ;;  %v1885_v22 = vld [vmem:[#allocation10 + $0x268] sm:$0xff] }
 0x2d5   :  { %v1709_v29 = vcombine.low %v1595_v24, %v1597_v27  ;;  %v1710_v30 = vcombine.low %v1666_v25, %v1668_v28  ;;  %v1887_v24 = vld [vmem:[#allocation10 + $0x278] sm:$0xff]  ;;  %v1884_v25 = vld [vmem:[#allocation10 + $0x260] sm:$0xff]  ;;  %v1886_v27 = vld [vmem:[#allocation10 + $0x270] sm:$0xff] }
 0x2d6   :  { %v1877_v28 = vld [vmem:[#allocation10 + $0x228] sm:$0xff] }
 0x2d7   :  { %v1717_v31 = vrot.slane %v1709_v29, %v6460_v53  ;;  %v1724_v32 = vrot.slane %v1710_v30, %v6460_v53  ;;  %v1879_v29 = vld [vmem:[#allocation10 + $0x238] sm:$0xff]  ;;  %v1876_v30 = vld [vmem:[#allocation10 + $0x220] sm:$0xff] }
 0x2d9   :  { %v1725_v34 = vcombine.low %v1717_v31, %v1724_v32  ;;  %v1878_v31 = vld [vmem:[#allocation10 + $0x230] sm:$0xff]  ;;  %v1869_v32 = vld [vmem:[#allocation10 + $0x1e8] sm:$0xff] }
 0x2db   :  { %v1732_v35 = vrot.slane %v1725_v34, %v6460_v53  ;;  %v1871_v34 = vld [vmem:[#allocation10 + $0x1f8] sm:$0xff] }
 0x2dd   :  { %v1734_v37 = vadd.f32 %v1732_v35, %v1704_v36  ;;  %v1868_v35 = vld [vmem:[#allocation10 + $0x1e0] sm:$0xff]  ;;  %v1870_v36 = vld [vmem:[#allocation10 + $0x1f0] sm:$0xff] }
 0x2df   :  { %v5965_v38 = vmul.f32 -1.442695, %v1734_v37  ;;  %v1774_v39 = vrot.slane %v1734_v37, 1  ;;  %v1785_v41 = vrot.slane %v1734_v37, 3  ;;  %v1782_v44 = vrot.slane %v1734_v37, 2  ;;  %v1861_v37 = vld [vmem:[#allocation10 + $0x1a8] sm:$0xff] }
 0x2e1   :  { %6061 = vpow2.f32 %v5965_v38  ;;  %v5966_v40 = vmul.f32 -1.442695, %v1774_v39  ;;  %v5967_v42 = vmul.f32 -1.442695, %v1785_v41  ;;  %v1863_v38 = vld [vmem:[#allocation10 + $0x1b8] sm:$0xff]  ;;  %v1860_v39 = vld [vmem:[#allocation10 + $0x1a0] sm:$0xff] }
 0x2e2   :  { %v1853_v41 = vld [vmem:[#allocation10 + $0x168] sm:$0xff] }
 0x2e3   :  { %6063 = vpow2.f32 %v5966_v40  ;;  %v1862_v40 = vld [vmem:[#allocation10 + $0x1b0] sm:$0xff] }
 0x2e4   :  { %6065 = vpow2.f32 %v5967_v42  ;;  %v1855_v42 = vld [vmem:[#allocation10 + $0x178] sm:$0xff] }
 0x2ee   :  { %v6062_v43 = vpop.eup %6061 }
 0x2ef   :  { %v1770_v45 = vadd.f32 1.0, %v6062_v43  ;;  %v1852_v43 = vld [vmem:[#allocation10 + $0x160] sm:$0xff] }
 0x2f0   :  { %v6064_v46 = vpop.eup %6063 }
 0x2f1   :  { %6067 = vrcp.f32 %v1770_v45  ;;  %v1779_v47 = vadd.f32 1.0, %v6064_v46  ;;  %v6066_v23 = vpop.eup %6065  ;;  %v1845_v45 = vld [vmem:[#allocation10 + $0x128] sm:$0xff]  ;;  %v1847_v46 = vld [vmem:[#allocation10 + $0x138] sm:$0xff] }
 0x2f2   :  { %6069 = vtanh.f32 %v1782_v44  ;;  %v1790_v26 = vadd.f32 1.0, %v6066_v23  ;;  %v1854_v44 = vld [vmem:[#allocation10 + $0x170] sm:$0xff] }
 0x2f3   :  { %6071 = vrcp.f32 %v1779_v47  ;;  %v1844_v47 = vld [vmem:[#allocation10 + $0x120] sm:$0xff]  ;;  %v1846_v23 = vld [vmem:[#allocation10 + $0x130] sm:$0xff] }
 0x2f4   :  { %6073 = vrcp.f32 %v1790_v26  ;;  %v1829_v26 = vld [vmem:[#allocation10 + $0xa8] sm:$0xff] }
 0x2fe   :  { %v6068_v48 = vpop.eup %6067 }
 0x2ff   :  { %v6070_v49 = vpop.eup %6069 }
 0x300   :  { %v6072_v33 = vpop.eup %6071  ;;  %v1797_v54 = vmul.f32 %v6070_v49, %v6068_v48  ;;  %v1837_v48 = vld [vmem:[#allocation10 + $0xe8] sm:$0xff]  ;;  %v1839_v49 = vld [vmem:[#allocation10 + $0xf8] sm:$0xff] }
 0x301   :  { %v1796_v52 = vmul.f32 %v6072_v33, %v1794_v50  ;;  %v6074_v56 = vpop.eup %6073  ;;  %v1836_v50 = vld [vmem:[#allocation10 + $0xe0] sm:$0xff]  ;;  %v1838_v33 = vld [vmem:[#allocation10 + $0xf0] sm:$0xff] }
 0x303   :  { %v1798_v55 = vadd.f32 %v1797_v54, %v1796_v52  ;;  %v1831_v52 = vld [vmem:[#allocation10 + $0xb8] sm:$0xff]  ;;  %v1828_v54 = vld [vmem:[#allocation10 + $0xa0] sm:$0xff] }
 0x305   :  { %6075 = vtanh.f32 %v1798_v55  ;;  %1804 = vst.msk [vmem:[#allocation4 + $0x1] sm:$0x1] %vm6466_vm2, %v1798_v55  ;;  %v1830_v55 = vld [vmem:[#allocation10 + $0xb0] sm:$0xff] }
 0x312   :  { %v6076_v57 = vpop.eup %6075 }
 0x313   :  { %v1800_v58 = vmul.f32 %v6076_v57, %v6074_v56  ;;  %v1821_v56 = vld [vmem:[#allocation10 + $0x68] sm:$0xff]  ;;  %v1823_v57 = vld [vmem:[#allocation10 + $0x78] sm:$0xff] }
 0x315   :  { %1802 = vst.msk [vmem:[#allocation3 + $0x1] sm:$0x1] %vm6466_vm2, %v1800_v58  ;;  %1806 = vst [vmem:[#allocation13 + $0xe] sm:$0x1] %v1800_v58  ;;  %v1820_v58 = vld [vmem:[#allocation10 + $0x60] sm:$0xff] }
 0x31c   :  { %v1807_v59 = vld [vmem:[#allocation3] sm:$0x3] }
 0x31d   :  { %v2072_v0 = vrot.slane %v1807_v59, %v6432_v12  ;;  %v6505_v60 = vrot.slane %v1807_v59, %v6435_v18  ;;  %v1822_v59 = vld [vmem:[#allocation10 + $0x70] sm:$0xff] }
 0x31f   :  { %2139 = vmatprep.mubr.f32.mxu0 %v2072_v0  ;;  %2210 = vmatprep.mubr.f32.mxu1 %v2072_v0 }
 0x320   :  { %2140 = vmatmul.mubr.f32.vlgmr.msra.gmra.mxu0 %v6505_v60  ;;  %2211 = vmatmul.mubr.f32.vlgmr.msra.gmra.mxu1 %v6505_v60 }
 0x321   :  { %2218 = vmatpush1.msra.mxu0 %v1932_v61  ;;  %2289 = vmatpush1.msra.mxu1 %v1934_v62  ;;  %v1815_v61 = vld [vmem:[#allocation10 + $0x38] sm:$0xff]  ;;  %v1812_v62 = vld [vmem:[#allocation10 + $0x20] sm:$0xff] }
 0x322   :  { %2219 = vmatprep.subr.mxu0 %v1925_v63  ;;  %2281 = vmatprep.mubr.f32.mxu0 %v2072_v0  ;;  %v1814_v63 = vld [vmem:[#allocation10 + $0x30] sm:$0xff] }
 0x323   :  { %2290 = vmatprep.subr.mxu1 %v1927_v1  ;;  %2352 = vmatprep.mubr.f32.mxu1 %v2072_v0  ;;  %v1813_v0 = vld [vmem:[#allocation10 + $0x28] sm:$0xff] }
 0x324   :  { %2220 = vmatpush1.msra.mxu0 %v1924_v2  ;;  %2291 = vmatpush1.msra.mxu1 %v1926_v3  ;;  %v2061_v1 = vld [vmem:[#allocation10 + $0x7e8] sm:$0xff]  ;;  %v2063_v2 = vld [vmem:[#allocation10 + $0x7f8] sm:$0xff]  ;;  %v2060_v3 = vld [vmem:[#allocation10 + $0x7e0] sm:$0xff] }
 0x325   :  { %2221 = vmatprep.subr.mxu0 %v1917_v4  ;;  %2292 = vmatprep.subr.mxu1 %v1919_v5  ;;  %v2062_v4 = vld [vmem:[#allocation10 + $0x7f0] sm:$0xff]  ;;  %v2053_v5 = vld [vmem:[#allocation10 + $0x7a8] sm:$0xff] }
 0x326   :  { %2222 = vmatpush1.msra.mxu0 %v1916_v6  ;;  %2293 = vmatpush1.msra.mxu1 %v1918_v7  ;;  %v2055_v6 = vld [vmem:[#allocation10 + $0x7b8] sm:$0xff]  ;;  %v2052_v7 = vld [vmem:[#allocation10 + $0x7a0] sm:$0xff] }
 0x327   :  { %2223 = vmatprep.subr.mxu0 %v1909_v8  ;;  %2294 = vmatprep.subr.mxu1 %v1911_v9  ;;  %v2054_v8 = vld [vmem:[#allocation10 + $0x7b0] sm:$0xff]  ;;  %v2045_v9 = vld [vmem:[#allocation10 + $0x768] sm:$0xff] }
 0x328   :  { %2224 = vmatpush1.msra.mxu0 %v1908_v10  ;;  %2295 = vmatpush1.msra.mxu1 %v1910_v11  ;;  %v2047_v10 = vld [vmem:[#allocation10 + $0x778] sm:$0xff]  ;;  %v2044_v11 = vld [vmem:[#allocation10 + $0x760] sm:$0xff] }
 0x329   :  { %2225 = vmatprep.subr.mxu0 %v1901_v13  ;;  %2296 = vmatprep.subr.mxu1 %v1903_v14  ;;  %v2046_v13 = vld [vmem:[#allocation10 + $0x770] sm:$0xff]  ;;  %v2037_v14 = vld [vmem:[#allocation10 + $0x728] sm:$0xff] }
 0x32a   :  { %2226 = vmatpush1.msra.mxu0 %v1900_v15  ;;  %2297 = vmatpush1.msra.mxu1 %v1902_v16  ;;  %v2039_v15 = vld [vmem:[#allocation10 + $0x738] sm:$0xff]  ;;  %v2036_v16 = vld [vmem:[#allocation10 + $0x720] sm:$0xff] }
 0x32b   :  { %2227 = vmatprep.subr.mxu0 %v1893_v17  ;;  %2298 = vmatprep.subr.mxu1 %v1895_v19  ;;  %v2038_v17 = vld [vmem:[#allocation10 + $0x730] sm:$0xff]  ;;  %v2029_v19 = vld [vmem:[#allocation10 + $0x6e8] sm:$0xff] }
 0x32c   :  { %2228 = vmatpush1.msra.mxu0 %v1892_v20  ;;  %2299 = vmatpush1.msra.mxu1 %v1894_v21  ;;  %v2031_v20 = vld [vmem:[#allocation10 + $0x6f8] sm:$0xff]  ;;  %v2028_v21 = vld [vmem:[#allocation10 + $0x6e0] sm:$0xff] }
 0x32d   :  { %2229 = vmatprep.subr.mxu0 %v1885_v22  ;;  %2300 = vmatprep.subr.mxu1 %v1887_v24  ;;  %v2030_v22 = vld [vmem:[#allocation10 + $0x6f0] sm:$0xff]  ;;  %v2021_v24 = vld [vmem:[#allocation10 + $0x6a8] sm:$0xff] }
 0x32e   :  { %2230 = vmatpush1.msra.mxu0 %v1884_v25  ;;  %2301 = vmatpush1.msra.mxu1 %v1886_v27  ;;  %v2023_v25 = vld [vmem:[#allocation10 + $0x6b8] sm:$0xff]  ;;  %v2020_v27 = vld [vmem:[#allocation10 + $0x6a0] sm:$0xff] }
 0x32f   :  { %2231 = vmatprep.subr.mxu0 %v1877_v28  ;;  %2302 = vmatprep.subr.mxu1 %v1879_v29  ;;  %v2022_v28 = vld [vmem:[#allocation10 + $0x6b0] sm:$0xff]  ;;  %v2013_v29 = vld [vmem:[#allocation10 + $0x668] sm:$0xff] }
 0x330   :  { %2232 = vmatpush1.msra.mxu0 %v1876_v30  ;;  %2303 = vmatpush1.msra.mxu1 %v1878_v31  ;;  %v2015_v30 = vld [vmem:[#allocation10 + $0x678] sm:$0xff]  ;;  %v2012_v31 = vld [vmem:[#allocation10 + $0x660] sm:$0xff] }
 0x331   :  { %2233 = vmatprep.subr.mxu0 %v1869_v32  ;;  %2304 = vmatprep.subr.mxu1 %v1871_v34  ;;  %v2014_v32 = vld [vmem:[#allocation10 + $0x670] sm:$0xff]  ;;  %v2005_v34 = vld [vmem:[#allocation10 + $0x628] sm:$0xff] }
 0x332   :  { %2234 = vmatpush1.msra.mxu0 %v1868_v35  ;;  %2305 = vmatpush1.msra.mxu1 %v1870_v36  ;;  %v2007_v35 = vld [vmem:[#allocation10 + $0x638] sm:$0xff]  ;;  %v2004_v36 = vld [vmem:[#allocation10 + $0x620] sm:$0xff] }
 0x333   :  { %2235 = vmatprep.subr.mxu0 %v1861_v37  ;;  %2306 = vmatprep.subr.mxu1 %v1863_v38  ;;  %v2006_v37 = vld [vmem:[#allocation10 + $0x630] sm:$0xff]  ;;  %v1997_v38 = vld [vmem:[#allocation10 + $0x5e8] sm:$0xff] }
 0x334   :  { %2236 = vmatpush1.msra.mxu0 %v1860_v39  ;;  %2307 = vmatpush1.msra.mxu1 %v1862_v40  ;;  %v1999_v39 = vld [vmem:[#allocation10 + $0x5f8] sm:$0xff]  ;;  %v1996_v40 = vld [vmem:[#allocation10 + $0x5e0] sm:$0xff] }
 0x335   :  { %2237 = vmatprep.subr.mxu0 %v1853_v41  ;;  %2308 = vmatprep.subr.mxu1 %v1855_v42  ;;  %v1998_v41 = vld [vmem:[#allocation10 + $0x5f0] sm:$0xff]  ;;  %v1989_v42 = vld [vmem:[#allocation10 + $0x5a8] sm:$0xff] }
 0x336   :  { %2238 = vmatpush1.msra.mxu0 %v1852_v43  ;;  %2309 = vmatpush1.msra.mxu1 %v1854_v44  ;;  %v1991_v43 = vld [vmem:[#allocation10 + $0x5b8] sm:$0xff]  ;;  %v1988_v44 = vld [vmem:[#allocation10 + $0x5a0] sm:$0xff] }
 0x337   :  { %2239 = vmatprep.subr.mxu0 %v1845_v45  ;;  %2310 = vmatprep.subr.mxu1 %v1847_v46  ;;  %v1990_v45 = vld [vmem:[#allocation10 + $0x5b0] sm:$0xff]  ;;  %v1981_v46 = vld [vmem:[#allocation10 + $0x568] sm:$0xff] }
 0x338   :  { %2240 = vmatpush1.msra.mxu0 %v1844_v47  ;;  %2311 = vmatpush1.msra.mxu1 %v1846_v23  ;;  %v1983_v47 = vld [vmem:[#allocation10 + $0x578] sm:$0xff]  ;;  %v1980_v23 = vld [vmem:[#allocation10 + $0x560] sm:$0xff] }
 0x339   :  { %2241 = vmatprep.subr.mxu0 %v1837_v48  ;;  %2312 = vmatprep.subr.mxu1 %v1839_v49  ;;  %v1982_v48 = vld [vmem:[#allocation10 + $0x570] sm:$0xff]  ;;  %v1973_v49 = vld [vmem:[#allocation10 + $0x528] sm:$0xff] }
 0x33a   :  { %2242 = vmatpush1.msra.mxu0 %v1836_v50  ;;  %2313 = vmatpush1.msra.mxu1 %v1838_v33  ;;  %v1975_v50 = vld [vmem:[#allocation10 + $0x538] sm:$0xff]  ;;  %v1972_v33 = vld [vmem:[#allocation10 + $0x520] sm:$0xff] }
 0x33b   :  { %2243 = vmatprep.subr.mxu0 %v1829_v26  ;;  %2314 = vmatprep.subr.mxu1 %v1831_v52  ;;  %v1974_v26 = vld [vmem:[#allocation10 + $0x530] sm:$0xff]  ;;  %v1965_v52 = vld [vmem:[#allocation10 + $0x4e8] sm:$0xff] }
 0x33c   :  { %2244 = vmatpush1.msra.mxu0 %v1828_v54  ;;  %2315 = vmatpush1.msra.mxu1 %v1830_v55  ;;  %v1967_v54 = vld [vmem:[#allocation10 + $0x4f8] sm:$0xff]  ;;  %v1964_v55 = vld [vmem:[#allocation10 + $0x4e0] sm:$0xff] }
 0x33d   :  { %2245 = vmatprep.subr.mxu0 %v1821_v56  ;;  %2316 = vmatprep.subr.mxu1 %v1823_v57  ;;  %v1966_v56 = vld [vmem:[#allocation10 + $0x4f0] sm:$0xff]  ;;  %v1957_v57 = vld [vmem:[#allocation10 + $0x4a8] sm:$0xff] }
 0x33e   :  { %2246 = vmatpush1.msra.mxu0 %v1820_v58  ;;  %2317 = vmatpush1.msra.mxu1 %v1822_v59  ;;  %v1959_v58 = vld [vmem:[#allocation10 + $0x4b8] sm:$0xff]  ;;  %v1956_v59 = vld [vmem:[#allocation10 + $0x4a0] sm:$0xff] }
 0x33f   :  { %2247 = vmatprep.subr.mxu0 %v1813_v0  ;;  %2318 = vmatprep.subr.mxu1 %v1815_v61  ;;  %v1958_v0 = vld [vmem:[#allocation10 + $0x4b0] sm:$0xff]  ;;  %v1949_v61 = vld [vmem:[#allocation10 + $0x468] sm:$0xff] }
 0x340   :  { %2248 = vmatpush1.msra.mxu0 %v1812_v62  ;;  %2319 = vmatpush1.msra.mxu1 %v1814_v63  ;;  %v1951_v62 = vld [vmem:[#allocation10 + $0x478] sm:$0xff]  ;;  %v1948_v63 = vld [vmem:[#allocation10 + $0x460] sm:$0xff] }
 0x341   :  { %2249 = vmatprep.subr.mxu0 %v2061_v1  ;;  %2320 = vmatprep.subr.mxu1 %v2063_v2  ;;  %v1950_v1 = vld [vmem:[#allocation10 + $0x470] sm:$0xff]  ;;  %v1941_v2 = vld [vmem:[#allocation10 + $0x428] sm:$0xff] }
 0x342   :  { %2250 = vmatpush2.msra.mxu0 %v2060_v3  ;;  %2321 = vmatpush2.msra.mxu1 %v2062_v4  ;;  %v1943_v3 = vld [vmem:[#allocation10 + $0x438] sm:$0xff]  ;;  %v1940_v4 = vld [vmem:[#allocation10 + $0x420] sm:$0xff] }
 0x343   :  { %2251 = vmatprep.subr.mxu0 %v2053_v5  ;;  %2322 = vmatprep.subr.mxu1 %v2055_v6  ;;  %v1942_v5 = vld [vmem:[#allocation10 + $0x430] sm:$0xff]  ;;  %v2617_v6 = vld [vmem:[#allocation10 + $0x3c8] sm:$0xff] }
 0x344   :  { %2252 = vmatpush2.msra.mxu0 %v2052_v7  ;;  %2323 = vmatpush2.msra.mxu1 %v2054_v8  ;;  %v2619_v7 = vld [vmem:[#allocation10 + $0x3d8] sm:$0xff]  ;;  %v2616_v8 = vld [vmem:[#allocation10 + $0x3c0] sm:$0xff] }
 0x345   :  { %2253 = vmatprep.subr.mxu0 %v2045_v9  ;;  %2324 = vmatprep.subr.mxu1 %v2047_v10  ;;  %v2618_v9 = vld [vmem:[#allocation10 + $0x3d0] sm:$0xff]  ;;  %v2609_v10 = vld [vmem:[#allocation10 + $0x388] sm:$0xff] }
 0x346   :  { %2254 = vmatpush2.msra.mxu0 %v2044_v11  ;;  %2325 = vmatpush2.msra.mxu1 %v2046_v13  ;;  %v2611_v11 = vld [vmem:[#allocation10 + $0x398] sm:$0xff]  ;;  %v2608_v13 = vld [vmem:[#allocation10 + $0x380] sm:$0xff] }
 0x347   :  { %2255 = vmatprep.subr.mxu0 %v2037_v14  ;;  %2326 = vmatprep.subr.mxu1 %v2039_v15  ;;  %v2610_v14 = vld [vmem:[#allocation10 + $0x390] sm:$0xff]  ;;  %v2601_v15 = vld [vmem:[#allocation10 + $0x348] sm:$0xff] }
 0x348   :  { %2256 = vmatpush2.msra.mxu0 %v2036_v16  ;;  %2327 = vmatpush2.msra.mxu1 %v2038_v17  ;;  %v2603_v16 = vld [vmem:[#allocation10 + $0x358] sm:$0xff]  ;;  %v2602_v17 = vld [vmem:[#allocation10 + $0x350] sm:$0xff] }
 0x349   :  { %2257 = vmatprep.subr.mxu0 %v2029_v19  ;;  %2328 = vmatprep.subr.mxu1 %v2031_v20  ;;  %v2593_v19 = vld [vmem:[#allocation10 + $0x308] sm:$0xff]  ;;  %v2595_v20 = vld [vmem:[#allocation10 + $0x318] sm:$0xff] }
 0x34a   :  { %2258 = vmatpush2.msra.mxu0 %v2028_v21  ;;  %2329 = vmatpush2.msra.mxu1 %v2030_v22  ;;  %v2592_v21 = vld [vmem:[#allocation10 + $0x300] sm:$0xff]  ;;  %v2594_v22 = vld [vmem:[#allocation10 + $0x310] sm:$0xff] }
 0x34b   :  { %2259 = vmatprep.subr.mxu0 %v2021_v24  ;;  %2330 = vmatprep.subr.mxu1 %v2023_v25  ;;  %v2585_v24 = vld [vmem:[#allocation10 + $0x2c8] sm:$0xff]  ;;  %v2587_v25 = vld [vmem:[#allocation10 + $0x2d8] sm:$0xff] }
 0x34c   :  { %2260 = vmatpush2.msra.mxu0 %v2020_v27  ;;  %2331 = vmatpush2.msra.mxu1 %v2022_v28  ;;  %v2584_v27 = vld [vmem:[#allocation10 + $0x2c0] sm:$0xff]  ;;  %v2586_v28 = vld [vmem:[#allocation10 + $0x2d0] sm:$0xff] }
 0x34d   :  { %2261 = vmatprep.subr.mxu0 %v2013_v29  ;;  %2332 = vmatprep.subr.mxu1 %v2015_v30  ;;  %v2577_v29 = vld [vmem:[#allocation10 + $0x288] sm:$0xff]  ;;  %v2579_v30 = vld [vmem:[#allocation10 + $0x298] sm:$0xff] }
 0x34e   :  { %2262 = vmatpush2.msra.mxu0 %v2012_v31  ;;  %2333 = vmatpush2.msra.mxu1 %v2014_v32  ;;  %v2576_v31 = vld [vmem:[#allocation10 + $0x280] sm:$0xff]  ;;  %v2578_v32 = vld [vmem:[#allocation10 + $0x290] sm:$0xff] }
 0x34f   :  { %2263 = vmatprep.subr.mxu0 %v2005_v34  ;;  %2334 = vmatprep.subr.mxu1 %v2007_v35  ;;  %v2569_v34 = vld [vmem:[#allocation10 + $0x248] sm:$0xff]  ;;  %v2571_v35 = vld [vmem:[#allocation10 + $0x258] sm:$0xff] }
 0x350   :  { %2264 = vmatpush2.msra.mxu0 %v2004_v36  ;;  %2335 = vmatpush2.msra.mxu1 %v2006_v37  ;;  %v2568_v36 = vld [vmem:[#allocation10 + $0x240] sm:$0xff]  ;;  %v2570_v37 = vld [vmem:[#allocation10 + $0x250] sm:$0xff] }
 0x351   :  { %2265 = vmatprep.subr.mxu0 %v1997_v38  ;;  %2336 = vmatprep.subr.mxu1 %v1999_v39  ;;  %v2561_v38 = vld [vmem:[#allocation10 + $0x208] sm:$0xff]  ;;  %v2563_v39 = vld [vmem:[#allocation10 + $0x218] sm:$0xff] }
 0x352   :  { %2266 = vmatpush2.msra.mxu0 %v1996_v40  ;;  %2337 = vmatpush2.msra.mxu1 %v1998_v41  ;;  %v2560_v40 = vld [vmem:[#allocation10 + $0x200] sm:$0xff]  ;;  %v2562_v41 = vld [vmem:[#allocation10 + $0x210] sm:$0xff] }
 0x353   :  { %2267 = vmatprep.subr.mxu0 %v1989_v42  ;;  %2338 = vmatprep.subr.mxu1 %v1991_v43  ;;  %v2553_v42 = vld [vmem:[#allocation10 + $0x1c8] sm:$0xff]  ;;  %v2555_v43 = vld [vmem:[#allocation10 + $0x1d8] sm:$0xff] }
 0x354   :  { %2268 = vmatpush2.msra.mxu0 %v1988_v44  ;;  %2339 = vmatpush2.msra.mxu1 %v1990_v45  ;;  %v2552_v44 = vld [vmem:[#allocation10 + $0x1c0] sm:$0xff]  ;;  %v2554_v45 = vld [vmem:[#allocation10 + $0x1d0] sm:$0xff] }
 0x355   :  { %2269 = vmatprep.subr.mxu0 %v1981_v46  ;;  %2340 = vmatprep.subr.mxu1 %v1983_v47  ;;  %v2545_v46 = vld [vmem:[#allocation10 + $0x188] sm:$0xff]  ;;  %v2547_v47 = vld [vmem:[#allocation10 + $0x198] sm:$0xff] }
 0x356   :  { %2270 = vmatpush2.msra.mxu0 %v1980_v23  ;;  %2341 = vmatpush2.msra.mxu1 %v1982_v48  ;;  %v2544_v23 = vld [vmem:[#allocation10 + $0x180] sm:$0xff]  ;;  %v2546_v48 = vld [vmem:[#allocation10 + $0x190] sm:$0xff] }
 0x357   :  { %2271 = vmatprep.subr.mxu0 %v1973_v49  ;;  %2342 = vmatprep.subr.mxu1 %v1975_v50  ;;  %v2537_v49 = vld [vmem:[#allocation10 + $0x148] sm:$0xff]  ;;  %v2539_v50 = vld [vmem:[#allocation10 + $0x158] sm:$0xff] }
 0x358   :  { %2272 = vmatpush2.msra.mxu0 %v1972_v33  ;;  %2343 = vmatpush2.msra.mxu1 %v1974_v26  ;;  %v2536_v33 = vld [vmem:[#allocation10 + $0x140] sm:$0xff]  ;;  %v2538_v26 = vld [vmem:[#allocation10 + $0x150] sm:$0xff] }
 0x359   :  { %2273 = vmatprep.subr.mxu0 %v1965_v52  ;;  %2344 = vmatprep.subr.mxu1 %v1967_v54  ;;  %v2529_v52 = vld [vmem:[#allocation10 + $0x108] sm:$0xff]  ;;  %v2531_v54 = vld [vmem:[#allocation10 + $0x118] sm:$0xff] }
 0x35a   :  { %2274 = vmatpush2.msra.mxu0 %v1964_v55  ;;  %2345 = vmatpush2.msra.mxu1 %v1966_v56  ;;  %v2528_v55 = vld [vmem:[#allocation10 + $0x100] sm:$0xff]  ;;  %v2530_v56 = vld [vmem:[#allocation10 + $0x110] sm:$0xff] }
 0x35b   :  { %2275 = vmatprep.subr.mxu0 %v1957_v57  ;;  %2346 = vmatprep.subr.mxu1 %v1959_v58  ;;  %v2521_v57 = vld [vmem:[#allocation10 + $0xc8] sm:$0xff]  ;;  %v2523_v58 = vld [vmem:[#allocation10 + $0xd8] sm:$0xff] }
 0x35c   :  { %2276 = vmatpush2.msra.mxu0 %v1956_v59  ;;  %2347 = vmatpush2.msra.mxu1 %v1958_v0  ;;  %v2520_v59 = vld [vmem:[#allocation10 + $0xc0] sm:$0xff]  ;;  %v2522_v0 = vld [vmem:[#allocation10 + $0xd0] sm:$0xff] }
 0x35d   :  { %2277 = vmatprep.subr.mxu0 %v1949_v61  ;;  %2348 = vmatprep.subr.mxu1 %v1951_v62  ;;  %v2513_v61 = vld [vmem:[#allocation10 + $0x88] sm:$0xff]  ;;  %v2515_v62 = vld [vmem:[#allocation10 + $0x98] sm:$0xff] }
 0x35e   :  { %2278 = vmatpush2.msra.mxu0 %v1948_v63  ;;  %2349 = vmatpush2.msra.mxu1 %v1950_v1  ;;  %v2512_v63 = vld [vmem:[#allocation10 + $0x80] sm:$0xff]  ;;  %v2514_v1 = vld [vmem:[#allocation10 + $0x90] sm:$0xff] }
 0x35f   :  { %2279 = vmatprep.subr.mxu0 %v1941_v2  ;;  %2350 = vmatprep.subr.mxu1 %v1943_v3  ;;  %v2505_v2 = vld [vmem:[#allocation10 + $0x48] sm:$0xff]  ;;  %v2507_v3 = vld [vmem:[#allocation10 + $0x58] sm:$0xff] }
 0x360   :  { %2280 = vmatpush2.msra.mxu0 %v1940_v4  ;;  %2351 = vmatpush2.msra.mxu1 %v1942_v5  ;;  %v2504_v4 = vld [vmem:[#allocation10 + $0x40] sm:$0xff]  ;;  %v2506_v5 = vld [vmem:[#allocation10 + $0x50] sm:$0xff] }
 0x361   :  { %2282 = vmatmul.mubr.f32.vlgmr.msra.gmra.mxu0 %v6505_v60  ;;  %2353 = vmatmul.mubr.f32.vlgmr.msra.gmra.mxu1 %v6505_v60  ;;  %v2600_v60 = vld [vmem:[#allocation10 + $0x340] sm:$0xff] }
 0x362   :  { %2763 = vmatprep.subr.mxu0 %v2617_v6  ;;  %2834 = vmatprep.subr.mxu1 %v2619_v7  ;;  %v2497_v6 = vld [vmem:[#allocation10 + $0x8] sm:$0xff]  ;;  %v2499_v7 = vld [vmem:[#allocation10 + $0x18] sm:$0xff] }
 0x363   :  { %2764 = vmatpush1.msra.mxu0 %v2616_v8  ;;  %2835 = vmatpush1.msra.mxu1 %v2618_v9  ;;  %v2496_v8 = vld [vmem:[#allocation10] sm:$0xff]  ;;  %v2498_v9 = vld [vmem:[#allocation10 + $0x10] sm:$0xff] }
 0x364   :  { %2765 = vmatprep.subr.mxu0 %v2609_v10  ;;  %2836 = vmatprep.subr.mxu1 %v2611_v11  ;;  %v2745_v10 = vld [vmem:[#allocation10 + $0x7c8] sm:$0xff]  ;;  %v2747_v11 = vld [vmem:[#allocation10 + $0x7d8] sm:$0xff] }
 0x365   :  { %2766 = vmatpush1.msra.mxu0 %v2608_v13  ;;  %2837 = vmatpush1.msra.mxu1 %v2610_v14  ;;  %v2744_v13 = vld [vmem:[#allocation10 + $0x7c0] sm:$0xff]  ;;  %v2746_v14 = vld [vmem:[#allocation10 + $0x7d0] sm:$0xff] }
 0x366   :  { %2767 = vmatprep.subr.mxu0 %v2601_v15  ;;  %2838 = vmatprep.subr.mxu1 %v2603_v16  ;;  %v2737_v15 = vld [vmem:[#allocation10 + $0x788] sm:$0xff]  ;;  %v2739_v16 = vld [vmem:[#allocation10 + $0x798] sm:$0xff] }
 0x367   :  { %2768 = vmatpush1.msra.mxu0 %v2600_v60  ;;  %2839 = vmatpush1.msra.mxu1 %v2602_v17  ;;  %v2736_v60 = vld [vmem:[#allocation10 + $0x780] sm:$0xff]  ;;  %v2738_v17 = vld [vmem:[#allocation10 + $0x790] sm:$0xff] }
 0x368   :  { %2769 = vmatprep.subr.mxu0 %v2593_v19  ;;  %2840 = vmatprep.subr.mxu1 %v2595_v20  ;;  %v2729_v19 = vld [vmem:[#allocation10 + $0x748] sm:$0xff]  ;;  %v2731_v20 = vld [vmem:[#allocation10 + $0x758] sm:$0xff] }
 0x369   :  { %2770 = vmatpush1.msra.mxu0 %v2592_v21  ;;  %2841 = vmatpush1.msra.mxu1 %v2594_v22  ;;  %v2728_v21 = vld [vmem:[#allocation10 + $0x740] sm:$0xff]  ;;  %v2730_v22 = vld [vmem:[#allocation10 + $0x750] sm:$0xff] }
 0x36a   :  { %2771 = vmatprep.subr.mxu0 %v2585_v24  ;;  %2842 = vmatprep.subr.mxu1 %v2587_v25  ;;  %v2721_v24 = vld [vmem:[#allocation10 + $0x708] sm:$0xff]  ;;  %v2723_v25 = vld [vmem:[#allocation10 + $0x718] sm:$0xff] }
 0x36b   :  { %2772 = vmatpush1.msra.mxu0 %v2584_v27  ;;  %2843 = vmatpush1.msra.mxu1 %v2586_v28  ;;  %v2720_v27 = vld [vmem:[#allocation10 + $0x700] sm:$0xff]  ;;  %v2722_v28 = vld [vmem:[#allocation10 + $0x710] sm:$0xff] }
 0x36c   :  { %2773 = vmatprep.subr.mxu0 %v2577_v29  ;;  %2844 = vmatprep.subr.mxu1 %v2579_v30  ;;  %v2713_v29 = vld [vmem:[#allocation10 + $0x6c8] sm:$0xff]  ;;  %v2715_v30 = vld [vmem:[#allocation10 + $0x6d8] sm:$0xff] }
 0x36d   :  { %2774 = vmatpush1.msra.mxu0 %v2576_v31  ;;  %2845 = vmatpush1.msra.mxu1 %v2578_v32  ;;  %v2712_v31 = vld [vmem:[#allocation10 + $0x6c0] sm:$0xff]  ;;  %v2714_v32 = vld [vmem:[#allocation10 + $0x6d0] sm:$0xff] }
 0x36e   :  { %2775 = vmatprep.subr.mxu0 %v2569_v34  ;;  %2846 = vmatprep.subr.mxu1 %v2571_v35  ;;  %v2705_v34 = vld [vmem:[#allocation10 + $0x688] sm:$0xff]  ;;  %v2707_v35 = vld [vmem:[#allocation10 + $0x698] sm:$0xff] }
 0x36f   :  { %2776 = vmatpush1.msra.mxu0 %v2568_v36  ;;  %2847 = vmatpush1.msra.mxu1 %v2570_v37  ;;  %v2704_v36 = vld [vmem:[#allocation10 + $0x680] sm:$0xff]  ;;  %v2706_v37 = vld [vmem:[#allocation10 + $0x690] sm:$0xff] }
 0x370   :  { %2777 = vmatprep.subr.mxu0 %v2561_v38  ;;  %2848 = vmatprep.subr.mxu1 %v2563_v39  ;;  %v2697_v38 = vld [vmem:[#allocation10 + $0x648] sm:$0xff]  ;;  %v2699_v39 = vld [vmem:[#allocation10 + $0x658] sm:$0xff] }
 0x371   :  { %2778 = vmatpush1.msra.mxu0 %v2560_v40  ;;  %2849 = vmatpush1.msra.mxu1 %v2562_v41  ;;  %v2696_v40 = vld [vmem:[#allocation10 + $0x640] sm:$0xff]  ;;  %v2698_v41 = vld [vmem:[#allocation10 + $0x650] sm:$0xff] }
 0x372   :  { %2779 = vmatprep.subr.mxu0 %v2553_v42  ;;  %2850 = vmatprep.subr.mxu1 %v2555_v43  ;;  %v2689_v42 = vld [vmem:[#allocation10 + $0x608] sm:$0xff]  ;;  %v2691_v43 = vld [vmem:[#allocation10 + $0x618] sm:$0xff] }
 0x373   :  { %2780 = vmatpush1.msra.mxu0 %v2552_v44  ;;  %2851 = vmatpush1.msra.mxu1 %v2554_v45  ;;  %v2688_v44 = vld [vmem:[#allocation10 + $0x600] sm:$0xff]  ;;  %v2690_v45 = vld [vmem:[#allocation10 + $0x610] sm:$0xff] }
 0x374   :  { %2781 = vmatprep.subr.mxu0 %v2545_v46  ;;  %2852 = vmatprep.subr.mxu1 %v2547_v47  ;;  %v2681_v46 = vld [vmem:[#allocation10 + $0x5c8] sm:$0xff]  ;;  %v2683_v47 = vld [vmem:[#allocation10 + $0x5d8] sm:$0xff] }
 0x375   :  { %2782 = vmatpush1.msra.mxu0 %v2544_v23  ;;  %2853 = vmatpush1.msra.mxu1 %v2546_v48  ;;  %v2680_v23 = vld [vmem:[#allocation10 + $0x5c0] sm:$0xff]  ;;  %v2682_v48 = vld [vmem:[#allocation10 + $0x5d0] sm:$0xff] }
 0x376   :  { %2783 = vmatprep.subr.mxu0 %v2537_v49  ;;  %2854 = vmatprep.subr.mxu1 %v2539_v50 }
 0x377   :  { %2784 = vmatpush1.msra.mxu0 %v2536_v33  ;;  %2855 = vmatpush1.msra.mxu1 %v2538_v26  ;;  %v2673_v33 = vld [vmem:[#allocation10 + $0x588] sm:$0xff]  ;;  %v2675_v26 = vld [vmem:[#allocation10 + $0x598] sm:$0xff] }
 0x378   :  { %2785 = vmatprep.subr.mxu0 %v2529_v52  ;;  %2856 = vmatprep.subr.mxu1 %v2531_v54  ;;  %v2672_v52 = vld [vmem:[#allocation10 + $0x580] sm:$0xff]  ;;  %v2674_v54 = vld [vmem:[#allocation10 + $0x590] sm:$0xff] }
 0x379   :  { %2786 = vmatpush1.msra.mxu0 %v2528_v55  ;;  %2857 = vmatpush1.msra.mxu1 %v2530_v56 }
 0x37a   :  { %2787 = vmatprep.subr.mxu0 %v2521_v57  ;;  %2858 = vmatprep.subr.mxu1 %v2523_v58  ;;  %v2665_v57 = vld [vmem:[#allocation10 + $0x548] sm:$0xff]  ;;  %v2667_v58 = vld [vmem:[#allocation10 + $0x558] sm:$0xff] }
 0x37b   :  { %2788 = vmatpush1.msra.mxu0 %v2520_v59  ;;  %2859 = vmatpush1.msra.mxu1 %v2522_v0 }
 0x37c   :  { %2789 = vmatprep.subr.mxu0 %v2513_v61  ;;  %2860 = vmatprep.subr.mxu1 %v2515_v62  ;;  %v2664_v61 = vld [vmem:[#allocation10 + $0x540] sm:$0xff]  ;;  %v2666_v62 = vld [vmem:[#allocation10 + $0x550] sm:$0xff] }
 0x37d   :  { %2790 = vmatpush1.msra.mxu0 %v2512_v63  ;;  %2861 = vmatpush1.msra.mxu1 %v2514_v1  ;;  %v2657_v63 = vld [vmem:[#allocation10 + $0x508] sm:$0xff]  ;;  %v2659_v1 = vld [vmem:[#allocation10 + $0x518] sm:$0xff] }
 0x37e   :  { %2791 = vmatprep.subr.mxu0 %v2505_v2  ;;  %2862 = vmatprep.subr.mxu1 %v2507_v3  ;;  %v2656_v2 = vld [vmem:[#allocation10 + $0x500] sm:$0xff] }
 0x37f   :  { %2792 = vmatpush1.msra.mxu0 %v2504_v4  ;;  %2863 = vmatpush1.msra.mxu1 %v2506_v5  ;;  %v2658_v5 = vld [vmem:[#allocation10 + $0x510] sm:$0xff] }
 0x380   :  { %2793 = vmatprep.subr.mxu0 %v2497_v6  ;;  %2864 = vmatprep.subr.mxu1 %v2499_v7  ;;  %v2649_v6 = vld [vmem:[#allocation10 + $0x4c8] sm:$0xff]  ;;  %v2651_v7 = vld [vmem:[#allocation10 + $0x4d8] sm:$0xff] }
 0x381   :  { %2794 = vmatpush1.msra.mxu0 %v2496_v8  ;;  %2865 = vmatpush1.msra.mxu1 %v2498_v9  ;;  %v2648_v8 = vld [vmem:[#allocation10 + $0x4c0] sm:$0xff]  ;;  %v2650_v9 = vld [vmem:[#allocation10 + $0x4d0] sm:$0xff] }
 0x382   :  { %2795 = vmatprep.subr.mxu0 %v2745_v10  ;;  %2866 = vmatprep.subr.mxu1 %v2747_v11  ;;  %v2641_v10 = vld [vmem:[#allocation10 + $0x488] sm:$0xff] }
 0x383   :  { %2796 = vmatpush2.msra.mxu0 %v2744_v13  ;;  %2867 = vmatpush2.msra.mxu1 %v2746_v14  ;;  %v2643_v13 = vld [vmem:[#allocation10 + $0x498] sm:$0xff]  ;;  %v2640_v14 = vld [vmem:[#allocation10 + $0x480] sm:$0xff] }
 0x384   :  { %2797 = vmatprep.subr.mxu0 %v2737_v15  ;;  %2868 = vmatprep.subr.mxu1 %v2739_v16  ;;  %v2642_v15 = vld [vmem:[#allocation10 + $0x490] sm:$0xff]  ;;  %v2633_v16 = vld [vmem:[#allocation10 + $0x448] sm:$0xff] }
 0x385   :  { %2798 = vmatpush2.msra.mxu0 %v2736_v60  ;;  %2869 = vmatpush2.msra.mxu1 %v2738_v17  ;;  %v2635_v60 = vld [vmem:[#allocation10 + $0x458] sm:$0xff] }
 0x386   :  { %2799 = vmatprep.subr.mxu0 %v2729_v19  ;;  %2870 = vmatprep.subr.mxu1 %v2731_v20  ;;  %v2632_v19 = vld [vmem:[#allocation10 + $0x440] sm:$0xff]  ;;  %v2634_v20 = vld [vmem:[#allocation10 + $0x450] sm:$0xff] }
 0x387   :  { %2800 = vmatpush2.msra.mxu0 %v2728_v21  ;;  %2871 = vmatpush2.msra.mxu1 %v2730_v22  ;;  %v2360_v21 = vld [vmem:[#allocation2 + $0x2] ss:$8 sm:$0xf] }
 0x388   :  { %2801 = vmatprep.subr.mxu0 %v2721_v24  ;;  %2872 = vmatprep.subr.mxu1 %v2723_v25  ;;  %v2625_v22 = vld [vmem:[#allocation10 + $0x408] sm:$0xff]  ;;  %v2627_v24 = vld [vmem:[#allocation10 + $0x418] sm:$0xff] }
 0x389   :  { %2802 = vmatpush2.msra.mxu0 %v2720_v27  ;;  %2873 = vmatpush2.msra.mxu1 %v2722_v28  ;;  %v2624_v27 = vld [vmem:[#allocation10 + $0x400] sm:$0xff]  ;;  %v2626_v28 = vld [vmem:[#allocation10 + $0x410] sm:$0xff] }
 0x38a   :  { %2803 = vmatprep.subr.mxu0 %v2713_v29  ;;  %2874 = vmatprep.subr.mxu1 %v2715_v30 }
 0x38b   :  { %2804 = vmatpush2.msra.mxu0 %v2712_v31  ;;  %2875 = vmatpush2.msra.mxu1 %v2714_v32  ;;  %v2621_v31 = vld [vmem:[#allocation10 + $0x3e8] sm:$0xff]  ;;  %v2623_v32 = vld [vmem:[#allocation10 + $0x3f8] sm:$0xff] }
 0x38c   :  { %2805 = vmatprep.subr.mxu0 %v2705_v34  ;;  %2876 = vmatprep.subr.mxu1 %v2707_v35 }
 0x38d   :  { %2806 = vmatpush2.msra.mxu0 %v2704_v36  ;;  %2877 = vmatpush2.msra.mxu1 %v2706_v37 }
 0x38e   :  { %2807 = vmatprep.subr.mxu0 %v2697_v38  ;;  %2878 = vmatprep.subr.mxu1 %v2699_v39 }
 0x38f   :  { %2808 = vmatpush2.msra.mxu0 %v2696_v40  ;;  %2879 = vmatpush2.msra.mxu1 %v2698_v41 }
 0x390   :  { %2809 = vmatprep.subr.mxu0 %v2689_v42  ;;  %2880 = vmatprep.subr.mxu1 %v2691_v43 }
 0x391   :  { %2810 = vmatpush2.msra.mxu0 %v2688_v44  ;;  %2881 = vmatpush2.msra.mxu1 %v2690_v45 }
 0x392   :  { %2811 = vmatprep.subr.mxu0 %v2681_v46  ;;  %2882 = vmatprep.subr.mxu1 %v2683_v47  ;;  %v2423_v46 = vld [vmem:[#allocation4] sm:$0x3] }
 0x393   :  { %2812 = vmatpush2.msra.mxu0 %v2680_v23  ;;  %2883 = vmatpush2.msra.mxu1 %v2682_v48 }
 0x394   :  { %2813 = vmatprep.subr.mxu0 %v2673_v33  ;;  %2884 = vmatprep.subr.mxu1 %v2675_v26 }
 0x395   :  { %2814 = vmatpush2.msra.mxu0 %v2672_v52  ;;  %2885 = vmatpush2.msra.mxu1 %v2674_v54 }
 0x396   :  { %2815 = vmatprep.subr.mxu0 %v2665_v57  ;;  %2886 = vmatprep.subr.mxu1 %v2667_v58 }
 0x397   :  { %2816 = vmatpush2.msra.mxu0 %v2664_v61  ;;  %2887 = vmatpush2.msra.mxu1 %v2666_v62 }
 0x398   :  { %2817 = vmatprep.subr.mxu0 %v2657_v63  ;;  %2888 = vmatprep.subr.mxu1 %v2659_v1  ;;  %v2392_v63 = vld [vmem:[#allocation2 + $0x25] ss:$8 sm:$0xf] }
 0x399   :  { %2818 = vmatpush2.msra.mxu0 %v2656_v2  ;;  %2889 = vmatpush2.msra.mxu1 %v2658_v5 }
 0x39a   :  { %2819 = vmatprep.subr.mxu0 %v2649_v6  ;;  %2890 = vmatprep.subr.mxu1 %v2651_v7 }
 0x39b   :  { %2820 = vmatpush2.msra.mxu0 %v2648_v8  ;;  %2891 = vmatpush2.msra.mxu1 %v2650_v9 }
 0x39c   :  { %2821 = vmatprep.subr.mxu0 %v2641_v10  ;;  %2892 = vmatprep.subr.mxu1 %v2643_v13 }
 0x39d   :  { %2822 = vmatpush2.msra.mxu0 %v2640_v14  ;;  %2893 = vmatpush2.msra.mxu1 %v2642_v15 }
 0x39e   :  { %2823 = vmatprep.subr.mxu0 %v2633_v16  ;;  %2894 = vmatprep.subr.mxu1 %v2635_v60  ;;  %v2482_v16 = vrot.slane %v2423_v46, 1 }
 0x39f   :  { %2824 = vmatpush2.msra.mxu0 %v2632_v19  ;;  %2895 = vmatpush2.msra.mxu1 %v2634_v20 }
 0x3a0   :  { %2825 = vmatprep.subr.mxu0 %v2625_v22  ;;  %2896 = vmatprep.subr.mxu1 %v2627_v24 }
 0x3a1   :  { %2826 = vmatpush2.msra.mxu0 %v2624_v27  ;;  %2897 = vmatpush2.msra.mxu1 %v2626_v28 }
 0x3a2   :  { %2905 = vmatprep.subr.mxu0 %v2621_v31  ;;  %2976 = vmatprep.subr.mxu1 %v2623_v32  ;;  %v2622_v31 = vld [vmem:[#allocation10 + $0x3f0] sm:$0xff]  ;;  %v2613_v32 = vld [vmem:[#allocation10 + $0x3a8] sm:$0xff] }
 0x3e0   :  { %v2141_v49 = vpop.f32.mrf.mxu0  ;;  %v2212_v50 = vpop.f32.mrf.mxu1 }
 0x3e2   :  { %v2143_v55 = vpop.f32.mrf.mxu0  ;;  %v2214_v56 = vpop.f32.mrf.mxu1 }
 0x3e3   :  { %v2365_v59 = vcombine.low %v2141_v49, %v2143_v55  ;;  %v2366_v0 = vcombine.low %v2212_v50, %v2214_v56 }
 0x3e5   :  { %v2373_v3 = vrot.slane %v2365_v59, %v6460_v53  ;;  %v2380_v4 = vrot.slane %v2366_v0, %v6460_v53 }
 0x3e7   :  { %v2381_v11 = vcombine.low %v2373_v3, %v2380_v4 }
 0x3e9   :  { %v2388_v17 = vrot.slane %v2381_v11, %v6460_v53 }
 0x3eb   :  { %v2390_v25 = vadd.f32 %v2388_v17, %v2360_v21 }
 0x3ed   :  { %v5968_v29 = vmul.f32 -1.442695, %v2390_v25  ;;  %v2431_v30 = vrot.slane %v2390_v25, 1  ;;  %v2442_v35 = vrot.slane %v2390_v25, 3  ;;  %v2439_v38 = vrot.slane %v2390_v25, 2 }
 0x3ef   :  { %6077 = vpow2.f32 %v5968_v29  ;;  %v5969_v34 = vmul.f32 -1.442695, %v2431_v30  ;;  %v5970_v36 = vmul.f32 -1.442695, %v2442_v35  ;;  %v2620_v30 = vld [vmem:[#allocation10 + $0x3e0] sm:$0xff] }
 0x3f0   :  { %v2612_v35 = vld [vmem:[#allocation10 + $0x3a0] sm:$0xff] }
 0x3f1   :  { %6079 = vpow2.f32 %v5969_v34  ;;  %v2615_v34 = vld [vmem:[#allocation10 + $0x3b8] sm:$0xff] }
 0x3f2   :  { %6081 = vpow2.f32 %v5970_v36  ;;  %v2614_v36 = vld [vmem:[#allocation10 + $0x3b0] sm:$0xff] }
 0x3fc   :  { %v6078_v37 = vpop.eup %6077 }
 0x3fd   :  { %v2427_v39 = vadd.f32 1.0, %v6078_v37  ;;  %v2605_v37 = vld [vmem:[#allocation10 + $0x368] sm:$0xff] }
 0x3fe   :  { %v6080_v40 = vpop.eup %6079 }
 0x3ff   :  { %6083 = vrcp.f32 %v2427_v39  ;;  %v2436_v41 = vadd.f32 1.0, %v6080_v40  ;;  %v6082_v42 = vpop.eup %6081  ;;  %v2604_v39 = vld [vmem:[#allocation10 + $0x360] sm:$0xff]  ;;  %v2606_v40 = vld [vmem:[#allocation10 + $0x370] sm:$0xff] }
 0x400   :  { %6085 = vtanh.f32 %v2439_v38  ;;  %v2447_v47 = vadd.f32 1.0, %v6082_v42  ;;  %v2607_v38 = vld [vmem:[#allocation10 + $0x378] sm:$0xff] }
 0x401   :  { %6087 = vrcp.f32 %v2436_v41  ;;  %v2597_v41 = vld [vmem:[#allocation10 + $0x328] sm:$0xff]  ;;  %v2599_v42 = vld [vmem:[#allocation10 + $0x338] sm:$0xff] }
 0x402   :  { %6089 = vrcp.f32 %v2447_v47  ;;  %v2588_v47 = vld [vmem:[#allocation10 + $0x2e0] sm:$0xff] }
 0x40c   :  { %v6084_v43 = vpop.eup %6083 }
 0x40d   :  { %v6086_v44 = vpop.eup %6085 }
 0x40e   :  { %v6088_v45 = vpop.eup %6087  ;;  %v2451_v48 = vmul.f32 %v6086_v44, %v6084_v43  ;;  %v2596_v43 = vld [vmem:[#allocation10 + $0x320] sm:$0xff]  ;;  %v2598_v44 = vld [vmem:[#allocation10 + $0x330] sm:$0xff] }
 0x40f   :  { %v2450_v23 = vmul.f32 %v6088_v45, %v2423_v46  ;;  %v6090_v50 = vpop.eup %6089  ;;  %v2589_v45 = vld [vmem:[#allocation10 + $0x2e8] sm:$0xff]  ;;  %v2591_v46 = vld [vmem:[#allocation10 + $0x2f8] sm:$0xff] }
 0x411   :  { %v2452_v49 = vadd.f32 %v2451_v48, %v2450_v23  ;;  %v2590_v23 = vld [vmem:[#allocation10 + $0x2f0] sm:$0xff]  ;;  %v2581_v48 = vld [vmem:[#allocation10 + $0x2a8] sm:$0xff] }
 0x413   :  { %6091 = vtanh.f32 %v2452_v49  ;;  %2491 = vst.msk [vmem:[#allocation4] sm:$0x1] %vm6466_vm2, %v2452_v49  ;;  %v2583_v49 = vld [vmem:[#allocation10 + $0x2b8] sm:$0xff] }
 0x420   :  { %v6092_v33 = vpop.eup %6091 }
 0x421   :  { %v2454_v26 = vmul.f32 %v6092_v33, %v6090_v50  ;;  %v2283_v52 = vpop.f32.mrf.mxu0  ;;  %v2354_v54 = vpop.f32.mrf.mxu1  ;;  %v2580_v50 = vld [vmem:[#allocation10 + $0x2a0] sm:$0xff]  ;;  %v2582_v33 = vld [vmem:[#allocation10 + $0x2b0] sm:$0xff] }
 0x423   :  { %2489 = vst.msk [vmem:[#allocation3] sm:$0x1] %vm6466_vm2, %v2454_v26  ;;  %2493 = vst [vmem:[#allocation13 + $0x2] sm:$0x1] %v2454_v26  ;;  %v2285_v55 = vpop.f32.mrf.mxu0  ;;  %v2356_v56 = vpop.f32.mrf.mxu1  ;;  %v2573_v26 = vld [vmem:[#allocation10 + $0x268] sm:$0xff] }
 0x424   :  { %v2397_v57 = vcombine.low %v2283_v52, %v2285_v55  ;;  %v2398_v58 = vcombine.low %v2354_v54, %v2356_v56  ;;  %v2575_v52 = vld [vmem:[#allocation10 + $0x278] sm:$0xff]  ;;  %v2572_v54 = vld [vmem:[#allocation10 + $0x260] sm:$0xff]  ;;  %v2574_v55 = vld [vmem:[#allocation10 + $0x270] sm:$0xff] }
 0x425   :  { %v2565_v56 = vld [vmem:[#allocation10 + $0x228] sm:$0xff] }
 0x426   :  { %v2405_v59 = vrot.slane %v2397_v57, %v6460_v53  ;;  %v2412_v0 = vrot.slane %v2398_v58, %v6460_v53  ;;  %v2567_v57 = vld [vmem:[#allocation10 + $0x238] sm:$0xff]  ;;  %v2564_v58 = vld [vmem:[#allocation10 + $0x220] sm:$0xff] }
 0x428   :  { %v2413_v61 = vcombine.low %v2405_v59, %v2412_v0  ;;  %v2566_v59 = vld [vmem:[#allocation10 + $0x230] sm:$0xff]  ;;  %v2557_v0 = vld [vmem:[#allocation10 + $0x1e8] sm:$0xff] }
 0x42a   :  { %v2420_v62 = vrot.slane %v2413_v61, %v6460_v53  ;;  %v2559_v61 = vld [vmem:[#allocation10 + $0x1f8] sm:$0xff] }
 0x42c   :  { %v2422_v1 = vadd.f32 %v2420_v62, %v2392_v63  ;;  %v2556_v62 = vld [vmem:[#allocation10 + $0x1e0] sm:$0xff]  ;;  %v2558_v63 = vld [vmem:[#allocation10 + $0x1f0] sm:$0xff] }
 0x42e   :  { %v5971_v2 = vmul.f32 -1.442695, %v2422_v1  ;;  %v2462_v3 = vrot.slane %v2422_v1, 1  ;;  %v2473_v5 = vrot.slane %v2422_v1, 3  ;;  %v2470_v8 = vrot.slane %v2422_v1, 2  ;;  %v2549_v1 = vld [vmem:[#allocation10 + $0x1a8] sm:$0xff] }
 0x430   :  { %6093 = vpow2.f32 %v5971_v2  ;;  %v5972_v4 = vmul.f32 -1.442695, %v2462_v3  ;;  %v5973_v6 = vmul.f32 -1.442695, %v2473_v5  ;;  %v2551_v2 = vld [vmem:[#allocation10 + $0x1b8] sm:$0xff]  ;;  %v2548_v3 = vld [vmem:[#allocation10 + $0x1a0] sm:$0xff] }
 0x431   :  { %v2541_v5 = vld [vmem:[#allocation10 + $0x168] sm:$0xff] }
 0x432   :  { %6095 = vpow2.f32 %v5972_v4  ;;  %v2550_v4 = vld [vmem:[#allocation10 + $0x1b0] sm:$0xff] }
 0x433   :  { %6097 = vpow2.f32 %v5973_v6  ;;  %v2543_v6 = vld [vmem:[#allocation10 + $0x178] sm:$0xff] }
 0x43d   :  { %v6094_v7 = vpop.eup %6093 }
 0x43e   :  { %v2458_v9 = vadd.f32 1.0, %v6094_v7  ;;  %v2540_v7 = vld [vmem:[#allocation10 + $0x160] sm:$0xff] }
 0x43f   :  { %v6096_v10 = vpop.eup %6095 }
 0x440   :  { %6099 = vrcp.f32 %v2458_v9  ;;  %v2467_v11 = vadd.f32 1.0, %v6096_v10  ;;  %v6098_v13 = vpop.eup %6097  ;;  %v2533_v9 = vld [vmem:[#allocation10 + $0x128] sm:$0xff]  ;;  %v2535_v10 = vld [vmem:[#allocation10 + $0x138] sm:$0xff] }
 0x441   :  { %6101 = vtanh.f32 %v2470_v8  ;;  %v2478_v17 = vadd.f32 1.0, %v6098_v13  ;;  %v2542_v8 = vld [vmem:[#allocation10 + $0x170] sm:$0xff] }
 0x442   :  { %6103 = vrcp.f32 %v2467_v11  ;;  %v2532_v11 = vld [vmem:[#allocation10 + $0x120] sm:$0xff]  ;;  %v2534_v13 = vld [vmem:[#allocation10 + $0x130] sm:$0xff] }
 0x443   :  { %6105 = vrcp.f32 %v2478_v17  ;;  %v2517_v17 = vld [vmem:[#allocation10 + $0xa8] sm:$0xff] }
 0x44d   :  { %v6100_v14 = vpop.eup %6099 }
 0x44e   :  { %v6102_v15 = vpop.eup %6101 }
 0x44f   :  { %v6104_v60 = vpop.eup %6103  ;;  %v2485_v20 = vmul.f32 %v6102_v15, %v6100_v14  ;;  %v2525_v14 = vld [vmem:[#allocation10 + $0xe8] sm:$0xff]  ;;  %v2527_v15 = vld [vmem:[#allocation10 + $0xf8] sm:$0xff] }
 0x450   :  { %v2484_v19 = vmul.f32 %v6104_v60, %v2482_v16  ;;  %v6106_v22 = vpop.eup %6105  ;;  %v2524_v16 = vld [vmem:[#allocation10 + $0xe0] sm:$0xff]  ;;  %v2526_v60 = vld [vmem:[#allocation10 + $0xf0] sm:$0xff] }
 0x452   :  { %v2486_v21 = vadd.f32 %v2485_v20, %v2484_v19  ;;  %v2519_v19 = vld [vmem:[#allocation10 + $0xb8] sm:$0xff]  ;;  %v2516_v20 = vld [vmem:[#allocation10 + $0xa0] sm:$0xff] }
 0x454   :  { %6107 = vtanh.f32 %v2486_v21  ;;  %2492 = vst.msk [vmem:[#allocation4 + $0x1] sm:$0x1] %vm6466_vm2, %v2486_v21  ;;  %v2518_v21 = vld [vmem:[#allocation10 + $0xb0] sm:$0xff] }
 0x461   :  { %v6108_v24 = vpop.eup %6107 }
 0x462   :  { %v2488_v25 = vmul.f32 %v6108_v24, %v6106_v22  ;;  %v2509_v22 = vld [vmem:[#allocation10 + $0x68] sm:$0xff]  ;;  %v2511_v24 = vld [vmem:[#allocation10 + $0x78] sm:$0xff] }
 0x464   :  { %2490 = vst.msk [vmem:[#allocation3 + $0x1] sm:$0x1] %vm6466_vm2, %v2488_v25  ;;  %2494 = vst [vmem:[#allocation13 + $0xd] sm:$0x1] %v2488_v25  ;;  %v2508_v25 = vld [vmem:[#allocation10 + $0x60] sm:$0xff] }
 0x46b   :  { %v2495_v27 = vld [vmem:[#allocation3] sm:$0x3] }
 0x46c   :  { %v2760_v28 = vrot.slane %v2495_v27, %v6432_v12  ;;  %v6527_v29 = vrot.slane %v2495_v27, %v6435_v18  ;;  %v2510_v27 = vld [vmem:[#allocation10 + $0x70] sm:$0xff] }
 0x46e   :  { %2827 = vmatprep.mubr.f32.mxu0 %v2760_v28  ;;  %2898 = vmatprep.mubr.f32.mxu1 %v2760_v28 }
 0x46f   :  { %2828 = vmatmul.mubr.f32.vlgmr.msra.gmra.mxu0 %v6527_v29  ;;  %2899 = vmatmul.mubr.f32.vlgmr.msra.gmra.mxu1 %v6527_v29 }
 0x470   :  { %2906 = vmatpush1.msra.mxu0 %v2620_v30  ;;  %2977 = vmatpush1.msra.mxu1 %v2622_v31  ;;  %v2503_v30 = vld [vmem:[#allocation10 + $0x38] sm:$0xff]  ;;  %v2500_v31 = vld [vmem:[#allocation10 + $0x20] sm:$0xff] }
 0x471   :  { %2907 = vmatprep.subr.mxu0 %v2613_v32  ;;  %2969 = vmatprep.mubr.f32.mxu0 %v2760_v28  ;;  %v2502_v32 = vld [vmem:[#allocation10 + $0x30] sm:$0xff] }
 0x472   :  { %2978 = vmatprep.subr.mxu1 %v2615_v34  ;;  %3040 = vmatprep.mubr.f32.mxu1 %v2760_v28  ;;  %v2501_v28 = vld [vmem:[#allocation10 + $0x28] sm:$0xff] }
 0x473   :  { %2908 = vmatpush1.msra.mxu0 %v2612_v35  ;;  %2979 = vmatpush1.msra.mxu1 %v2614_v36  ;;  %v2749_v34 = vld [vmem:[#allocation10 + $0x7e8] sm:$0xff]  ;;  %v2751_v35 = vld [vmem:[#allocation10 + $0x7f8] sm:$0xff]  ;;  %v2748_v36 = vld [vmem:[#allocation10 + $0x7e0] sm:$0xff] }
 0x474   :  { %2909 = vmatprep.subr.mxu0 %v2605_v37  ;;  %2980 = vmatprep.subr.mxu1 %v2607_v38  ;;  %v2750_v37 = vld [vmem:[#allocation10 + $0x7f0] sm:$0xff]  ;;  %v2741_v38 = vld [vmem:[#allocation10 + $0x7a8] sm:$0xff] }
 0x475   :  { %2910 = vmatpush1.msra.mxu0 %v2604_v39  ;;  %2981 = vmatpush1.msra.mxu1 %v2606_v40  ;;  %v2743_v39 = vld [vmem:[#allocation10 + $0x7b8] sm:$0xff]  ;;  %v2740_v40 = vld [vmem:[#allocation10 + $0x7a0] sm:$0xff] }
 0x476   :  { %2911 = vmatprep.subr.mxu0 %v2597_v41  ;;  %2982 = vmatprep.subr.mxu1 %v2599_v42  ;;  %v2742_v41 = vld [vmem:[#allocation10 + $0x7b0] sm:$0xff]  ;;  %v2733_v42 = vld [vmem:[#allocation10 + $0x768] sm:$0xff] }
 0x477   :  { %2912 = vmatpush1.msra.mxu0 %v2596_v43  ;;  %2983 = vmatpush1.msra.mxu1 %v2598_v44  ;;  %v2735_v43 = vld [vmem:[#allocation10 + $0x778] sm:$0xff]  ;;  %v2732_v44 = vld [vmem:[#allocation10 + $0x760] sm:$0xff] }
 0x478   :  { %2913 = vmatprep.subr.mxu0 %v2589_v45  ;;  %2984 = vmatprep.subr.mxu1 %v2591_v46  ;;  %v2734_v45 = vld [vmem:[#allocation10 + $0x770] sm:$0xff]  ;;  %v2725_v46 = vld [vmem:[#allocation10 + $0x728] sm:$0xff] }
 0x479   :  { %2914 = vmatpush1.msra.mxu0 %v2588_v47  ;;  %2985 = vmatpush1.msra.mxu1 %v2590_v23  ;;  %v2727_v47 = vld [vmem:[#allocation10 + $0x738] sm:$0xff]  ;;  %v2724_v23 = vld [vmem:[#allocation10 + $0x720] sm:$0xff] }
 0x47a   :  { %2915 = vmatprep.subr.mxu0 %v2581_v48  ;;  %2986 = vmatprep.subr.mxu1 %v2583_v49  ;;  %v2726_v48 = vld [vmem:[#allocation10 + $0x730] sm:$0xff]  ;;  %v2717_v49 = vld [vmem:[#allocation10 + $0x6e8] sm:$0xff] }
 0x47b   :  { %2916 = vmatpush1.msra.mxu0 %v2580_v50  ;;  %2987 = vmatpush1.msra.mxu1 %v2582_v33  ;;  %v2719_v50 = vld [vmem:[#allocation10 + $0x6f8] sm:$0xff]  ;;  %v2716_v33 = vld [vmem:[#allocation10 + $0x6e0] sm:$0xff] }
 0x47c   :  { %2917 = vmatprep.subr.mxu0 %v2573_v26  ;;  %2988 = vmatprep.subr.mxu1 %v2575_v52  ;;  %v2718_v26 = vld [vmem:[#allocation10 + $0x6f0] sm:$0xff]  ;;  %v2709_v52 = vld [vmem:[#allocation10 + $0x6a8] sm:$0xff] }
 0x47d   :  { %2918 = vmatpush1.msra.mxu0 %v2572_v54  ;;  %2989 = vmatpush1.msra.mxu1 %v2574_v55  ;;  %v2711_v54 = vld [vmem:[#allocation10 + $0x6b8] sm:$0xff]  ;;  %v2708_v55 = vld [vmem:[#allocation10 + $0x6a0] sm:$0xff] }
 0x47e   :  { %2919 = vmatprep.subr.mxu0 %v2565_v56  ;;  %2990 = vmatprep.subr.mxu1 %v2567_v57  ;;  %v2710_v56 = vld [vmem:[#allocation10 + $0x6b0] sm:$0xff]  ;;  %v2701_v57 = vld [vmem:[#allocation10 + $0x668] sm:$0xff] }
 0x47f   :  { %2920 = vmatpush1.msra.mxu0 %v2564_v58  ;;  %2991 = vmatpush1.msra.mxu1 %v2566_v59  ;;  %v2703_v58 = vld [vmem:[#allocation10 + $0x678] sm:$0xff]  ;;  %v2700_v59 = vld [vmem:[#allocation10 + $0x660] sm:$0xff] }
 0x480   :  { %2921 = vmatprep.subr.mxu0 %v2557_v0  ;;  %2992 = vmatprep.subr.mxu1 %v2559_v61  ;;  %v2702_v0 = vld [vmem:[#allocation10 + $0x670] sm:$0xff]  ;;  %v2693_v61 = vld [vmem:[#allocation10 + $0x628] sm:$0xff] }
 0x481   :  { %2922 = vmatpush1.msra.mxu0 %v2556_v62  ;;  %2993 = vmatpush1.msra.mxu1 %v2558_v63  ;;  %v2695_v62 = vld [vmem:[#allocation10 + $0x638] sm:$0xff]  ;;  %v2692_v63 = vld [vmem:[#allocation10 + $0x620] sm:$0xff] }
 0x482   :  { %2923 = vmatprep.subr.mxu0 %v2549_v1  ;;  %2994 = vmatprep.subr.mxu1 %v2551_v2  ;;  %v2694_v1 = vld [vmem:[#allocation10 + $0x630] sm:$0xff]  ;;  %v2685_v2 = vld [vmem:[#allocation10 + $0x5e8] sm:$0xff] }
 0x483   :  { %2924 = vmatpush1.msra.mxu0 %v2548_v3  ;;  %2995 = vmatpush1.msra.mxu1 %v2550_v4  ;;  %v2687_v3 = vld [vmem:[#allocation10 + $0x5f8] sm:$0xff]  ;;  %v2684_v4 = vld [vmem:[#allocation10 + $0x5e0] sm:$0xff] }
 0x484   :  { %2925 = vmatprep.subr.mxu0 %v2541_v5  ;;  %2996 = vmatprep.subr.mxu1 %v2543_v6  ;;  %v2686_v5 = vld [vmem:[#allocation10 + $0x5f0] sm:$0xff]  ;;  %v2677_v6 = vld [vmem:[#allocation10 + $0x5a8] sm:$0xff] }
 0x485   :  { %2926 = vmatpush1.msra.mxu0 %v2540_v7  ;;  %2997 = vmatpush1.msra.mxu1 %v2542_v8  ;;  %v2679_v7 = vld [vmem:[#allocation10 + $0x5b8] sm:$0xff]  ;;  %v2676_v8 = vld [vmem:[#allocation10 + $0x5a0] sm:$0xff] }
 0x486   :  { %2927 = vmatprep.subr.mxu0 %v2533_v9  ;;  %2998 = vmatprep.subr.mxu1 %v2535_v10  ;;  %v2678_v9 = vld [vmem:[#allocation10 + $0x5b0] sm:$0xff]  ;;  %v2669_v10 = vld [vmem:[#allocation10 + $0x568] sm:$0xff] }
 0x487   :  { %2928 = vmatpush1.msra.mxu0 %v2532_v11  ;;  %2999 = vmatpush1.msra.mxu1 %v2534_v13  ;;  %v2671_v11 = vld [vmem:[#allocation10 + $0x578] sm:$0xff]  ;;  %v2668_v13 = vld [vmem:[#allocation10 + $0x560] sm:$0xff] }
 0x488   :  { %2929 = vmatprep.subr.mxu0 %v2525_v14  ;;  %3000 = vmatprep.subr.mxu1 %v2527_v15  ;;  %v2670_v14 = vld [vmem:[#allocation10 + $0x570] sm:$0xff]  ;;  %v2661_v15 = vld [vmem:[#allocation10 + $0x528] sm:$0xff] }
 0x489   :  { %2930 = vmatpush1.msra.mxu0 %v2524_v16  ;;  %3001 = vmatpush1.msra.mxu1 %v2526_v60  ;;  %v2663_v16 = vld [vmem:[#allocation10 + $0x538] sm:$0xff]  ;;  %v2660_v60 = vld [vmem:[#allocation10 + $0x520] sm:$0xff] }
 0x48a   :  { %2931 = vmatprep.subr.mxu0 %v2517_v17  ;;  %3002 = vmatprep.subr.mxu1 %v2519_v19  ;;  %v2662_v17 = vld [vmem:[#allocation10 + $0x530] sm:$0xff]  ;;  %v2653_v19 = vld [vmem:[#allocation10 + $0x4e8] sm:$0xff] }
 0x48b   :  { %2932 = vmatpush1.msra.mxu0 %v2516_v20  ;;  %3003 = vmatpush1.msra.mxu1 %v2518_v21  ;;  %v2655_v20 = vld [vmem:[#allocation10 + $0x4f8] sm:$0xff]  ;;  %v2652_v21 = vld [vmem:[#allocation10 + $0x4e0] sm:$0xff] }
 0x48c   :  { %2933 = vmatprep.subr.mxu0 %v2509_v22  ;;  %3004 = vmatprep.subr.mxu1 %v2511_v24  ;;  %v2654_v22 = vld [vmem:[#allocation10 + $0x4f0] sm:$0xff]  ;;  %v2645_v24 = vld [vmem:[#allocation10 + $0x4a8] sm:$0xff] }
 0x48d   :  { %2934 = vmatpush1.msra.mxu0 %v2508_v25  ;;  %3005 = vmatpush1.msra.mxu1 %v2510_v27  ;;  %v2647_v25 = vld [vmem:[#allocation10 + $0x4b8] sm:$0xff]  ;;  %v2644_v27 = vld [vmem:[#allocation10 + $0x4a0] sm:$0xff] }
 0x48e   :  { %2935 = vmatprep.subr.mxu0 %v2501_v28  ;;  %3006 = vmatprep.subr.mxu1 %v2503_v30  ;;  %v2646_v28 = vld [vmem:[#allocation10 + $0x4b0] sm:$0xff]  ;;  %v2637_v30 = vld [vmem:[#allocation10 + $0x468] sm:$0xff] }
 0x48f   :  { %2936 = vmatpush1.msra.mxu0 %v2500_v31  ;;  %3007 = vmatpush1.msra.mxu1 %v2502_v32  ;;  %v2639_v31 = vld [vmem:[#allocation10 + $0x478] sm:$0xff]  ;;  %v2636_v32 = vld [vmem:[#allocation10 + $0x460] sm:$0xff] }
 0x490   :  { %2937 = vmatprep.subr.mxu0 %v2749_v34  ;;  %3008 = vmatprep.subr.mxu1 %v2751_v35  ;;  %v2638_v34 = vld [vmem:[#allocation10 + $0x470] sm:$0xff]  ;;  %v2629_v35 = vld [vmem:[#allocation10 + $0x428] sm:$0xff] }
 0x491   :  { %2938 = vmatpush2.msra.mxu0 %v2748_v36  ;;  %3009 = vmatpush2.msra.mxu1 %v2750_v37  ;;  %v2631_v36 = vld [vmem:[#allocation10 + $0x438] sm:$0xff]  ;;  %v2628_v37 = vld [vmem:[#allocation10 + $0x420] sm:$0xff] }
 0x492   :  { %2939 = vmatprep.subr.mxu0 %v2741_v38  ;;  %3010 = vmatprep.subr.mxu1 %v2743_v39  ;;  %v2630_v38 = vld [vmem:[#allocation10 + $0x430] sm:$0xff]  ;;  %v3305_v39 = vld [vmem:[#allocation10 + $0x3c8] sm:$0xff] }
 0x493   :  { %2940 = vmatpush2.msra.mxu0 %v2740_v40  ;;  %3011 = vmatpush2.msra.mxu1 %v2742_v41  ;;  %v3307_v40 = vld [vmem:[#allocation10 + $0x3d8] sm:$0xff]  ;;  %v3304_v41 = vld [vmem:[#allocation10 + $0x3c0] sm:$0xff] }
 0x494   :  { %2941 = vmatprep.subr.mxu0 %v2733_v42  ;;  %3012 = vmatprep.subr.mxu1 %v2735_v43  ;;  %v3306_v42 = vld [vmem:[#allocation10 + $0x3d0] sm:$0xff]  ;;  %v3297_v43 = vld [vmem:[#allocation10 + $0x388] sm:$0xff] }
 0x495   :  { %2942 = vmatpush2.msra.mxu0 %v2732_v44  ;;  %3013 = vmatpush2.msra.mxu1 %v2734_v45  ;;  %v3299_v44 = vld [vmem:[#allocation10 + $0x398] sm:$0xff]  ;;  %v3296_v45 = vld [vmem:[#allocation10 + $0x380] sm:$0xff] }
 0x496   :  { %2943 = vmatprep.subr.mxu0 %v2725_v46  ;;  %3014 = vmatprep.subr.mxu1 %v2727_v47  ;;  %v3298_v46 = vld [vmem:[#allocation10 + $0x390] sm:$0xff]  ;;  %v3289_v47 = vld [vmem:[#allocation10 + $0x348] sm:$0xff] }
 0x497   :  { %2944 = vmatpush2.msra.mxu0 %v2724_v23  ;;  %3015 = vmatpush2.msra.mxu1 %v2726_v48  ;;  %v3291_v23 = vld [vmem:[#allocation10 + $0x358] sm:$0xff]  ;;  %v3290_v48 = vld [vmem:[#allocation10 + $0x350] sm:$0xff] }
 0x498   :  { %2945 = vmatprep.subr.mxu0 %v2717_v49  ;;  %3016 = vmatprep.subr.mxu1 %v2719_v50  ;;  %v3281_v49 = vld [vmem:[#allocation10 + $0x308] sm:$0xff]  ;;  %v3283_v50 = vld [vmem:[#allocation10 + $0x318] sm:$0xff] }
 0x499   :  { %2946 = vmatpush2.msra.mxu0 %v2716_v33  ;;  %3017 = vmatpush2.msra.mxu1 %v2718_v26  ;;  %v3280_v33 = vld [vmem:[#allocation10 + $0x300] sm:$0xff]  ;;  %v3282_v26 = vld [vmem:[#allocation10 + $0x310] sm:$0xff] }
 0x49a   :  { %2947 = vmatprep.subr.mxu0 %v2709_v52  ;;  %3018 = vmatprep.subr.mxu1 %v2711_v54  ;;  %v3273_v52 = vld [vmem:[#allocation10 + $0x2c8] sm:$0xff]  ;;  %v3275_v54 = vld [vmem:[#allocation10 + $0x2d8] sm:$0xff] }
 0x49b   :  { %2948 = vmatpush2.msra.mxu0 %v2708_v55  ;;  %3019 = vmatpush2.msra.mxu1 %v2710_v56  ;;  %v3272_v55 = vld [vmem:[#allocation10 + $0x2c0] sm:$0xff]  ;;  %v3274_v56 = vld [vmem:[#allocation10 + $0x2d0] sm:$0xff] }
 0x49c   :  { %2949 = vmatprep.subr.mxu0 %v2701_v57  ;;  %3020 = vmatprep.subr.mxu1 %v2703_v58  ;;  %v3265_v57 = vld [vmem:[#allocation10 + $0x288] sm:$0xff]  ;;  %v3267_v58 = vld [vmem:[#allocation10 + $0x298] sm:$0xff] }
 0x49d   :  { %2950 = vmatpush2.msra.mxu0 %v2700_v59  ;;  %3021 = vmatpush2.msra.mxu1 %v2702_v0  ;;  %v3264_v59 = vld [vmem:[#allocation10 + $0x280] sm:$0xff]  ;;  %v3266_v0 = vld [vmem:[#allocation10 + $0x290] sm:$0xff] }
 0x49e   :  { %2951 = vmatprep.subr.mxu0 %v2693_v61  ;;  %3022 = vmatprep.subr.mxu1 %v2695_v62  ;;  %v3257_v61 = vld [vmem:[#allocation10 + $0x248] sm:$0xff]  ;;  %v3259_v62 = vld [vmem:[#allocation10 + $0x258] sm:$0xff] }
 0x49f   :  { %2952 = vmatpush2.msra.mxu0 %v2692_v63  ;;  %3023 = vmatpush2.msra.mxu1 %v2694_v1  ;;  %v3256_v63 = vld [vmem:[#allocation10 + $0x240] sm:$0xff]  ;;  %v3258_v1 = vld [vmem:[#allocation10 + $0x250] sm:$0xff] }
 0x4a0   :  { %2953 = vmatprep.subr.mxu0 %v2685_v2  ;;  %3024 = vmatprep.subr.mxu1 %v2687_v3  ;;  %v3249_v2 = vld [vmem:[#allocation10 + $0x208] sm:$0xff]  ;;  %v3251_v3 = vld [vmem:[#allocation10 + $0x218] sm:$0xff] }
 0x4a1   :  { %2954 = vmatpush2.msra.mxu0 %v2684_v4  ;;  %3025 = vmatpush2.msra.mxu1 %v2686_v5  ;;  %v3248_v4 = vld [vmem:[#allocation10 + $0x200] sm:$0xff]  ;;  %v3250_v5 = vld [vmem:[#allocation10 + $0x210] sm:$0xff] }
 0x4a2   :  { %2955 = vmatprep.subr.mxu0 %v2677_v6  ;;  %3026 = vmatprep.subr.mxu1 %v2679_v7  ;;  %v3241_v6 = vld [vmem:[#allocation10 + $0x1c8] sm:$0xff]  ;;  %v3243_v7 = vld [vmem:[#allocation10 + $0x1d8] sm:$0xff] }
 0x4a3   :  { %2956 = vmatpush2.msra.mxu0 %v2676_v8  ;;  %3027 = vmatpush2.msra.mxu1 %v2678_v9  ;;  %v3240_v8 = vld [vmem:[#allocation10 + $0x1c0] sm:$0xff]  ;;  %v3242_v9 = vld [vmem:[#allocation10 + $0x1d0] sm:$0xff] }
 0x4a4   :  { %2957 = vmatprep.subr.mxu0 %v2669_v10  ;;  %3028 = vmatprep.subr.mxu1 %v2671_v11  ;;  %v3233_v10 = vld [vmem:[#allocation10 + $0x188] sm:$0xff]  ;;  %v3235_v11 = vld [vmem:[#allocation10 + $0x198] sm:$0xff] }
 0x4a5   :  { %2958 = vmatpush2.msra.mxu0 %v2668_v13  ;;  %3029 = vmatpush2.msra.mxu1 %v2670_v14  ;;  %v3232_v13 = vld [vmem:[#allocation10 + $0x180] sm:$0xff]  ;;  %v3234_v14 = vld [vmem:[#allocation10 + $0x190] sm:$0xff] }
 0x4a6   :  { %2959 = vmatprep.subr.mxu0 %v2661_v15  ;;  %3030 = vmatprep.subr.mxu1 %v2663_v16  ;;  %v3225_v15 = vld [vmem:[#allocation10 + $0x148] sm:$0xff]  ;;  %v3227_v16 = vld [vmem:[#allocation10 + $0x158] sm:$0xff] }
 0x4a7   :  { %2960 = vmatpush2.msra.mxu0 %v2660_v60  ;;  %3031 = vmatpush2.msra.mxu1 %v2662_v17  ;;  %v3224_v60 = vld [vmem:[#allocation10 + $0x140] sm:$0xff]  ;;  %v3226_v17 = vld [vmem:[#allocation10 + $0x150] sm:$0xff] }
 0x4a8   :  { %2961 = vmatprep.subr.mxu0 %v2653_v19  ;;  %3032 = vmatprep.subr.mxu1 %v2655_v20  ;;  %v3217_v19 = vld [vmem:[#allocation10 + $0x108] sm:$0xff]  ;;  %v3219_v20 = vld [vmem:[#allocation10 + $0x118] sm:$0xff] }
 0x4a9   :  { %2962 = vmatpush2.msra.mxu0 %v2652_v21  ;;  %3033 = vmatpush2.msra.mxu1 %v2654_v22  ;;  %v3216_v21 = vld [vmem:[#allocation10 + $0x100] sm:$0xff]  ;;  %v3218_v22 = vld [vmem:[#allocation10 + $0x110] sm:$0xff] }
 0x4aa   :  { %2963 = vmatprep.subr.mxu0 %v2645_v24  ;;  %3034 = vmatprep.subr.mxu1 %v2647_v25  ;;  %v3209_v24 = vld [vmem:[#allocation10 + $0xc8] sm:$0xff]  ;;  %v3211_v25 = vld [vmem:[#allocation10 + $0xd8] sm:$0xff] }
 0x4ab   :  { %2964 = vmatpush2.msra.mxu0 %v2644_v27  ;;  %3035 = vmatpush2.msra.mxu1 %v2646_v28  ;;  %v3208_v27 = vld [vmem:[#allocation10 + $0xc0] sm:$0xff]  ;;  %v3210_v28 = vld [vmem:[#allocation10 + $0xd0] sm:$0xff] }
 0x4ac   :  { %2965 = vmatprep.subr.mxu0 %v2637_v30  ;;  %3036 = vmatprep.subr.mxu1 %v2639_v31  ;;  %v3201_v30 = vld [vmem:[#allocation10 + $0x88] sm:$0xff]  ;;  %v3203_v31 = vld [vmem:[#allocation10 + $0x98] sm:$0xff] }
 0x4ad   :  { %2966 = vmatpush2.msra.mxu0 %v2636_v32  ;;  %3037 = vmatpush2.msra.mxu1 %v2638_v34  ;;  %v3200_v32 = vld [vmem:[#allocation10 + $0x80] sm:$0xff]  ;;  %v3202_v34 = vld [vmem:[#allocation10 + $0x90] sm:$0xff] }
 0x4ae   :  { %2967 = vmatprep.subr.mxu0 %v2629_v35  ;;  %3038 = vmatprep.subr.mxu1 %v2631_v36  ;;  %v3193_v35 = vld [vmem:[#allocation10 + $0x48] sm:$0xff]  ;;  %v3195_v36 = vld [vmem:[#allocation10 + $0x58] sm:$0xff] }
 0x4af   :  { %2968 = vmatpush2.msra.mxu0 %v2628_v37  ;;  %3039 = vmatpush2.msra.mxu1 %v2630_v38  ;;  %v3192_v37 = vld [vmem:[#allocation10 + $0x40] sm:$0xff]  ;;  %v3194_v38 = vld [vmem:[#allocation10 + $0x50] sm:$0xff] }
 0x4b0   :  { %2970 = vmatmul.mubr.f32.vlgmr.msra.gmra.mxu0 %v6527_v29  ;;  %3041 = vmatmul.mubr.f32.vlgmr.msra.gmra.mxu1 %v6527_v29  ;;  %v3288_v29 = vld [vmem:[#allocation10 + $0x340] sm:$0xff] }
 0x4b1   :  { %3451 = vmatprep.subr.mxu0 %v3305_v39  ;;  %3522 = vmatprep.subr.mxu1 %v3307_v40  ;;  %v3185_v39 = vld [vmem:[#allocation10 + $0x8] sm:$0xff]  ;;  %v3187_v40 = vld [vmem:[#allocation10 + $0x18] sm:$0xff] }
 0x4b2   :  { %3452 = vmatpush1.msra.mxu0 %v3304_v41  ;;  %3523 = vmatpush1.msra.mxu1 %v3306_v42  ;;  %v3184_v41 = vld [vmem:[#allocation10] sm:$0xff]  ;;  %v3186_v42 = vld [vmem:[#allocation10 + $0x10] sm:$0xff] }
 0x4b3   :  { %3453 = vmatprep.subr.mxu0 %v3297_v43  ;;  %3524 = vmatprep.subr.mxu1 %v3299_v44  ;;  %v3433_v43 = vld [vmem:[#allocation10 + $0x7c8] sm:$0xff]  ;;  %v3435_v44 = vld [vmem:[#allocation10 + $0x7d8] sm:$0xff] }
 0x4b4   :  { %3454 = vmatpush1.msra.mxu0 %v3296_v45  ;;  %3525 = vmatpush1.msra.mxu1 %v3298_v46  ;;  %v3432_v45 = vld [vmem:[#allocation10 + $0x7c0] sm:$0xff]  ;;  %v3434_v46 = vld [vmem:[#allocation10 + $0x7d0] sm:$0xff] }
 0x4b5   :  { %3455 = vmatprep.subr.mxu0 %v3289_v47  ;;  %3526 = vmatprep.subr.mxu1 %v3291_v23  ;;  %v3425_v47 = vld [vmem:[#allocation10 + $0x788] sm:$0xff]  ;;  %v3427_v23 = vld [vmem:[#allocation10 + $0x798] sm:$0xff] }
 0x4b6   :  { %3456 = vmatpush1.msra.mxu0 %v3288_v29  ;;  %3527 = vmatpush1.msra.mxu1 %v3290_v48  ;;  %v3424_v29 = vld [vmem:[#allocation10 + $0x780] sm:$0xff]  ;;  %v3426_v48 = vld [vmem:[#allocation10 + $0x790] sm:$0xff] }
 0x4b7   :  { %3457 = vmatprep.subr.mxu0 %v3281_v49  ;;  %3528 = vmatprep.subr.mxu1 %v3283_v50  ;;  %v3417_v49 = vld [vmem:[#allocation10 + $0x748] sm:$0xff]  ;;  %v3419_v50 = vld [vmem:[#allocation10 + $0x758] sm:$0xff] }
 0x4b8   :  { %3458 = vmatpush1.msra.mxu0 %v3280_v33  ;;  %3529 = vmatpush1.msra.mxu1 %v3282_v26  ;;  %v3416_v33 = vld [vmem:[#allocation10 + $0x740] sm:$0xff]  ;;  %v3418_v26 = vld [vmem:[#allocation10 + $0x750] sm:$0xff] }
 0x4b9   :  { %3459 = vmatprep.subr.mxu0 %v3273_v52  ;;  %3530 = vmatprep.subr.mxu1 %v3275_v54  ;;  %v3409_v52 = vld [vmem:[#allocation10 + $0x708] sm:$0xff]  ;;  %v3411_v54 = vld [vmem:[#allocation10 + $0x718] sm:$0xff] }
 0x4ba   :  { %3460 = vmatpush1.msra.mxu0 %v3272_v55  ;;  %3531 = vmatpush1.msra.mxu1 %v3274_v56  ;;  %v3408_v55 = vld [vmem:[#allocation10 + $0x700] sm:$0xff]  ;;  %v3410_v56 = vld [vmem:[#allocation10 + $0x710] sm:$0xff] }
 0x4bb   :  { %3461 = vmatprep.subr.mxu0 %v3265_v57  ;;  %3532 = vmatprep.subr.mxu1 %v3267_v58  ;;  %v3401_v57 = vld [vmem:[#allocation10 + $0x6c8] sm:$0xff]  ;;  %v3403_v58 = vld [vmem:[#allocation10 + $0x6d8] sm:$0xff] }
 0x4bc   :  { %3462 = vmatpush1.msra.mxu0 %v3264_v59  ;;  %3533 = vmatpush1.msra.mxu1 %v3266_v0  ;;  %v3400_v59 = vld [vmem:[#allocation10 + $0x6c0] sm:$0xff]  ;;  %v3402_v0 = vld [vmem:[#allocation10 + $0x6d0] sm:$0xff] }
 0x4bd   :  { %3463 = vmatprep.subr.mxu0 %v3257_v61  ;;  %3534 = vmatprep.subr.mxu1 %v3259_v62  ;;  %v3393_v61 = vld [vmem:[#allocation10 + $0x688] sm:$0xff]  ;;  %v3395_v62 = vld [vmem:[#allocation10 + $0x698] sm:$0xff] }
 0x4be   :  { %3464 = vmatpush1.msra.mxu0 %v3256_v63  ;;  %3535 = vmatpush1.msra.mxu1 %v3258_v1  ;;  %v3392_v63 = vld [vmem:[#allocation10 + $0x680] sm:$0xff]  ;;  %v3394_v1 = vld [vmem:[#allocation10 + $0x690] sm:$0xff] }
 0x4bf   :  { %3465 = vmatprep.subr.mxu0 %v3249_v2  ;;  %3536 = vmatprep.subr.mxu1 %v3251_v3  ;;  %v3385_v2 = vld [vmem:[#allocation10 + $0x648] sm:$0xff]  ;;  %v3387_v3 = vld [vmem:[#allocation10 + $0x658] sm:$0xff] }
 0x4c0   :  { %3466 = vmatpush1.msra.mxu0 %v3248_v4  ;;  %3537 = vmatpush1.msra.mxu1 %v3250_v5  ;;  %v3384_v4 = vld [vmem:[#allocation10 + $0x640] sm:$0xff]  ;;  %v3386_v5 = vld [vmem:[#allocation10 + $0x650] sm:$0xff] }
 0x4c1   :  { %3467 = vmatprep.subr.mxu0 %v3241_v6  ;;  %3538 = vmatprep.subr.mxu1 %v3243_v7  ;;  %v3377_v6 = vld [vmem:[#allocation10 + $0x608] sm:$0xff]  ;;  %v3379_v7 = vld [vmem:[#allocation10 + $0x618] sm:$0xff] }
 0x4c2   :  { %3468 = vmatpush1.msra.mxu0 %v3240_v8  ;;  %3539 = vmatpush1.msra.mxu1 %v3242_v9  ;;  %v3376_v8 = vld [vmem:[#allocation10 + $0x600] sm:$0xff]  ;;  %v3378_v9 = vld [vmem:[#allocation10 + $0x610] sm:$0xff] }
 0x4c3   :  { %3469 = vmatprep.subr.mxu0 %v3233_v10  ;;  %3540 = vmatprep.subr.mxu1 %v3235_v11  ;;  %v3369_v10 = vld [vmem:[#allocation10 + $0x5c8] sm:$0xff]  ;;  %v3371_v11 = vld [vmem:[#allocation10 + $0x5d8] sm:$0xff] }
 0x4c4   :  { %3470 = vmatpush1.msra.mxu0 %v3232_v13  ;;  %3541 = vmatpush1.msra.mxu1 %v3234_v14  ;;  %v3368_v13 = vld [vmem:[#allocation10 + $0x5c0] sm:$0xff]  ;;  %v3370_v14 = vld [vmem:[#allocation10 + $0x5d0] sm:$0xff] }
 0x4c5   :  { %3471 = vmatprep.subr.mxu0 %v3225_v15  ;;  %3542 = vmatprep.subr.mxu1 %v3227_v16 }
 0x4c6   :  { %3472 = vmatpush1.msra.mxu0 %v3224_v60  ;;  %3543 = vmatpush1.msra.mxu1 %v3226_v17  ;;  %v3361_v60 = vld [vmem:[#allocation10 + $0x588] sm:$0xff]  ;;  %v3363_v17 = vld [vmem:[#allocation10 + $0x598] sm:$0xff] }
 0x4c7   :  { %3473 = vmatprep.subr.mxu0 %v3217_v19  ;;  %3544 = vmatprep.subr.mxu1 %v3219_v20  ;;  %v3360_v19 = vld [vmem:[#allocation10 + $0x580] sm:$0xff]  ;;  %v3362_v20 = vld [vmem:[#allocation10 + $0x590] sm:$0xff] }
 0x4c8   :  { %3474 = vmatpush1.msra.mxu0 %v3216_v21  ;;  %3545 = vmatpush1.msra.mxu1 %v3218_v22 }
 0x4c9   :  { %3475 = vmatprep.subr.mxu0 %v3209_v24  ;;  %3546 = vmatprep.subr.mxu1 %v3211_v25  ;;  %v3353_v24 = vld [vmem:[#allocation10 + $0x548] sm:$0xff]  ;;  %v3355_v25 = vld [vmem:[#allocation10 + $0x558] sm:$0xff] }
 0x4ca   :  { %3476 = vmatpush1.msra.mxu0 %v3208_v27  ;;  %3547 = vmatpush1.msra.mxu1 %v3210_v28 }
 0x4cb   :  { %3477 = vmatprep.subr.mxu0 %v3201_v30  ;;  %3548 = vmatprep.subr.mxu1 %v3203_v31  ;;  %v3352_v30 = vld [vmem:[#allocation10 + $0x540] sm:$0xff]  ;;  %v3354_v31 = vld [vmem:[#allocation10 + $0x550] sm:$0xff] }
 0x4cc   :  { %3478 = vmatpush1.msra.mxu0 %v3200_v32  ;;  %3549 = vmatpush1.msra.mxu1 %v3202_v34  ;;  %v3345_v32 = vld [vmem:[#allocation10 + $0x508] sm:$0xff]  ;;  %v3347_v34 = vld [vmem:[#allocation10 + $0x518] sm:$0xff] }
 0x4cd   :  { %3479 = vmatprep.subr.mxu0 %v3193_v35  ;;  %3550 = vmatprep.subr.mxu1 %v3195_v36  ;;  %v3344_v35 = vld [vmem:[#allocation10 + $0x500] sm:$0xff] }
 0x4ce   :  { %3480 = vmatpush1.msra.mxu0 %v3192_v37  ;;  %3551 = vmatpush1.msra.mxu1 %v3194_v38  ;;  %v3346_v38 = vld [vmem:[#allocation10 + $0x510] sm:$0xff] }
 0x4cf   :  { %3481 = vmatprep.subr.mxu0 %v3185_v39  ;;  %3552 = vmatprep.subr.mxu1 %v3187_v40  ;;  %v3337_v39 = vld [vmem:[#allocation10 + $0x4c8] sm:$0xff]  ;;  %v3339_v40 = vld [vmem:[#allocation10 + $0x4d8] sm:$0xff] }
 0x4d0   :  { %3482 = vmatpush1.msra.mxu0 %v3184_v41  ;;  %3553 = vmatpush1.msra.mxu1 %v3186_v42  ;;  %v3336_v41 = vld [vmem:[#allocation10 + $0x4c0] sm:$0xff]  ;;  %v3338_v42 = vld [vmem:[#allocation10 + $0x4d0] sm:$0xff] }
 0x4d1   :  { %3483 = vmatprep.subr.mxu0 %v3433_v43  ;;  %3554 = vmatprep.subr.mxu1 %v3435_v44  ;;  %v3329_v43 = vld [vmem:[#allocation10 + $0x488] sm:$0xff] }
 0x4d2   :  { %3484 = vmatpush2.msra.mxu0 %v3432_v45  ;;  %3555 = vmatpush2.msra.mxu1 %v3434_v46  ;;  %v3331_v45 = vld [vmem:[#allocation10 + $0x498] sm:$0xff]  ;;  %v3328_v46 = vld [vmem:[#allocation10 + $0x480] sm:$0xff] }
 0x4d3   :  { %3485 = vmatprep.subr.mxu0 %v3425_v47  ;;  %3556 = vmatprep.subr.mxu1 %v3427_v23  ;;  %v3330_v47 = vld [vmem:[#allocation10 + $0x490] sm:$0xff]  ;;  %v3321_v23 = vld [vmem:[#allocation10 + $0x448] sm:$0xff] }
 0x4d4   :  { %3486 = vmatpush2.msra.mxu0 %v3424_v29  ;;  %3557 = vmatpush2.msra.mxu1 %v3426_v48  ;;  %v3323_v29 = vld [vmem:[#allocation10 + $0x458] sm:$0xff] }
 0x4d5   :  { %3487 = vmatprep.subr.mxu0 %v3417_v49  ;;  %3558 = vmatprep.subr.mxu1 %v3419_v50  ;;  %v3320_v49 = vld [vmem:[#allocation10 + $0x440] sm:$0xff]  ;;  %v3322_v50 = vld [vmem:[#allocation10 + $0x450] sm:$0xff] }
 0x4d6   :  { %3488 = vmatpush2.msra.mxu0 %v3416_v33  ;;  %3559 = vmatpush2.msra.mxu1 %v3418_v26  ;;  %v3048_v33 = vld [vmem:[#allocation2 + $0x3] ss:$8 sm:$0xf] }
 0x4d7   :  { %3489 = vmatprep.subr.mxu0 %v3409_v52  ;;  %3560 = vmatprep.subr.mxu1 %v3411_v54  ;;  %v3313_v26 = vld [vmem:[#allocation10 + $0x408] sm:$0xff]  ;;  %v3315_v52 = vld [vmem:[#allocation10 + $0x418] sm:$0xff] }
 0x4d8   :  { %3490 = vmatpush2.msra.mxu0 %v3408_v55  ;;  %3561 = vmatpush2.msra.mxu1 %v3410_v56  ;;  %v3312_v55 = vld [vmem:[#allocation10 + $0x400] sm:$0xff]  ;;  %v3314_v56 = vld [vmem:[#allocation10 + $0x410] sm:$0xff] }
 0x4d9   :  { %3491 = vmatprep.subr.mxu0 %v3401_v57  ;;  %3562 = vmatprep.subr.mxu1 %v3403_v58 }
 0x4da   :  { %3492 = vmatpush2.msra.mxu0 %v3400_v59  ;;  %3563 = vmatpush2.msra.mxu1 %v3402_v0  ;;  %v3309_v59 = vld [vmem:[#allocation10 + $0x3e8] sm:$0xff]  ;;  %v3311_v0 = vld [vmem:[#allocation10 + $0x3f8] sm:$0xff] }
 0x4db   :  { %3493 = vmatprep.subr.mxu0 %v3393_v61  ;;  %3564 = vmatprep.subr.mxu1 %v3395_v62 }
 0x4dc   :  { %3494 = vmatpush2.msra.mxu0 %v3392_v63  ;;  %3565 = vmatpush2.msra.mxu1 %v3394_v1 }
 0x4dd   :  { %3495 = vmatprep.subr.mxu0 %v3385_v2  ;;  %3566 = vmatprep.subr.mxu1 %v3387_v3 }
 0x4de   :  { %3496 = vmatpush2.msra.mxu0 %v3384_v4  ;;  %3567 = vmatpush2.msra.mxu1 %v3386_v5 }
 0x4df   :  { %3497 = vmatprep.subr.mxu0 %v3377_v6  ;;  %3568 = vmatprep.subr.mxu1 %v3379_v7 }
 0x4e0   :  { %3498 = vmatpush2.msra.mxu0 %v3376_v8  ;;  %3569 = vmatpush2.msra.mxu1 %v3378_v9 }
 0x4e1   :  { %3499 = vmatprep.subr.mxu0 %v3369_v10  ;;  %3570 = vmatprep.subr.mxu1 %v3371_v11  ;;  %v3111_v10 = vld [vmem:[#allocation4] sm:$0x3] }
 0x4e2   :  { %3500 = vmatpush2.msra.mxu0 %v3368_v13  ;;  %3571 = vmatpush2.msra.mxu1 %v3370_v14 }
 0x4e3   :  { %3501 = vmatprep.subr.mxu0 %v3361_v60  ;;  %3572 = vmatprep.subr.mxu1 %v3363_v17 }
 0x4e4   :  { %3502 = vmatpush2.msra.mxu0 %v3360_v19  ;;  %3573 = vmatpush2.msra.mxu1 %v3362_v20 }
 0x4e5   :  { %3503 = vmatprep.subr.mxu0 %v3353_v24  ;;  %3574 = vmatprep.subr.mxu1 %v3355_v25 }
 0x4e6   :  { %3504 = vmatpush2.msra.mxu0 %v3352_v30  ;;  %3575 = vmatpush2.msra.mxu1 %v3354_v31 }
 0x4e7   :  { %3505 = vmatprep.subr.mxu0 %v3345_v32  ;;  %3576 = vmatprep.subr.mxu1 %v3347_v34  ;;  %v3080_v32 = vld [vmem:[#allocation2 + $0x24] ss:$8 sm:$0xf] }
 0x4e8   :  { %3506 = vmatpush2.msra.mxu0 %v3344_v35  ;;  %3577 = vmatpush2.msra.mxu1 %v3346_v38 }
 0x4e9   :  { %3507 = vmatprep.subr.mxu0 %v3337_v39  ;;  %3578 = vmatprep.subr.mxu1 %v3339_v40 }
 0x4ea   :  { %3508 = vmatpush2.msra.mxu0 %v3336_v41  ;;  %3579 = vmatpush2.msra.mxu1 %v3338_v42 }
 0x4eb   :  { %3509 = vmatprep.subr.mxu0 %v3329_v43  ;;  %3580 = vmatprep.subr.mxu1 %v3331_v45 }
 0x4ec   :  { %3510 = vmatpush2.msra.mxu0 %v3328_v46  ;;  %3581 = vmatpush2.msra.mxu1 %v3330_v47 }
 0x4ed   :  { %3511 = vmatprep.subr.mxu0 %v3321_v23  ;;  %3582 = vmatprep.subr.mxu1 %v3323_v29  ;;  %v3170_v23 = vrot.slane %v3111_v10, 1 }
 0x4ee   :  { %3512 = vmatpush2.msra.mxu0 %v3320_v49  ;;  %3583 = vmatpush2.msra.mxu1 %v3322_v50 }
 0x4ef   :  { %3513 = vmatprep.subr.mxu0 %v3313_v26  ;;  %3584 = vmatprep.subr.mxu1 %v3315_v52 }
 0x4f0   :  { %3514 = vmatpush2.msra.mxu0 %v3312_v55  ;;  %3585 = vmatpush2.msra.mxu1 %v3314_v56 }
 0x4f1   :  { %3593 = vmatprep.subr.mxu0 %v3309_v59  ;;  %3664 = vmatprep.subr.mxu1 %v3311_v0  ;;  %v3310_v59 = vld [vmem:[#allocation10 + $0x3f0] sm:$0xff]  ;;  %v3301_v0 = vld [vmem:[#allocation10 + $0x3a8] sm:$0xff] }
 0x52f   :  { %v2829_v15 = vpop.f32.mrf.mxu0  ;;  %v2900_v16 = vpop.f32.mrf.mxu1 }
 0x531   :  { %v2831_v21 = vpop.f32.mrf.mxu0  ;;  %v2902_v22 = vpop.f32.mrf.mxu1 }
 0x532   :  { %v3053_v27 = vcombine.low %v2829_v15, %v2831_v21  ;;  %v3054_v28 = vcombine.low %v2900_v16, %v2902_v22 }
 0x534   :  { %v3061_v36 = vrot.slane %v3053_v27, %v6460_v53  ;;  %v3068_v37 = vrot.slane %v3054_v28, %v6460_v53 }
 0x536   :  { %v3069_v44 = vcombine.low %v3061_v36, %v3068_v37 }
 0x538   :  { %v3076_v48 = vrot.slane %v3069_v44, %v6460_v53 }
 0x53a   :  { %v3078_v54 = vadd.f32 %v3076_v48, %v3048_v33 }
 0x53c   :  { %v5974_v57 = vmul.f32 -1.442695, %v3078_v54  ;;  %v3119_v58 = vrot.slane %v3078_v54, 1  ;;  %v3130_v62 = vrot.slane %v3078_v54, 3  ;;  %v3127_v2 = vrot.slane %v3078_v54, 2 }
 0x53e   :  { %6109 = vpow2.f32 %v5974_v57  ;;  %v5975_v61 = vmul.f32 -1.442695, %v3119_v58  ;;  %v5976_v63 = vmul.f32 -1.442695, %v3130_v62  ;;  %v3308_v58 = vld [vmem:[#allocation10 + $0x3e0] sm:$0xff] }
 0x53f   :  { %v3300_v62 = vld [vmem:[#allocation10 + $0x3a0] sm:$0xff] }
 0x540   :  { %6111 = vpow2.f32 %v5975_v61  ;;  %v3303_v61 = vld [vmem:[#allocation10 + $0x3b8] sm:$0xff] }
 0x541   :  { %6113 = vpow2.f32 %v5976_v63  ;;  %v3302_v63 = vld [vmem:[#allocation10 + $0x3b0] sm:$0xff] }
 0x54b   :  { %v6110_v1 = vpop.eup %6109 }
 0x54c   :  { %v3115_v3 = vadd.f32 1.0, %v6110_v1  ;;  %v3293_v1 = vld [vmem:[#allocation10 + $0x368] sm:$0xff] }
 0x54d   :  { %v6112_v4 = vpop.eup %6111 }
 0x54e   :  { %6115 = vrcp.f32 %v3115_v3  ;;  %v3124_v5 = vadd.f32 1.0, %v6112_v4  ;;  %v6114_v6 = vpop.eup %6113  ;;  %v3292_v3 = vld [vmem:[#allocation10 + $0x360] sm:$0xff]  ;;  %v3294_v4 = vld [vmem:[#allocation10 + $0x370] sm:$0xff] }
 0x54f   :  { %6117 = vtanh.f32 %v3127_v2  ;;  %v3135_v11 = vadd.f32 1.0, %v6114_v6  ;;  %v3295_v2 = vld [vmem:[#allocation10 + $0x378] sm:$0xff] }
 0x550   :  { %6119 = vrcp.f32 %v3124_v5  ;;  %v3285_v5 = vld [vmem:[#allocation10 + $0x328] sm:$0xff]  ;;  %v3287_v6 = vld [vmem:[#allocation10 + $0x338] sm:$0xff] }
 0x551   :  { %6121 = vrcp.f32 %v3135_v11  ;;  %v3276_v11 = vld [vmem:[#allocation10 + $0x2e0] sm:$0xff] }
 0x55b   :  { %v6116_v7 = vpop.eup %6115 }
 0x55c   :  { %v6118_v8 = vpop.eup %6117 }
 0x55d   :  { %v6120_v9 = vpop.eup %6119  ;;  %v3139_v14 = vmul.f32 %v6118_v8, %v6116_v7  ;;  %v3284_v7 = vld [vmem:[#allocation10 + $0x320] sm:$0xff]  ;;  %v3286_v8 = vld [vmem:[#allocation10 + $0x330] sm:$0xff] }
 0x55e   :  { %v3138_v13 = vmul.f32 %v6120_v9, %v3111_v10  ;;  %v6122_v16 = vpop.eup %6121  ;;  %v3277_v9 = vld [vmem:[#allocation10 + $0x2e8] sm:$0xff]  ;;  %v3279_v10 = vld [vmem:[#allocation10 + $0x2f8] sm:$0xff] }
 0x560   :  { %v3140_v15 = vadd.f32 %v3139_v14, %v3138_v13  ;;  %v3278_v13 = vld [vmem:[#allocation10 + $0x2f0] sm:$0xff]  ;;  %v3269_v14 = vld [vmem:[#allocation10 + $0x2a8] sm:$0xff] }
 0x562   :  { %6123 = vtanh.f32 %v3140_v15  ;;  %3179 = vst.msk [vmem:[#allocation4] sm:$0x1] %vm6466_vm2, %v3140_v15  ;;  %v3271_v15 = vld [vmem:[#allocation10 + $0x2b8] sm:$0xff] }
 0x56f   :  { %v6124_v60 = vpop.eup %6123 }
 0x570   :  { %v3142_v17 = vmul.f32 %v6124_v60, %v6122_v16  ;;  %v2971_v19 = vpop.f32.mrf.mxu0  ;;  %v3042_v20 = vpop.f32.mrf.mxu1  ;;  %v3268_v16 = vld [vmem:[#allocation10 + $0x2a0] sm:$0xff]  ;;  %v3270_v60 = vld [vmem:[#allocation10 + $0x2b0] sm:$0xff] }
 0x572   :  { %3181 = vst [vmem:[#allocation13 + $0x3] sm:$0x1] %v3142_v17  ;;  %3177 = vst.msk [vmem:[#allocation3] sm:$0x1] %vm6466_vm2, %v3142_v17  ;;  %v2973_v21 = vpop.f32.mrf.mxu0  ;;  %v3044_v22 = vpop.f32.mrf.mxu1  ;;  %v3261_v17 = vld [vmem:[#allocation10 + $0x268] sm:$0xff] }
 0x573   :  { %v3085_v24 = vcombine.low %v2971_v19, %v2973_v21  ;;  %v3086_v25 = vcombine.low %v3042_v20, %v3044_v22  ;;  %v3263_v19 = vld [vmem:[#allocation10 + $0x278] sm:$0xff]  ;;  %v3260_v20 = vld [vmem:[#allocation10 + $0x260] sm:$0xff]  ;;  %v3262_v21 = vld [vmem:[#allocation10 + $0x270] sm:$0xff] }
 0x574   :  { %v3253_v22 = vld [vmem:[#allocation10 + $0x228] sm:$0xff] }
 0x575   :  { %v3093_v27 = vrot.slane %v3085_v24, %v6460_v53  ;;  %v3100_v28 = vrot.slane %v3086_v25, %v6460_v53  ;;  %v3255_v24 = vld [vmem:[#allocation10 + $0x238] sm:$0xff]  ;;  %v3252_v25 = vld [vmem:[#allocation10 + $0x220] sm:$0xff] }
 0x577   :  { %v3101_v30 = vcombine.low %v3093_v27, %v3100_v28  ;;  %v3254_v27 = vld [vmem:[#allocation10 + $0x230] sm:$0xff]  ;;  %v3245_v28 = vld [vmem:[#allocation10 + $0x1e8] sm:$0xff] }
 0x579   :  { %v3108_v31 = vrot.slane %v3101_v30, %v6460_v53  ;;  %v3247_v30 = vld [vmem:[#allocation10 + $0x1f8] sm:$0xff] }
 0x57b   :  { %v3110_v34 = vadd.f32 %v3108_v31, %v3080_v32  ;;  %v3244_v31 = vld [vmem:[#allocation10 + $0x1e0] sm:$0xff]  ;;  %v3246_v32 = vld [vmem:[#allocation10 + $0x1f0] sm:$0xff] }
 0x57d   :  { %v5977_v35 = vmul.f32 -1.442695, %v3110_v34  ;;  %v3150_v36 = vrot.slane %v3110_v34, 1  ;;  %v3161_v38 = vrot.slane %v3110_v34, 3  ;;  %v3158_v41 = vrot.slane %v3110_v34, 2  ;;  %v3237_v34 = vld [vmem:[#allocation10 + $0x1a8] sm:$0xff] }
 0x57f   :  { %6125 = vpow2.f32 %v5977_v35  ;;  %v5978_v37 = vmul.f32 -1.442695, %v3150_v36  ;;  %v5979_v39 = vmul.f32 -1.442695, %v3161_v38  ;;  %v3239_v35 = vld [vmem:[#allocation10 + $0x1b8] sm:$0xff]  ;;  %v3236_v36 = vld [vmem:[#allocation10 + $0x1a0] sm:$0xff] }
 0x580   :  { %v3229_v38 = vld [vmem:[#allocation10 + $0x168] sm:$0xff] }
 0x581   :  { %6127 = vpow2.f32 %v5978_v37  ;;  %v3238_v37 = vld [vmem:[#allocation10 + $0x1b0] sm:$0xff] }
 0x582   :  { %6129 = vpow2.f32 %v5979_v39  ;;  %v3231_v39 = vld [vmem:[#allocation10 + $0x178] sm:$0xff] }
 0x58c   :  { %v6126_v40 = vpop.eup %6125 }
 0x58d   :  { %v3146_v42 = vadd.f32 1.0, %v6126_v40  ;;  %v3228_v40 = vld [vmem:[#allocation10 + $0x160] sm:$0xff] }
 0x58e   :  { %v6128_v43 = vpop.eup %6127 }
 0x58f   :  { %6131 = vrcp.f32 %v3146_v42  ;;  %v3155_v44 = vadd.f32 1.0, %v6128_v43  ;;  %v6130_v45 = vpop.eup %6129  ;;  %v3221_v42 = vld [vmem:[#allocation10 + $0x128] sm:$0xff]  ;;  %v3223_v43 = vld [vmem:[#allocation10 + $0x138] sm:$0xff] }
 0x590   :  { %6133 = vtanh.f32 %v3158_v41  ;;  %v3166_v48 = vadd.f32 1.0, %v6130_v45  ;;  %v3230_v41 = vld [vmem:[#allocation10 + $0x170] sm:$0xff] }
 0x591   :  { %6135 = vrcp.f32 %v3155_v44  ;;  %v3220_v44 = vld [vmem:[#allocation10 + $0x120] sm:$0xff]  ;;  %v3222_v45 = vld [vmem:[#allocation10 + $0x130] sm:$0xff] }
 0x592   :  { %6137 = vrcp.f32 %v3166_v48  ;;  %v3205_v48 = vld [vmem:[#allocation10 + $0xa8] sm:$0xff] }
 0x59c   :  { %v6132_v46 = vpop.eup %6131 }
 0x59d   :  { %v6134_v47 = vpop.eup %6133 }
 0x59e   :  { %v6136_v29 = vpop.eup %6135  ;;  %v3173_v50 = vmul.f32 %v6134_v47, %v6132_v46  ;;  %v3213_v46 = vld [vmem:[#allocation10 + $0xe8] sm:$0xff]  ;;  %v3215_v47 = vld [vmem:[#allocation10 + $0xf8] sm:$0xff] }
 0x59f   :  { %v3172_v49 = vmul.f32 %v6136_v29, %v3170_v23  ;;  %v6138_v26 = vpop.eup %6137  ;;  %v3212_v23 = vld [vmem:[#allocation10 + $0xe0] sm:$0xff]  ;;  %v3214_v29 = vld [vmem:[#allocation10 + $0xf0] sm:$0xff] }
 0x5a1   :  { %v3174_v33 = vadd.f32 %v3173_v50, %v3172_v49  ;;  %v3207_v49 = vld [vmem:[#allocation10 + $0xb8] sm:$0xff]  ;;  %v3204_v50 = vld [vmem:[#allocation10 + $0xa0] sm:$0xff] }
 0x5a3   :  { %6139 = vtanh.f32 %v3174_v33  ;;  %3180 = vst.msk [vmem:[#allocation4 + $0x1] sm:$0x1] %vm6466_vm2, %v3174_v33  ;;  %v3206_v33 = vld [vmem:[#allocation10 + $0xb0] sm:$0xff] }
 0x5b0   :  { %v6140_v52 = vpop.eup %6139 }
 0x5b1   :  { %v3176_v54 = vmul.f32 %v6140_v52, %v6138_v26  ;;  %v3197_v26 = vld [vmem:[#allocation10 + $0x68] sm:$0xff]  ;;  %v3199_v52 = vld [vmem:[#allocation10 + $0x78] sm:$0xff] }
 0x5b3   :  { %3182 = vst [vmem:[#allocation13 + $0xc] sm:$0x1] %v3176_v54  ;;  %3178 = vst.msk [vmem:[#allocation3 + $0x1] sm:$0x1] %vm6466_vm2, %v3176_v54  ;;  %v3196_v54 = vld [vmem:[#allocation10 + $0x60] sm:$0xff] }
 0x5ba   :  { %v3183_v55 = vld [vmem:[#allocation3] sm:$0x3] }
 0x5bb   :  { %v3448_v56 = vrot.slane %v3183_v55, %v6432_v12  ;;  %v6549_v57 = vrot.slane %v3183_v55, %v6435_v18  ;;  %v3198_v55 = vld [vmem:[#allocation10 + $0x70] sm:$0xff] }
 0x5bd   :  { %3515 = vmatprep.mubr.f32.mxu0 %v3448_v56  ;;  %3586 = vmatprep.mubr.f32.mxu1 %v3448_v56 }
 0x5be   :  { %3516 = vmatmul.mubr.f32.vlgmr.msra.gmra.mxu0 %v6549_v57  ;;  %3587 = vmatmul.mubr.f32.vlgmr.msra.gmra.mxu1 %v6549_v57 }
 0x5bf   :  { %3594 = vmatpush1.msra.mxu0 %v3308_v58  ;;  %3665 = vmatpush1.msra.mxu1 %v3310_v59  ;;  %v3191_v58 = vld [vmem:[#allocation10 + $0x38] sm:$0xff]  ;;  %v3188_v59 = vld [vmem:[#allocation10 + $0x20] sm:$0xff] }
 0x5c0   :  { %3595 = vmatprep.subr.mxu0 %v3301_v0  ;;  %3657 = vmatprep.mubr.f32.mxu0 %v3448_v56  ;;  %v3190_v0 = vld [vmem:[#allocation10 + $0x30] sm:$0xff] }
 0x5c1   :  { %3666 = vmatprep.subr.mxu1 %v3303_v61  ;;  %3728 = vmatprep.mubr.f32.mxu1 %v3448_v56  ;;  %v3189_v56 = vld [vmem:[#allocation10 + $0x28] sm:$0xff] }
 0x5c2   :  { %3596 = vmatpush1.msra.mxu0 %v3300_v62  ;;  %3667 = vmatpush1.msra.mxu1 %v3302_v63  ;;  %v3437_v61 = vld [vmem:[#allocation10 + $0x7e8] sm:$0xff]  ;;  %v3439_v62 = vld [vmem:[#allocation10 + $0x7f8] sm:$0xff]  ;;  %v3436_v63 = vld [vmem:[#allocation10 + $0x7e0] sm:$0xff] }
 0x5c3   :  { %3597 = vmatprep.subr.mxu0 %v3293_v1  ;;  %3668 = vmatprep.subr.mxu1 %v3295_v2  ;;  %v3438_v1 = vld [vmem:[#allocation10 + $0x7f0] sm:$0xff]  ;;  %v3429_v2 = vld [vmem:[#allocation10 + $0x7a8] sm:$0xff] }
 0x5c4   :  { %3598 = vmatpush1.msra.mxu0 %v3292_v3  ;;  %3669 = vmatpush1.msra.mxu1 %v3294_v4  ;;  %v3431_v3 = vld [vmem:[#allocation10 + $0x7b8] sm:$0xff]  ;;  %v3428_v4 = vld [vmem:[#allocation10 + $0x7a0] sm:$0xff] }
 0x5c5   :  { %3599 = vmatprep.subr.mxu0 %v3285_v5  ;;  %3670 = vmatprep.subr.mxu1 %v3287_v6  ;;  %v3430_v5 = vld [vmem:[#allocation10 + $0x7b0] sm:$0xff]  ;;  %v3421_v6 = vld [vmem:[#allocation10 + $0x768] sm:$0xff] }
 0x5c6   :  { %3600 = vmatpush1.msra.mxu0 %v3284_v7  ;;  %3671 = vmatpush1.msra.mxu1 %v3286_v8  ;;  %v3423_v7 = vld [vmem:[#allocation10 + $0x778] sm:$0xff]  ;;  %v3420_v8 = vld [vmem:[#allocation10 + $0x760] sm:$0xff] }
 0x5c7   :  { %3601 = vmatprep.subr.mxu0 %v3277_v9  ;;  %3672 = vmatprep.subr.mxu1 %v3279_v10  ;;  %v3422_v9 = vld [vmem:[#allocation10 + $0x770] sm:$0xff]  ;;  %v3413_v10 = vld [vmem:[#allocation10 + $0x728] sm:$0xff] }
 0x5c8   :  { %3602 = vmatpush1.msra.mxu0 %v3276_v11  ;;  %3673 = vmatpush1.msra.mxu1 %v3278_v13  ;;  %v3415_v11 = vld [vmem:[#allocation10 + $0x738] sm:$0xff]  ;;  %v3412_v13 = vld [vmem:[#allocation10 + $0x720] sm:$0xff] }
 0x5c9   :  { %3603 = vmatprep.subr.mxu0 %v3269_v14  ;;  %3674 = vmatprep.subr.mxu1 %v3271_v15  ;;  %v3414_v14 = vld [vmem:[#allocation10 + $0x730] sm:$0xff]  ;;  %v3405_v15 = vld [vmem:[#allocation10 + $0x6e8] sm:$0xff] }
 0x5ca   :  { %3604 = vmatpush1.msra.mxu0 %v3268_v16  ;;  %3675 = vmatpush1.msra.mxu1 %v3270_v60  ;;  %v3407_v16 = vld [vmem:[#allocation10 + $0x6f8] sm:$0xff]  ;;  %v3404_v60 = vld [vmem:[#allocation10 + $0x6e0] sm:$0xff] }
 0x5cb   :  { %3605 = vmatprep.subr.mxu0 %v3261_v17  ;;  %3676 = vmatprep.subr.mxu1 %v3263_v19  ;;  %v3406_v17 = vld [vmem:[#allocation10 + $0x6f0] sm:$0xff]  ;;  %v3397_v19 = vld [vmem:[#allocation10 + $0x6a8] sm:$0xff] }
 0x5cc   :  { %3606 = vmatpush1.msra.mxu0 %v3260_v20  ;;  %3677 = vmatpush1.msra.mxu1 %v3262_v21  ;;  %v3399_v20 = vld [vmem:[#allocation10 + $0x6b8] sm:$0xff]  ;;  %v3396_v21 = vld [vmem:[#allocation10 + $0x6a0] sm:$0xff] }
 0x5cd   :  { %3607 = vmatprep.subr.mxu0 %v3253_v22  ;;  %3678 = vmatprep.subr.mxu1 %v3255_v24  ;;  %v3398_v22 = vld [vmem:[#allocation10 + $0x6b0] sm:$0xff]  ;;  %v3389_v24 = vld [vmem:[#allocation10 + $0x668] sm:$0xff] }
 0x5ce   :  { %3608 = vmatpush1.msra.mxu0 %v3252_v25  ;;  %3679 = vmatpush1.msra.mxu1 %v3254_v27  ;;  %v3391_v25 = vld [vmem:[#allocation10 + $0x678] sm:$0xff]  ;;  %v3388_v27 = vld [vmem:[#allocation10 + $0x660] sm:$0xff] }
 0x5cf   :  { %3609 = vmatprep.subr.mxu0 %v3245_v28  ;;  %3680 = vmatprep.subr.mxu1 %v3247_v30  ;;  %v3390_v28 = vld [vmem:[#allocation10 + $0x670] sm:$0xff]  ;;  %v3381_v30 = vld [vmem:[#allocation10 + $0x628] sm:$0xff] }
 0x5d0   :  { %3610 = vmatpush1.msra.mxu0 %v3244_v31  ;;  %3681 = vmatpush1.msra.mxu1 %v3246_v32  ;;  %v3383_v31 = vld [vmem:[#allocation10 + $0x638] sm:$0xff]  ;;  %v3380_v32 = vld [vmem:[#allocation10 + $0x620] sm:$0xff] }
 0x5d1   :  { %3611 = vmatprep.subr.mxu0 %v3237_v34  ;;  %3682 = vmatprep.subr.mxu1 %v3239_v35  ;;  %v3382_v34 = vld [vmem:[#allocation10 + $0x630] sm:$0xff]  ;;  %v3373_v35 = vld [vmem:[#allocation10 + $0x5e8] sm:$0xff] }
 0x5d2   :  { %3612 = vmatpush1.msra.mxu0 %v3236_v36  ;;  %3683 = vmatpush1.msra.mxu1 %v3238_v37  ;;  %v3375_v36 = vld [vmem:[#allocation10 + $0x5f8] sm:$0xff]  ;;  %v3372_v37 = vld [vmem:[#allocation10 + $0x5e0] sm:$0xff] }
 0x5d3   :  { %3613 = vmatprep.subr.mxu0 %v3229_v38  ;;  %3684 = vmatprep.subr.mxu1 %v3231_v39  ;;  %v3374_v38 = vld [vmem:[#allocation10 + $0x5f0] sm:$0xff]  ;;  %v3365_v39 = vld [vmem:[#allocation10 + $0x5a8] sm:$0xff] }
 0x5d4   :  { %3614 = vmatpush1.msra.mxu0 %v3228_v40  ;;  %3685 = vmatpush1.msra.mxu1 %v3230_v41  ;;  %v3367_v40 = vld [vmem:[#allocation10 + $0x5b8] sm:$0xff]  ;;  %v3364_v41 = vld [vmem:[#allocation10 + $0x5a0] sm:$0xff] }
 0x5d5   :  { %3615 = vmatprep.subr.mxu0 %v3221_v42  ;;  %3686 = vmatprep.subr.mxu1 %v3223_v43  ;;  %v3366_v42 = vld [vmem:[#allocation10 + $0x5b0] sm:$0xff]  ;;  %v3357_v43 = vld [vmem:[#allocation10 + $0x568] sm:$0xff] }
 0x5d6   :  { %3616 = vmatpush1.msra.mxu0 %v3220_v44  ;;  %3687 = vmatpush1.msra.mxu1 %v3222_v45  ;;  %v3359_v44 = vld [vmem:[#allocation10 + $0x578] sm:$0xff]  ;;  %v3356_v45 = vld [vmem:[#allocation10 + $0x560] sm:$0xff] }
 0x5d7   :  { %3617 = vmatprep.subr.mxu0 %v3213_v46  ;;  %3688 = vmatprep.subr.mxu1 %v3215_v47  ;;  %v3358_v46 = vld [vmem:[#allocation10 + $0x570] sm:$0xff]  ;;  %v3349_v47 = vld [vmem:[#allocation10 + $0x528] sm:$0xff] }
 0x5d8   :  { %3618 = vmatpush1.msra.mxu0 %v3212_v23  ;;  %3689 = vmatpush1.msra.mxu1 %v3214_v29  ;;  %v3351_v23 = vld [vmem:[#allocation10 + $0x538] sm:$0xff]  ;;  %v3348_v29 = vld [vmem:[#allocation10 + $0x520] sm:$0xff] }
 0x5d9   :  { %3619 = vmatprep.subr.mxu0 %v3205_v48  ;;  %3690 = vmatprep.subr.mxu1 %v3207_v49  ;;  %v3350_v48 = vld [vmem:[#allocation10 + $0x530] sm:$0xff]  ;;  %v3341_v49 = vld [vmem:[#allocation10 + $0x4e8] sm:$0xff] }
 0x5da   :  { %3620 = vmatpush1.msra.mxu0 %v3204_v50  ;;  %3691 = vmatpush1.msra.mxu1 %v3206_v33  ;;  %v3343_v50 = vld [vmem:[#allocation10 + $0x4f8] sm:$0xff]  ;;  %v3340_v33 = vld [vmem:[#allocation10 + $0x4e0] sm:$0xff] }
 0x5db   :  { %3621 = vmatprep.subr.mxu0 %v3197_v26  ;;  %3692 = vmatprep.subr.mxu1 %v3199_v52  ;;  %v3342_v26 = vld [vmem:[#allocation10 + $0x4f0] sm:$0xff]  ;;  %v3333_v52 = vld [vmem:[#allocation10 + $0x4a8] sm:$0xff] }
 0x5dc   :  { %3622 = vmatpush1.msra.mxu0 %v3196_v54  ;;  %3693 = vmatpush1.msra.mxu1 %v3198_v55  ;;  %v3335_v54 = vld [vmem:[#allocation10 + $0x4b8] sm:$0xff]  ;;  %v3332_v55 = vld [vmem:[#allocation10 + $0x4a0] sm:$0xff] }
 0x5dd   :  { %3623 = vmatprep.subr.mxu0 %v3189_v56  ;;  %3694 = vmatprep.subr.mxu1 %v3191_v58  ;;  %v3334_v56 = vld [vmem:[#allocation10 + $0x4b0] sm:$0xff]  ;;  %v3325_v58 = vld [vmem:[#allocation10 + $0x468] sm:$0xff] }
 0x5de   :  { %3624 = vmatpush1.msra.mxu0 %v3188_v59  ;;  %3695 = vmatpush1.msra.mxu1 %v3190_v0  ;;  %v3327_v59 = vld [vmem:[#allocation10 + $0x478] sm:$0xff]  ;;  %v3324_v0 = vld [vmem:[#allocation10 + $0x460] sm:$0xff] }
 0x5df   :  { %3625 = vmatprep.subr.mxu0 %v3437_v61  ;;  %3696 = vmatprep.subr.mxu1 %v3439_v62  ;;  %v3326_v61 = vld [vmem:[#allocation10 + $0x470] sm:$0xff]  ;;  %v3317_v62 = vld [vmem:[#allocation10 + $0x428] sm:$0xff] }
 0x5e0   :  { %3626 = vmatpush2.msra.mxu0 %v3436_v63  ;;  %3697 = vmatpush2.msra.mxu1 %v3438_v1  ;;  %v3319_v63 = vld [vmem:[#allocation10 + $0x438] sm:$0xff]  ;;  %v3316_v1 = vld [vmem:[#allocation10 + $0x420] sm:$0xff] }
 0x5e1   :  { %3627 = vmatprep.subr.mxu0 %v3429_v2  ;;  %3698 = vmatprep.subr.mxu1 %v3431_v3  ;;  %v3318_v2 = vld [vmem:[#allocation10 + $0x430] sm:$0xff]  ;;  %v3993_v3 = vld [vmem:[#allocation10 + $0x3c8] sm:$0xff] }
 0x5e2   :  { %3628 = vmatpush2.msra.mxu0 %v3428_v4  ;;  %3699 = vmatpush2.msra.mxu1 %v3430_v5  ;;  %v3995_v4 = vld [vmem:[#allocation10 + $0x3d8] sm:$0xff]  ;;  %v3992_v5 = vld [vmem:[#allocation10 + $0x3c0] sm:$0xff] }
 0x5e3   :  { %3629 = vmatprep.subr.mxu0 %v3421_v6  ;;  %3700 = vmatprep.subr.mxu1 %v3423_v7  ;;  %v3994_v6 = vld [vmem:[#allocation10 + $0x3d0] sm:$0xff]  ;;  %v3985_v7 = vld [vmem:[#allocation10 + $0x388] sm:$0xff] }
 0x5e4   :  { %3630 = vmatpush2.msra.mxu0 %v3420_v8  ;;  %3701 = vmatpush2.msra.mxu1 %v3422_v9  ;;  %v3987_v8 = vld [vmem:[#allocation10 + $0x398] sm:$0xff]  ;;  %v3984_v9 = vld [vmem:[#allocation10 + $0x380] sm:$0xff] }
 0x5e5   :  { %3631 = vmatprep.subr.mxu0 %v3413_v10  ;;  %3702 = vmatprep.subr.mxu1 %v3415_v11  ;;  %v3986_v10 = vld [vmem:[#allocation10 + $0x390] sm:$0xff]  ;;  %v3977_v11 = vld [vmem:[#allocation10 + $0x348] sm:$0xff] }
 0x5e6   :  { %3632 = vmatpush2.msra.mxu0 %v3412_v13  ;;  %3703 = vmatpush2.msra.mxu1 %v3414_v14  ;;  %v3979_v13 = vld [vmem:[#allocation10 + $0x358] sm:$0xff]  ;;  %v3978_v14 = vld [vmem:[#allocation10 + $0x350] sm:$0xff] }
 0x5e7   :  { %3633 = vmatprep.subr.mxu0 %v3405_v15  ;;  %3704 = vmatprep.subr.mxu1 %v3407_v16  ;;  %v3969_v15 = vld [vmem:[#allocation10 + $0x308] sm:$0xff]  ;;  %v3971_v16 = vld [vmem:[#allocation10 + $0x318] sm:$0xff] }
 0x5e8   :  { %3634 = vmatpush2.msra.mxu0 %v3404_v60  ;;  %3705 = vmatpush2.msra.mxu1 %v3406_v17  ;;  %v3968_v60 = vld [vmem:[#allocation10 + $0x300] sm:$0xff]  ;;  %v3970_v17 = vld [vmem:[#allocation10 + $0x310] sm:$0xff] }
 0x5e9   :  { %3635 = vmatprep.subr.mxu0 %v3397_v19  ;;  %3706 = vmatprep.subr.mxu1 %v3399_v20  ;;  %v3961_v19 = vld [vmem:[#allocation10 + $0x2c8] sm:$0xff]  ;;  %v3963_v20 = vld [vmem:[#allocation10 + $0x2d8] sm:$0xff] }
 0x5ea   :  { %3636 = vmatpush2.msra.mxu0 %v3396_v21  ;;  %3707 = vmatpush2.msra.mxu1 %v3398_v22  ;;  %v3960_v21 = vld [vmem:[#allocation10 + $0x2c0] sm:$0xff]  ;;  %v3962_v22 = vld [vmem:[#allocation10 + $0x2d0] sm:$0xff] }
 0x5eb   :  { %3637 = vmatprep.subr.mxu0 %v3389_v24  ;;  %3708 = vmatprep.subr.mxu1 %v3391_v25  ;;  %v3953_v24 = vld [vmem:[#allocation10 + $0x288] sm:$0xff]  ;;  %v3955_v25 = vld [vmem:[#allocation10 + $0x298] sm:$0xff] }
 0x5ec   :  { %3638 = vmatpush2.msra.mxu0 %v3388_v27  ;;  %3709 = vmatpush2.msra.mxu1 %v3390_v28  ;;  %v3952_v27 = vld [vmem:[#allocation10 + $0x280] sm:$0xff]  ;;  %v3954_v28 = vld [vmem:[#allocation10 + $0x290] sm:$0xff] }
 0x5ed   :  { %3639 = vmatprep.subr.mxu0 %v3381_v30  ;;  %3710 = vmatprep.subr.mxu1 %v3383_v31  ;;  %v3945_v30 = vld [vmem:[#allocation10 + $0x248] sm:$0xff]  ;;  %v3947_v31 = vld [vmem:[#allocation10 + $0x258] sm:$0xff] }
 0x5ee   :  { %3640 = vmatpush2.msra.mxu0 %v3380_v32  ;;  %3711 = vmatpush2.msra.mxu1 %v3382_v34  ;;  %v3944_v32 = vld [vmem:[#allocation10 + $0x240] sm:$0xff]  ;;  %v3946_v34 = vld [vmem:[#allocation10 + $0x250] sm:$0xff] }
 0x5ef   :  { %3641 = vmatprep.subr.mxu0 %v3373_v35  ;;  %3712 = vmatprep.subr.mxu1 %v3375_v36  ;;  %v3937_v35 = vld [vmem:[#allocation10 + $0x208] sm:$0xff]  ;;  %v3939_v36 = vld [vmem:[#allocation10 + $0x218] sm:$0xff] }
 0x5f0   :  { %3642 = vmatpush2.msra.mxu0 %v3372_v37  ;;  %3713 = vmatpush2.msra.mxu1 %v3374_v38  ;;  %v3936_v37 = vld [vmem:[#allocation10 + $0x200] sm:$0xff]  ;;  %v3938_v38 = vld [vmem:[#allocation10 + $0x210] sm:$0xff] }
 0x5f1   :  { %3643 = vmatprep.subr.mxu0 %v3365_v39  ;;  %3714 = vmatprep.subr.mxu1 %v3367_v40  ;;  %v3929_v39 = vld [vmem:[#allocation10 + $0x1c8] sm:$0xff]  ;;  %v3931_v40 = vld [vmem:[#allocation10 + $0x1d8] sm:$0xff] }
 0x5f2   :  { %3644 = vmatpush2.msra.mxu0 %v3364_v41  ;;  %3715 = vmatpush2.msra.mxu1 %v3366_v42  ;;  %v3928_v41 = vld [vmem:[#allocation10 + $0x1c0] sm:$0xff]  ;;  %v3930_v42 = vld [vmem:[#allocation10 + $0x1d0] sm:$0xff] }
 0x5f3   :  { %3645 = vmatprep.subr.mxu0 %v3357_v43  ;;  %3716 = vmatprep.subr.mxu1 %v3359_v44  ;;  %v3921_v43 = vld [vmem:[#allocation10 + $0x188] sm:$0xff]  ;;  %v3923_v44 = vld [vmem:[#allocation10 + $0x198] sm:$0xff] }
 0x5f4   :  { %3646 = vmatpush2.msra.mxu0 %v3356_v45  ;;  %3717 = vmatpush2.msra.mxu1 %v3358_v46  ;;  %v3920_v45 = vld [vmem:[#allocation10 + $0x180] sm:$0xff]  ;;  %v3922_v46 = vld [vmem:[#allocation10 + $0x190] sm:$0xff] }
 0x5f5   :  { %3647 = vmatprep.subr.mxu0 %v3349_v47  ;;  %3718 = vmatprep.subr.mxu1 %v3351_v23  ;;  %v3913_v47 = vld [vmem:[#allocation10 + $0x148] sm:$0xff]  ;;  %v3915_v23 = vld [vmem:[#allocation10 + $0x158] sm:$0xff] }
 0x5f6   :  { %3648 = vmatpush2.msra.mxu0 %v3348_v29  ;;  %3719 = vmatpush2.msra.mxu1 %v3350_v48  ;;  %v3912_v29 = vld [vmem:[#allocation10 + $0x140] sm:$0xff]  ;;  %v3914_v48 = vld [vmem:[#allocation10 + $0x150] sm:$0xff] }
 0x5f7   :  { %3649 = vmatprep.subr.mxu0 %v3341_v49  ;;  %3720 = vmatprep.subr.mxu1 %v3343_v50  ;;  %v3905_v49 = vld [vmem:[#allocation10 + $0x108] sm:$0xff]  ;;  %v3907_v50 = vld [vmem:[#allocation10 + $0x118] sm:$0xff] }
 0x5f8   :  { %3650 = vmatpush2.msra.mxu0 %v3340_v33  ;;  %3721 = vmatpush2.msra.mxu1 %v3342_v26  ;;  %v3904_v33 = vld [vmem:[#allocation10 + $0x100] sm:$0xff]  ;;  %v3906_v26 = vld [vmem:[#allocation10 + $0x110] sm:$0xff] }
 0x5f9   :  { %3651 = vmatprep.subr.mxu0 %v3333_v52  ;;  %3722 = vmatprep.subr.mxu1 %v3335_v54  ;;  %v3897_v52 = vld [vmem:[#allocation10 + $0xc8] sm:$0xff]  ;;  %v3899_v54 = vld [vmem:[#allocation10 + $0xd8] sm:$0xff] }
 0x5fa   :  { %3652 = vmatpush2.msra.mxu0 %v3332_v55  ;;  %3723 = vmatpush2.msra.mxu1 %v3334_v56  ;;  %v3896_v55 = vld [vmem:[#allocation10 + $0xc0] sm:$0xff]  ;;  %v3898_v56 = vld [vmem:[#allocation10 + $0xd0] sm:$0xff] }
 0x5fb   :  { %3653 = vmatprep.subr.mxu0 %v3325_v58  ;;  %3724 = vmatprep.subr.mxu1 %v3327_v59  ;;  %v3889_v58 = vld [vmem:[#allocation10 + $0x88] sm:$0xff]  ;;  %v3891_v59 = vld [vmem:[#allocation10 + $0x98] sm:$0xff] }
 0x5fc   :  { %3654 = vmatpush2.msra.mxu0 %v3324_v0  ;;  %3725 = vmatpush2.msra.mxu1 %v3326_v61  ;;  %v3888_v0 = vld [vmem:[#allocation10 + $0x80] sm:$0xff]  ;;  %v3890_v61 = vld [vmem:[#allocation10 + $0x90] sm:$0xff] }
 0x5fd   :  { %3655 = vmatprep.subr.mxu0 %v3317_v62  ;;  %3726 = vmatprep.subr.mxu1 %v3319_v63  ;;  %v3881_v62 = vld [vmem:[#allocation10 + $0x48] sm:$0xff]  ;;  %v3883_v63 = vld [vmem:[#allocation10 + $0x58] sm:$0xff] }
 0x5fe   :  { %3656 = vmatpush2.msra.mxu0 %v3316_v1  ;;  %3727 = vmatpush2.msra.mxu1 %v3318_v2  ;;  %v3880_v1 = vld [vmem:[#allocation10 + $0x40] sm:$0xff]  ;;  %v3882_v2 = vld [vmem:[#allocation10 + $0x50] sm:$0xff] }
 0x5ff   :  { %3658 = vmatmul.mubr.f32.vlgmr.msra.gmra.mxu0 %v6549_v57  ;;  %3729 = vmatmul.mubr.f32.vlgmr.msra.gmra.mxu1 %v6549_v57  ;;  %v3976_v57 = vld [vmem:[#allocation10 + $0x340] sm:$0xff] }
 0x600   :  { %4139 = vmatprep.subr.mxu0 %v3993_v3  ;;  %4210 = vmatprep.subr.mxu1 %v3995_v4  ;;  %v3873_v3 = vld [vmem:[#allocation10 + $0x8] sm:$0xff]  ;;  %v3875_v4 = vld [vmem:[#allocation10 + $0x18] sm:$0xff] }
 0x601   :  { %4140 = vmatpush1.msra.mxu0 %v3992_v5  ;;  %4211 = vmatpush1.msra.mxu1 %v3994_v6  ;;  %v3872_v5 = vld [vmem:[#allocation10] sm:$0xff]  ;;  %v3874_v6 = vld [vmem:[#allocation10 + $0x10] sm:$0xff] }
 0x602   :  { %4141 = vmatprep.subr.mxu0 %v3985_v7  ;;  %4212 = vmatprep.subr.mxu1 %v3987_v8  ;;  %v4121_v7 = vld [vmem:[#allocation10 + $0x7c8] sm:$0xff]  ;;  %v4123_v8 = vld [vmem:[#allocation10 + $0x7d8] sm:$0xff] }
 0x603   :  { %4142 = vmatpush1.msra.mxu0 %v3984_v9  ;;  %4213 = vmatpush1.msra.mxu1 %v3986_v10  ;;  %v4120_v9 = vld [vmem:[#allocation10 + $0x7c0] sm:$0xff]  ;;  %v4122_v10 = vld [vmem:[#allocation10 + $0x7d0] sm:$0xff] }
 0x604   :  { %4143 = vmatprep.subr.mxu0 %v3977_v11  ;;  %4214 = vmatprep.subr.mxu1 %v3979_v13  ;;  %v4113_v11 = vld [vmem:[#allocation10 + $0x788] sm:$0xff]  ;;  %v4115_v13 = vld [vmem:[#allocation10 + $0x798] sm:$0xff] }
 0x605   :  { %4144 = vmatpush1.msra.mxu0 %v3976_v57  ;;  %4215 = vmatpush1.msra.mxu1 %v3978_v14  ;;  %v4112_v57 = vld [vmem:[#allocation10 + $0x780] sm:$0xff]  ;;  %v4114_v14 = vld [vmem:[#allocation10 + $0x790] sm:$0xff] }
 0x606   :  { %4145 = vmatprep.subr.mxu0 %v3969_v15  ;;  %4216 = vmatprep.subr.mxu1 %v3971_v16  ;;  %v4105_v15 = vld [vmem:[#allocation10 + $0x748] sm:$0xff]  ;;  %v4107_v16 = vld [vmem:[#allocation10 + $0x758] sm:$0xff] }
 0x607   :  { %4146 = vmatpush1.msra.mxu0 %v3968_v60  ;;  %4217 = vmatpush1.msra.mxu1 %v3970_v17  ;;  %v4104_v60 = vld [vmem:[#allocation10 + $0x740] sm:$0xff]  ;;  %v4106_v17 = vld [vmem:[#allocation10 + $0x750] sm:$0xff] }
 0x608   :  { %4147 = vmatprep.subr.mxu0 %v3961_v19  ;;  %4218 = vmatprep.subr.mxu1 %v3963_v20  ;;  %v4097_v19 = vld [vmem:[#allocation10 + $0x708] sm:$0xff]  ;;  %v4099_v20 = vld [vmem:[#allocation10 + $0x718] sm:$0xff] }
 0x609   :  { %4148 = vmatpush1.msra.mxu0 %v3960_v21  ;;  %4219 = vmatpush1.msra.mxu1 %v3962_v22  ;;  %v4096_v21 = vld [vmem:[#allocation10 + $0x700] sm:$0xff]  ;;  %v4098_v22 = vld [vmem:[#allocation10 + $0x710] sm:$0xff] }
 0x60a   :  { %4149 = vmatprep.subr.mxu0 %v3953_v24  ;;  %4220 = vmatprep.subr.mxu1 %v3955_v25  ;;  %v4089_v24 = vld [vmem:[#allocation10 + $0x6c8] sm:$0xff]  ;;  %v4091_v25 = vld [vmem:[#allocation10 + $0x6d8] sm:$0xff] }
 0x60b   :  { %4150 = vmatpush1.msra.mxu0 %v3952_v27  ;;  %4221 = vmatpush1.msra.mxu1 %v3954_v28  ;;  %v4088_v27 = vld [vmem:[#allocation10 + $0x6c0] sm:$0xff]  ;;  %v4090_v28 = vld [vmem:[#allocation10 + $0x6d0] sm:$0xff] }
 0x60c   :  { %4151 = vmatprep.subr.mxu0 %v3945_v30  ;;  %4222 = vmatprep.subr.mxu1 %v3947_v31  ;;  %v4081_v30 = vld [vmem:[#allocation10 + $0x688] sm:$0xff]  ;;  %v4083_v31 = vld [vmem:[#allocation10 + $0x698] sm:$0xff] }
 0x60d   :  { %4152 = vmatpush1.msra.mxu0 %v3944_v32  ;;  %4223 = vmatpush1.msra.mxu1 %v3946_v34  ;;  %v4080_v32 = vld [vmem:[#allocation10 + $0x680] sm:$0xff]  ;;  %v4082_v34 = vld [vmem:[#allocation10 + $0x690] sm:$0xff] }
 0x60e   :  { %4153 = vmatprep.subr.mxu0 %v3937_v35  ;;  %4224 = vmatprep.subr.mxu1 %v3939_v36  ;;  %v4073_v35 = vld [vmem:[#allocation10 + $0x648] sm:$0xff]  ;;  %v4075_v36 = vld [vmem:[#allocation10 + $0x658] sm:$0xff] }
 0x60f   :  { %4154 = vmatpush1.msra.mxu0 %v3936_v37  ;;  %4225 = vmatpush1.msra.mxu1 %v3938_v38  ;;  %v4072_v37 = vld [vmem:[#allocation10 + $0x640] sm:$0xff]  ;;  %v4074_v38 = vld [vmem:[#allocation10 + $0x650] sm:$0xff] }
 0x610   :  { %4155 = vmatprep.subr.mxu0 %v3929_v39  ;;  %4226 = vmatprep.subr.mxu1 %v3931_v40  ;;  %v4065_v39 = vld [vmem:[#allocation10 + $0x608] sm:$0xff]  ;;  %v4067_v40 = vld [vmem:[#allocation10 + $0x618] sm:$0xff] }
 0x611   :  { %4156 = vmatpush1.msra.mxu0 %v3928_v41  ;;  %4227 = vmatpush1.msra.mxu1 %v3930_v42  ;;  %v4064_v41 = vld [vmem:[#allocation10 + $0x600] sm:$0xff]  ;;  %v4066_v42 = vld [vmem:[#allocation10 + $0x610] sm:$0xff] }
 0x612   :  { %4157 = vmatprep.subr.mxu0 %v3921_v43  ;;  %4228 = vmatprep.subr.mxu1 %v3923_v44  ;;  %v4057_v43 = vld [vmem:[#allocation10 + $0x5c8] sm:$0xff]  ;;  %v4059_v44 = vld [vmem:[#allocation10 + $0x5d8] sm:$0xff] }
 0x613   :  { %4158 = vmatpush1.msra.mxu0 %v3920_v45  ;;  %4229 = vmatpush1.msra.mxu1 %v3922_v46  ;;  %v4056_v45 = vld [vmem:[#allocation10 + $0x5c0] sm:$0xff]  ;;  %v4058_v46 = vld [vmem:[#allocation10 + $0x5d0] sm:$0xff] }
 0x614   :  { %4159 = vmatprep.subr.mxu0 %v3913_v47  ;;  %4230 = vmatprep.subr.mxu1 %v3915_v23 }
 0x615   :  { %4160 = vmatpush1.msra.mxu0 %v3912_v29  ;;  %4231 = vmatpush1.msra.mxu1 %v3914_v48  ;;  %v4049_v29 = vld [vmem:[#allocation10 + $0x588] sm:$0xff]  ;;  %v4051_v48 = vld [vmem:[#allocation10 + $0x598] sm:$0xff] }
 0x616   :  { %4161 = vmatprep.subr.mxu0 %v3905_v49  ;;  %4232 = vmatprep.subr.mxu1 %v3907_v50  ;;  %v4048_v49 = vld [vmem:[#allocation10 + $0x580] sm:$0xff]  ;;  %v4050_v50 = vld [vmem:[#allocation10 + $0x590] sm:$0xff] }
 0x617   :  { %4162 = vmatpush1.msra.mxu0 %v3904_v33  ;;  %4233 = vmatpush1.msra.mxu1 %v3906_v26 }
 0x618   :  { %4163 = vmatprep.subr.mxu0 %v3897_v52  ;;  %4234 = vmatprep.subr.mxu1 %v3899_v54  ;;  %v4041_v52 = vld [vmem:[#allocation10 + $0x548] sm:$0xff]  ;;  %v4043_v54 = vld [vmem:[#allocation10 + $0x558] sm:$0xff] }
 0x619   :  { %4164 = vmatpush1.msra.mxu0 %v3896_v55  ;;  %4235 = vmatpush1.msra.mxu1 %v3898_v56 }
 0x61a   :  { %4165 = vmatprep.subr.mxu0 %v3889_v58  ;;  %4236 = vmatprep.subr.mxu1 %v3891_v59  ;;  %v4040_v58 = vld [vmem:[#allocation10 + $0x540] sm:$0xff]  ;;  %v4042_v59 = vld [vmem:[#allocation10 + $0x550] sm:$0xff] }
 0x61b   :  { %4166 = vmatpush1.msra.mxu0 %v3888_v0  ;;  %4237 = vmatpush1.msra.mxu1 %v3890_v61  ;;  %v4033_v0 = vld [vmem:[#allocation10 + $0x508] sm:$0xff]  ;;  %v4035_v61 = vld [vmem:[#allocation10 + $0x518] sm:$0xff] }
 0x61c   :  { %4167 = vmatprep.subr.mxu0 %v3881_v62  ;;  %4238 = vmatprep.subr.mxu1 %v3883_v63  ;;  %v4032_v62 = vld [vmem:[#allocation10 + $0x500] sm:$0xff] }
 0x61d   :  { %4168 = vmatpush1.msra.mxu0 %v3880_v1  ;;  %4239 = vmatpush1.msra.mxu1 %v3882_v2  ;;  %v4034_v2 = vld [vmem:[#allocation10 + $0x510] sm:$0xff] }
 0x61e   :  { %4169 = vmatprep.subr.mxu0 %v3873_v3  ;;  %4240 = vmatprep.subr.mxu1 %v3875_v4  ;;  %v4025_v3 = vld [vmem:[#allocation10 + $0x4c8] sm:$0xff]  ;;  %v4027_v4 = vld [vmem:[#allocation10 + $0x4d8] sm:$0xff] }
 0x61f   :  { %4170 = vmatpush1.msra.mxu0 %v3872_v5  ;;  %4241 = vmatpush1.msra.mxu1 %v3874_v6  ;;  %v4024_v5 = vld [vmem:[#allocation10 + $0x4c0] sm:$0xff]  ;;  %v4026_v6 = vld [vmem:[#allocation10 + $0x4d0] sm:$0xff] }
 0x620   :  { %4171 = vmatprep.subr.mxu0 %v4121_v7  ;;  %4242 = vmatprep.subr.mxu1 %v4123_v8  ;;  %v4017_v7 = vld [vmem:[#allocation10 + $0x488] sm:$0xff] }
 0x621   :  { %4172 = vmatpush2.msra.mxu0 %v4120_v9  ;;  %4243 = vmatpush2.msra.mxu1 %v4122_v10  ;;  %v4019_v9 = vld [vmem:[#allocation10 + $0x498] sm:$0xff]  ;;  %v4016_v10 = vld [vmem:[#allocation10 + $0x480] sm:$0xff] }
 0x622   :  { %4173 = vmatprep.subr.mxu0 %v4113_v11  ;;  %4244 = vmatprep.subr.mxu1 %v4115_v13  ;;  %v4018_v11 = vld [vmem:[#allocation10 + $0x490] sm:$0xff]  ;;  %v4009_v13 = vld [vmem:[#allocation10 + $0x448] sm:$0xff] }
 0x623   :  { %4174 = vmatpush2.msra.mxu0 %v4112_v57  ;;  %4245 = vmatpush2.msra.mxu1 %v4114_v14  ;;  %v4011_v57 = vld [vmem:[#allocation10 + $0x458] sm:$0xff] }
 0x624   :  { %4175 = vmatprep.subr.mxu0 %v4105_v15  ;;  %4246 = vmatprep.subr.mxu1 %v4107_v16  ;;  %v4008_v15 = vld [vmem:[#allocation10 + $0x440] sm:$0xff]  ;;  %v4010_v16 = vld [vmem:[#allocation10 + $0x450] sm:$0xff] }
 0x625   :  { %4176 = vmatpush2.msra.mxu0 %v4104_v60  ;;  %4247 = vmatpush2.msra.mxu1 %v4106_v17  ;;  %v3736_v60 = vld [vmem:[#allocation2 + $0x4] ss:$8 sm:$0xf] }
 0x626   :  { %4177 = vmatprep.subr.mxu0 %v4097_v19  ;;  %4248 = vmatprep.subr.mxu1 %v4099_v20  ;;  %v4001_v17 = vld [vmem:[#allocation10 + $0x408] sm:$0xff]  ;;  %v4003_v19 = vld [vmem:[#allocation10 + $0x418] sm:$0xff] }
 0x627   :  { %4178 = vmatpush2.msra.mxu0 %v4096_v21  ;;  %4249 = vmatpush2.msra.mxu1 %v4098_v22  ;;  %v4000_v21 = vld [vmem:[#allocation10 + $0x400] sm:$0xff]  ;;  %v4002_v22 = vld [vmem:[#allocation10 + $0x410] sm:$0xff] }
 0x628   :  { %4179 = vmatprep.subr.mxu0 %v4089_v24  ;;  %4250 = vmatprep.subr.mxu1 %v4091_v25 }
 0x629   :  { %4180 = vmatpush2.msra.mxu0 %v4088_v27  ;;  %4251 = vmatpush2.msra.mxu1 %v4090_v28  ;;  %v3997_v27 = vld [vmem:[#allocation10 + $0x3e8] sm:$0xff]  ;;  %v3999_v28 = vld [vmem:[#allocation10 + $0x3f8] sm:$0xff] }
 0x62a   :  { %4181 = vmatprep.subr.mxu0 %v4081_v30  ;;  %4252 = vmatprep.subr.mxu1 %v4083_v31 }
 0x62b   :  { %4182 = vmatpush2.msra.mxu0 %v4080_v32  ;;  %4253 = vmatpush2.msra.mxu1 %v4082_v34 }
 0x62c   :  { %4183 = vmatprep.subr.mxu0 %v4073_v35  ;;  %4254 = vmatprep.subr.mxu1 %v4075_v36 }
 0x62d   :  { %4184 = vmatpush2.msra.mxu0 %v4072_v37  ;;  %4255 = vmatpush2.msra.mxu1 %v4074_v38 }
 0x62e   :  { %4185 = vmatprep.subr.mxu0 %v4065_v39  ;;  %4256 = vmatprep.subr.mxu1 %v4067_v40 }
 0x62f   :  { %4186 = vmatpush2.msra.mxu0 %v4064_v41  ;;  %4257 = vmatpush2.msra.mxu1 %v4066_v42 }
 0x630   :  { %4187 = vmatprep.subr.mxu0 %v4057_v43  ;;  %4258 = vmatprep.subr.mxu1 %v4059_v44  ;;  %v3799_v43 = vld [vmem:[#allocation4] sm:$0x3] }
 0x631   :  { %4188 = vmatpush2.msra.mxu0 %v4056_v45  ;;  %4259 = vmatpush2.msra.mxu1 %v4058_v46 }
 0x632   :  { %4189 = vmatprep.subr.mxu0 %v4049_v29  ;;  %4260 = vmatprep.subr.mxu1 %v4051_v48 }
 0x633   :  { %4190 = vmatpush2.msra.mxu0 %v4048_v49  ;;  %4261 = vmatpush2.msra.mxu1 %v4050_v50 }
 0x634   :  { %4191 = vmatprep.subr.mxu0 %v4041_v52  ;;  %4262 = vmatprep.subr.mxu1 %v4043_v54 }
 0x635   :  { %4192 = vmatpush2.msra.mxu0 %v4040_v58  ;;  %4263 = vmatpush2.msra.mxu1 %v4042_v59 }
 0x636   :  { %4193 = vmatprep.subr.mxu0 %v4033_v0  ;;  %4264 = vmatprep.subr.mxu1 %v4035_v61  ;;  %v3768_v0 = vld [vmem:[#allocation2 + $0x23] ss:$8 sm:$0xf] }
 0x637   :  { %4194 = vmatpush2.msra.mxu0 %v4032_v62  ;;  %4265 = vmatpush2.msra.mxu1 %v4034_v2 }
 0x638   :  { %4195 = vmatprep.subr.mxu0 %v4025_v3  ;;  %4266 = vmatprep.subr.mxu1 %v4027_v4 }
 0x639   :  { %4196 = vmatpush2.msra.mxu0 %v4024_v5  ;;  %4267 = vmatpush2.msra.mxu1 %v4026_v6 }
 0x63a   :  { %4197 = vmatprep.subr.mxu0 %v4017_v7  ;;  %4268 = vmatprep.subr.mxu1 %v4019_v9 }
 0x63b   :  { %4198 = vmatpush2.msra.mxu0 %v4016_v10  ;;  %4269 = vmatpush2.msra.mxu1 %v4018_v11 }
 0x63c   :  { %4199 = vmatprep.subr.mxu0 %v4009_v13  ;;  %4270 = vmatprep.subr.mxu1 %v4011_v57  ;;  %v3858_v13 = vrot.slane %v3799_v43, 1 }
 0x63d   :  { %4200 = vmatpush2.msra.mxu0 %v4008_v15  ;;  %4271 = vmatpush2.msra.mxu1 %v4010_v16 }
 0x63e   :  { %4201 = vmatprep.subr.mxu0 %v4001_v17  ;;  %4272 = vmatprep.subr.mxu1 %v4003_v19 }
 0x63f   :  { %4202 = vmatpush2.msra.mxu0 %v4000_v21  ;;  %4273 = vmatpush2.msra.mxu1 %v4002_v22 }
 0x640   :  { %4281 = vmatprep.subr.mxu0 %v3997_v27  ;;  %4352 = vmatprep.subr.mxu1 %v3999_v28  ;;  %v3998_v27 = vld [vmem:[#allocation10 + $0x3f0] sm:$0xff]  ;;  %v3989_v28 = vld [vmem:[#allocation10 + $0x3a8] sm:$0xff] }
 0x67e   :  { %v3517_v47 = vpop.f32.mrf.mxu0  ;;  %v3588_v23 = vpop.f32.mrf.mxu1 }
 0x680   :  { %v3519_v33 = vpop.f32.mrf.mxu0  ;;  %v3590_v26 = vpop.f32.mrf.mxu1 }
 0x681   :  { %v3741_v55 = vcombine.low %v3517_v47, %v3519_v33  ;;  %v3742_v56 = vcombine.low %v3588_v23, %v3590_v26 }
 0x683   :  { %v3749_v63 = vrot.slane %v3741_v55, %v6460_v53  ;;  %v3756_v1 = vrot.slane %v3742_v56, %v6460_v53 }
 0x685   :  { %v3757_v8 = vcombine.low %v3749_v63, %v3756_v1 }
 0x687   :  { %v3764_v14 = vrot.slane %v3757_v8, %v6460_v53 }
 0x689   :  { %v3766_v20 = vadd.f32 %v3764_v14, %v3736_v60 }
 0x68b   :  { %v5980_v24 = vmul.f32 -1.442695, %v3766_v20  ;;  %v3807_v25 = vrot.slane %v3766_v20, 1  ;;  %v3818_v31 = vrot.slane %v3766_v20, 3  ;;  %v3815_v35 = vrot.slane %v3766_v20, 2 }
 0x68d   :  { %6141 = vpow2.f32 %v5980_v24  ;;  %v5981_v30 = vmul.f32 -1.442695, %v3807_v25  ;;  %v5982_v32 = vmul.f32 -1.442695, %v3818_v31  ;;  %v3996_v25 = vld [vmem:[#allocation10 + $0x3e0] sm:$0xff] }
 0x68e   :  { %v3988_v31 = vld [vmem:[#allocation10 + $0x3a0] sm:$0xff] }
 0x68f   :  { %6143 = vpow2.f32 %v5981_v30  ;;  %v3991_v30 = vld [vmem:[#allocation10 + $0x3b8] sm:$0xff] }
 0x690   :  { %6145 = vpow2.f32 %v5982_v32  ;;  %v3990_v32 = vld [vmem:[#allocation10 + $0x3b0] sm:$0xff] }
 0x69a   :  { %v6142_v34 = vpop.eup %6141 }
 0x69b   :  { %v3803_v36 = vadd.f32 1.0, %v6142_v34  ;;  %v3981_v34 = vld [vmem:[#allocation10 + $0x368] sm:$0xff] }
 0x69c   :  { %v6144_v37 = vpop.eup %6143 }
 0x69d   :  { %6147 = vrcp.f32 %v3803_v36  ;;  %v3812_v38 = vadd.f32 1.0, %v6144_v37  ;;  %v6146_v39 = vpop.eup %6145  ;;  %v3980_v36 = vld [vmem:[#allocation10 + $0x360] sm:$0xff]  ;;  %v3982_v37 = vld [vmem:[#allocation10 + $0x370] sm:$0xff] }
 0x69e   :  { %6149 = vtanh.f32 %v3815_v35  ;;  %v3823_v44 = vadd.f32 1.0, %v6146_v39  ;;  %v3983_v35 = vld [vmem:[#allocation10 + $0x378] sm:$0xff] }
 0x69f   :  { %6151 = vrcp.f32 %v3812_v38  ;;  %v3973_v38 = vld [vmem:[#allocation10 + $0x328] sm:$0xff]  ;;  %v3975_v39 = vld [vmem:[#allocation10 + $0x338] sm:$0xff] }
 0x6a0   :  { %6153 = vrcp.f32 %v3823_v44  ;;  %v3964_v44 = vld [vmem:[#allocation10 + $0x2e0] sm:$0xff] }
 0x6aa   :  { %v6148_v40 = vpop.eup %6147 }
 0x6ab   :  { %v6150_v41 = vpop.eup %6149 }
 0x6ac   :  { %v6152_v42 = vpop.eup %6151  ;;  %v3827_v46 = vmul.f32 %v6150_v41, %v6148_v40  ;;  %v3972_v40 = vld [vmem:[#allocation10 + $0x320] sm:$0xff]  ;;  %v3974_v41 = vld [vmem:[#allocation10 + $0x330] sm:$0xff] }
 0x6ad   :  { %v3826_v45 = vmul.f32 %v6152_v42, %v3799_v43  ;;  %v6154_v23 = vpop.eup %6153  ;;  %v3965_v42 = vld [vmem:[#allocation10 + $0x2e8] sm:$0xff]  ;;  %v3967_v43 = vld [vmem:[#allocation10 + $0x2f8] sm:$0xff] }
 0x6af   :  { %v3828_v47 = vadd.f32 %v3827_v46, %v3826_v45  ;;  %v3966_v45 = vld [vmem:[#allocation10 + $0x2f0] sm:$0xff]  ;;  %v3957_v46 = vld [vmem:[#allocation10 + $0x2a8] sm:$0xff] }
 0x6b1   :  { %6155 = vtanh.f32 %v3828_v47  ;;  %3867 = vst.msk [vmem:[#allocation4] sm:$0x1] %vm6466_vm2, %v3828_v47  ;;  %v3959_v47 = vld [vmem:[#allocation10 + $0x2b8] sm:$0xff] }
 0x6be   :  { %v6156_v29 = vpop.eup %6155 }
 0x6bf   :  { %v3830_v48 = vmul.f32 %v6156_v29, %v6154_v23  ;;  %v3659_v49 = vpop.f32.mrf.mxu0  ;;  %v3730_v50 = vpop.f32.mrf.mxu1  ;;  %v3956_v23 = vld [vmem:[#allocation10 + $0x2a0] sm:$0xff]  ;;  %v3958_v29 = vld [vmem:[#allocation10 + $0x2b0] sm:$0xff] }
 0x6c1   :  { %3869 = vst [vmem:[#allocation13 + $0x4] sm:$0x1] %v3830_v48  ;;  %3865 = vst.msk [vmem:[#allocation3] sm:$0x1] %vm6466_vm2, %v3830_v48  ;;  %v3661_v33 = vpop.f32.mrf.mxu0  ;;  %v3732_v26 = vpop.f32.mrf.mxu1  ;;  %v3949_v48 = vld [vmem:[#allocation10 + $0x268] sm:$0xff] }
 0x6c2   :  { %v3773_v52 = vcombine.low %v3659_v49, %v3661_v33  ;;  %v3774_v54 = vcombine.low %v3730_v50, %v3732_v26  ;;  %v3951_v49 = vld [vmem:[#allocation10 + $0x278] sm:$0xff]  ;;  %v3948_v50 = vld [vmem:[#allocation10 + $0x260] sm:$0xff]  ;;  %v3950_v33 = vld [vmem:[#allocation10 + $0x270] sm:$0xff] }
 0x6c3   :  { %v3941_v26 = vld [vmem:[#allocation10 + $0x228] sm:$0xff] }
 0x6c4   :  { %v3781_v55 = vrot.slane %v3773_v52, %v6460_v53  ;;  %v3788_v56 = vrot.slane %v3774_v54, %v6460_v53  ;;  %v3943_v52 = vld [vmem:[#allocation10 + $0x238] sm:$0xff]  ;;  %v3940_v54 = vld [vmem:[#allocation10 + $0x220] sm:$0xff] }
 0x6c6   :  { %v3789_v58 = vcombine.low %v3781_v55, %v3788_v56  ;;  %v3942_v55 = vld [vmem:[#allocation10 + $0x230] sm:$0xff]  ;;  %v3933_v56 = vld [vmem:[#allocation10 + $0x1e8] sm:$0xff] }
 0x6c8   :  { %v3796_v59 = vrot.slane %v3789_v58, %v6460_v53  ;;  %v3935_v58 = vld [vmem:[#allocation10 + $0x1f8] sm:$0xff] }
 0x6ca   :  { %v3798_v61 = vadd.f32 %v3796_v59, %v3768_v0  ;;  %v3932_v59 = vld [vmem:[#allocation10 + $0x1e0] sm:$0xff]  ;;  %v3934_v0 = vld [vmem:[#allocation10 + $0x1f0] sm:$0xff] }
 0x6cc   :  { %v5983_v62 = vmul.f32 -1.442695, %v3798_v61  ;;  %v3838_v63 = vrot.slane %v3798_v61, 1  ;;  %v3849_v2 = vrot.slane %v3798_v61, 3  ;;  %v3846_v5 = vrot.slane %v3798_v61, 2  ;;  %v3925_v61 = vld [vmem:[#allocation10 + $0x1a8] sm:$0xff] }
 0x6ce   :  { %6157 = vpow2.f32 %v5983_v62  ;;  %v5984_v1 = vmul.f32 -1.442695, %v3838_v63  ;;  %v5985_v3 = vmul.f32 -1.442695, %v3849_v2  ;;  %v3927_v62 = vld [vmem:[#allocation10 + $0x1b8] sm:$0xff]  ;;  %v3924_v63 = vld [vmem:[#allocation10 + $0x1a0] sm:$0xff] }
 0x6cf   :  { %v3917_v2 = vld [vmem:[#allocation10 + $0x168] sm:$0xff] }
 0x6d0   :  { %6159 = vpow2.f32 %v5984_v1  ;;  %v3926_v1 = vld [vmem:[#allocation10 + $0x1b0] sm:$0xff] }
 0x6d1   :  { %6161 = vpow2.f32 %v5985_v3  ;;  %v3919_v3 = vld [vmem:[#allocation10 + $0x178] sm:$0xff] }
 0x6db   :  { %v6158_v4 = vpop.eup %6157 }
 0x6dc   :  { %v3834_v6 = vadd.f32 1.0, %v6158_v4  ;;  %v3916_v4 = vld [vmem:[#allocation10 + $0x160] sm:$0xff] }
 0x6dd   :  { %v6160_v7 = vpop.eup %6159 }
 0x6de   :  { %6163 = vrcp.f32 %v3834_v6  ;;  %v3843_v8 = vadd.f32 1.0, %v6160_v7  ;;  %v6162_v9 = vpop.eup %6161  ;;  %v3909_v6 = vld [vmem:[#allocation10 + $0x128] sm:$0xff]  ;;  %v3911_v7 = vld [vmem:[#allocation10 + $0x138] sm:$0xff] }
 0x6df   :  { %6165 = vtanh.f32 %v3846_v5  ;;  %v3854_v14 = vadd.f32 1.0, %v6162_v9  ;;  %v3918_v5 = vld [vmem:[#allocation10 + $0x170] sm:$0xff] }
 0x6e0   :  { %6167 = vrcp.f32 %v3843_v8  ;;  %v3908_v8 = vld [vmem:[#allocation10 + $0x120] sm:$0xff]  ;;  %v3910_v9 = vld [vmem:[#allocation10 + $0x130] sm:$0xff] }
 0x6e1   :  { %6169 = vrcp.f32 %v3854_v14  ;;  %v3893_v14 = vld [vmem:[#allocation10 + $0xa8] sm:$0xff] }
 0x6eb   :  { %v6164_v10 = vpop.eup %6163 }
 0x6ec   :  { %v6166_v11 = vpop.eup %6165 }
 0x6ed   :  { %v6168_v57 = vpop.eup %6167  ;;  %v3861_v16 = vmul.f32 %v6166_v11, %v6164_v10  ;;  %v3901_v10 = vld [vmem:[#allocation10 + $0xe8] sm:$0xff]  ;;  %v3903_v11 = vld [vmem:[#allocation10 + $0xf8] sm:$0xff] }
 0x6ee   :  { %v3860_v15 = vmul.f32 %v6168_v57, %v3858_v13  ;;  %v6170_v17 = vpop.eup %6169  ;;  %v3900_v13 = vld [vmem:[#allocation10 + $0xe0] sm:$0xff]  ;;  %v3902_v57 = vld [vmem:[#allocation10 + $0xf0] sm:$0xff] }
 0x6f0   :  { %v3862_v60 = vadd.f32 %v3861_v16, %v3860_v15  ;;  %v3895_v15 = vld [vmem:[#allocation10 + $0xb8] sm:$0xff]  ;;  %v3892_v16 = vld [vmem:[#allocation10 + $0xa0] sm:$0xff] }
 0x6f2   :  { %6171 = vtanh.f32 %v3862_v60  ;;  %3868 = vst.msk [vmem:[#allocation4 + $0x1] sm:$0x1] %vm6466_vm2, %v3862_v60  ;;  %v3894_v60 = vld [vmem:[#allocation10 + $0xb0] sm:$0xff] }
 0x6ff   :  { %v6172_v19 = vpop.eup %6171 }
 0x700   :  { %v3864_v20 = vmul.f32 %v6172_v19, %v6170_v17  ;;  %v3885_v17 = vld [vmem:[#allocation10 + $0x68] sm:$0xff]  ;;  %v3887_v19 = vld [vmem:[#allocation10 + $0x78] sm:$0xff] }
 0x702   :  { %3870 = vst [vmem:[#allocation13 + $0xb] sm:$0x1] %v3864_v20  ;;  %3866 = vst.msk [vmem:[#allocation3 + $0x1] sm:$0x1] %vm6466_vm2, %v3864_v20  ;;  %v3884_v20 = vld [vmem:[#allocation10 + $0x60] sm:$0xff] }
 0x709   :  { %v3871_v21 = vld [vmem:[#allocation3] sm:$0x3] }
 0x70a   :  { %v4136_v22 = vrot.slane %v3871_v21, %v6432_v12  ;;  %v6571_v24 = vrot.slane %v3871_v21, %v6435_v18  ;;  %v3886_v21 = vld [vmem:[#allocation10 + $0x70] sm:$0xff] }
 0x70c   :  { %4203 = vmatprep.mubr.f32.mxu0 %v4136_v22  ;;  %4274 = vmatprep.mubr.f32.mxu1 %v4136_v22 }
 0x70d   :  { %4204 = vmatmul.mubr.f32.vlgmr.msra.gmra.mxu0 %v6571_v24  ;;  %4275 = vmatmul.mubr.f32.vlgmr.msra.gmra.mxu1 %v6571_v24 }
 0x70e   :  { %4282 = vmatpush1.msra.mxu0 %v3996_v25  ;;  %4353 = vmatpush1.msra.mxu1 %v3998_v27  ;;  %v3879_v25 = vld [vmem:[#allocation10 + $0x38] sm:$0xff]  ;;  %v3876_v27 = vld [vmem:[#allocation10 + $0x20] sm:$0xff] }
 0x70f   :  { %4283 = vmatprep.subr.mxu0 %v3989_v28  ;;  %4345 = vmatprep.mubr.f32.mxu0 %v4136_v22  ;;  %v3878_v28 = vld [vmem:[#allocation10 + $0x30] sm:$0xff] }
 0x710   :  { %4354 = vmatprep.subr.mxu1 %v3991_v30  ;;  %4416 = vmatprep.mubr.f32.mxu1 %v4136_v22  ;;  %v3877_v22 = vld [vmem:[#allocation10 + $0x28] sm:$0xff] }
 0x711   :  { %4284 = vmatpush1.msra.mxu0 %v3988_v31  ;;  %4355 = vmatpush1.msra.mxu1 %v3990_v32  ;;  %v4125_v30 = vld [vmem:[#allocation10 + $0x7e8] sm:$0xff]  ;;  %v4127_v31 = vld [vmem:[#allocation10 + $0x7f8] sm:$0xff]  ;;  %v4124_v32 = vld [vmem:[#allocation10 + $0x7e0] sm:$0xff] }
 0x712   :  { %4285 = vmatprep.subr.mxu0 %v3981_v34  ;;  %4356 = vmatprep.subr.mxu1 %v3983_v35  ;;  %v4126_v34 = vld [vmem:[#allocation10 + $0x7f0] sm:$0xff]  ;;  %v4117_v35 = vld [vmem:[#allocation10 + $0x7a8] sm:$0xff] }
 0x713   :  { %4286 = vmatpush1.msra.mxu0 %v3980_v36  ;;  %4357 = vmatpush1.msra.mxu1 %v3982_v37  ;;  %v4119_v36 = vld [vmem:[#allocation10 + $0x7b8] sm:$0xff]  ;;  %v4116_v37 = vld [vmem:[#allocation10 + $0x7a0] sm:$0xff] }
 0x714   :  { %4287 = vmatprep.subr.mxu0 %v3973_v38  ;;  %4358 = vmatprep.subr.mxu1 %v3975_v39  ;;  %v4118_v38 = vld [vmem:[#allocation10 + $0x7b0] sm:$0xff]  ;;  %v4109_v39 = vld [vmem:[#allocation10 + $0x768] sm:$0xff] }
 0x715   :  { %4288 = vmatpush1.msra.mxu0 %v3972_v40  ;;  %4359 = vmatpush1.msra.mxu1 %v3974_v41  ;;  %v4111_v40 = vld [vmem:[#allocation10 + $0x778] sm:$0xff]  ;;  %v4108_v41 = vld [vmem:[#allocation10 + $0x760] sm:$0xff] }
 0x716   :  { %4289 = vmatprep.subr.mxu0 %v3965_v42  ;;  %4360 = vmatprep.subr.mxu1 %v3967_v43  ;;  %v4110_v42 = vld [vmem:[#allocation10 + $0x770] sm:$0xff]  ;;  %v4101_v43 = vld [vmem:[#allocation10 + $0x728] sm:$0xff] }
 0x717   :  { %4290 = vmatpush1.msra.mxu0 %v3964_v44  ;;  %4361 = vmatpush1.msra.mxu1 %v3966_v45  ;;  %v4103_v44 = vld [vmem:[#allocation10 + $0x738] sm:$0xff]  ;;  %v4100_v45 = vld [vmem:[#allocation10 + $0x720] sm:$0xff] }
 0x718   :  { %4291 = vmatprep.subr.mxu0 %v3957_v46  ;;  %4362 = vmatprep.subr.mxu1 %v3959_v47  ;;  %v4102_v46 = vld [vmem:[#allocation10 + $0x730] sm:$0xff]  ;;  %v4093_v47 = vld [vmem:[#allocation10 + $0x6e8] sm:$0xff] }
 0x719   :  { %4292 = vmatpush1.msra.mxu0 %v3956_v23  ;;  %4363 = vmatpush1.msra.mxu1 %v3958_v29  ;;  %v4095_v23 = vld [vmem:[#allocation10 + $0x6f8] sm:$0xff]  ;;  %v4092_v29 = vld [vmem:[#allocation10 + $0x6e0] sm:$0xff] }
 0x71a   :  { %4293 = vmatprep.subr.mxu0 %v3949_v48  ;;  %4364 = vmatprep.subr.mxu1 %v3951_v49  ;;  %v4094_v48 = vld [vmem:[#allocation10 + $0x6f0] sm:$0xff]  ;;  %v4085_v49 = vld [vmem:[#allocation10 + $0x6a8] sm:$0xff] }
 0x71b   :  { %4294 = vmatpush1.msra.mxu0 %v3948_v50  ;;  %4365 = vmatpush1.msra.mxu1 %v3950_v33  ;;  %v4087_v50 = vld [vmem:[#allocation10 + $0x6b8] sm:$0xff]  ;;  %v4084_v33 = vld [vmem:[#allocation10 + $0x6a0] sm:$0xff] }
 0x71c   :  { %4295 = vmatprep.subr.mxu0 %v3941_v26  ;;  %4366 = vmatprep.subr.mxu1 %v3943_v52  ;;  %v4086_v26 = vld [vmem:[#allocation10 + $0x6b0] sm:$0xff]  ;;  %v4077_v52 = vld [vmem:[#allocation10 + $0x668] sm:$0xff] }
 0x71d   :  { %4296 = vmatpush1.msra.mxu0 %v3940_v54  ;;  %4367 = vmatpush1.msra.mxu1 %v3942_v55  ;;  %v4079_v54 = vld [vmem:[#allocation10 + $0x678] sm:$0xff]  ;;  %v4076_v55 = vld [vmem:[#allocation10 + $0x660] sm:$0xff] }
 0x71e   :  { %4297 = vmatprep.subr.mxu0 %v3933_v56  ;;  %4368 = vmatprep.subr.mxu1 %v3935_v58  ;;  %v4078_v56 = vld [vmem:[#allocation10 + $0x670] sm:$0xff]  ;;  %v4069_v58 = vld [vmem:[#allocation10 + $0x628] sm:$0xff] }
 0x71f   :  { %4298 = vmatpush1.msra.mxu0 %v3932_v59  ;;  %4369 = vmatpush1.msra.mxu1 %v3934_v0  ;;  %v4071_v59 = vld [vmem:[#allocation10 + $0x638] sm:$0xff]  ;;  %v4068_v0 = vld [vmem:[#allocation10 + $0x620] sm:$0xff] }
 0x720   :  { %4299 = vmatprep.subr.mxu0 %v3925_v61  ;;  %4370 = vmatprep.subr.mxu1 %v3927_v62  ;;  %v4070_v61 = vld [vmem:[#allocation10 + $0x630] sm:$0xff]  ;;  %v4061_v62 = vld [vmem:[#allocation10 + $0x5e8] sm:$0xff] }
 0x721   :  { %4300 = vmatpush1.msra.mxu0 %v3924_v63  ;;  %4371 = vmatpush1.msra.mxu1 %v3926_v1  ;;  %v4063_v63 = vld [vmem:[#allocation10 + $0x5f8] sm:$0xff]  ;;  %v4060_v1 = vld [vmem:[#allocation10 + $0x5e0] sm:$0xff] }
 0x722   :  { %4301 = vmatprep.subr.mxu0 %v3917_v2  ;;  %4372 = vmatprep.subr.mxu1 %v3919_v3  ;;  %v4062_v2 = vld [vmem:[#allocation10 + $0x5f0] sm:$0xff]  ;;  %v4053_v3 = vld [vmem:[#allocation10 + $0x5a8] sm:$0xff] }
 0x723   :  { %4302 = vmatpush1.msra.mxu0 %v3916_v4  ;;  %4373 = vmatpush1.msra.mxu1 %v3918_v5  ;;  %v4055_v4 = vld [vmem:[#allocation10 + $0x5b8] sm:$0xff]  ;;  %v4052_v5 = vld [vmem:[#allocation10 + $0x5a0] sm:$0xff] }
 0x724   :  { %4303 = vmatprep.subr.mxu0 %v3909_v6  ;;  %4374 = vmatprep.subr.mxu1 %v3911_v7  ;;  %v4054_v6 = vld [vmem:[#allocation10 + $0x5b0] sm:$0xff]  ;;  %v4045_v7 = vld [vmem:[#allocation10 + $0x568] sm:$0xff] }
 0x725   :  { %4304 = vmatpush1.msra.mxu0 %v3908_v8  ;;  %4375 = vmatpush1.msra.mxu1 %v3910_v9  ;;  %v4047_v8 = vld [vmem:[#allocation10 + $0x578] sm:$0xff]  ;;  %v4044_v9 = vld [vmem:[#allocation10 + $0x560] sm:$0xff] }
 0x726   :  { %4305 = vmatprep.subr.mxu0 %v3901_v10  ;;  %4376 = vmatprep.subr.mxu1 %v3903_v11  ;;  %v4046_v10 = vld [vmem:[#allocation10 + $0x570] sm:$0xff]  ;;  %v4037_v11 = vld [vmem:[#allocation10 + $0x528] sm:$0xff] }
 0x727   :  { %4306 = vmatpush1.msra.mxu0 %v3900_v13  ;;  %4377 = vmatpush1.msra.mxu1 %v3902_v57  ;;  %v4039_v13 = vld [vmem:[#allocation10 + $0x538] sm:$0xff]  ;;  %v4036_v57 = vld [vmem:[#allocation10 + $0x520] sm:$0xff] }
 0x728   :  { %4307 = vmatprep.subr.mxu0 %v3893_v14  ;;  %4378 = vmatprep.subr.mxu1 %v3895_v15  ;;  %v4038_v14 = vld [vmem:[#allocation10 + $0x530] sm:$0xff]  ;;  %v4029_v15 = vld [vmem:[#allocation10 + $0x4e8] sm:$0xff] }
 0x729   :  { %4308 = vmatpush1.msra.mxu0 %v3892_v16  ;;  %4379 = vmatpush1.msra.mxu1 %v3894_v60  ;;  %v4031_v16 = vld [vmem:[#allocation10 + $0x4f8] sm:$0xff]  ;;  %v4028_v60 = vld [vmem:[#allocation10 + $0x4e0] sm:$0xff] }
 0x72a   :  { %4309 = vmatprep.subr.mxu0 %v3885_v17  ;;  %4380 = vmatprep.subr.mxu1 %v3887_v19  ;;  %v4030_v17 = vld [vmem:[#allocation10 + $0x4f0] sm:$0xff]  ;;  %v4021_v19 = vld [vmem:[#allocation10 + $0x4a8] sm:$0xff] }
 0x72b   :  { %4310 = vmatpush1.msra.mxu0 %v3884_v20  ;;  %4381 = vmatpush1.msra.mxu1 %v3886_v21  ;;  %v4023_v20 = vld [vmem:[#allocation10 + $0x4b8] sm:$0xff]  ;;  %v4020_v21 = vld [vmem:[#allocation10 + $0x4a0] sm:$0xff] }
 0x72c   :  { %4311 = vmatprep.subr.mxu0 %v3877_v22  ;;  %4382 = vmatprep.subr.mxu1 %v3879_v25  ;;  %v4022_v22 = vld [vmem:[#allocation10 + $0x4b0] sm:$0xff]  ;;  %v4013_v25 = vld [vmem:[#allocation10 + $0x468] sm:$0xff] }
 0x72d   :  { %4312 = vmatpush1.msra.mxu0 %v3876_v27  ;;  %4383 = vmatpush1.msra.mxu1 %v3878_v28  ;;  %v4015_v27 = vld [vmem:[#allocation10 + $0x478] sm:$0xff]  ;;  %v4012_v28 = vld [vmem:[#allocation10 + $0x460] sm:$0xff] }
 0x72e   :  { %4313 = vmatprep.subr.mxu0 %v4125_v30  ;;  %4384 = vmatprep.subr.mxu1 %v4127_v31  ;;  %v4014_v30 = vld [vmem:[#allocation10 + $0x470] sm:$0xff]  ;;  %v4005_v31 = vld [vmem:[#allocation10 + $0x428] sm:$0xff] }
 0x72f   :  { %4314 = vmatpush2.msra.mxu0 %v4124_v32  ;;  %4385 = vmatpush2.msra.mxu1 %v4126_v34  ;;  %v4007_v32 = vld [vmem:[#allocation10 + $0x438] sm:$0xff]  ;;  %v4004_v34 = vld [vmem:[#allocation10 + $0x420] sm:$0xff] }
 0x730   :  { %4315 = vmatprep.subr.mxu0 %v4117_v35  ;;  %4386 = vmatprep.subr.mxu1 %v4119_v36  ;;  %v4006_v35 = vld [vmem:[#allocation10 + $0x430] sm:$0xff]  ;;  %v4681_v36 = vld [vmem:[#allocation10 + $0x3c8] sm:$0xff] }
 0x731   :  { %4316 = vmatpush2.msra.mxu0 %v4116_v37  ;;  %4387 = vmatpush2.msra.mxu1 %v4118_v38  ;;  %v4683_v37 = vld [vmem:[#allocation10 + $0x3d8] sm:$0xff]  ;;  %v4680_v38 = vld [vmem:[#allocation10 + $0x3c0] sm:$0xff] }
 0x732   :  { %4317 = vmatprep.subr.mxu0 %v4109_v39  ;;  %4388 = vmatprep.subr.mxu1 %v4111_v40  ;;  %v4682_v39 = vld [vmem:[#allocation10 + $0x3d0] sm:$0xff]  ;;  %v4673_v40 = vld [vmem:[#allocation10 + $0x388] sm:$0xff] }
 0x733   :  { %4318 = vmatpush2.msra.mxu0 %v4108_v41  ;;  %4389 = vmatpush2.msra.mxu1 %v4110_v42  ;;  %v4675_v41 = vld [vmem:[#allocation10 + $0x398] sm:$0xff]  ;;  %v4672_v42 = vld [vmem:[#allocation10 + $0x380] sm:$0xff] }
 0x734   :  { %4319 = vmatprep.subr.mxu0 %v4101_v43  ;;  %4390 = vmatprep.subr.mxu1 %v4103_v44  ;;  %v4674_v43 = vld [vmem:[#allocation10 + $0x390] sm:$0xff]  ;;  %v4665_v44 = vld [vmem:[#allocation10 + $0x348] sm:$0xff] }
 0x735   :  { %4320 = vmatpush2.msra.mxu0 %v4100_v45  ;;  %4391 = vmatpush2.msra.mxu1 %v4102_v46  ;;  %v4667_v45 = vld [vmem:[#allocation10 + $0x358] sm:$0xff]  ;;  %v4666_v46 = vld [vmem:[#allocation10 + $0x350] sm:$0xff] }
 0x736   :  { %4321 = vmatprep.subr.mxu0 %v4093_v47  ;;  %4392 = vmatprep.subr.mxu1 %v4095_v23  ;;  %v4657_v47 = vld [vmem:[#allocation10 + $0x308] sm:$0xff]  ;;  %v4659_v23 = vld [vmem:[#allocation10 + $0x318] sm:$0xff] }
 0x737   :  { %4322 = vmatpush2.msra.mxu0 %v4092_v29  ;;  %4393 = vmatpush2.msra.mxu1 %v4094_v48  ;;  %v4656_v29 = vld [vmem:[#allocation10 + $0x300] sm:$0xff]  ;;  %v4658_v48 = vld [vmem:[#allocation10 + $0x310] sm:$0xff] }
 0x738   :  { %4323 = vmatprep.subr.mxu0 %v4085_v49  ;;  %4394 = vmatprep.subr.mxu1 %v4087_v50  ;;  %v4649_v49 = vld [vmem:[#allocation10 + $0x2c8] sm:$0xff]  ;;  %v4651_v50 = vld [vmem:[#allocation10 + $0x2d8] sm:$0xff] }
 0x739   :  { %4324 = vmatpush2.msra.mxu0 %v4084_v33  ;;  %4395 = vmatpush2.msra.mxu1 %v4086_v26  ;;  %v4648_v33 = vld [vmem:[#allocation10 + $0x2c0] sm:$0xff]  ;;  %v4650_v26 = vld [vmem:[#allocation10 + $0x2d0] sm:$0xff] }
 0x73a   :  { %4325 = vmatprep.subr.mxu0 %v4077_v52  ;;  %4396 = vmatprep.subr.mxu1 %v4079_v54  ;;  %v4641_v52 = vld [vmem:[#allocation10 + $0x288] sm:$0xff]  ;;  %v4643_v54 = vld [vmem:[#allocation10 + $0x298] sm:$0xff] }
 0x73b   :  { %4326 = vmatpush2.msra.mxu0 %v4076_v55  ;;  %4397 = vmatpush2.msra.mxu1 %v4078_v56  ;;  %v4640_v55 = vld [vmem:[#allocation10 + $0x280] sm:$0xff]  ;;  %v4642_v56 = vld [vmem:[#allocation10 + $0x290] sm:$0xff] }
 0x73c   :  { %4327 = vmatprep.subr.mxu0 %v4069_v58  ;;  %4398 = vmatprep.subr.mxu1 %v4071_v59  ;;  %v4633_v58 = vld [vmem:[#allocation10 + $0x248] sm:$0xff]  ;;  %v4635_v59 = vld [vmem:[#allocation10 + $0x258] sm:$0xff] }
 0x73d   :  { %4328 = vmatpush2.msra.mxu0 %v4068_v0  ;;  %4399 = vmatpush2.msra.mxu1 %v4070_v61  ;;  %v4632_v0 = vld [vmem:[#allocation10 + $0x240] sm:$0xff]  ;;  %v4634_v61 = vld [vmem:[#allocation10 + $0x250] sm:$0xff] }
 0x73e   :  { %4329 = vmatprep.subr.mxu0 %v4061_v62  ;;  %4400 = vmatprep.subr.mxu1 %v4063_v63  ;;  %v4625_v62 = vld [vmem:[#allocation10 + $0x208] sm:$0xff]  ;;  %v4627_v63 = vld [vmem:[#allocation10 + $0x218] sm:$0xff] }
 0x73f   :  { %4330 = vmatpush2.msra.mxu0 %v4060_v1  ;;  %4401 = vmatpush2.msra.mxu1 %v4062_v2  ;;  %v4624_v1 = vld [vmem:[#allocation10 + $0x200] sm:$0xff]  ;;  %v4626_v2 = vld [vmem:[#allocation10 + $0x210] sm:$0xff] }
 0x740   :  { %4331 = vmatprep.subr.mxu0 %v4053_v3  ;;  %4402 = vmatprep.subr.mxu1 %v4055_v4  ;;  %v4617_v3 = vld [vmem:[#allocation10 + $0x1c8] sm:$0xff]  ;;  %v4619_v4 = vld [vmem:[#allocation10 + $0x1d8] sm:$0xff] }
 0x741   :  { %4332 = vmatpush2.msra.mxu0 %v4052_v5  ;;  %4403 = vmatpush2.msra.mxu1 %v4054_v6  ;;  %v4616_v5 = vld [vmem:[#allocation10 + $0x1c0] sm:$0xff]  ;;  %v4618_v6 = vld [vmem:[#allocation10 + $0x1d0] sm:$0xff] }
 0x742   :  { %4333 = vmatprep.subr.mxu0 %v4045_v7  ;;  %4404 = vmatprep.subr.mxu1 %v4047_v8  ;;  %v4609_v7 = vld [vmem:[#allocation10 + $0x188] sm:$0xff]  ;;  %v4611_v8 = vld [vmem:[#allocation10 + $0x198] sm:$0xff] }
 0x743   :  { %4334 = vmatpush2.msra.mxu0 %v4044_v9  ;;  %4405 = vmatpush2.msra.mxu1 %v4046_v10  ;;  %v4608_v9 = vld [vmem:[#allocation10 + $0x180] sm:$0xff]  ;;  %v4610_v10 = vld [vmem:[#allocation10 + $0x190] sm:$0xff] }
 0x744   :  { %4335 = vmatprep.subr.mxu0 %v4037_v11  ;;  %4406 = vmatprep.subr.mxu1 %v4039_v13  ;;  %v4601_v11 = vld [vmem:[#allocation10 + $0x148] sm:$0xff]  ;;  %v4603_v13 = vld [vmem:[#allocation10 + $0x158] sm:$0xff] }
 0x745   :  { %4336 = vmatpush2.msra.mxu0 %v4036_v57  ;;  %4407 = vmatpush2.msra.mxu1 %v4038_v14  ;;  %v4600_v57 = vld [vmem:[#allocation10 + $0x140] sm:$0xff]  ;;  %v4602_v14 = vld [vmem:[#allocation10 + $0x150] sm:$0xff] }
 0x746   :  { %4337 = vmatprep.subr.mxu0 %v4029_v15  ;;  %4408 = vmatprep.subr.mxu1 %v4031_v16  ;;  %v4593_v15 = vld [vmem:[#allocation10 + $0x108] sm:$0xff]  ;;  %v4595_v16 = vld [vmem:[#allocation10 + $0x118] sm:$0xff] }
 0x747   :  { %4338 = vmatpush2.msra.mxu0 %v4028_v60  ;;  %4409 = vmatpush2.msra.mxu1 %v4030_v17  ;;  %v4592_v60 = vld [vmem:[#allocation10 + $0x100] sm:$0xff]  ;;  %v4594_v17 = vld [vmem:[#allocation10 + $0x110] sm:$0xff] }
 0x748   :  { %4339 = vmatprep.subr.mxu0 %v4021_v19  ;;  %4410 = vmatprep.subr.mxu1 %v4023_v20  ;;  %v4585_v19 = vld [vmem:[#allocation10 + $0xc8] sm:$0xff]  ;;  %v4587_v20 = vld [vmem:[#allocation10 + $0xd8] sm:$0xff] }
 0x749   :  { %4340 = vmatpush2.msra.mxu0 %v4020_v21  ;;  %4411 = vmatpush2.msra.mxu1 %v4022_v22  ;;  %v4584_v21 = vld [vmem:[#allocation10 + $0xc0] sm:$0xff]  ;;  %v4586_v22 = vld [vmem:[#allocation10 + $0xd0] sm:$0xff] }
 0x74a   :  { %4341 = vmatprep.subr.mxu0 %v4013_v25  ;;  %4412 = vmatprep.subr.mxu1 %v4015_v27  ;;  %v4577_v25 = vld [vmem:[#allocation10 + $0x88] sm:$0xff]  ;;  %v4579_v27 = vld [vmem:[#allocation10 + $0x98] sm:$0xff] }
 0x74b   :  { %4342 = vmatpush2.msra.mxu0 %v4012_v28  ;;  %4413 = vmatpush2.msra.mxu1 %v4014_v30  ;;  %v4576_v28 = vld [vmem:[#allocation10 + $0x80] sm:$0xff]  ;;  %v4578_v30 = vld [vmem:[#allocation10 + $0x90] sm:$0xff] }
 0x74c   :  { %4343 = vmatprep.subr.mxu0 %v4005_v31  ;;  %4414 = vmatprep.subr.mxu1 %v4007_v32  ;;  %v4569_v31 = vld [vmem:[#allocation10 + $0x48] sm:$0xff]  ;;  %v4571_v32 = vld [vmem:[#allocation10 + $0x58] sm:$0xff] }
 0x74d   :  { %4344 = vmatpush2.msra.mxu0 %v4004_v34  ;;  %4415 = vmatpush2.msra.mxu1 %v4006_v35  ;;  %v4568_v34 = vld [vmem:[#allocation10 + $0x40] sm:$0xff]  ;;  %v4570_v35 = vld [vmem:[#allocation10 + $0x50] sm:$0xff] }
 0x74e   :  { %4346 = vmatmul.mubr.f32.vlgmr.msra.gmra.mxu0 %v6571_v24  ;;  %4417 = vmatmul.mubr.f32.vlgmr.msra.gmra.mxu1 %v6571_v24  ;;  %v4664_v24 = vld [vmem:[#allocation10 + $0x340] sm:$0xff] }
 0x74f   :  { %4827 = vmatprep.subr.mxu0 %v4681_v36  ;;  %4898 = vmatprep.subr.mxu1 %v4683_v37  ;;  %v4561_v36 = vld [vmem:[#allocation10 + $0x8] sm:$0xff]  ;;  %v4563_v37 = vld [vmem:[#allocation10 + $0x18] sm:$0xff] }
 0x750   :  { %4828 = vmatpush1.msra.mxu0 %v4680_v38  ;;  %4899 = vmatpush1.msra.mxu1 %v4682_v39  ;;  %v4560_v38 = vld [vmem:[#allocation10] sm:$0xff]  ;;  %v4562_v39 = vld [vmem:[#allocation10 + $0x10] sm:$0xff] }
 0x751   :  { %4829 = vmatprep.subr.mxu0 %v4673_v40  ;;  %4900 = vmatprep.subr.mxu1 %v4675_v41  ;;  %v4809_v40 = vld [vmem:[#allocation10 + $0x7c8] sm:$0xff]  ;;  %v4811_v41 = vld [vmem:[#allocation10 + $0x7d8] sm:$0xff] }
 0x752   :  { %4830 = vmatpush1.msra.mxu0 %v4672_v42  ;;  %4901 = vmatpush1.msra.mxu1 %v4674_v43  ;;  %v4808_v42 = vld [vmem:[#allocation10 + $0x7c0] sm:$0xff]  ;;  %v4810_v43 = vld [vmem:[#allocation10 + $0x7d0] sm:$0xff] }
 0x753   :  { %4831 = vmatprep.subr.mxu0 %v4665_v44  ;;  %4902 = vmatprep.subr.mxu1 %v4667_v45  ;;  %v4801_v44 = vld [vmem:[#allocation10 + $0x788] sm:$0xff]  ;;  %v4803_v45 = vld [vmem:[#allocation10 + $0x798] sm:$0xff] }
 0x754   :  { %4832 = vmatpush1.msra.mxu0 %v4664_v24  ;;  %4903 = vmatpush1.msra.mxu1 %v4666_v46  ;;  %v4800_v24 = vld [vmem:[#allocation10 + $0x780] sm:$0xff]  ;;  %v4802_v46 = vld [vmem:[#allocation10 + $0x790] sm:$0xff] }
 0x755   :  { %4833 = vmatprep.subr.mxu0 %v4657_v47  ;;  %4904 = vmatprep.subr.mxu1 %v4659_v23  ;;  %v4793_v47 = vld [vmem:[#allocation10 + $0x748] sm:$0xff]  ;;  %v4795_v23 = vld [vmem:[#allocation10 + $0x758] sm:$0xff] }
 0x756   :  { %4834 = vmatpush1.msra.mxu0 %v4656_v29  ;;  %4905 = vmatpush1.msra.mxu1 %v4658_v48  ;;  %v4792_v29 = vld [vmem:[#allocation10 + $0x740] sm:$0xff]  ;;  %v4794_v48 = vld [vmem:[#allocation10 + $0x750] sm:$0xff] }
 0x757   :  { %4835 = vmatprep.subr.mxu0 %v4649_v49  ;;  %4906 = vmatprep.subr.mxu1 %v4651_v50  ;;  %v4785_v49 = vld [vmem:[#allocation10 + $0x708] sm:$0xff]  ;;  %v4787_v50 = vld [vmem:[#allocation10 + $0x718] sm:$0xff] }
 0x758   :  { %4836 = vmatpush1.msra.mxu0 %v4648_v33  ;;  %4907 = vmatpush1.msra.mxu1 %v4650_v26  ;;  %v4784_v33 = vld [vmem:[#allocation10 + $0x700] sm:$0xff]  ;;  %v4786_v26 = vld [vmem:[#allocation10 + $0x710] sm:$0xff] }
 0x759   :  { %4837 = vmatprep.subr.mxu0 %v4641_v52  ;;  %4908 = vmatprep.subr.mxu1 %v4643_v54  ;;  %v4777_v52 = vld [vmem:[#allocation10 + $0x6c8] sm:$0xff]  ;;  %v4779_v54 = vld [vmem:[#allocation10 + $0x6d8] sm:$0xff] }
 0x75a   :  { %4838 = vmatpush1.msra.mxu0 %v4640_v55  ;;  %4909 = vmatpush1.msra.mxu1 %v4642_v56  ;;  %v4776_v55 = vld [vmem:[#allocation10 + $0x6c0] sm:$0xff]  ;;  %v4778_v56 = vld [vmem:[#allocation10 + $0x6d0] sm:$0xff] }
 0x75b   :  { %4839 = vmatprep.subr.mxu0 %v4633_v58  ;;  %4910 = vmatprep.subr.mxu1 %v4635_v59  ;;  %v4769_v58 = vld [vmem:[#allocation10 + $0x688] sm:$0xff]  ;;  %v4771_v59 = vld [vmem:[#allocation10 + $0x698] sm:$0xff] }
 0x75c   :  { %4840 = vmatpush1.msra.mxu0 %v4632_v0  ;;  %4911 = vmatpush1.msra.mxu1 %v4634_v61  ;;  %v4768_v0 = vld [vmem:[#allocation10 + $0x680] sm:$0xff]  ;;  %v4770_v61 = vld [vmem:[#allocation10 + $0x690] sm:$0xff] }
 0x75d   :  { %4841 = vmatprep.subr.mxu0 %v4625_v62  ;;  %4912 = vmatprep.subr.mxu1 %v4627_v63  ;;  %v4761_v62 = vld [vmem:[#allocation10 + $0x648] sm:$0xff]  ;;  %v4763_v63 = vld [vmem:[#allocation10 + $0x658] sm:$0xff] }
 0x75e   :  { %4842 = vmatpush1.msra.mxu0 %v4624_v1  ;;  %4913 = vmatpush1.msra.mxu1 %v4626_v2  ;;  %v4760_v1 = vld [vmem:[#allocation10 + $0x640] sm:$0xff]  ;;  %v4762_v2 = vld [vmem:[#allocation10 + $0x650] sm:$0xff] }
 0x75f   :  { %4843 = vmatprep.subr.mxu0 %v4617_v3  ;;  %4914 = vmatprep.subr.mxu1 %v4619_v4  ;;  %v4753_v3 = vld [vmem:[#allocation10 + $0x608] sm:$0xff]  ;;  %v4755_v4 = vld [vmem:[#allocation10 + $0x618] sm:$0xff] }
 0x760   :  { %4844 = vmatpush1.msra.mxu0 %v4616_v5  ;;  %4915 = vmatpush1.msra.mxu1 %v4618_v6  ;;  %v4752_v5 = vld [vmem:[#allocation10 + $0x600] sm:$0xff]  ;;  %v4754_v6 = vld [vmem:[#allocation10 + $0x610] sm:$0xff] }
 0x761   :  { %4845 = vmatprep.subr.mxu0 %v4609_v7  ;;  %4916 = vmatprep.subr.mxu1 %v4611_v8  ;;  %v4745_v7 = vld [vmem:[#allocation10 + $0x5c8] sm:$0xff]  ;;  %v4747_v8 = vld [vmem:[#allocation10 + $0x5d8] sm:$0xff] }
 0x762   :  { %4846 = vmatpush1.msra.mxu0 %v4608_v9  ;;  %4917 = vmatpush1.msra.mxu1 %v4610_v10  ;;  %v4744_v9 = vld [vmem:[#allocation10 + $0x5c0] sm:$0xff]  ;;  %v4746_v10 = vld [vmem:[#allocation10 + $0x5d0] sm:$0xff] }
 0x763   :  { %4847 = vmatprep.subr.mxu0 %v4601_v11  ;;  %4918 = vmatprep.subr.mxu1 %v4603_v13 }
 0x764   :  { %4848 = vmatpush1.msra.mxu0 %v4600_v57  ;;  %4919 = vmatpush1.msra.mxu1 %v4602_v14  ;;  %v4737_v57 = vld [vmem:[#allocation10 + $0x588] sm:$0xff]  ;;  %v4739_v14 = vld [vmem:[#allocation10 + $0x598] sm:$0xff] }
 0x765   :  { %4849 = vmatprep.subr.mxu0 %v4593_v15  ;;  %4920 = vmatprep.subr.mxu1 %v4595_v16  ;;  %v4736_v15 = vld [vmem:[#allocation10 + $0x580] sm:$0xff]  ;;  %v4738_v16 = vld [vmem:[#allocation10 + $0x590] sm:$0xff] }
 0x766   :  { %4850 = vmatpush1.msra.mxu0 %v4592_v60  ;;  %4921 = vmatpush1.msra.mxu1 %v4594_v17 }
 0x767   :  { %4851 = vmatprep.subr.mxu0 %v4585_v19  ;;  %4922 = vmatprep.subr.mxu1 %v4587_v20  ;;  %v4729_v19 = vld [vmem:[#allocation10 + $0x548] sm:$0xff]  ;;  %v4731_v20 = vld [vmem:[#allocation10 + $0x558] sm:$0xff] }
 0x768   :  { %4852 = vmatpush1.msra.mxu0 %v4584_v21  ;;  %4923 = vmatpush1.msra.mxu1 %v4586_v22 }
 0x769   :  { %4853 = vmatprep.subr.mxu0 %v4577_v25  ;;  %4924 = vmatprep.subr.mxu1 %v4579_v27  ;;  %v4728_v25 = vld [vmem:[#allocation10 + $0x540] sm:$0xff]  ;;  %v4730_v27 = vld [vmem:[#allocation10 + $0x550] sm:$0xff] }
 0x76a   :  { %4854 = vmatpush1.msra.mxu0 %v4576_v28  ;;  %4925 = vmatpush1.msra.mxu1 %v4578_v30  ;;  %v4721_v28 = vld [vmem:[#allocation10 + $0x508] sm:$0xff]  ;;  %v4723_v30 = vld [vmem:[#allocation10 + $0x518] sm:$0xff] }
 0x76b   :  { %4855 = vmatprep.subr.mxu0 %v4569_v31  ;;  %4926 = vmatprep.subr.mxu1 %v4571_v32  ;;  %v4720_v31 = vld [vmem:[#allocation10 + $0x500] sm:$0xff] }
 0x76c   :  { %4856 = vmatpush1.msra.mxu0 %v4568_v34  ;;  %4927 = vmatpush1.msra.mxu1 %v4570_v35  ;;  %v4722_v35 = vld [vmem:[#allocation10 + $0x510] sm:$0xff] }
 0x76d   :  { %4857 = vmatprep.subr.mxu0 %v4561_v36  ;;  %4928 = vmatprep.subr.mxu1 %v4563_v37  ;;  %v4713_v36 = vld [vmem:[#allocation10 + $0x4c8] sm:$0xff]  ;;  %v4715_v37 = vld [vmem:[#allocation10 + $0x4d8] sm:$0xff] }
 0x76e   :  { %4858 = vmatpush1.msra.mxu0 %v4560_v38  ;;  %4929 = vmatpush1.msra.mxu1 %v4562_v39  ;;  %v4712_v38 = vld [vmem:[#allocation10 + $0x4c0] sm:$0xff]  ;;  %v4714_v39 = vld [vmem:[#allocation10 + $0x4d0] sm:$0xff] }
 0x76f   :  { %4859 = vmatprep.subr.mxu0 %v4809_v40  ;;  %4930 = vmatprep.subr.mxu1 %v4811_v41  ;;  %v4705_v40 = vld [vmem:[#allocation10 + $0x488] sm:$0xff] }
 0x770   :  { %4860 = vmatpush2.msra.mxu0 %v4808_v42  ;;  %4931 = vmatpush2.msra.mxu1 %v4810_v43  ;;  %v4707_v42 = vld [vmem:[#allocation10 + $0x498] sm:$0xff]  ;;  %v4704_v43 = vld [vmem:[#allocation10 + $0x480] sm:$0xff] }
 0x771   :  { %4861 = vmatprep.subr.mxu0 %v4801_v44  ;;  %4932 = vmatprep.subr.mxu1 %v4803_v45  ;;  %v4706_v44 = vld [vmem:[#allocation10 + $0x490] sm:$0xff]  ;;  %v4697_v45 = vld [vmem:[#allocation10 + $0x448] sm:$0xff] }
 0x772   :  { %4862 = vmatpush2.msra.mxu0 %v4800_v24  ;;  %4933 = vmatpush2.msra.mxu1 %v4802_v46  ;;  %v4699_v24 = vld [vmem:[#allocation10 + $0x458] sm:$0xff] }
 0x773   :  { %4863 = vmatprep.subr.mxu0 %v4793_v47  ;;  %4934 = vmatprep.subr.mxu1 %v4795_v23  ;;  %v4696_v47 = vld [vmem:[#allocation10 + $0x440] sm:$0xff]  ;;  %v4698_v23 = vld [vmem:[#allocation10 + $0x450] sm:$0xff] }
 0x774   :  { %4864 = vmatpush2.msra.mxu0 %v4792_v29  ;;  %4935 = vmatpush2.msra.mxu1 %v4794_v48  ;;  %v4424_v29 = vld [vmem:[#allocation2 + $0x5] ss:$8 sm:$0xf] }
 0x775   :  { %4865 = vmatprep.subr.mxu0 %v4785_v49  ;;  %4936 = vmatprep.subr.mxu1 %v4787_v50  ;;  %v4689_v48 = vld [vmem:[#allocation10 + $0x408] sm:$0xff]  ;;  %v4691_v49 = vld [vmem:[#allocation10 + $0x418] sm:$0xff] }
 0x776   :  { %4866 = vmatpush2.msra.mxu0 %v4784_v33  ;;  %4937 = vmatpush2.msra.mxu1 %v4786_v26  ;;  %v4688_v33 = vld [vmem:[#allocation10 + $0x400] sm:$0xff]  ;;  %v4690_v26 = vld [vmem:[#allocation10 + $0x410] sm:$0xff] }
 0x777   :  { %4867 = vmatprep.subr.mxu0 %v4777_v52  ;;  %4938 = vmatprep.subr.mxu1 %v4779_v54 }
 0x778   :  { %4868 = vmatpush2.msra.mxu0 %v4776_v55  ;;  %4939 = vmatpush2.msra.mxu1 %v4778_v56  ;;  %v4685_v55 = vld [vmem:[#allocation10 + $0x3e8] sm:$0xff]  ;;  %v4687_v56 = vld [vmem:[#allocation10 + $0x3f8] sm:$0xff] }
 0x779   :  { %4869 = vmatprep.subr.mxu0 %v4769_v58  ;;  %4940 = vmatprep.subr.mxu1 %v4771_v59 }
 0x77a   :  { %4870 = vmatpush2.msra.mxu0 %v4768_v0  ;;  %4941 = vmatpush2.msra.mxu1 %v4770_v61 }
 0x77b   :  { %4871 = vmatprep.subr.mxu0 %v4761_v62  ;;  %4942 = vmatprep.subr.mxu1 %v4763_v63 }
 0x77c   :  { %4872 = vmatpush2.msra.mxu0 %v4760_v1  ;;  %4943 = vmatpush2.msra.mxu1 %v4762_v2 }
 0x77d   :  { %4873 = vmatprep.subr.mxu0 %v4753_v3  ;;  %4944 = vmatprep.subr.mxu1 %v4755_v4 }
 0x77e   :  { %4874 = vmatpush2.msra.mxu0 %v4752_v5  ;;  %4945 = vmatpush2.msra.mxu1 %v4754_v6 }
 0x77f   :  { %4875 = vmatprep.subr.mxu0 %v4745_v7  ;;  %4946 = vmatprep.subr.mxu1 %v4747_v8  ;;  %v4487_v7 = vld [vmem:[#allocation4] sm:$0x3] }
 0x780   :  { %4876 = vmatpush2.msra.mxu0 %v4744_v9  ;;  %4947 = vmatpush2.msra.mxu1 %v4746_v10 }
 0x781   :  { %4877 = vmatprep.subr.mxu0 %v4737_v57  ;;  %4948 = vmatprep.subr.mxu1 %v4739_v14 }
 0x782   :  { %4878 = vmatpush2.msra.mxu0 %v4736_v15  ;;  %4949 = vmatpush2.msra.mxu1 %v4738_v16 }
 0x783   :  { %4879 = vmatprep.subr.mxu0 %v4729_v19  ;;  %4950 = vmatprep.subr.mxu1 %v4731_v20 }
 0x784   :  { %4880 = vmatpush2.msra.mxu0 %v4728_v25  ;;  %4951 = vmatpush2.msra.mxu1 %v4730_v27 }
 0x785   :  { %4881 = vmatprep.subr.mxu0 %v4721_v28  ;;  %4952 = vmatprep.subr.mxu1 %v4723_v30  ;;  %v4456_v28 = vld [vmem:[#allocation2 + $0x22] ss:$8 sm:$0xf] }
 0x786   :  { %4882 = vmatpush2.msra.mxu0 %v4720_v31  ;;  %4953 = vmatpush2.msra.mxu1 %v4722_v35 }
 0x787   :  { %4883 = vmatprep.subr.mxu0 %v4713_v36  ;;  %4954 = vmatprep.subr.mxu1 %v4715_v37 }
 0x788   :  { %4884 = vmatpush2.msra.mxu0 %v4712_v38  ;;  %4955 = vmatpush2.msra.mxu1 %v4714_v39 }
 0x789   :  { %4885 = vmatprep.subr.mxu0 %v4705_v40  ;;  %4956 = vmatprep.subr.mxu1 %v4707_v42 }
 0x78a   :  { %4886 = vmatpush2.msra.mxu0 %v4704_v43  ;;  %4957 = vmatpush2.msra.mxu1 %v4706_v44 }
 0x78b   :  { %4887 = vmatprep.subr.mxu0 %v4697_v45  ;;  %4958 = vmatprep.subr.mxu1 %v4699_v24  ;;  %v4546_v45 = vrot.slane %v4487_v7, 1 }
 0x78c   :  { %4888 = vmatpush2.msra.mxu0 %v4696_v47  ;;  %4959 = vmatpush2.msra.mxu1 %v4698_v23 }
 0x78d   :  { %4889 = vmatprep.subr.mxu0 %v4689_v48  ;;  %4960 = vmatprep.subr.mxu1 %v4691_v49 }
 0x78e   :  { %4890 = vmatpush2.msra.mxu0 %v4688_v33  ;;  %4961 = vmatpush2.msra.mxu1 %v4690_v26 }
 0x78f   :  { %4969 = vmatprep.subr.mxu0 %v4685_v55  ;;  %5040 = vmatprep.subr.mxu1 %v4687_v56  ;;  %v4686_v55 = vld [vmem:[#allocation10 + $0x3f0] sm:$0xff]  ;;  %v4677_v56 = vld [vmem:[#allocation10 + $0x3a8] sm:$0xff] }
 0x7cd   :  { %v4205_v11 = vpop.f32.mrf.mxu0  ;;  %v4276_v13 = vpop.f32.mrf.mxu1 }
 0x7cf   :  { %v4207_v60 = vpop.f32.mrf.mxu0  ;;  %v4278_v17 = vpop.f32.mrf.mxu1 }
 0x7d0   :  { %v4429_v21 = vcombine.low %v4205_v11, %v4207_v60  ;;  %v4430_v22 = vcombine.low %v4276_v13, %v4278_v17 }
 0x7d2   :  { %v4437_v32 = vrot.slane %v4429_v21, %v6460_v53  ;;  %v4444_v34 = vrot.slane %v4430_v22, %v6460_v53 }
 0x7d4   :  { %v4445_v41 = vcombine.low %v4437_v32, %v4444_v34 }
 0x7d6   :  { %v4452_v46 = vrot.slane %v4445_v41, %v6460_v53 }
 0x7d8   :  { %v4454_v50 = vadd.f32 %v4452_v46, %v4424_v29 }
 0x7da   :  { %v5986_v52 = vmul.f32 -1.442695, %v4454_v50  ;;  %v4495_v54 = vrot.slane %v4454_v50, 1  ;;  %v4506_v59 = vrot.slane %v4454_v50, 3  ;;  %v4503_v62 = vrot.slane %v4454_v50, 2 }
 0x7dc   :  { %6173 = vpow2.f32 %v5986_v52  ;;  %v5987_v58 = vmul.f32 -1.442695, %v4495_v54  ;;  %v5988_v0 = vmul.f32 -1.442695, %v4506_v59  ;;  %v4684_v54 = vld [vmem:[#allocation10 + $0x3e0] sm:$0xff] }
 0x7dd   :  { %v4676_v59 = vld [vmem:[#allocation10 + $0x3a0] sm:$0xff] }
 0x7de   :  { %6175 = vpow2.f32 %v5987_v58  ;;  %v4679_v58 = vld [vmem:[#allocation10 + $0x3b8] sm:$0xff] }
 0x7df   :  { %6177 = vpow2.f32 %v5988_v0  ;;  %v4678_v0 = vld [vmem:[#allocation10 + $0x3b0] sm:$0xff] }
 0x7e9   :  { %v6174_v61 = vpop.eup %6173 }
 0x7ea   :  { %v4491_v63 = vadd.f32 1.0, %v6174_v61  ;;  %v4669_v61 = vld [vmem:[#allocation10 + $0x368] sm:$0xff] }
 0x7eb   :  { %v6176_v1 = vpop.eup %6175 }
 0x7ec   :  { %6179 = vrcp.f32 %v4491_v63  ;;  %v4500_v2 = vadd.f32 1.0, %v6176_v1  ;;  %v6178_v3 = vpop.eup %6177  ;;  %v4668_v63 = vld [vmem:[#allocation10 + $0x360] sm:$0xff]  ;;  %v4670_v1 = vld [vmem:[#allocation10 + $0x370] sm:$0xff] }
 0x7ed   :  { %6181 = vtanh.f32 %v4503_v62  ;;  %v4511_v8 = vadd.f32 1.0, %v6178_v3  ;;  %v4671_v62 = vld [vmem:[#allocation10 + $0x378] sm:$0xff] }
 0x7ee   :  { %6183 = vrcp.f32 %v4500_v2  ;;  %v4661_v2 = vld [vmem:[#allocation10 + $0x328] sm:$0xff]  ;;  %v4663_v3 = vld [vmem:[#allocation10 + $0x338] sm:$0xff] }
 0x7ef   :  { %6185 = vrcp.f32 %v4511_v8  ;;  %v4652_v8 = vld [vmem:[#allocation10 + $0x2e0] sm:$0xff] }
 0x7f9   :  { %v6180_v4 = vpop.eup %6179 }
 0x7fa   :  { %v6182_v5 = vpop.eup %6181 }
 0x7fb   :  { %v6184_v6 = vpop.eup %6183  ;;  %v4515_v10 = vmul.f32 %v6182_v5, %v6180_v4  ;;  %v4660_v4 = vld [vmem:[#allocation10 + $0x320] sm:$0xff]  ;;  %v4662_v5 = vld [vmem:[#allocation10 + $0x330] sm:$0xff] }
 0x7fc   :  { %v4514_v9 = vmul.f32 %v6184_v6, %v4487_v7  ;;  %v6186_v13 = vpop.eup %6185  ;;  %v4653_v6 = vld [vmem:[#allocation10 + $0x2e8] sm:$0xff]  ;;  %v4655_v7 = vld [vmem:[#allocation10 + $0x2f8] sm:$0xff] }
 0x7fe   :  { %v4516_v11 = vadd.f32 %v4515_v10, %v4514_v9  ;;  %v4654_v9 = vld [vmem:[#allocation10 + $0x2f0] sm:$0xff]  ;;  %v4645_v10 = vld [vmem:[#allocation10 + $0x2a8] sm:$0xff] }
 0x800   :  { %6187 = vtanh.f32 %v4516_v11  ;;  %4555 = vst.msk [vmem:[#allocation4] sm:$0x1] %vm6466_vm2, %v4516_v11  ;;  %v4647_v11 = vld [vmem:[#allocation10 + $0x2b8] sm:$0xff] }
 0x80d   :  { %v6188_v57 = vpop.eup %6187 }
 0x80e   :  { %v4518_v14 = vmul.f32 %v6188_v57, %v6186_v13  ;;  %v4347_v15 = vpop.f32.mrf.mxu0  ;;  %v4418_v16 = vpop.f32.mrf.mxu1  ;;  %v4644_v13 = vld [vmem:[#allocation10 + $0x2a0] sm:$0xff]  ;;  %v4646_v57 = vld [vmem:[#allocation10 + $0x2b0] sm:$0xff] }
 0x810   :  { %4557 = vst [vmem:[#allocation13 + $0x5] sm:$0x1] %v4518_v14  ;;  %4553 = vst.msk [vmem:[#allocation3] sm:$0x1] %vm6466_vm2, %v4518_v14  ;;  %v4349_v60 = vpop.f32.mrf.mxu0  ;;  %v4420_v17 = vpop.f32.mrf.mxu1  ;;  %v4637_v14 = vld [vmem:[#allocation10 + $0x268] sm:$0xff] }
 0x811   :  { %v4461_v19 = vcombine.low %v4347_v15, %v4349_v60  ;;  %v4462_v20 = vcombine.low %v4418_v16, %v4420_v17  ;;  %v4639_v15 = vld [vmem:[#allocation10 + $0x278] sm:$0xff]  ;;  %v4636_v16 = vld [vmem:[#allocation10 + $0x260] sm:$0xff]  ;;  %v4638_v60 = vld [vmem:[#allocation10 + $0x270] sm:$0xff] }
 0x812   :  { %v4629_v17 = vld [vmem:[#allocation10 + $0x228] sm:$0xff] }
 0x813   :  { %v4469_v21 = vrot.slane %v4461_v19, %v6460_v53  ;;  %v4476_v22 = vrot.slane %v4462_v20, %v6460_v53  ;;  %v4631_v19 = vld [vmem:[#allocation10 + $0x238] sm:$0xff]  ;;  %v4628_v20 = vld [vmem:[#allocation10 + $0x220] sm:$0xff] }
 0x815   :  { %v4477_v25 = vcombine.low %v4469_v21, %v4476_v22  ;;  %v4630_v21 = vld [vmem:[#allocation10 + $0x230] sm:$0xff]  ;;  %v4621_v22 = vld [vmem:[#allocation10 + $0x1e8] sm:$0xff] }
 0x817   :  { %v4484_v27 = vrot.slane %v4477_v25, %v6460_v53  ;;  %v4623_v25 = vld [vmem:[#allocation10 + $0x1f8] sm:$0xff] }
 0x819   :  { %v4486_v30 = vadd.f32 %v4484_v27, %v4456_v28  ;;  %v4620_v27 = vld [vmem:[#allocation10 + $0x1e0] sm:$0xff]  ;;  %v4622_v28 = vld [vmem:[#allocation10 + $0x1f0] sm:$0xff] }
 0x81b   :  { %v5989_v31 = vmul.f32 -1.442695, %v4486_v30  ;;  %v4526_v32 = vrot.slane %v4486_v30, 1  ;;  %v4537_v35 = vrot.slane %v4486_v30, 3  ;;  %v4534_v38 = vrot.slane %v4486_v30, 2  ;;  %v4613_v30 = vld [vmem:[#allocation10 + $0x1a8] sm:$0xff] }
 0x81d   :  { %6189 = vpow2.f32 %v5989_v31  ;;  %v5990_v34 = vmul.f32 -1.442695, %v4526_v32  ;;  %v5991_v36 = vmul.f32 -1.442695, %v4537_v35  ;;  %v4615_v31 = vld [vmem:[#allocation10 + $0x1b8] sm:$0xff]  ;;  %v4612_v32 = vld [vmem:[#allocation10 + $0x1a0] sm:$0xff] }
 0x81e   :  { %v4605_v35 = vld [vmem:[#allocation10 + $0x168] sm:$0xff] }
 0x81f   :  { %6191 = vpow2.f32 %v5990_v34  ;;  %v4614_v34 = vld [vmem:[#allocation10 + $0x1b0] sm:$0xff] }
 0x820   :  { %6193 = vpow2.f32 %v5991_v36  ;;  %v4607_v36 = vld [vmem:[#allocation10 + $0x178] sm:$0xff] }
 0x82a   :  { %v6190_v37 = vpop.eup %6189 }
 0x82b   :  { %v4522_v39 = vadd.f32 1.0, %v6190_v37  ;;  %v4604_v37 = vld [vmem:[#allocation10 + $0x160] sm:$0xff] }
 0x82c   :  { %v6192_v40 = vpop.eup %6191 }
 0x82d   :  { %6195 = vrcp.f32 %v4522_v39  ;;  %v4531_v41 = vadd.f32 1.0, %v6192_v40  ;;  %v6194_v42 = vpop.eup %6193  ;;  %v4597_v39 = vld [vmem:[#allocation10 + $0x128] sm:$0xff]  ;;  %v4599_v40 = vld [vmem:[#allocation10 + $0x138] sm:$0xff] }
 0x82e   :  { %6197 = vtanh.f32 %v4534_v38  ;;  %v4542_v46 = vadd.f32 1.0, %v6194_v42  ;;  %v4606_v38 = vld [vmem:[#allocation10 + $0x170] sm:$0xff] }
 0x82f   :  { %6199 = vrcp.f32 %v4531_v41  ;;  %v4596_v41 = vld [vmem:[#allocation10 + $0x120] sm:$0xff]  ;;  %v4598_v42 = vld [vmem:[#allocation10 + $0x130] sm:$0xff] }
 0x830   :  { %6201 = vrcp.f32 %v4542_v46  ;;  %v4581_v46 = vld [vmem:[#allocation10 + $0xa8] sm:$0xff] }
 0x83a   :  { %v6196_v43 = vpop.eup %6195 }
 0x83b   :  { %v6198_v44 = vpop.eup %6197 }
 0x83c   :  { %v6200_v24 = vpop.eup %6199  ;;  %v4549_v23 = vmul.f32 %v6198_v44, %v6196_v43  ;;  %v4589_v43 = vld [vmem:[#allocation10 + $0xe8] sm:$0xff]  ;;  %v4591_v44 = vld [vmem:[#allocation10 + $0xf8] sm:$0xff] }
 0x83d   :  { %v4548_v47 = vmul.f32 %v6200_v24, %v4546_v45  ;;  %v6202_v48 = vpop.eup %6201  ;;  %v4588_v45 = vld [vmem:[#allocation10 + $0xe0] sm:$0xff]  ;;  %v4590_v24 = vld [vmem:[#allocation10 + $0xf0] sm:$0xff] }
 0x83f   :  { %v4550_v29 = vadd.f32 %v4549_v23, %v4548_v47  ;;  %v4583_v47 = vld [vmem:[#allocation10 + $0xb8] sm:$0xff]  ;;  %v4580_v23 = vld [vmem:[#allocation10 + $0xa0] sm:$0xff] }
 0x841   :  { %6203 = vtanh.f32 %v4550_v29  ;;  %4556 = vst.msk [vmem:[#allocation4 + $0x1] sm:$0x1] %vm6466_vm2, %v4550_v29  ;;  %v4582_v29 = vld [vmem:[#allocation10 + $0xb0] sm:$0xff] }
 0x84e   :  { %v6204_v49 = vpop.eup %6203 }
 0x84f   :  { %v4552_v50 = vmul.f32 %v6204_v49, %v6202_v48  ;;  %v4573_v48 = vld [vmem:[#allocation10 + $0x68] sm:$0xff]  ;;  %v4575_v49 = vld [vmem:[#allocation10 + $0x78] sm:$0xff] }
 0x851   :  { %4558 = vst [vmem:[#allocation13 + $0xa] sm:$0x1] %v4552_v50  ;;  %4554 = vst.msk [vmem:[#allocation3 + $0x1] sm:$0x1] %vm6466_vm2, %v4552_v50  ;;  %v4572_v50 = vld [vmem:[#allocation10 + $0x60] sm:$0xff] }
 0x858   :  { %v4559_v33 = vld [vmem:[#allocation3] sm:$0x3] }
 0x859   :  { %v4824_v26 = vrot.slane %v4559_v33, %v6432_v12  ;;  %v6593_v52 = vrot.slane %v4559_v33, %v6435_v18  ;;  %v4574_v33 = vld [vmem:[#allocation10 + $0x70] sm:$0xff] }
 0x85b   :  { %4891 = vmatprep.mubr.f32.mxu0 %v4824_v26  ;;  %4962 = vmatprep.mubr.f32.mxu1 %v4824_v26 }
 0x85c   :  { %4892 = vmatmul.mubr.f32.vlgmr.msra.gmra.mxu0 %v6593_v52  ;;  %4963 = vmatmul.mubr.f32.vlgmr.msra.gmra.mxu1 %v6593_v52 }
 0x85d   :  { %4970 = vmatpush1.msra.mxu0 %v4684_v54  ;;  %5041 = vmatpush1.msra.mxu1 %v4686_v55  ;;  %v4567_v54 = vld [vmem:[#allocation10 + $0x38] sm:$0xff]  ;;  %v4564_v55 = vld [vmem:[#allocation10 + $0x20] sm:$0xff] }
 0x85e   :  { %4971 = vmatprep.subr.mxu0 %v4677_v56  ;;  %5033 = vmatprep.mubr.f32.mxu0 %v4824_v26  ;;  %v4566_v56 = vld [vmem:[#allocation10 + $0x30] sm:$0xff] }
 0x85f   :  { %5042 = vmatprep.subr.mxu1 %v4679_v58  ;;  %5104 = vmatprep.mubr.f32.mxu1 %v4824_v26  ;;  %v4565_v26 = vld [vmem:[#allocation10 + $0x28] sm:$0xff] }
 0x860   :  { %4972 = vmatpush1.msra.mxu0 %v4676_v59  ;;  %5043 = vmatpush1.msra.mxu1 %v4678_v0  ;;  %v4813_v58 = vld [vmem:[#allocation10 + $0x7e8] sm:$0xff]  ;;  %v4815_v59 = vld [vmem:[#allocation10 + $0x7f8] sm:$0xff]  ;;  %v4812_v0 = vld [vmem:[#allocation10 + $0x7e0] sm:$0xff] }
 0x861   :  { %4973 = vmatprep.subr.mxu0 %v4669_v61  ;;  %5044 = vmatprep.subr.mxu1 %v4671_v62  ;;  %v4814_v61 = vld [vmem:[#allocation10 + $0x7f0] sm:$0xff]  ;;  %v4805_v62 = vld [vmem:[#allocation10 + $0x7a8] sm:$0xff] }
 0x862   :  { %4974 = vmatpush1.msra.mxu0 %v4668_v63  ;;  %5045 = vmatpush1.msra.mxu1 %v4670_v1  ;;  %v4807_v63 = vld [vmem:[#allocation10 + $0x7b8] sm:$0xff]  ;;  %v4804_v1 = vld [vmem:[#allocation10 + $0x7a0] sm:$0xff] }
 0x863   :  { %4975 = vmatprep.subr.mxu0 %v4661_v2  ;;  %5046 = vmatprep.subr.mxu1 %v4663_v3  ;;  %v4806_v2 = vld [vmem:[#allocation10 + $0x7b0] sm:$0xff]  ;;  %v4797_v3 = vld [vmem:[#allocation10 + $0x768] sm:$0xff] }
 0x864   :  { %4976 = vmatpush1.msra.mxu0 %v4660_v4  ;;  %5047 = vmatpush1.msra.mxu1 %v4662_v5  ;;  %v4799_v4 = vld [vmem:[#allocation10 + $0x778] sm:$0xff]  ;;  %v4796_v5 = vld [vmem:[#allocation10 + $0x760] sm:$0xff] }
 0x865   :  { %4977 = vmatprep.subr.mxu0 %v4653_v6  ;;  %5048 = vmatprep.subr.mxu1 %v4655_v7  ;;  %v4798_v6 = vld [vmem:[#allocation10 + $0x770] sm:$0xff]  ;;  %v4789_v7 = vld [vmem:[#allocation10 + $0x728] sm:$0xff] }
 0x866   :  { %4978 = vmatpush1.msra.mxu0 %v4652_v8  ;;  %5049 = vmatpush1.msra.mxu1 %v4654_v9  ;;  %v4791_v8 = vld [vmem:[#allocation10 + $0x738] sm:$0xff]  ;;  %v4788_v9 = vld [vmem:[#allocation10 + $0x720] sm:$0xff] }
 0x867   :  { %4979 = vmatprep.subr.mxu0 %v4645_v10  ;;  %5050 = vmatprep.subr.mxu1 %v4647_v11  ;;  %v4790_v10 = vld [vmem:[#allocation10 + $0x730] sm:$0xff]  ;;  %v4781_v11 = vld [vmem:[#allocation10 + $0x6e8] sm:$0xff] }
 0x868   :  { %4980 = vmatpush1.msra.mxu0 %v4644_v13  ;;  %5051 = vmatpush1.msra.mxu1 %v4646_v57  ;;  %v4783_v13 = vld [vmem:[#allocation10 + $0x6f8] sm:$0xff]  ;;  %v4780_v57 = vld [vmem:[#allocation10 + $0x6e0] sm:$0xff] }
 0x869   :  { %4981 = vmatprep.subr.mxu0 %v4637_v14  ;;  %5052 = vmatprep.subr.mxu1 %v4639_v15  ;;  %v4782_v14 = vld [vmem:[#allocation10 + $0x6f0] sm:$0xff]  ;;  %v4773_v15 = vld [vmem:[#allocation10 + $0x6a8] sm:$0xff] }
 0x86a   :  { %4982 = vmatpush1.msra.mxu0 %v4636_v16  ;;  %5053 = vmatpush1.msra.mxu1 %v4638_v60  ;;  %v4775_v16 = vld [vmem:[#allocation10 + $0x6b8] sm:$0xff]  ;;  %v4772_v60 = vld [vmem:[#allocation10 + $0x6a0] sm:$0xff] }
 0x86b   :  { %4983 = vmatprep.subr.mxu0 %v4629_v17  ;;  %5054 = vmatprep.subr.mxu1 %v4631_v19  ;;  %v4774_v17 = vld [vmem:[#allocation10 + $0x6b0] sm:$0xff]  ;;  %v4765_v19 = vld [vmem:[#allocation10 + $0x668] sm:$0xff] }
 0x86c   :  { %4984 = vmatpush1.msra.mxu0 %v4628_v20  ;;  %5055 = vmatpush1.msra.mxu1 %v4630_v21  ;;  %v4767_v20 = vld [vmem:[#allocation10 + $0x678] sm:$0xff]  ;;  %v4764_v21 = vld [vmem:[#allocation10 + $0x660] sm:$0xff] }
 0x86d   :  { %4985 = vmatprep.subr.mxu0 %v4621_v22  ;;  %5056 = vmatprep.subr.mxu1 %v4623_v25  ;;  %v4766_v22 = vld [vmem:[#allocation10 + $0x670] sm:$0xff]  ;;  %v4757_v25 = vld [vmem:[#allocation10 + $0x628] sm:$0xff] }
 0x86e   :  { %4986 = vmatpush1.msra.mxu0 %v4620_v27  ;;  %5057 = vmatpush1.msra.mxu1 %v4622_v28  ;;  %v4759_v27 = vld [vmem:[#allocation10 + $0x638] sm:$0xff]  ;;  %v4756_v28 = vld [vmem:[#allocation10 + $0x620] sm:$0xff] }
 0x86f   :  { %4987 = vmatprep.subr.mxu0 %v4613_v30  ;;  %5058 = vmatprep.subr.mxu1 %v4615_v31  ;;  %v4758_v30 = vld [vmem:[#allocation10 + $0x630] sm:$0xff]  ;;  %v4749_v31 = vld [vmem:[#allocation10 + $0x5e8] sm:$0xff] }
 0x870   :  { %4988 = vmatpush1.msra.mxu0 %v4612_v32  ;;  %5059 = vmatpush1.msra.mxu1 %v4614_v34  ;;  %v4751_v32 = vld [vmem:[#allocation10 + $0x5f8] sm:$0xff]  ;;  %v4748_v34 = vld [vmem:[#allocation10 + $0x5e0] sm:$0xff] }
 0x871   :  { %4989 = vmatprep.subr.mxu0 %v4605_v35  ;;  %5060 = vmatprep.subr.mxu1 %v4607_v36  ;;  %v4750_v35 = vld [vmem:[#allocation10 + $0x5f0] sm:$0xff]  ;;  %v4741_v36 = vld [vmem:[#allocation10 + $0x5a8] sm:$0xff] }
 0x872   :  { %4990 = vmatpush1.msra.mxu0 %v4604_v37  ;;  %5061 = vmatpush1.msra.mxu1 %v4606_v38  ;;  %v4743_v37 = vld [vmem:[#allocation10 + $0x5b8] sm:$0xff]  ;;  %v4740_v38 = vld [vmem:[#allocation10 + $0x5a0] sm:$0xff] }
 0x873   :  { %4991 = vmatprep.subr.mxu0 %v4597_v39  ;;  %5062 = vmatprep.subr.mxu1 %v4599_v40  ;;  %v4742_v39 = vld [vmem:[#allocation10 + $0x5b0] sm:$0xff]  ;;  %v4733_v40 = vld [vmem:[#allocation10 + $0x568] sm:$0xff] }
 0x874   :  { %4992 = vmatpush1.msra.mxu0 %v4596_v41  ;;  %5063 = vmatpush1.msra.mxu1 %v4598_v42  ;;  %v4735_v41 = vld [vmem:[#allocation10 + $0x578] sm:$0xff]  ;;  %v4732_v42 = vld [vmem:[#allocation10 + $0x560] sm:$0xff] }
 0x875   :  { %4993 = vmatprep.subr.mxu0 %v4589_v43  ;;  %5064 = vmatprep.subr.mxu1 %v4591_v44  ;;  %v4734_v43 = vld [vmem:[#allocation10 + $0x570] sm:$0xff]  ;;  %v4725_v44 = vld [vmem:[#allocation10 + $0x528] sm:$0xff] }
 0x876   :  { %4994 = vmatpush1.msra.mxu0 %v4588_v45  ;;  %5065 = vmatpush1.msra.mxu1 %v4590_v24  ;;  %v4727_v45 = vld [vmem:[#allocation10 + $0x538] sm:$0xff]  ;;  %v4724_v24 = vld [vmem:[#allocation10 + $0x520] sm:$0xff] }
 0x877   :  { %4995 = vmatprep.subr.mxu0 %v4581_v46  ;;  %5066 = vmatprep.subr.mxu1 %v4583_v47  ;;  %v4726_v46 = vld [vmem:[#allocation10 + $0x530] sm:$0xff]  ;;  %v4717_v47 = vld [vmem:[#allocation10 + $0x4e8] sm:$0xff] }
 0x878   :  { %4996 = vmatpush1.msra.mxu0 %v4580_v23  ;;  %5067 = vmatpush1.msra.mxu1 %v4582_v29  ;;  %v4719_v23 = vld [vmem:[#allocation10 + $0x4f8] sm:$0xff]  ;;  %v4716_v29 = vld [vmem:[#allocation10 + $0x4e0] sm:$0xff] }
 0x879   :  { %4997 = vmatprep.subr.mxu0 %v4573_v48  ;;  %5068 = vmatprep.subr.mxu1 %v4575_v49  ;;  %v4718_v48 = vld [vmem:[#allocation10 + $0x4f0] sm:$0xff]  ;;  %v4709_v49 = vld [vmem:[#allocation10 + $0x4a8] sm:$0xff] }
 0x87a   :  { %4998 = vmatpush1.msra.mxu0 %v4572_v50  ;;  %5069 = vmatpush1.msra.mxu1 %v4574_v33  ;;  %v4711_v50 = vld [vmem:[#allocation10 + $0x4b8] sm:$0xff]  ;;  %v4708_v33 = vld [vmem:[#allocation10 + $0x4a0] sm:$0xff] }
 0x87b   :  { %4999 = vmatprep.subr.mxu0 %v4565_v26  ;;  %5070 = vmatprep.subr.mxu1 %v4567_v54  ;;  %v4710_v26 = vld [vmem:[#allocation10 + $0x4b0] sm:$0xff]  ;;  %v4701_v54 = vld [vmem:[#allocation10 + $0x468] sm:$0xff] }
 0x87c   :  { %5000 = vmatpush1.msra.mxu0 %v4564_v55  ;;  %5071 = vmatpush1.msra.mxu1 %v4566_v56  ;;  %v4703_v55 = vld [vmem:[#allocation10 + $0x478] sm:$0xff]  ;;  %v4700_v56 = vld [vmem:[#allocation10 + $0x460] sm:$0xff] }
 0x87d   :  { %5001 = vmatprep.subr.mxu0 %v4813_v58  ;;  %5072 = vmatprep.subr.mxu1 %v4815_v59  ;;  %v4702_v58 = vld [vmem:[#allocation10 + $0x470] sm:$0xff]  ;;  %v4693_v59 = vld [vmem:[#allocation10 + $0x428] sm:$0xff] }
 0x87e   :  { %5002 = vmatpush2.msra.mxu0 %v4812_v0  ;;  %5073 = vmatpush2.msra.mxu1 %v4814_v61  ;;  %v4695_v0 = vld [vmem:[#allocation10 + $0x438] sm:$0xff]  ;;  %v4692_v61 = vld [vmem:[#allocation10 + $0x420] sm:$0xff] }
 0x87f   :  { %5003 = vmatprep.subr.mxu0 %v4805_v62  ;;  %5074 = vmatprep.subr.mxu1 %v4807_v63  ;;  %v4694_v62 = vld [vmem:[#allocation10 + $0x430] sm:$0xff]  ;;  %v5369_v63 = vld [vmem:[#allocation10 + $0x3c8] sm:$0xff] }
 0x880   :  { %5004 = vmatpush2.msra.mxu0 %v4804_v1  ;;  %5075 = vmatpush2.msra.mxu1 %v4806_v2  ;;  %v5371_v1 = vld [vmem:[#allocation10 + $0x3d8] sm:$0xff]  ;;  %v5368_v2 = vld [vmem:[#allocation10 + $0x3c0] sm:$0xff] }
 0x881   :  { %5005 = vmatprep.subr.mxu0 %v4797_v3  ;;  %5076 = vmatprep.subr.mxu1 %v4799_v4  ;;  %v5370_v3 = vld [vmem:[#allocation10 + $0x3d0] sm:$0xff]  ;;  %v5361_v4 = vld [vmem:[#allocation10 + $0x388] sm:$0xff] }
 0x882   :  { %5006 = vmatpush2.msra.mxu0 %v4796_v5  ;;  %5077 = vmatpush2.msra.mxu1 %v4798_v6  ;;  %v5363_v5 = vld [vmem:[#allocation10 + $0x398] sm:$0xff]  ;;  %v5360_v6 = vld [vmem:[#allocation10 + $0x380] sm:$0xff] }
 0x883   :  { %5007 = vmatprep.subr.mxu0 %v4789_v7  ;;  %5078 = vmatprep.subr.mxu1 %v4791_v8  ;;  %v5362_v7 = vld [vmem:[#allocation10 + $0x390] sm:$0xff]  ;;  %v5353_v8 = vld [vmem:[#allocation10 + $0x348] sm:$0xff] }
 0x884   :  { %5008 = vmatpush2.msra.mxu0 %v4788_v9  ;;  %5079 = vmatpush2.msra.mxu1 %v4790_v10  ;;  %v5355_v9 = vld [vmem:[#allocation10 + $0x358] sm:$0xff]  ;;  %v5354_v10 = vld [vmem:[#allocation10 + $0x350] sm:$0xff] }
 0x885   :  { %5009 = vmatprep.subr.mxu0 %v4781_v11  ;;  %5080 = vmatprep.subr.mxu1 %v4783_v13  ;;  %v5345_v11 = vld [vmem:[#allocation10 + $0x308] sm:$0xff]  ;;  %v5347_v13 = vld [vmem:[#allocation10 + $0x318] sm:$0xff] }
 0x886   :  { %5010 = vmatpush2.msra.mxu0 %v4780_v57  ;;  %5081 = vmatpush2.msra.mxu1 %v4782_v14  ;;  %v5344_v57 = vld [vmem:[#allocation10 + $0x300] sm:$0xff]  ;;  %v5346_v14 = vld [vmem:[#allocation10 + $0x310] sm:$0xff] }
 0x887   :  { %5011 = vmatprep.subr.mxu0 %v4773_v15  ;;  %5082 = vmatprep.subr.mxu1 %v4775_v16  ;;  %v5337_v15 = vld [vmem:[#allocation10 + $0x2c8] sm:$0xff]  ;;  %v5339_v16 = vld [vmem:[#allocation10 + $0x2d8] sm:$0xff] }
 0x888   :  { %5012 = vmatpush2.msra.mxu0 %v4772_v60  ;;  %5083 = vmatpush2.msra.mxu1 %v4774_v17  ;;  %v5336_v60 = vld [vmem:[#allocation10 + $0x2c0] sm:$0xff]  ;;  %v5338_v17 = vld [vmem:[#allocation10 + $0x2d0] sm:$0xff] }
 0x889   :  { %5013 = vmatprep.subr.mxu0 %v4765_v19  ;;  %5084 = vmatprep.subr.mxu1 %v4767_v20  ;;  %v5329_v19 = vld [vmem:[#allocation10 + $0x288] sm:$0xff]  ;;  %v5331_v20 = vld [vmem:[#allocation10 + $0x298] sm:$0xff] }
 0x88a   :  { %5014 = vmatpush2.msra.mxu0 %v4764_v21  ;;  %5085 = vmatpush2.msra.mxu1 %v4766_v22  ;;  %v5328_v21 = vld [vmem:[#allocation10 + $0x280] sm:$0xff]  ;;  %v5330_v22 = vld [vmem:[#allocation10 + $0x290] sm:$0xff] }
 0x88b   :  { %5015 = vmatprep.subr.mxu0 %v4757_v25  ;;  %5086 = vmatprep.subr.mxu1 %v4759_v27  ;;  %v5321_v25 = vld [vmem:[#allocation10 + $0x248] sm:$0xff]  ;;  %v5323_v27 = vld [vmem:[#allocation10 + $0x258] sm:$0xff] }
 0x88c   :  { %5016 = vmatpush2.msra.mxu0 %v4756_v28  ;;  %5087 = vmatpush2.msra.mxu1 %v4758_v30  ;;  %v5320_v28 = vld [vmem:[#allocation10 + $0x240] sm:$0xff]  ;;  %v5322_v30 = vld [vmem:[#allocation10 + $0x250] sm:$0xff] }
 0x88d   :  { %5017 = vmatprep.subr.mxu0 %v4749_v31  ;;  %5088 = vmatprep.subr.mxu1 %v4751_v32  ;;  %v5313_v31 = vld [vmem:[#allocation10 + $0x208] sm:$0xff]  ;;  %v5315_v32 = vld [vmem:[#allocation10 + $0x218] sm:$0xff] }
 0x88e   :  { %5018 = vmatpush2.msra.mxu0 %v4748_v34  ;;  %5089 = vmatpush2.msra.mxu1 %v4750_v35  ;;  %v5312_v34 = vld [vmem:[#allocation10 + $0x200] sm:$0xff]  ;;  %v5314_v35 = vld [vmem:[#allocation10 + $0x210] sm:$0xff] }
 0x88f   :  { %5019 = vmatprep.subr.mxu0 %v4741_v36  ;;  %5090 = vmatprep.subr.mxu1 %v4743_v37  ;;  %v5305_v36 = vld [vmem:[#allocation10 + $0x1c8] sm:$0xff]  ;;  %v5307_v37 = vld [vmem:[#allocation10 + $0x1d8] sm:$0xff] }
 0x890   :  { %5020 = vmatpush2.msra.mxu0 %v4740_v38  ;;  %5091 = vmatpush2.msra.mxu1 %v4742_v39  ;;  %v5304_v38 = vld [vmem:[#allocation10 + $0x1c0] sm:$0xff]  ;;  %v5306_v39 = vld [vmem:[#allocation10 + $0x1d0] sm:$0xff] }
 0x891   :  { %5021 = vmatprep.subr.mxu0 %v4733_v40  ;;  %5092 = vmatprep.subr.mxu1 %v4735_v41  ;;  %v5297_v40 = vld [vmem:[#allocation10 + $0x188] sm:$0xff]  ;;  %v5299_v41 = vld [vmem:[#allocation10 + $0x198] sm:$0xff] }
 0x892   :  { %5022 = vmatpush2.msra.mxu0 %v4732_v42  ;;  %5093 = vmatpush2.msra.mxu1 %v4734_v43  ;;  %v5296_v42 = vld [vmem:[#allocation10 + $0x180] sm:$0xff]  ;;  %v5298_v43 = vld [vmem:[#allocation10 + $0x190] sm:$0xff] }
 0x893   :  { %5023 = vmatprep.subr.mxu0 %v4725_v44  ;;  %5094 = vmatprep.subr.mxu1 %v4727_v45  ;;  %v5289_v44 = vld [vmem:[#allocation10 + $0x148] sm:$0xff]  ;;  %v5291_v45 = vld [vmem:[#allocation10 + $0x158] sm:$0xff] }
 0x894   :  { %5024 = vmatpush2.msra.mxu0 %v4724_v24  ;;  %5095 = vmatpush2.msra.mxu1 %v4726_v46  ;;  %v5288_v24 = vld [vmem:[#allocation10 + $0x140] sm:$0xff]  ;;  %v5290_v46 = vld [vmem:[#allocation10 + $0x150] sm:$0xff] }
 0x895   :  { %5025 = vmatprep.subr.mxu0 %v4717_v47  ;;  %5096 = vmatprep.subr.mxu1 %v4719_v23  ;;  %v5281_v47 = vld [vmem:[#allocation10 + $0x108] sm:$0xff]  ;;  %v5283_v23 = vld [vmem:[#allocation10 + $0x118] sm:$0xff] }
 0x896   :  { %5026 = vmatpush2.msra.mxu0 %v4716_v29  ;;  %5097 = vmatpush2.msra.mxu1 %v4718_v48  ;;  %v5280_v29 = vld [vmem:[#allocation10 + $0x100] sm:$0xff]  ;;  %v5282_v48 = vld [vmem:[#allocation10 + $0x110] sm:$0xff] }
 0x897   :  { %5027 = vmatprep.subr.mxu0 %v4709_v49  ;;  %5098 = vmatprep.subr.mxu1 %v4711_v50  ;;  %v5273_v49 = vld [vmem:[#allocation10 + $0xc8] sm:$0xff]  ;;  %v5275_v50 = vld [vmem:[#allocation10 + $0xd8] sm:$0xff] }
 0x898   :  { %5028 = vmatpush2.msra.mxu0 %v4708_v33  ;;  %5099 = vmatpush2.msra.mxu1 %v4710_v26  ;;  %v5272_v33 = vld [vmem:[#allocation10 + $0xc0] sm:$0xff]  ;;  %v5274_v26 = vld [vmem:[#allocation10 + $0xd0] sm:$0xff] }
 0x899   :  { %5029 = vmatprep.subr.mxu0 %v4701_v54  ;;  %5100 = vmatprep.subr.mxu1 %v4703_v55  ;;  %v5265_v54 = vld [vmem:[#allocation10 + $0x88] sm:$0xff]  ;;  %v5267_v55 = vld [vmem:[#allocation10 + $0x98] sm:$0xff] }
 0x89a   :  { %5030 = vmatpush2.msra.mxu0 %v4700_v56  ;;  %5101 = vmatpush2.msra.mxu1 %v4702_v58  ;;  %v5264_v56 = vld [vmem:[#allocation10 + $0x80] sm:$0xff]  ;;  %v5266_v58 = vld [vmem:[#allocation10 + $0x90] sm:$0xff] }
 0x89b   :  { %5031 = vmatprep.subr.mxu0 %v4693_v59  ;;  %5102 = vmatprep.subr.mxu1 %v4695_v0  ;;  %v5257_v59 = vld [vmem:[#allocation10 + $0x48] sm:$0xff]  ;;  %v5259_v0 = vld [vmem:[#allocation10 + $0x58] sm:$0xff] }
 0x89c   :  { %5032 = vmatpush2.msra.mxu0 %v4692_v61  ;;  %5103 = vmatpush2.msra.mxu1 %v4694_v62  ;;  %v5256_v61 = vld [vmem:[#allocation10 + $0x40] sm:$0xff]  ;;  %v5258_v62 = vld [vmem:[#allocation10 + $0x50] sm:$0xff] }
 0x89d   :  { %5034 = vmatmul.mubr.f32.vlgmr.msra.gmra.mxu0 %v6593_v52  ;;  %5105 = vmatmul.mubr.f32.vlgmr.msra.gmra.mxu1 %v6593_v52  ;;  %v5352_v52 = vld [vmem:[#allocation10 + $0x340] sm:$0xff] }
 0x89e   :  { %5515 = vmatprep.subr.mxu0 %v5369_v63  ;;  %5586 = vmatprep.subr.mxu1 %v5371_v1  ;;  %v5249_v63 = vld [vmem:[#allocation10 + $0x8] sm:$0xff]  ;;  %v5251_v1 = vld [vmem:[#allocation10 + $0x18] sm:$0xff] }
 0x89f   :  { %5516 = vmatpush1.msra.mxu0 %v5368_v2  ;;  %5587 = vmatpush1.msra.mxu1 %v5370_v3  ;;  %v5248_v2 = vld [vmem:[#allocation10] sm:$0xff]  ;;  %v5250_v3 = vld [vmem:[#allocation10 + $0x10] sm:$0xff] }
 0x8a0   :  { %5517 = vmatprep.subr.mxu0 %v5361_v4  ;;  %5588 = vmatprep.subr.mxu1 %v5363_v5  ;;  %v5497_v4 = vld [vmem:[#allocation10 + $0x7c8] sm:$0xff]  ;;  %v5499_v5 = vld [vmem:[#allocation10 + $0x7d8] sm:$0xff] }
 0x8a1   :  { %5518 = vmatpush1.msra.mxu0 %v5360_v6  ;;  %5589 = vmatpush1.msra.mxu1 %v5362_v7  ;;  %v5496_v6 = vld [vmem:[#allocation10 + $0x7c0] sm:$0xff]  ;;  %v5498_v7 = vld [vmem:[#allocation10 + $0x7d0] sm:$0xff] }
 0x8a2   :  { %5519 = vmatprep.subr.mxu0 %v5353_v8  ;;  %5590 = vmatprep.subr.mxu1 %v5355_v9  ;;  %v5489_v8 = vld [vmem:[#allocation10 + $0x788] sm:$0xff]  ;;  %v5491_v9 = vld [vmem:[#allocation10 + $0x798] sm:$0xff] }
 0x8a3   :  { %5520 = vmatpush1.msra.mxu0 %v5352_v52  ;;  %5591 = vmatpush1.msra.mxu1 %v5354_v10  ;;  %v5488_v52 = vld [vmem:[#allocation10 + $0x780] sm:$0xff]  ;;  %v5490_v10 = vld [vmem:[#allocation10 + $0x790] sm:$0xff] }
 0x8a4   :  { %5521 = vmatprep.subr.mxu0 %v5345_v11  ;;  %5592 = vmatprep.subr.mxu1 %v5347_v13  ;;  %v5481_v11 = vld [vmem:[#allocation10 + $0x748] sm:$0xff]  ;;  %v5483_v13 = vld [vmem:[#allocation10 + $0x758] sm:$0xff] }
 0x8a5   :  { %5522 = vmatpush1.msra.mxu0 %v5344_v57  ;;  %5593 = vmatpush1.msra.mxu1 %v5346_v14  ;;  %v5480_v57 = vld [vmem:[#allocation10 + $0x740] sm:$0xff]  ;;  %v5482_v14 = vld [vmem:[#allocation10 + $0x750] sm:$0xff] }
 0x8a6   :  { %5523 = vmatprep.subr.mxu0 %v5337_v15  ;;  %5594 = vmatprep.subr.mxu1 %v5339_v16  ;;  %v5473_v15 = vld [vmem:[#allocation10 + $0x708] sm:$0xff]  ;;  %v5475_v16 = vld [vmem:[#allocation10 + $0x718] sm:$0xff] }
 0x8a7   :  { %5524 = vmatpush1.msra.mxu0 %v5336_v60  ;;  %5595 = vmatpush1.msra.mxu1 %v5338_v17  ;;  %v5472_v60 = vld [vmem:[#allocation10 + $0x700] sm:$0xff]  ;;  %v5474_v17 = vld [vmem:[#allocation10 + $0x710] sm:$0xff] }
 0x8a8   :  { %5525 = vmatprep.subr.mxu0 %v5329_v19  ;;  %5596 = vmatprep.subr.mxu1 %v5331_v20  ;;  %v5465_v19 = vld [vmem:[#allocation10 + $0x6c8] sm:$0xff]  ;;  %v5467_v20 = vld [vmem:[#allocation10 + $0x6d8] sm:$0xff] }
 0x8a9   :  { %5526 = vmatpush1.msra.mxu0 %v5328_v21  ;;  %5597 = vmatpush1.msra.mxu1 %v5330_v22  ;;  %v5464_v21 = vld [vmem:[#allocation10 + $0x6c0] sm:$0xff]  ;;  %v5466_v22 = vld [vmem:[#allocation10 + $0x6d0] sm:$0xff] }
 0x8aa   :  { %5527 = vmatprep.subr.mxu0 %v5321_v25  ;;  %5598 = vmatprep.subr.mxu1 %v5323_v27  ;;  %v5457_v25 = vld [vmem:[#allocation10 + $0x688] sm:$0xff]  ;;  %v5459_v27 = vld [vmem:[#allocation10 + $0x698] sm:$0xff] }
 0x8ab   :  { %5528 = vmatpush1.msra.mxu0 %v5320_v28  ;;  %5599 = vmatpush1.msra.mxu1 %v5322_v30  ;;  %v5456_v28 = vld [vmem:[#allocation10 + $0x680] sm:$0xff]  ;;  %v5458_v30 = vld [vmem:[#allocation10 + $0x690] sm:$0xff] }
 0x8ac   :  { %5529 = vmatprep.subr.mxu0 %v5313_v31  ;;  %5600 = vmatprep.subr.mxu1 %v5315_v32  ;;  %v5449_v31 = vld [vmem:[#allocation10 + $0x648] sm:$0xff]  ;;  %v5451_v32 = vld [vmem:[#allocation10 + $0x658] sm:$0xff] }
 0x8ad   :  { %5530 = vmatpush1.msra.mxu0 %v5312_v34  ;;  %5601 = vmatpush1.msra.mxu1 %v5314_v35  ;;  %v5448_v34 = vld [vmem:[#allocation10 + $0x640] sm:$0xff]  ;;  %v5450_v35 = vld [vmem:[#allocation10 + $0x650] sm:$0xff] }
 0x8ae   :  { %5531 = vmatprep.subr.mxu0 %v5305_v36  ;;  %5602 = vmatprep.subr.mxu1 %v5307_v37  ;;  %v5441_v36 = vld [vmem:[#allocation10 + $0x608] sm:$0xff]  ;;  %v5443_v37 = vld [vmem:[#allocation10 + $0x618] sm:$0xff] }
 0x8af   :  { %5532 = vmatpush1.msra.mxu0 %v5304_v38  ;;  %5603 = vmatpush1.msra.mxu1 %v5306_v39  ;;  %v5440_v38 = vld [vmem:[#allocation10 + $0x600] sm:$0xff]  ;;  %v5442_v39 = vld [vmem:[#allocation10 + $0x610] sm:$0xff] }
 0x8b0   :  { %5533 = vmatprep.subr.mxu0 %v5297_v40  ;;  %5604 = vmatprep.subr.mxu1 %v5299_v41  ;;  %v5433_v40 = vld [vmem:[#allocation10 + $0x5c8] sm:$0xff]  ;;  %v5435_v41 = vld [vmem:[#allocation10 + $0x5d8] sm:$0xff] }
 0x8b1   :  { %5534 = vmatpush1.msra.mxu0 %v5296_v42  ;;  %5605 = vmatpush1.msra.mxu1 %v5298_v43  ;;  %v5432_v42 = vld [vmem:[#allocation10 + $0x5c0] sm:$0xff]  ;;  %v5434_v43 = vld [vmem:[#allocation10 + $0x5d0] sm:$0xff] }
 0x8b2   :  { %5535 = vmatprep.subr.mxu0 %v5289_v44  ;;  %5606 = vmatprep.subr.mxu1 %v5291_v45 }
 0x8b3   :  { %5536 = vmatpush1.msra.mxu0 %v5288_v24  ;;  %5607 = vmatpush1.msra.mxu1 %v5290_v46  ;;  %v5425_v24 = vld [vmem:[#allocation10 + $0x588] sm:$0xff]  ;;  %v5427_v46 = vld [vmem:[#allocation10 + $0x598] sm:$0xff] }
 0x8b4   :  { %5537 = vmatprep.subr.mxu0 %v5281_v47  ;;  %5608 = vmatprep.subr.mxu1 %v5283_v23  ;;  %v5424_v47 = vld [vmem:[#allocation10 + $0x580] sm:$0xff]  ;;  %v5426_v23 = vld [vmem:[#allocation10 + $0x590] sm:$0xff] }
 0x8b5   :  { %5538 = vmatpush1.msra.mxu0 %v5280_v29  ;;  %5609 = vmatpush1.msra.mxu1 %v5282_v48 }
 0x8b6   :  { %5539 = vmatprep.subr.mxu0 %v5273_v49  ;;  %5610 = vmatprep.subr.mxu1 %v5275_v50  ;;  %v5417_v49 = vld [vmem:[#allocation10 + $0x548] sm:$0xff]  ;;  %v5419_v50 = vld [vmem:[#allocation10 + $0x558] sm:$0xff] }
 0x8b7   :  { %5540 = vmatpush1.msra.mxu0 %v5272_v33  ;;  %5611 = vmatpush1.msra.mxu1 %v5274_v26 }
 0x8b8   :  { %5541 = vmatprep.subr.mxu0 %v5265_v54  ;;  %5612 = vmatprep.subr.mxu1 %v5267_v55  ;;  %v5416_v54 = vld [vmem:[#allocation10 + $0x540] sm:$0xff]  ;;  %v5418_v55 = vld [vmem:[#allocation10 + $0x550] sm:$0xff] }
 0x8b9   :  { %5542 = vmatpush1.msra.mxu0 %v5264_v56  ;;  %5613 = vmatpush1.msra.mxu1 %v5266_v58  ;;  %v5409_v56 = vld [vmem:[#allocation10 + $0x508] sm:$0xff]  ;;  %v5411_v58 = vld [vmem:[#allocation10 + $0x518] sm:$0xff] }
 0x8ba   :  { %5543 = vmatprep.subr.mxu0 %v5257_v59  ;;  %5614 = vmatprep.subr.mxu1 %v5259_v0  ;;  %v5408_v59 = vld [vmem:[#allocation10 + $0x500] sm:$0xff] }
 0x8bb   :  { %5544 = vmatpush1.msra.mxu0 %v5256_v61  ;;  %5615 = vmatpush1.msra.mxu1 %v5258_v62  ;;  %v5410_v62 = vld [vmem:[#allocation10 + $0x510] sm:$0xff] }
 0x8bc   :  { %5545 = vmatprep.subr.mxu0 %v5249_v63  ;;  %5616 = vmatprep.subr.mxu1 %v5251_v1  ;;  %v5401_v63 = vld [vmem:[#allocation10 + $0x4c8] sm:$0xff]  ;;  %v5403_v1 = vld [vmem:[#allocation10 + $0x4d8] sm:$0xff] }
 0x8bd   :  { %5546 = vmatpush1.msra.mxu0 %v5248_v2  ;;  %5617 = vmatpush1.msra.mxu1 %v5250_v3  ;;  %v5400_v2 = vld [vmem:[#allocation10 + $0x4c0] sm:$0xff]  ;;  %v5402_v3 = vld [vmem:[#allocation10 + $0x4d0] sm:$0xff] }
 0x8be   :  { %5547 = vmatprep.subr.mxu0 %v5497_v4  ;;  %5618 = vmatprep.subr.mxu1 %v5499_v5  ;;  %v5393_v4 = vld [vmem:[#allocation10 + $0x488] sm:$0xff] }
 0x8bf   :  { %5548 = vmatpush2.msra.mxu0 %v5496_v6  ;;  %5619 = vmatpush2.msra.mxu1 %v5498_v7  ;;  %v5395_v6 = vld [vmem:[#allocation10 + $0x498] sm:$0xff]  ;;  %v5392_v7 = vld [vmem:[#allocation10 + $0x480] sm:$0xff] }
 0x8c0   :  { %5549 = vmatprep.subr.mxu0 %v5489_v8  ;;  %5620 = vmatprep.subr.mxu1 %v5491_v9  ;;  %v5394_v8 = vld [vmem:[#allocation10 + $0x490] sm:$0xff]  ;;  %v5385_v9 = vld [vmem:[#allocation10 + $0x448] sm:$0xff] }
 0x8c1   :  { %5550 = vmatpush2.msra.mxu0 %v5488_v52  ;;  %5621 = vmatpush2.msra.mxu1 %v5490_v10  ;;  %v5387_v52 = vld [vmem:[#allocation10 + $0x458] sm:$0xff] }
 0x8c2   :  { %5551 = vmatprep.subr.mxu0 %v5481_v11  ;;  %5622 = vmatprep.subr.mxu1 %v5483_v13  ;;  %v5384_v11 = vld [vmem:[#allocation10 + $0x440] sm:$0xff]  ;;  %v5386_v13 = vld [vmem:[#allocation10 + $0x450] sm:$0xff] }
 0x8c3   :  { %5552 = vmatpush2.msra.mxu0 %v5480_v57  ;;  %5623 = vmatpush2.msra.mxu1 %v5482_v14  ;;  %v5112_v57 = vld [vmem:[#allocation2 + $0x6] ss:$8 sm:$0xf] }
 0x8c4   :  { %5553 = vmatprep.subr.mxu0 %v5473_v15  ;;  %5624 = vmatprep.subr.mxu1 %v5475_v16  ;;  %v5377_v14 = vld [vmem:[#allocation10 + $0x408] sm:$0xff]  ;;  %v5379_v15 = vld [vmem:[#allocation10 + $0x418] sm:$0xff] }
 0x8c5   :  { %5554 = vmatpush2.msra.mxu0 %v5472_v60  ;;  %5625 = vmatpush2.msra.mxu1 %v5474_v17  ;;  %v5376_v60 = vld [vmem:[#allocation10 + $0x400] sm:$0xff]  ;;  %v5378_v17 = vld [vmem:[#allocation10 + $0x410] sm:$0xff] }
 0x8c6   :  { %5555 = vmatprep.subr.mxu0 %v5465_v19  ;;  %5626 = vmatprep.subr.mxu1 %v5467_v20 }
 0x8c7   :  { %5556 = vmatpush2.msra.mxu0 %v5464_v21  ;;  %5627 = vmatpush2.msra.mxu1 %v5466_v22  ;;  %v5373_v21 = vld [vmem:[#allocation10 + $0x3e8] sm:$0xff]  ;;  %v5375_v22 = vld [vmem:[#allocation10 + $0x3f8] sm:$0xff] }
 0x8c8   :  { %5557 = vmatprep.subr.mxu0 %v5457_v25  ;;  %5628 = vmatprep.subr.mxu1 %v5459_v27 }
 0x8c9   :  { %5558 = vmatpush2.msra.mxu0 %v5456_v28  ;;  %5629 = vmatpush2.msra.mxu1 %v5458_v30 }
 0x8ca   :  { %5559 = vmatprep.subr.mxu0 %v5449_v31  ;;  %5630 = vmatprep.subr.mxu1 %v5451_v32 }
 0x8cb   :  { %5560 = vmatpush2.msra.mxu0 %v5448_v34  ;;  %5631 = vmatpush2.msra.mxu1 %v5450_v35 }
 0x8cc   :  { %5561 = vmatprep.subr.mxu0 %v5441_v36  ;;  %5632 = vmatprep.subr.mxu1 %v5443_v37 }
 0x8cd   :  { %5562 = vmatpush2.msra.mxu0 %v5440_v38  ;;  %5633 = vmatpush2.msra.mxu1 %v5442_v39 }
 0x8ce   :  { %5563 = vmatprep.subr.mxu0 %v5433_v40  ;;  %5634 = vmatprep.subr.mxu1 %v5435_v41  ;;  %v5175_v40 = vld [vmem:[#allocation4] sm:$0x3] }
 0x8cf   :  { %5564 = vmatpush2.msra.mxu0 %v5432_v42  ;;  %5635 = vmatpush2.msra.mxu1 %v5434_v43 }
 0x8d0   :  { %5565 = vmatprep.subr.mxu0 %v5425_v24  ;;  %5636 = vmatprep.subr.mxu1 %v5427_v46 }
 0x8d1   :  { %5566 = vmatpush2.msra.mxu0 %v5424_v47  ;;  %5637 = vmatpush2.msra.mxu1 %v5426_v23 }
 0x8d2   :  { %5567 = vmatprep.subr.mxu0 %v5417_v49  ;;  %5638 = vmatprep.subr.mxu1 %v5419_v50 }
 0x8d3   :  { %5568 = vmatpush2.msra.mxu0 %v5416_v54  ;;  %5639 = vmatpush2.msra.mxu1 %v5418_v55 }
 0x8d4   :  { %5569 = vmatprep.subr.mxu0 %v5409_v56  ;;  %5640 = vmatprep.subr.mxu1 %v5411_v58  ;;  %v5144_v56 = vld [vmem:[#allocation2 + $0x21] ss:$8 sm:$0xf] }
 0x8d5   :  { %5570 = vmatpush2.msra.mxu0 %v5408_v59  ;;  %5641 = vmatpush2.msra.mxu1 %v5410_v62 }
 0x8d6   :  { %5571 = vmatprep.subr.mxu0 %v5401_v63  ;;  %5642 = vmatprep.subr.mxu1 %v5403_v1 }
 0x8d7   :  { %5572 = vmatpush2.msra.mxu0 %v5400_v2  ;;  %5643 = vmatpush2.msra.mxu1 %v5402_v3 }
 0x8d8   :  { %5573 = vmatprep.subr.mxu0 %v5393_v4  ;;  %5644 = vmatprep.subr.mxu1 %v5395_v6 }
 0x8d9   :  { %5574 = vmatpush2.msra.mxu0 %v5392_v7  ;;  %5645 = vmatpush2.msra.mxu1 %v5394_v8 }
 0x8da   :  { %5575 = vmatprep.subr.mxu0 %v5385_v9  ;;  %5646 = vmatprep.subr.mxu1 %v5387_v52  ;;  %v5234_v9 = vrot.slane %v5175_v40, 1 }
 0x8db   :  { %5576 = vmatpush2.msra.mxu0 %v5384_v11  ;;  %5647 = vmatpush2.msra.mxu1 %v5386_v13 }
 0x8dc   :  { %5577 = vmatprep.subr.mxu0 %v5377_v14  ;;  %5648 = vmatprep.subr.mxu1 %v5379_v15 }
 0x8dd   :  { %5578 = vmatpush2.msra.mxu0 %v5376_v60  ;;  %5649 = vmatpush2.msra.mxu1 %v5378_v17 }
 0x8de   :  { %5657 = vmatprep.subr.mxu0 %v5373_v21  ;;  %5728 = vmatprep.subr.mxu1 %v5375_v22  ;;  %v5374_v21 = vld [vmem:[#allocation10 + $0x3f0] sm:$0xff]  ;;  %v5365_v22 = vld [vmem:[#allocation10 + $0x3a8] sm:$0xff] }
 0x91c   :  { %v4893_v44 = vpop.f32.mrf.mxu0  ;;  %v4964_v45 = vpop.f32.mrf.mxu1 }
 0x91e   :  { %v4895_v29 = vpop.f32.mrf.mxu0  ;;  %v4966_v48 = vpop.f32.mrf.mxu1 }
 0x91f   :  { %v5117_v33 = vcombine.low %v4893_v44, %v4895_v29  ;;  %v5118_v26 = vcombine.low %v4964_v45, %v4966_v48 }
 0x921   :  { %v5125_v0 = vrot.slane %v5117_v33, %v6460_v53  ;;  %v5132_v61 = vrot.slane %v5118_v26, %v6460_v53 }
 0x923   :  { %v5133_v5 = vcombine.low %v5125_v0, %v5132_v61 }
 0x925   :  { %v5140_v10 = vrot.slane %v5133_v5, %v6460_v53 }
 0x927   :  { %v5142_v16 = vadd.f32 %v5140_v10, %v5112_v57 }
 0x929   :  { %v5992_v19 = vmul.f32 -1.442695, %v5142_v16  ;;  %v5183_v20 = vrot.slane %v5142_v16, 1  ;;  %v5194_v27 = vrot.slane %v5142_v16, 3  ;;  %v5191_v31 = vrot.slane %v5142_v16, 2 }
 0x92b   :  { %6205 = vpow2.f32 %v5992_v19  ;;  %v5993_v25 = vmul.f32 -1.442695, %v5183_v20  ;;  %v5994_v28 = vmul.f32 -1.442695, %v5194_v27  ;;  %v5372_v20 = vld [vmem:[#allocation10 + $0x3e0] sm:$0xff] }
 0x92c   :  { %v5364_v27 = vld [vmem:[#allocation10 + $0x3a0] sm:$0xff] }
 0x92d   :  { %6207 = vpow2.f32 %v5993_v25  ;;  %v5367_v25 = vld [vmem:[#allocation10 + $0x3b8] sm:$0xff] }
 0x92e   :  { %6209 = vpow2.f32 %v5994_v28  ;;  %v5366_v28 = vld [vmem:[#allocation10 + $0x3b0] sm:$0xff] }
 0x938   :  { %v6206_v30 = vpop.eup %6205 }
 0x939   :  { %v5179_v32 = vadd.f32 1.0, %v6206_v30  ;;  %v5359_v30 = vld [vmem:[#allocation10 + $0x378] sm:$0xff] }
 0x93a   :  { %v6208_v34 = vpop.eup %6207 }
 0x93b   :  { %6211 = vrcp.f32 %v5179_v32  ;;  %v5188_v35 = vadd.f32 1.0, %v6208_v34  ;;  %v6210_v36 = vpop.eup %6209  ;;  %v5349_v32 = vld [vmem:[#allocation10 + $0x328] sm:$0xff]  ;;  %v5351_v34 = vld [vmem:[#allocation10 + $0x338] sm:$0xff] }
 0x93c   :  { %6213 = vtanh.f32 %v5191_v31  ;;  %v5199_v41 = vadd.f32 1.0, %v6210_v36  ;;  %v5358_v31 = vld [vmem:[#allocation10 + $0x370] sm:$0xff] }
 0x93d   :  { %6215 = vrcp.f32 %v5188_v35  ;;  %v5348_v35 = vld [vmem:[#allocation10 + $0x320] sm:$0xff]  ;;  %v5350_v36 = vld [vmem:[#allocation10 + $0x330] sm:$0xff] }
 0x93e   :  { %6217 = vrcp.f32 %v5199_v41  ;;  %v5333_v41 = vld [vmem:[#allocation10 + $0x2a8] sm:$0xff] }
 0x948   :  { %v6212_v37 = vpop.eup %6211 }
 0x949   :  { %v6214_v38 = vpop.eup %6213 }
 0x94a   :  { %v6216_v39 = vpop.eup %6215  ;;  %v5203_v43 = vmul.f32 %v6214_v38, %v6212_v37  ;;  %v5341_v37 = vld [vmem:[#allocation10 + $0x2e8] sm:$0xff]  ;;  %v5343_v38 = vld [vmem:[#allocation10 + $0x2f8] sm:$0xff] }
 0x94b   :  { %v5202_v42 = vmul.f32 %v6216_v39, %v5175_v40  ;;  %v6218_v45 = vpop.eup %6217  ;;  %v5340_v39 = vld [vmem:[#allocation10 + $0x2e0] sm:$0xff]  ;;  %v5342_v40 = vld [vmem:[#allocation10 + $0x2f0] sm:$0xff] }
 0x94d   :  { %v5204_v44 = vadd.f32 %v5203_v43, %v5202_v42  ;;  %v5335_v42 = vld [vmem:[#allocation10 + $0x2b8] sm:$0xff]  ;;  %v5332_v43 = vld [vmem:[#allocation10 + $0x2a0] sm:$0xff] }
 0x94f   :  { %6219 = vtanh.f32 %v5204_v44  ;;  %5243 = vst.msk [vmem:[#allocation4] sm:$0x1] %vm6466_vm2, %v5204_v44  ;;  %v5334_v44 = vld [vmem:[#allocation10 + $0x2b0] sm:$0xff] }
 0x95c   :  { %v6220_v24 = vpop.eup %6219 }
 0x95d   :  { %v5206_v46 = vmul.f32 %v6220_v24, %v6218_v45  ;;  %v5035_v47 = vpop.f32.mrf.mxu0  ;;  %v5106_v23 = vpop.f32.mrf.mxu1  ;;  %v5325_v45 = vld [vmem:[#allocation10 + $0x268] sm:$0xff]  ;;  %v5327_v24 = vld [vmem:[#allocation10 + $0x278] sm:$0xff] }
 0x95f   :  { %5245 = vst [vmem:[#allocation13 + $0x6] sm:$0x1] %v5206_v46  ;;  %5241 = vst.msk [vmem:[#allocation3] sm:$0x1] %vm6466_vm2, %v5206_v46  ;;  %v5037_v29 = vpop.f32.mrf.mxu0  ;;  %v5108_v48 = vpop.f32.mrf.mxu1  ;;  %v5324_v46 = vld [vmem:[#allocation10 + $0x260] sm:$0xff] }
 0x960   :  { %v5149_v49 = vcombine.low %v5035_v47, %v5037_v29  ;;  %v5150_v50 = vcombine.low %v5106_v23, %v5108_v48  ;;  %v5326_v47 = vld [vmem:[#allocation10 + $0x270] sm:$0xff]  ;;  %v5317_v23 = vld [vmem:[#allocation10 + $0x228] sm:$0xff]  ;;  %v5319_v29 = vld [vmem:[#allocation10 + $0x238] sm:$0xff] }
 0x961   :  { %v5316_v48 = vld [vmem:[#allocation10 + $0x220] sm:$0xff] }
 0x962   :  { %v5157_v33 = vrot.slane %v5149_v49, %v6460_v53  ;;  %v5164_v26 = vrot.slane %v5150_v50, %v6460_v53  ;;  %v5318_v49 = vld [vmem:[#allocation10 + $0x230] sm:$0xff]  ;;  %v5309_v50 = vld [vmem:[#allocation10 + $0x1e8] sm:$0xff] }
 0x964   :  { %v5165_v54 = vcombine.low %v5157_v33, %v5164_v26  ;;  %v5311_v33 = vld [vmem:[#allocation10 + $0x1f8] sm:$0xff]  ;;  %v5308_v26 = vld [vmem:[#allocation10 + $0x1e0] sm:$0xff] }
 0x966   :  { %v5172_v55 = vrot.slane %v5165_v54, %v6460_v53  ;;  %v5310_v54 = vld [vmem:[#allocation10 + $0x1f0] sm:$0xff] }
 0x968   :  { %v5174_v58 = vadd.f32 %v5172_v55, %v5144_v56  ;;  %v5301_v55 = vld [vmem:[#allocation10 + $0x1a8] sm:$0xff]  ;;  %v5303_v56 = vld [vmem:[#allocation10 + $0x1b8] sm:$0xff] }
 0x96a   :  { %v5995_v59 = vmul.f32 -1.442695, %v5174_v58  ;;  %v5214_v0 = vrot.slane %v5174_v58, 1  ;;  %v5225_v62 = vrot.slane %v5174_v58, 3  ;;  %v5222_v2 = vrot.slane %v5174_v58, 2  ;;  %v5300_v58 = vld [vmem:[#allocation10 + $0x1a0] sm:$0xff] }
 0x96c   :  { %6221 = vpow2.f32 %v5995_v59  ;;  %v5996_v61 = vmul.f32 -1.442695, %v5214_v0  ;;  %v5997_v63 = vmul.f32 -1.442695, %v5225_v62  ;;  %v5302_v59 = vld [vmem:[#allocation10 + $0x1b0] sm:$0xff]  ;;  %v5293_v0 = vld [vmem:[#allocation10 + $0x168] sm:$0xff] }
 0x96d   :  { %v5292_v62 = vld [vmem:[#allocation10 + $0x160] sm:$0xff] }
 0x96e   :  { %6223 = vpow2.f32 %v5996_v61  ;;  %v5295_v61 = vld [vmem:[#allocation10 + $0x178] sm:$0xff] }
 0x96f   :  { %6225 = vpow2.f32 %v5997_v63  ;;  %v5294_v63 = vld [vmem:[#allocation10 + $0x170] sm:$0xff] }
 0x979   :  { %v6222_v1 = vpop.eup %6221 }
 0x97a   :  { %v5210_v3 = vadd.f32 1.0, %v6222_v1  ;;  %v5285_v1 = vld [vmem:[#allocation10 + $0x128] sm:$0xff] }
 0x97b   :  { %v6224_v4 = vpop.eup %6223 }
 0x97c   :  { %6227 = vrcp.f32 %v5210_v3  ;;  %v5219_v5 = vadd.f32 1.0, %v6224_v4  ;;  %v6226_v6 = vpop.eup %6225  ;;  %v5284_v3 = vld [vmem:[#allocation10 + $0x120] sm:$0xff]  ;;  %v5286_v4 = vld [vmem:[#allocation10 + $0x130] sm:$0xff] }
 0x97d   :  { %6229 = vtanh.f32 %v5222_v2  ;;  %v5230_v10 = vadd.f32 1.0, %v6226_v6  ;;  %v5287_v2 = vld [vmem:[#allocation10 + $0x138] sm:$0xff] }
 0x97e   :  { %6231 = vrcp.f32 %v5219_v5  ;;  %v5277_v5 = vld [vmem:[#allocation10 + $0xe8] sm:$0xff]  ;;  %v5279_v6 = vld [vmem:[#allocation10 + $0xf8] sm:$0xff] }
 0x97f   :  { %6233 = vrcp.f32 %v5230_v10  ;;  %v5268_v10 = vld [vmem:[#allocation10 + $0xa0] sm:$0xff] }
 0x989   :  { %v6228_v7 = vpop.eup %6227 }
 0x98a   :  { %v6230_v8 = vpop.eup %6229 }
 0x98b   :  { %v6232_v52 = vpop.eup %6231  ;;  %v5237_v13 = vmul.f32 %v6230_v8, %v6228_v7  ;;  %v5276_v7 = vld [vmem:[#allocation10 + $0xe0] sm:$0xff]  ;;  %v5278_v8 = vld [vmem:[#allocation10 + $0xf0] sm:$0xff] }
 0x98c   :  { %v5236_v11 = vmul.f32 %v6232_v52, %v5234_v9  ;;  %v6234_v14 = vpop.eup %6233  ;;  %v5269_v9 = vld [vmem:[#allocation10 + $0xa8] sm:$0xff]  ;;  %v5271_v52 = vld [vmem:[#allocation10 + $0xb8] sm:$0xff] }
 0x98e   :  { %v5238_v57 = vadd.f32 %v5237_v13, %v5236_v11  ;;  %v5270_v11 = vld [vmem:[#allocation10 + $0xb0] sm:$0xff]  ;;  %v5261_v13 = vld [vmem:[#allocation10 + $0x68] sm:$0xff] }
 0x990   :  { %6235 = vtanh.f32 %v5238_v57  ;;  %5244 = vst.msk [vmem:[#allocation4 + $0x1] sm:$0x1] %vm6466_vm2, %v5238_v57  ;;  %v5263_v57 = vld [vmem:[#allocation10 + $0x78] sm:$0xff] }
 0x99d   :  { %v6236_v15 = vpop.eup %6235 }
 0x99e   :  { %v5240_v16 = vmul.f32 %v6236_v15, %v6234_v14  ;;  %v5260_v14 = vld [vmem:[#allocation10 + $0x60] sm:$0xff]  ;;  %v5262_v15 = vld [vmem:[#allocation10 + $0x70] sm:$0xff] }
 0x9a0   :  { %5246 = vst [vmem:[#allocation13 + $0x9] sm:$0x1] %v5240_v16  ;;  %5242 = vst.msk [vmem:[#allocation3 + $0x1] sm:$0x1] %vm6466_vm2, %v5240_v16  ;;  %v5253_v16 = vld [vmem:[#allocation10 + $0x28] sm:$0xff] }
 0x9a7   :  { %v5247_v60 = vld [vmem:[#allocation3] sm:$0x3] }
 0x9a8   :  { %v5512_v17 = vrot.slane %v5247_v60, %v6432_v12  ;;  %v6615_v19 = vrot.slane %v5247_v60, %v6435_v18  ;;  %v5357_v12 = vld [vmem:[#allocation10 + $0x368] sm:$0xff]  ;;  %v5356_v18 = vld [vmem:[#allocation10 + $0x360] sm:$0xff]  ;;  %v5255_v60 = vld [vmem:[#allocation10 + $0x38] sm:$0xff] }
 0x9aa   :  { %5579 = vmatprep.mubr.f32.mxu0 %v5512_v17  ;;  %5650 = vmatprep.mubr.f32.mxu1 %v5512_v17 }
 0x9ab   :  { %5580 = vmatmul.mubr.f32.vlgmr.msra.gmra.mxu0 %v6615_v19  ;;  %5651 = vmatmul.mubr.f32.vlgmr.msra.gmra.mxu1 %v6615_v19 }
 0x9ac   :  { %5658 = vmatpush1.msra.mxu0 %v5372_v20  ;;  %5729 = vmatpush1.msra.mxu1 %v5374_v21  ;;  %v5254_v20 = vld [vmem:[#allocation10 + $0x30] sm:$0xff]  ;;  %v5501_v21 = vld [vmem:[#allocation10 + $0x7e8] sm:$0xff] }
 0x9ad   :  { %5659 = vmatprep.subr.mxu0 %v5365_v22  ;;  %5721 = vmatprep.mubr.f32.mxu0 %v5512_v17  ;;  %v5503_v22 = vld [vmem:[#allocation10 + $0x7f8] sm:$0xff] }
 0x9ae   :  { %5730 = vmatprep.subr.mxu1 %v5367_v25  ;;  %5792 = vmatprep.mubr.f32.mxu1 %v5512_v17  ;;  %v5252_v17 = vld [vmem:[#allocation10 + $0x20] sm:$0xff] }
 0x9af   :  { %5660 = vmatpush1.msra.mxu0 %v5364_v27  ;;  %5731 = vmatpush1.msra.mxu1 %v5366_v28  ;;  %v5500_v25 = vld [vmem:[#allocation10 + $0x7e0] sm:$0xff]  ;;  %v5502_v27 = vld [vmem:[#allocation10 + $0x7f0] sm:$0xff]  ;;  %v5493_v28 = vld [vmem:[#allocation10 + $0x7a8] sm:$0xff] }
 0x9b0   :  { %5661 = vmatprep.subr.mxu0 %v5357_v12  ;;  %5732 = vmatprep.subr.mxu1 %v5359_v30  ;;  %v5495_v12 = vld [vmem:[#allocation10 + $0x7b8] sm:$0xff]  ;;  %v5492_v30 = vld [vmem:[#allocation10 + $0x7a0] sm:$0xff] }
 0x9b1   :  { %5662 = vmatpush1.msra.mxu0 %v5356_v18  ;;  %5733 = vmatpush1.msra.mxu1 %v5358_v31  ;;  %v5494_v18 = vld [vmem:[#allocation10 + $0x7b0] sm:$0xff]  ;;  %v5485_v31 = vld [vmem:[#allocation10 + $0x768] sm:$0xff] }
 0x9b2   :  { %5663 = vmatprep.subr.mxu0 %v5349_v32  ;;  %5734 = vmatprep.subr.mxu1 %v5351_v34  ;;  %v5487_v32 = vld [vmem:[#allocation10 + $0x778] sm:$0xff]  ;;  %v5484_v34 = vld [vmem:[#allocation10 + $0x760] sm:$0xff] }
 0x9b3   :  { %5664 = vmatpush1.msra.mxu0 %v5348_v35  ;;  %5735 = vmatpush1.msra.mxu1 %v5350_v36  ;;  %v5486_v35 = vld [vmem:[#allocation10 + $0x770] sm:$0xff]  ;;  %v5477_v36 = vld [vmem:[#allocation10 + $0x728] sm:$0xff] }
 0x9b4   :  { %5665 = vmatprep.subr.mxu0 %v5341_v37  ;;  %5736 = vmatprep.subr.mxu1 %v5343_v38  ;;  %v5479_v37 = vld [vmem:[#allocation10 + $0x738] sm:$0xff]  ;;  %v5476_v38 = vld [vmem:[#allocation10 + $0x720] sm:$0xff] }
 0x9b5   :  { %5666 = vmatpush1.msra.mxu0 %v5340_v39  ;;  %5737 = vmatpush1.msra.mxu1 %v5342_v40  ;;  %v5478_v39 = vld [vmem:[#allocation10 + $0x730] sm:$0xff]  ;;  %v5469_v40 = vld [vmem:[#allocation10 + $0x6e8] sm:$0xff] }
 0x9b6   :  { %5667 = vmatprep.subr.mxu0 %v5333_v41  ;;  %5738 = vmatprep.subr.mxu1 %v5335_v42  ;;  %v5471_v41 = vld [vmem:[#allocation10 + $0x6f8] sm:$0xff]  ;;  %v5468_v42 = vld [vmem:[#allocation10 + $0x6e0] sm:$0xff] }
 0x9b7   :  { %5668 = vmatpush1.msra.mxu0 %v5332_v43  ;;  %5739 = vmatpush1.msra.mxu1 %v5334_v44  ;;  %v5470_v43 = vld [vmem:[#allocation10 + $0x6f0] sm:$0xff]  ;;  %v5461_v44 = vld [vmem:[#allocation10 + $0x6a8] sm:$0xff] }
 0x9b8   :  { %5669 = vmatprep.subr.mxu0 %v5325_v45  ;;  %5740 = vmatprep.subr.mxu1 %v5327_v24  ;;  %v5463_v45 = vld [vmem:[#allocation10 + $0x6b8] sm:$0xff]  ;;  %v5460_v24 = vld [vmem:[#allocation10 + $0x6a0] sm:$0xff] }
 0x9b9   :  { %5670 = vmatpush1.msra.mxu0 %v5324_v46  ;;  %5741 = vmatpush1.msra.mxu1 %v5326_v47  ;;  %v5462_v46 = vld [vmem:[#allocation10 + $0x6b0] sm:$0xff]  ;;  %v5453_v47 = vld [vmem:[#allocation10 + $0x668] sm:$0xff] }
 0x9ba   :  { %5671 = vmatprep.subr.mxu0 %v5317_v23  ;;  %5742 = vmatprep.subr.mxu1 %v5319_v29  ;;  %v5455_v23 = vld [vmem:[#allocation10 + $0x678] sm:$0xff]  ;;  %v5452_v29 = vld [vmem:[#allocation10 + $0x660] sm:$0xff] }
 0x9bb   :  { %5672 = vmatpush1.msra.mxu0 %v5316_v48  ;;  %5743 = vmatpush1.msra.mxu1 %v5318_v49  ;;  %v5454_v48 = vld [vmem:[#allocation10 + $0x670] sm:$0xff]  ;;  %v5445_v49 = vld [vmem:[#allocation10 + $0x628] sm:$0xff] }
 0x9bc   :  { %5673 = vmatprep.subr.mxu0 %v5309_v50  ;;  %5744 = vmatprep.subr.mxu1 %v5311_v33  ;;  %v5447_v50 = vld [vmem:[#allocation10 + $0x638] sm:$0xff]  ;;  %v5444_v33 = vld [vmem:[#allocation10 + $0x620] sm:$0xff] }
 0x9bd   :  { %5674 = vmatpush1.msra.mxu0 %v5308_v26  ;;  %5745 = vmatpush1.msra.mxu1 %v5310_v54  ;;  %v5446_v26 = vld [vmem:[#allocation10 + $0x630] sm:$0xff]  ;;  %v5437_v54 = vld [vmem:[#allocation10 + $0x5e8] sm:$0xff] }
 0x9be   :  { %5675 = vmatprep.subr.mxu0 %v5301_v55  ;;  %5746 = vmatprep.subr.mxu1 %v5303_v56  ;;  %v5439_v55 = vld [vmem:[#allocation10 + $0x5f8] sm:$0xff]  ;;  %v5436_v56 = vld [vmem:[#allocation10 + $0x5e0] sm:$0xff] }
 0x9bf   :  { %5676 = vmatpush1.msra.mxu0 %v5300_v58  ;;  %5747 = vmatpush1.msra.mxu1 %v5302_v59  ;;  %v5438_v58 = vld [vmem:[#allocation10 + $0x5f0] sm:$0xff]  ;;  %v5429_v59 = vld [vmem:[#allocation10 + $0x5a8] sm:$0xff] }
 0x9c0   :  { %5677 = vmatprep.subr.mxu0 %v5293_v0  ;;  %5748 = vmatprep.subr.mxu1 %v5295_v61  ;;  %v5431_v0 = vld [vmem:[#allocation10 + $0x5b8] sm:$0xff]  ;;  %v5428_v61 = vld [vmem:[#allocation10 + $0x5a0] sm:$0xff] }
 0x9c1   :  { %5678 = vmatpush1.msra.mxu0 %v5292_v62  ;;  %5749 = vmatpush1.msra.mxu1 %v5294_v63  ;;  %v5430_v62 = vld [vmem:[#allocation10 + $0x5b0] sm:$0xff]  ;;  %v5421_v63 = vld [vmem:[#allocation10 + $0x568] sm:$0xff] }
 0x9c2   :  { %5679 = vmatprep.subr.mxu0 %v5285_v1  ;;  %5750 = vmatprep.subr.mxu1 %v5287_v2  ;;  %v5423_v1 = vld [vmem:[#allocation10 + $0x578] sm:$0xff]  ;;  %v5420_v2 = vld [vmem:[#allocation10 + $0x560] sm:$0xff] }
 0x9c3   :  { %5680 = vmatpush1.msra.mxu0 %v5284_v3  ;;  %5751 = vmatpush1.msra.mxu1 %v5286_v4  ;;  %v5422_v3 = vld [vmem:[#allocation10 + $0x570] sm:$0xff]  ;;  %v5413_v4 = vld [vmem:[#allocation10 + $0x528] sm:$0xff] }
 0x9c4   :  { %5681 = vmatprep.subr.mxu0 %v5277_v5  ;;  %5752 = vmatprep.subr.mxu1 %v5279_v6  ;;  %v5415_v5 = vld [vmem:[#allocation10 + $0x538] sm:$0xff]  ;;  %v5412_v6 = vld [vmem:[#allocation10 + $0x520] sm:$0xff] }
 0x9c5   :  { %5682 = vmatpush1.msra.mxu0 %v5276_v7  ;;  %5753 = vmatpush1.msra.mxu1 %v5278_v8  ;;  %v5414_v7 = vld [vmem:[#allocation10 + $0x530] sm:$0xff]  ;;  %v5405_v8 = vld [vmem:[#allocation10 + $0x4e8] sm:$0xff] }
 0x9c6   :  { %5683 = vmatprep.subr.mxu0 %v5269_v9  ;;  %5754 = vmatprep.subr.mxu1 %v5271_v52  ;;  %v5407_v9 = vld [vmem:[#allocation10 + $0x4f8] sm:$0xff]  ;;  %v5404_v52 = vld [vmem:[#allocation10 + $0x4e0] sm:$0xff] }
 0x9c7   :  { %5684 = vmatpush1.msra.mxu0 %v5268_v10  ;;  %5755 = vmatpush1.msra.mxu1 %v5270_v11  ;;  %v5406_v10 = vld [vmem:[#allocation10 + $0x4f0] sm:$0xff]  ;;  %v5397_v11 = vld [vmem:[#allocation10 + $0x4a8] sm:$0xff] }
 0x9c8   :  { %5685 = vmatprep.subr.mxu0 %v5261_v13  ;;  %5756 = vmatprep.subr.mxu1 %v5263_v57  ;;  %v5399_v13 = vld [vmem:[#allocation10 + $0x4b8] sm:$0xff]  ;;  %v5396_v57 = vld [vmem:[#allocation10 + $0x4a0] sm:$0xff] }
 0x9c9   :  { %5686 = vmatpush1.msra.mxu0 %v5260_v14  ;;  %5757 = vmatpush1.msra.mxu1 %v5262_v15  ;;  %v5398_v14 = vld [vmem:[#allocation10 + $0x4b0] sm:$0xff]  ;;  %v5389_v15 = vld [vmem:[#allocation10 + $0x468] sm:$0xff] }
 0x9ca   :  { %5687 = vmatprep.subr.mxu0 %v5253_v16  ;;  %5758 = vmatprep.subr.mxu1 %v5255_v60  ;;  %v5391_v16 = vld [vmem:[#allocation10 + $0x478] sm:$0xff]  ;;  %v5388_v60 = vld [vmem:[#allocation10 + $0x460] sm:$0xff] }
 0x9cb   :  { %5688 = vmatpush1.msra.mxu0 %v5252_v17  ;;  %5759 = vmatpush1.msra.mxu1 %v5254_v20  ;;  %v5390_v17 = vld [vmem:[#allocation10 + $0x470] sm:$0xff]  ;;  %v5381_v20 = vld [vmem:[#allocation10 + $0x428] sm:$0xff] }
 0x9cc   :  { %5689 = vmatprep.subr.mxu0 %v5501_v21  ;;  %5760 = vmatprep.subr.mxu1 %v5503_v22  ;;  %v5383_v21 = vld [vmem:[#allocation10 + $0x438] sm:$0xff]  ;;  %v5380_v22 = vld [vmem:[#allocation10 + $0x420] sm:$0xff] }
 0x9cd   :  { %5690 = vmatpush2.msra.mxu0 %v5500_v25  ;;  %5761 = vmatpush2.msra.mxu1 %v5502_v27  ;;  %v5382_v25 = vld [vmem:[#allocation10 + $0x430] sm:$0xff] }
 0x9ce   :  { %5691 = vmatprep.subr.mxu0 %v5493_v28  ;;  %5762 = vmatprep.subr.mxu1 %v5495_v12 }
 0x9cf   :  { %5692 = vmatpush2.msra.mxu0 %v5492_v30  ;;  %5763 = vmatpush2.msra.mxu1 %v5494_v18 }
 0x9d0   :  { %5693 = vmatprep.subr.mxu0 %v5485_v31  ;;  %5764 = vmatprep.subr.mxu1 %v5487_v32 }
 0x9d1   :  { %5694 = vmatpush2.msra.mxu0 %v5484_v34  ;;  %5765 = vmatpush2.msra.mxu1 %v5486_v35 }
 0x9d2   :  { %5695 = vmatprep.subr.mxu0 %v5477_v36  ;;  %5766 = vmatprep.subr.mxu1 %v5479_v37  ;;  %v5800_v37 = vld [vmem:[#allocation2 + $0x7] ss:$8 sm:$0xf] }
 0x9d3   :  { %5696 = vmatpush2.msra.mxu0 %v5476_v38  ;;  %5767 = vmatpush2.msra.mxu1 %v5478_v39 }
 0x9d4   :  { %5697 = vmatprep.subr.mxu0 %v5469_v40  ;;  %5768 = vmatprep.subr.mxu1 %v5471_v41 }
 0x9d5   :  { %5698 = vmatpush2.msra.mxu0 %v5468_v42  ;;  %5769 = vmatpush2.msra.mxu1 %v5470_v43 }
 0x9d6   :  { %5699 = vmatprep.subr.mxu0 %v5461_v44  ;;  %5770 = vmatprep.subr.mxu1 %v5463_v45 }
 0x9d7   :  { %5700 = vmatpush2.msra.mxu0 %v5460_v24  ;;  %5771 = vmatpush2.msra.mxu1 %v5462_v46 }
 0x9d8   :  { %5701 = vmatprep.subr.mxu0 %v5453_v47  ;;  %5772 = vmatprep.subr.mxu1 %v5455_v23 }
 0x9d9   :  { %5702 = vmatpush2.msra.mxu0 %v5452_v29  ;;  %5773 = vmatpush2.msra.mxu1 %v5454_v48 }
 0x9da   :  { %5703 = vmatprep.subr.mxu0 %v5445_v49  ;;  %5774 = vmatprep.subr.mxu1 %v5447_v50  ;;  %v5863_v49 = vld [vmem:[#allocation4] sm:$0x3] }
 0x9db   :  { %5704 = vmatpush2.msra.mxu0 %v5444_v33  ;;  %5775 = vmatpush2.msra.mxu1 %v5446_v26 }
 0x9dc   :  { %5705 = vmatprep.subr.mxu0 %v5437_v54  ;;  %5776 = vmatprep.subr.mxu1 %v5439_v55 }
 0x9dd   :  { %5706 = vmatpush2.msra.mxu0 %v5436_v56  ;;  %5777 = vmatpush2.msra.mxu1 %v5438_v58 }
 0x9de   :  { %5707 = vmatprep.subr.mxu0 %v5429_v59  ;;  %5778 = vmatprep.subr.mxu1 %v5431_v0 }
 0x9df   :  { %5708 = vmatpush2.msra.mxu0 %v5428_v61  ;;  %5779 = vmatpush2.msra.mxu1 %v5430_v62 }
 0x9e0   :  { %5709 = vmatprep.subr.mxu0 %v5421_v63  ;;  %5780 = vmatprep.subr.mxu1 %v5423_v1 }
 0x9e1   :  { %5710 = vmatpush2.msra.mxu0 %v5420_v2  ;;  %5781 = vmatpush2.msra.mxu1 %v5422_v3 }
 0x9e2   :  { %5711 = vmatprep.subr.mxu0 %v5413_v4  ;;  %5782 = vmatprep.subr.mxu1 %v5415_v5 }
 0x9e3   :  { %5712 = vmatpush2.msra.mxu0 %v5412_v6  ;;  %5783 = vmatpush2.msra.mxu1 %v5414_v7  ;;  %v5832_v6 = vld [vmem:[#allocation2 + $0x20] ss:$8 sm:$0xf] }
 0x9e4   :  { %5713 = vmatprep.subr.mxu0 %v5405_v8  ;;  %5784 = vmatprep.subr.mxu1 %v5407_v9 }
 0x9e5   :  { %5714 = vmatpush2.msra.mxu0 %v5404_v52  ;;  %5785 = vmatpush2.msra.mxu1 %v5406_v10 }
 0x9e6   :  { %5715 = vmatprep.subr.mxu0 %v5397_v11  ;;  %5786 = vmatprep.subr.mxu1 %v5399_v13 }
 0x9e7   :  { %5716 = vmatpush2.msra.mxu0 %v5396_v57  ;;  %5787 = vmatpush2.msra.mxu1 %v5398_v14 }
 0x9e8   :  { %5717 = vmatprep.subr.mxu0 %v5389_v15  ;;  %5788 = vmatprep.subr.mxu1 %v5391_v16 }
 0x9e9   :  { %5718 = vmatpush2.msra.mxu0 %v5388_v60  ;;  %5789 = vmatpush2.msra.mxu1 %v5390_v17 }
 0x9ea   :  { %5719 = vmatprep.subr.mxu0 %v5381_v20  ;;  %5790 = vmatprep.subr.mxu1 %v5383_v21  ;;  %v5922_v20 = vrot.slane %v5863_v49, 1 }
 0x9eb   :  { %5720 = vmatpush2.msra.mxu0 %v5380_v22  ;;  %5791 = vmatpush2.msra.mxu1 %v5382_v25 }
 0x9ec   :  { %5722 = vmatmul.mubr.f32.vlgmr.msra.gmra.mxu0 %v6615_v19  ;;  %5793 = vmatmul.mubr.f32.vlgmr.msra.gmra.mxu1 %v6615_v19 }
 0xa6b   :  { %v5581_v27 = vpop.f32.mrf.mxu0  ;;  %v5652_v28 = vpop.f32.mrf.mxu1 }
 0xa6d   :  { %v5583_v12 = vpop.f32.mrf.mxu0  ;;  %v5654_v30 = vpop.f32.mrf.mxu1 }
 0xa6e   :  { %v5805_v18 = vcombine.low %v5581_v27, %v5583_v12  ;;  %v5806_v31 = vcombine.low %v5652_v28, %v5654_v30 }
 0xa70   :  { %v5813_v32 = vrot.slane %v5805_v18, %v6460_v53  ;;  %v5820_v34 = vrot.slane %v5806_v31, %v6460_v53 }
 0xa72   :  { %v5821_v35 = vcombine.low %v5813_v32, %v5820_v34 }
 0xa74   :  { %v5828_v36 = vrot.slane %v5821_v35, %v6460_v53 }
 0xa76   :  { %v5830_v38 = vadd.f32 %v5828_v36, %v5800_v37 }
 0xa78   :  { %v5998_v39 = vmul.f32 -1.442695, %v5830_v38  ;;  %v5871_v40 = vrot.slane %v5830_v38, 1  ;;  %v5882_v19 = vrot.slane %v5830_v38, 3  ;;  %v5879_v44 = vrot.slane %v5830_v38, 2 }
 0xa7a   :  { %6237 = vpow2.f32 %v5998_v39  ;;  %v5999_v41 = vmul.f32 -1.442695, %v5871_v40  ;;  %v6000_v42 = vmul.f32 -1.442695, %v5882_v19 }
 0xa7c   :  { %6239 = vpow2.f32 %v5999_v41 }
 0xa7d   :  { %6241 = vpow2.f32 %v6000_v42 }
 0xa87   :  { %v6238_v43 = vpop.eup %6237 }
 0xa88   :  { %v5867_v45 = vadd.f32 1.0, %v6238_v43 }
 0xa89   :  { %v6240_v24 = vpop.eup %6239 }
 0xa8a   :  { %6243 = vrcp.f32 %v5867_v45  ;;  %v5876_v46 = vadd.f32 1.0, %v6240_v24  ;;  %v6242_v47 = vpop.eup %6241 }
 0xa8b   :  { %6245 = vtanh.f32 %v5879_v44  ;;  %v5887_v50 = vadd.f32 1.0, %v6242_v47 }
 0xa8c   :  { %6247 = vrcp.f32 %v5876_v46 }
 0xa8d   :  { %6249 = vrcp.f32 %v5887_v50 }
 0xa97   :  { %v6244_v23 = vpop.eup %6243 }
 0xa98   :  { %v6246_v29 = vpop.eup %6245 }
 0xa99   :  { %v6248_v48 = vpop.eup %6247  ;;  %v5891_v26 = vmul.f32 %v6246_v29, %v6244_v23 }
 0xa9a   :  { %v5890_v33 = vmul.f32 %v6248_v48, %v5863_v49  ;;  %v6250_v55 = vpop.eup %6249 }
 0xa9c   :  { %v5892_v54 = vadd.f32 %v5891_v26, %v5890_v33 }
 0xa9e   :  { %6251 = vtanh.f32 %v5892_v54  ;;  %5931 = vst.msk [vmem:[#allocation4] sm:$0x1] %vm6466_vm2, %v5892_v54 }
 0xaab   :  { %v6252_v56 = vpop.eup %6251 }
 0xaac   :  { %v5894_v58 = vmul.f32 %v6252_v56, %v6250_v55  ;;  %v5723_v59 = vpop.f32.mrf.mxu0  ;;  %v5794_v0 = vpop.f32.mrf.mxu1 }
 0xaae   :  { %5929 = vst.msk [vmem:[#allocation3] sm:$0x1] %vm6466_vm2, %v5894_v58  ;;  %5933 = vst [vmem:[#allocation13 + $0x7] sm:$0x1] %v5894_v58  ;;  %v5725_v61 = vpop.f32.mrf.mxu0  ;;  %v5796_v62 = vpop.f32.mrf.mxu1 }
 0xaaf   :  { %v5837_v63 = vcombine.low %v5723_v59, %v5725_v61  ;;  %v5838_v1 = vcombine.low %v5794_v0, %v5796_v62 }
 0xab1   :  { %v5845_v2 = vrot.slane %v5837_v63, %v6460_v53  ;;  %v5852_v3 = vrot.slane %v5838_v1, %v6460_v53 }
 0xab3   :  { %v5853_v4 = vcombine.low %v5845_v2, %v5852_v3 }
 0xab5   :  { %v5860_v5 = vrot.slane %v5853_v4, %v6460_v53 }
 0xab7   :  { %v5862_v7 = vadd.f32 %v5860_v5, %v5832_v6 }
 0xab9   :  { %v6001_v8 = vmul.f32 -1.442695, %v5862_v7  ;;  %v5902_v9 = vrot.slane %v5862_v7, 1  ;;  %v5913_v10 = vrot.slane %v5862_v7, 3  ;;  %v5910_v57 = vrot.slane %v5862_v7, 2 }
 0xabb   :  { %6253 = vpow2.f32 %v6001_v8  ;;  %v6002_v52 = vmul.f32 -1.442695, %v5902_v9  ;;  %v6003_v11 = vmul.f32 -1.442695, %v5913_v10 }
 0xabd   :  { %6255 = vpow2.f32 %v6002_v52 }
 0xabe   :  { %6257 = vpow2.f32 %v6003_v11 }
 0xac8   :  { %v6254_v13 = vpop.eup %6253 }
 0xac9   :  { %v5898_v14 = vadd.f32 1.0, %v6254_v13 }
 0xaca   :  { %v6256_v15 = vpop.eup %6255 }
 0xacb   :  { %6259 = vrcp.f32 %v5898_v14  ;;  %v5907_v16 = vadd.f32 1.0, %v6256_v15  ;;  %v6258_v60 = vpop.eup %6257 }
 0xacc   :  { %6261 = vtanh.f32 %v5910_v57  ;;  %v5918_v22 = vadd.f32 1.0, %v6258_v60 }
 0xacd   :  { %6263 = vrcp.f32 %v5907_v16 }
 0xace   :  { %6265 = vrcp.f32 %v5918_v22 }
 0xad8   :  { %v6260_v53 = vpop.eup %6259 }
 0xad9   :  { %v6262_v17 = vpop.eup %6261 }
 0xada   :  { %v6264_v21 = vpop.eup %6263  ;;  %v5925_v27 = vmul.f32 %v6262_v17, %v6260_v53 }
 0xadb   :  { %v5924_v25 = vmul.f32 %v6264_v21, %v5922_v20  ;;  %v6266_v12 = vpop.eup %6265 }
 0xadd   :  { %v5926_v28 = vadd.f32 %v5925_v27, %v5924_v25 }
 0xadf   :  { %6267 = vtanh.f32 %v5926_v28  ;;  %5932 = vst.msk [vmem:[#allocation4 + $0x1] sm:$0x1] %vm6466_vm2, %v5926_v28 }
 0xaec   :  { %v6268_v30 = vpop.eup %6267 }
 0xaed   :  { %v5928_v18 = vmul.f32 %v6268_v30, %v6266_v12 }
 0xaef   :  { %5930 = vst.msk [vmem:[#allocation3 + $0x1] sm:$0x1] %vm6466_vm2, %v5928_v18  ;;  %5934 = vst [vmem:[#allocation13 + $0x8] sm:$0x1] %v5928_v18 }
 0xaf0   :  { %6360 = shalt.err (!%p6357_p10)
}
 0xaf1   :  { %5944 = dma.vmem_to_hbm [thread:$0]  %s5942_s3, 256, %s6642_s4, [#allocation7]  }
 0xaf2   :  { %6375 = dma.done.wait [#allocation7], 256  }
 0xaf3   :  { %6376 = vsyncadd [#allocation7], 4294967040 }
 0xaf4   :  { %5948 = vsyncpa [#allocation6], 1 }
 0xaf5   :  { %5949 = vsyncpa [#allocation9], 1 }
 0xaf6   :  { %5950 = vsyncpa [#allocation12], 1 }
 0xaf7   :  { %5951 = vsyncpa [#allocation7], 1 }

</bundles_post_ra>
